<compile_context>
chip_gen: v7x
topology: tpu7x:2x2x1
jax: 0.10.0
libtpu: 0.0.40
codegen_flags: <defaults>
</compile_context>

<pallas_src>
import functools
import numpy as np

import jax
import jax.numpy as jnp
from jax.experimental import pallas as pl
from jax.experimental.pallas import tpu as pltpu


LANE = 128
SUBLANE = 8


def _round_up(n, m):
    return ((n + m - 1) // m) * m


# ----------------------------------------------------------------------------
# Pallas kernel: grid = (batch_blocks, T); one decode timestep per inner step.
# ----------------------------------------------------------------------------
def decoder_step_kernel(
    dlen_ref,          # (BB, 1)   int32 decode lengths (sorted desc, padded rows = 0)
    enc_ref,           # (BB, Pp, Ep) encoder features (padded), compute dtype
    emb_ref,           # (1, BB, Mp)  embedding slice for timestep t, compute dtype
    w_enc_att_ref, b_enc_att_ref,     # (Ep, Ap), (1, Ap)
    w_dec_att_ref, b_dec_att_ref,     # (Dp, Ap), (1, Ap)
    w_full_ref, b_full_ref,           # (1, Ap),  (1, 1)   (f32, used elementwise)
    w_init_h_ref, b_init_h_ref,       # (Ep, Dp), (1, Dp)
    w_init_c_ref, b_init_c_ref,       # (Ep, Dp), (1, Dp)
    w_fbeta_ref, b_fbeta_ref,         # (Dp, Ep), (1, Ep)
    w_ih_emb_ref, w_ih_awe_ref, b_ih_ref,   # (Mp, 4Dp), (Ep, 4Dp), (1, 4Dp)
    w_hh_ref, b_hh_ref,               # (Dp, 4Dp), (1, 4Dp)
    w_fc_ref, b_fc_ref,               # (Dp, Vp), (1, Vp)
    pred_ref,          # out: (1, BB, Vp) f32
    alpha_ref,         # out: (1, BB, Pp) f32
    h_sc, c_sc,        # scratch: (BB, Dp) f32, carried across t within a batch block
    att1_sc,           # scratch: (BB, Pp, Ap) f32, time-invariant attention projection
    *, num_pixels,     # real (unpadded) number of pixels P
):
    t = pl.program_id(1)
    enc = enc_ref[...]                          # (BB, Pp, Ep), compute dtype
    BB, Pp, Ep = enc.shape
    Dp = h_sc.shape[1]
    cdt = enc.dtype
    f32 = jnp.float32

    # ---- per-batch-block init (t == 0): init_hidden_state + hoisted enc projection ----
    @pl.when(t == 0)
    def _init():
        # mean over real pixels only (padded pixel rows are zero).
        mean_enc = jnp.sum(enc.astype(f32), axis=1) * (1.0 / num_pixels)     # (BB, Ep)
        mean_c = mean_enc.astype(cdt)
        h_sc[...] = jnp.dot(mean_c, w_init_h_ref[...],
                            preferred_element_type=f32) + b_init_h_ref[...]
        c_sc[...] = jnp.dot(mean_c, w_init_c_ref[...],
                            preferred_element_type=f32) + b_init_c_ref[...]
        # Time-invariant: encoder_att(encoder_out). Computed once, reused for all t.
        att1 = jnp.dot(enc.reshape(BB * Pp, Ep), w_enc_att_ref[...],
                       preferred_element_type=f32) + b_enc_att_ref[...]      # (BB*Pp, Ap)
        att1_sc[...] = att1.reshape(BB, Pp, att1.shape[-1])

    h = h_sc[...]                               # (BB, Dp) f32
    c = c_sc[...]                               # (BB, Dp) f32

    # ---- Attention ----
    att2 = jnp.dot(h.astype(cdt), w_dec_att_ref[...],
                   preferred_element_type=f32) + b_dec_att_ref[...]          # (BB, Ap)
    att = jnp.maximum(att1_sc[...] + att2[:, None, :], 0.0)                  # ReLU, (BB, Pp, Ap)
    # Score contraction: att is already resident (needed for the ReLU) and full_att has a
    # single output column, so a VPU mul + XLU lane-reduce overlaps with the MXU work
    # above/below instead of serializing a 1-column matmul through the MXU.
    e = jnp.sum(att * w_full_ref[...][None, :, :], axis=-1) + b_full_ref[...]  # (BB, Pp)

    # masked softmax over the (padded) pixel axis
    pix = jax.lax.broadcasted_iota(jnp.int32, (1, Pp), 1)
    pmask = pix < num_pixels
    e = jnp.where(pmask, e, -1e30)
    e_max = jnp.max(e, axis=1, keepdims=True)
    ex = jnp.where(pmask, jnp.exp(e - e_max), 0.0)
    denom = jnp.sum(ex, axis=1, keepdims=True)
    alpha = ex * pl.reciprocal(denom, approx=True)                           # (BB, Pp)

    # context vector via MXU batched matmul (instead of (B,P,E) elementwise + reduce)
    awe = jnp.einsum('bqp,bpe->bqe', alpha[:, None, :].astype(cdt), enc,
                     preferred_element_type=f32)[:, 0, :]                    # (BB, Ep)

    # ---- gate = sigmoid(f_beta(h)) ----
    gate = jax.nn.sigmoid(jnp.dot(h.astype(cdt), w_fbeta_ref[...],
                                  preferred_element_type=f32) + b_fbeta_ref[...])
    awe = gate * awe

    # ---- LSTMCell([embedding_t ; awe], (h, c)); torch gate order i, f, g, o ----
    emb_t = emb_ref[0]                                                       # (BB, Mp)
    gates = (jnp.dot(emb_t, w_ih_emb_ref[...], preferred_element_type=f32)
             + jnp.dot(awe.astype(cdt), w_ih_awe_ref[...], preferred_element_type=f32)
             + b_ih_ref[...]
             + jnp.dot(h.astype(cdt), w_hh_ref[...], preferred_element_type=f32)
             + b_hh_ref[...])                                                # (BB, 4Dp)
    i_g = jax.nn.sigmoid(gates[:, 0:Dp])
    f_g = jax.nn.sigmoid(gates[:, Dp:2 * Dp])
    g_g = jnp.tanh(gates[:, 2 * Dp:3 * Dp])
    o_g = jax.nn.sigmoid(gates[:, 3 * Dp:4 * Dp])
    c_new = f_g * c + i_g * g_g
    h_new = o_g * jnp.tanh(c_new)
    h_sc[...] = h_new
    c_sc[...] = c_new

    # ---- fc(dropout(h)); dropout == identity (eval mode) ----
    preds = jnp.dot(h_new.astype(cdt), w_fc_ref[...],
                    preferred_element_type=f32) + b_fc_ref[...]              # (BB, Vp)

    # Emulate the shrinking-batch loop: rows with decode_length <= t keep zeros.
    mask = dlen_ref[...] > t                                                 # (BB, 1)
    pred_ref[0] = jnp.where(mask, preds, 0.0)
    alpha_ref[0] = jnp.where(mask, alpha, 0.0)


# ----------------------------------------------------------------------------
# Parameter preparation: pad to vreg tiles, pre-transpose to (in, out), cast.
# ----------------------------------------------------------------------------
KP_KEYS = (
    "w_enc_att", "b_enc_att", "w_dec_att", "b_dec_att", "w_full", "b_full",
    "w_init_h", "b_init_h", "w_init_c", "b_init_c", "w_fbeta", "b_fbeta",
    "w_ih_emb", "w_ih_awe", "b_ih", "w_hh", "b_hh", "w_fc", "b_fc",
)


def _prepare_kernel_params(p, *, Ap, Ep, Dp, Mp, Vp, dtype):
    D = p["init_h_w"].shape[0]
    M = p["embedding"].shape[1]
    E = p["enc_att_w"].shape[1]

    def padw(w_in_out, rows, cols):         # already (in, out); zero-pad, cast to dtype
        out = jnp.zeros((rows, cols), jnp.float32)
        out = out.at[:w_in_out.shape[0], :w_in_out.shape[1]].set(w_in_out)
        return out.astype(dtype)

    def padb(b, n):                         # (out,) -> (1, n) f32
        return jnp.zeros((1, n), jnp.float32).at[0, :b.shape[0]].set(b)

    def lstm_w(w, in_real, in_pad):         # torch (4D, in_real) -> (in_pad, 4*Dp)
        blocks = []
        for k in range(4):                  # gate order i, f, g, o
            blk = w[k * D:(k + 1) * D, :].T                    # (in_real, D)
            blocks.append(jnp.zeros((in_pad, Dp), jnp.float32)
                          .at[:in_real, :D].set(blk))
        return jnp.concatenate(blocks, axis=1).astype(dtype)

    def lstm_b(b):                          # (4D,) -> (1, 4*Dp) f32
        blocks = [jnp.zeros((Dp,), jnp.float32).at[:D].set(b[k * D:(k + 1) * D])
                  for k in range(4)]
        return jnp.concatenate(blocks)[None, :]

    w_ih = p["lstm_w_ih"]
    return {
        "w_enc_att": padw(p["enc_att_w"].T, Ep, Ap),
        "b_enc_att": padb(p["enc_att_b"], Ap),
        "w_dec_att": padw(p["dec_att_w"].T, Dp, Ap),
        "b_dec_att": padb(p["dec_att_b"], Ap),
        "w_full": padb(p["full_att_w"][0], Ap),                 # (1, Ap) f32, elementwise use
        "b_full": p["full_att_b"].reshape(1, 1).astype(jnp.float32),
        "w_init_h": padw(p["init_h_w"].T, Ep, Dp),
        "b_init_h": padb(p["init_h_b"], Dp),
        "w_init_c": padw(p["init_c_w"].T, Ep, Dp),
        "b_init_c": padb(p["init_c_b"], Dp),
        "w_fbeta": padw(p["f_beta_w"].T, Dp, Ep),
        "b_fbeta": padb(p["f_beta_b"], Ep),
        "w_ih_emb": lstm_w(w_ih[:, :M], M, Mp),
        "w_ih_awe": lstm_w(w_ih[:, M:], E, Ep),
        "b_ih": lstm_b(p["lstm_b_ih"]),
        "w_hh": lstm_w(p["lstm_w_hh"], D, Dp),
        "b_hh": lstm_b(p["lstm_b_hh"]),
        "w_fc": padw(p["fc_w"].T, Dp, Vp),
        "b_fc": padb(p["fc_b"], Vp),
    }


# ----------------------------------------------------------------------------
# Wrapper: sort, embed, pad, call the kernel, unpad.
# ----------------------------------------------------------------------------
def decoder_with_attention_forward(params, encoder_out, encoded_captions, caption_lengths,
                                    *, compute_dtype=jnp.float32, block_b=SUBLANE):
    B, Hs, Ws, E = encoder_out.shape
    P = Hs * Ws
    enc = encoder_out.reshape(B, P, E)

    cap_len = caption_lengths[:, 0]
    sort_ind = jnp.argsort(-cap_len)                      # descending sort
    cap_len_sorted = cap_len[sort_ind]
    enc = enc[sort_ind]
    caps_sorted = encoded_captions[sort_ind]
    decode_lengths = (cap_len_sorted - 1).astype(jnp.int32)
    # TODO(synk): host sync (matches PyTorch's .tolist()/max(decode_lengths)); serializes dispatch.
    T_max = int(jnp.max(decode_lengths))

    A = params["enc_att_w"].shape[0]
    D = params["init_h_w"].shape[0]
    M = params["embedding"].shape[1]
    V = params["fc_w"].shape[0]

    Bp = _round_up(B, block_b)
    Pp = _round_up(P, LANE)
    Ep = _round_up(E, LANE)
    Ap = _round_up(A, LANE)
    Dp = _round_up(D, LANE)
    Mp = _round_up(M, LANE)
    Vp = _round_up(V, LANE)

    kp = _prepare_kernel_params(params, Ap=Ap, Ep=Ep, Dp=Dp, Mp=Mp, Vp=Vp,
                                dtype=compute_dtype)

    # padded, sorted inputs (time-major embeddings)
    enc_pad = jnp.zeros((Bp, Pp, Ep), compute_dtype).at[:B, :P, :E].set(
        enc.astype(compute_dtype))
    emb = params["embedding"][caps_sorted][:, :T_max, :]            # (B, T, M)
    emb_tm = jnp.zeros((T_max, Bp, Mp), compute_dtype).at[:, :B, :M].set(
        jnp.transpose(emb, (1, 0, 2)).astype(compute_dtype))
    dlen = jnp.zeros((Bp, 1), jnp.int32).at[:B, 0].set(decode_lengths)

    NB = Bp // block_b
    grid = (NB, T_max)

    def const_spec(arr):
        nd = arr.ndim
        return pl.BlockSpec(tuple(arr.shape), lambda b, t, nd=nd: (0,) * nd)

    in_specs = [
        pl.BlockSpec((block_b, 1), lambda b, t: (b, 0)),
        pl.BlockSpec((block_b, Pp, Ep), lambda b, t: (b, 0, 0)),
        pl.BlockSpec((1, block_b, Mp), lambda b, t: (t, b, 0)),
    ] + [const_spec(kp[k]) for k in KP_KEYS]

    out_specs = [
        pl.BlockSpec((1, block_b, Vp), lambda b, t: (t, b, 0)),
        pl.BlockSpec((1, block_b, Pp), lambda b, t: (t, b, 0)),
    ]

    grid_spec = pltpu.PrefetchScalarGridSpec(
        num_scalar_prefetch=0,
        grid=grid,
        in_specs=in_specs,
        out_specs=out_specs,
        scratch_shapes=[
            pltpu.VMEM((block_b, Dp), jnp.float32),        # h
            pltpu.VMEM((block_b, Dp), jnp.float32),        # c
            pltpu.VMEM((block_b, Pp, Ap), jnp.float32),    # hoisted encoder_att(enc)
        ],
    )

    kernel = functools.partial(decoder_step_kernel, num_pixels=P)
    preds_t, alphas_t = pl.pallas_call(
        kernel,
        out_shape=(jax.ShapeDtypeStruct((T_max, Bp, Vp), jnp.float32),
                   jax.ShapeDtypeStruct((T_max, Bp, Pp), jnp.float32)),
        grid_spec=grid_spec,
        compiler_params=pltpu.CompilerParams(
            # batch axis parallel -> shardable across v7x's two TensorCores;
            # time axis is the recurrence -> arbitrary.
            dimension_semantics=("parallel", "arbitrary"),
            vmem_limit_bytes=48 * 1024 * 1024,
        ),
    )(dlen, enc_pad, emb_tm, *(kp[k] for k in KP_KEYS))

    predictions = jnp.transpose(preds_t, (1, 0, 2))[:B, :, :V]       # (B, T, V)
    alphas = jnp.transpose(alphas_t, (1, 0, 2))[:B, :, :P]           # (B, T, P)
    decode_lengths_list = [int(x) for x in np.asarray(decode_lengths)]
    return predictions, caps_sorted, decode_lengths_list, alphas, sort_ind


# ----------------------------------------------------------------------------
# Deterministic parameter init (torch-style layouts, shapes from __init__).
# ----------------------------------------------------------------------------
def init_params(key, *, attention_dim, embed_dim, decoder_dim, vocab_size, encoder_dim):
    A, M, D, V, E = attention_dim, embed_dim, decoder_dim, vocab_size, encoder_dim
    keys = iter(jax.random.split(key, 24))

    def linear(out_d, in_d):
        bound = 1.0 / float(np.sqrt(in_d))
        w = jax.random.uniform(next(keys), (out_d, in_d), jnp.float32, -bound, bound)
        b = jax.random.uniform(next(keys), (out_d,), jnp.float32, -bound, bound)
        return w, b

    enc_att_w, enc_att_b = linear(A, E)
    dec_att_w, dec_att_b = linear(A, D)
    full_att_w, full_att_b = linear(1, A)
    init_h_w, init_h_b = linear(D, E)
    init_c_w, init_c_b = linear(D, E)
    f_beta_w, f_beta_b = linear(E, D)

    # nn.LSTMCell(M + E, D): uniform(-1/sqrt(D), 1/sqrt(D)); gate order i, f, g, o
    bd = 1.0 / float(np.sqrt(D))
    lstm_w_ih = jax.random.uniform(next(keys), (4 * D, M + E), jnp.float32, -bd, bd)
    lstm_w_hh = jax.random.uniform(next(keys), (4 * D, D), jnp.float32, -bd, bd)
    lstm_b_ih = jax.random.uniform(next(keys), (4 * D,), jnp.float32, -bd, bd)
    lstm_b_hh = jax.random.uniform(next(keys), (4 * D,), jnp.float32, -bd, bd)

    # init_weights(): embedding & fc.weight uniform(-0.1, 0.1); fc.bias = 0
    embedding = jax.random.uniform(next(keys), (V, M), jnp.float32, -0.1, 0.1)
    fc_w = jax.random.uniform(next(keys), (V, D), jnp.float32, -0.1, 0.1)
    fc_b = jnp.zeros((V,), jnp.float32)

    return dict(
        embedding=embedding,
        enc_att_w=enc_att_w, enc_att_b=enc_att_b,
        dec_att_w=dec_att_w, dec_att_b=dec_att_b,
        full_att_w=full_att_w, full_att_b=full_att_b,
        init_h_w=init_h_w, init_h_b=init_h_b,
        init_c_w=init_c_w, init_c_b=init_c_b,
        f_beta_w=f_beta_w, f_beta_b=f_beta_b,
        lstm_w_ih=lstm_w_ih, lstm_w_hh=lstm_w_hh,
        lstm_b_ih=lstm_b_ih, lstm_b_hh=lstm_b_hh,
        fc_w=fc_w, fc_b=fc_b,
    )


# ----------------------------------------------------------------------------
# Pure-JAX reference of the module's forward (eval-mode dropout), for checking.
# ----------------------------------------------------------------------------
def reference_forward(params, encoder_out, encoded_captions, caption_lengths):
    B, Hs, Ws, E = encoder_out.shape
    P = Hs * Ws
    enc = encoder_out.reshape(B, P, E)
    cap_len = caption_lengths[:, 0]
    sort_ind = jnp.argsort(-cap_len)
    enc = enc[sort_ind]
    caps = encoded_captions[sort_ind]
    dlen = (cap_len[sort_ind] - 1).astype(jnp.int32)
    T = int(jnp.max(dlen))
    D = params["init_h_w"].shape[0]
    emb = params["embedding"][caps]                                    # (B, L, M)

    mean_enc = enc.mean(axis=1)
    h = mean_enc @ params["init_h_w"].T + params["init_h_b"]
    c = mean_enc @ params["init_c_w"].T + params["init_c_b"]
    att1 = enc @ params["enc_att_w"].T + params["enc_att_b"]           # time-invariant
    preds_all, alphas_all = [], []
    for t in range(T):
        att2 = h @ params["dec_att_w"].T + params["dec_att_b"]
        att = jnp.maximum(att1 + att2[:, None, :], 0.0)
        e = att @ params["full_att_w"][0] + params["full_att_b"][0]    # (B, P)
        alpha = jax.nn.softmax(e, axis=1)
        awe = jnp.einsum('bp,bpe->be', alpha, enc)
        gate = jax.nn.sigmoid(h @ params["f_beta_w"].T + params["f_beta_b"])
        awe = gate * awe
        x = jnp.concatenate([emb[:, t, :], awe], axis=1)
        gates = (x @ params["lstm_w_ih"].T + params["lstm_b_ih"]
                 + h @ params["lstm_w_hh"].T + params["lstm_b_hh"])
        i_g = jax.nn.sigmoid(gates[:, :D]); f_g = jax.nn.sigmoid(gates[:, D:2 * D])
        g_g = jnp.tanh(gates[:, 2 * D:3 * D]); o_g = jax.nn.sigmoid(gates[:, 3 * D:])
        c = f_g * c + i_g * g_g
        h = o_g * jnp.tanh(c)
        preds = h @ params["fc_w"].T + params["fc_b"]
        m = (dlen > t)[:, None]
        preds_all.append(jnp.where(m, preds, 0.0))
        alphas_all.append(jnp.where(m, alpha, 0.0))
    return (jnp.stack(preds_all, axis=1), caps,
            [int(x) for x in np.asarray(dlen)],
            jnp.stack(alphas_all, axis=1), sort_ind)


# ----------------------------------------------------------------------------
if __name__ == "__main__":
    key = jax.random.PRNGKey(0)
    B, enc_size, E = 4, 4, 32          # encoder feature map 4x4x32 -> 16 pixels
    A, M, D, V = 32, 16, 32, 64        # attention, embed, decoder, vocab dims
    L = 8                              # max caption length

    k_param, k_enc, k_cap = jax.random.split(key, 3)
    params = init_params(k_param, attention_dim=A, embed_dim=M,
                         decoder_dim=D, vocab_size=V, encoder_dim=E)

    encoder_out = jax.random.normal(k_enc, (B, enc_size, enc_size, E), jnp.float32)
    encoded_captions = jax.random.randint(k_cap, (B, L), 0, V)
    caption_lengths = jnp.array([[8], [5], [7], [6]], dtype=jnp.int32)

    # f32 path + strict correctness check against the pure-JAX reference
    preds, caps_sorted, dec_lens, alphas, sort_ind = decoder_with_attention_forward(
        params, encoder_out, encoded_captions, caption_lengths,
        compute_dtype=jnp.float32)
    jax.block_until_ready((preds, alphas))

    ref_p, ref_caps, ref_lens, ref_a, _ = reference_forward(
        params, encoder_out, encoded_captions, caption_lengths)
    np.testing.assert_allclose(np.asarray(preds), np.asarray(ref_p), rtol=1e-2, atol=1e-2)
    np.testing.assert_allclose(np.asarray(alphas), np.asarray(ref_a), rtol=5e-3, atol=5e-3)
    assert dec_lens == ref_lens
    assert np.array_equal(np.asarray(caps_sorted), np.asarray(ref_caps))

    # bf16 storage/matmul path (DMA + MXU win on v6e/v7x; elementwise stays f32, v5e-safe)
    preds_bf, _, _, alphas_bf, _ = decoder_with_attention_forward(
        params, encoder_out, encoded_captions, caption_lengths,
        compute_dtype=jnp.bfloat16)
    jax.block_until_ready((preds_bf, alphas_bf))
    assert np.all(np.isfinite(np.asarray(preds_bf)))
    assert np.all(np.isfinite(np.asarray(alphas_bf)))

    print("KERNEL_OK")
</pallas_src>

<mosaic_0001>
module attributes {stable_mosaic.version = 11 : i64} {
  func.func @decoder_step_kernel(%arg0: i32, %arg1: i32, %arg2: memref<8x1xi32, #tpu.memory_space<vmem>>, %arg3: memref<8x128x128xf32, #tpu.memory_space<vmem>>, %arg4: memref<1x8x128xf32, #tpu.memory_space<vmem>>, %arg5: memref<128x128xf32, #tpu.memory_space<vmem>>, %arg6: memref<1x128xf32, #tpu.memory_space<vmem>>, %arg7: memref<128x128xf32, #tpu.memory_space<vmem>>, %arg8: memref<1x128xf32, #tpu.memory_space<vmem>>, %arg9: memref<1x128xf32, #tpu.memory_space<vmem>>, %arg10: memref<1x1xf32, #tpu.memory_space<vmem>>, %arg11: memref<128x128xf32, #tpu.memory_space<vmem>>, %arg12: memref<1x128xf32, #tpu.memory_space<vmem>>, %arg13: memref<128x128xf32, #tpu.memory_space<vmem>>, %arg14: memref<1x128xf32, #tpu.memory_space<vmem>>, %arg15: memref<128x128xf32, #tpu.memory_space<vmem>>, %arg16: memref<1x128xf32, #tpu.memory_space<vmem>>, %arg17: memref<128x512xf32, #tpu.memory_space<vmem>>, %arg18: memref<128x512xf32, #tpu.memory_space<vmem>>, %arg19: memref<1x512xf32, #tpu.memory_space<vmem>>, %arg20: memref<128x512xf32, #tpu.memory_space<vmem>>, %arg21: memref<1x512xf32, #tpu.memory_space<vmem>>, %arg22: memref<128x128xf32, #tpu.memory_space<vmem>>, %arg23: memref<1x128xf32, #tpu.memory_space<vmem>>, %arg24: memref<1x8x128xf32, #tpu.memory_space<vmem>>, %arg25: memref<1x8x128xf32, #tpu.memory_space<vmem>>, %arg26: memref<8x128xf32, #tpu.memory_space<vmem>>, %arg27: memref<8x128xf32, #tpu.memory_space<vmem>>, %arg28: memref<8x128x128xf32, #tpu.memory_space<vmem>>) attributes {dimension_semantics = [#tpu.dimension_semantics<parallel>, #tpu.dimension_semantics<arbitrary>], iteration_bounds = array<i64: 1, 7>, scalar_prefetch = 0 : i64, scratch_operands = 3 : i64, tpu.core_type = #tpu.core_type<tc>, window_params = [{transform_indices = @transform_0, window_bounds = array<i64: 8, 1>}, {transform_indices = @transform_1, window_bounds = array<i64: 8, 128, 128>}, {transform_indices = @transform_2, window_bounds = array<i64: 1, 8, 128>}, {pipeline_mode = #tpu.pipeline_mode<synchronous>, transform_indices = @transform_3, window_bounds = array<i64: 128, 128>}, {pipeline_mode = #tpu.pipeline_mode<synchronous>, transform_indices = @transform_4, window_bounds = array<i64: 1, 128>}, {pipeline_mode = #tpu.pipeline_mode<synchronous>, transform_indices = @transform_5, window_bounds = array<i64: 128, 128>}, {pipeline_mode = #tpu.pipeline_mode<synchronous>, transform_indices = @transform_6, window_bounds = array<i64: 1, 128>}, {pipeline_mode = #tpu.pipeline_mode<synchronous>, transform_indices = @transform_7, window_bounds = array<i64: 1, 128>}, {pipeline_mode = #tpu.pipeline_mode<synchronous>, transform_indices = @transform_8, window_bounds = array<i64: 1, 1>}, {pipeline_mode = #tpu.pipeline_mode<synchronous>, transform_indices = @transform_9, window_bounds = array<i64: 128, 128>}, {pipeline_mode = #tpu.pipeline_mode<synchronous>, transform_indices = @transform_10, window_bounds = array<i64: 1, 128>}, {pipeline_mode = #tpu.pipeline_mode<synchronous>, transform_indices = @transform_11, window_bounds = array<i64: 128, 128>}, {pipeline_mode = #tpu.pipeline_mode<synchronous>, transform_indices = @transform_12, window_bounds = array<i64: 1, 128>}, {pipeline_mode = #tpu.pipeline_mode<synchronous>, transform_indices = @transform_13, window_bounds = array<i64: 128, 128>}, {pipeline_mode = #tpu.pipeline_mode<synchronous>, transform_indices = @transform_14, window_bounds = array<i64: 1, 128>}, {pipeline_mode = #tpu.pipeline_mode<synchronous>, transform_indices = @transform_15, window_bounds = array<i64: 128, 512>}, {pipeline_mode = #tpu.pipeline_mode<synchronous>, transform_indices = @transform_16, window_bounds = array<i64: 128, 512>}, {pipeline_mode = #tpu.pipeline_mode<synchronous>, transform_indices = @transform_17, window_bounds = array<i64: 1, 512>}, {pipeline_mode = #tpu.pipeline_mode<synchronous>, transform_indices = @transform_18, window_bounds = array<i64: 128, 512>}, {pipeline_mode = #tpu.pipeline_mode<synchronous>, transform_indices = @transform_19, window_bounds = array<i64: 1, 512>}, {pipeline_mode = #tpu.pipeline_mode<synchronous>, transform_indices = @transform_20, window_bounds = array<i64: 128, 128>}, {pipeline_mode = #tpu.pipeline_mode<synchronous>, transform_indices = @transform_21, window_bounds = array<i64: 1, 128>}, {transform_indices = @transform_22, window_bounds = array<i64: 1, 8, 128>}, {transform_indices = @transform_23, window_bounds = array<i64: 1, 8, 128>}]} {
    %c0 = arith.constant 0 : index
    %c0_0 = arith.constant 0 : index
    %c0_1 = arith.constant 0 : index
    %0 = vector.load %arg3[%c0, %c0_0, %c0_1] : memref<8x128x128xf32, #tpu.memory_space<vmem>>, vector<8x128x128xf32>
    %c0_i32 = arith.constant 0 : i32
    %1 = arith.cmpi eq, %arg1, %c0_i32 : i32
    %2 = arith.extui %1 : i1 to i32
    %c0_i32_2 = arith.constant 0 : i32
    %3 = arith.cmpi ne, %2, %c0_i32_2 : i32
    scf.if %3 {
      %cst_69 = arith.constant dense<0.000000e+00> : vector<8x128xf32>
      %125 = vector.multi_reduction <add>, %0, %cst_69 [1] : vector<8x128x128xf32> to vector<8x128xf32>
      %cst_70 = arith.constant 6.250000e-02 : f32
      %126 = vector.broadcast %cst_70 : f32 to vector<8x128xf32>
      %127 = arith.mulf %125, %126 : vector<8x128xf32>
      %c0_71 = arith.constant 0 : index
      %c0_72 = arith.constant 0 : index
      %128 = vector.load %arg11[%c0_71, %c0_72] : memref<128x128xf32, #tpu.memory_space<vmem>>, vector<128x128xf32>
      %cst_73 = arith.constant dense<0.000000e+00> : vector<8x128xf32>
      %129 = tpu.matmul %127, %128, %cst_73 {dimension_numbers = #tpu.dot_dimension_numbers<[1], [0], [0], [1], [0, 0, 1, 1], [], []>} : vector<8x128xf32>, vector<128x128xf32>, vector<8x128xf32> -> vector<8x128xf32>
      %c0_74 = arith.constant 0 : index
      %c0_75 = arith.constant 0 : index
      %130 = vector.load %arg12[%c0_74, %c0_75] : memref<1x128xf32, #tpu.memory_space<vmem>>, vector<1x128xf32>
      %131 = vector.broadcast %130 : vector<1x128xf32> to vector<8x128xf32>
      %132 = arith.addf %129, %131 : vector<8x128xf32>
      %c0_76 = arith.constant 0 : index
      %c0_77 = arith.constant 0 : index
      %133 = vector.load %arg26[%c0_76, %c0_77] : memref<8x128xf32, #tpu.memory_space<vmem>>, vector<8x128xf32>
      tpu.vector_store %arg26[%c0_76, %c0_77], %132 {strides = array<i32>} : memref<8x128xf32, #tpu.memory_space<vmem>>, vector<8x128xf32>,
      %c0_78 = arith.constant 0 : index
      %c0_79 = arith.constant 0 : index
      %134 = vector.load %arg13[%c0_78, %c0_79] : memref<128x128xf32, #tpu.memory_space<vmem>>, vector<128x128xf32>
      %cst_80 = arith.constant dense<0.000000e+00> : vector<8x128xf32>
      %135 = tpu.matmul %127, %134, %cst_80 {dimension_numbers = #tpu.dot_dimension_numbers<[1], [0], [0], [1], [0, 0, 1, 1], [], []>} : vector<8x128xf32>, vector<128x128xf32>, vector<8x128xf32> -> vector<8x128xf32>
      %c0_81 = arith.constant 0 : index
      %c0_82 = arith.constant 0 : index
      %136 = vector.load %arg14[%c0_81, %c0_82] : memref<1x128xf32, #tpu.memory_space<vmem>>, vector<1x128xf32>
      %137 = vector.broadcast %136 : vector<1x128xf32> to vector<8x128xf32>
      %138 = arith.addf %135, %137 : vector<8x128xf32>
      %c0_83 = arith.constant 0 : index
      %c0_84 = arith.constant 0 : index
      %139 = vector.load %arg27[%c0_83, %c0_84] : memref<8x128xf32, #tpu.memory_space<vmem>>, vector<8x128xf32>
      tpu.vector_store %arg27[%c0_83, %c0_84], %138 {strides = array<i32>} : memref<8x128xf32, #tpu.memory_space<vmem>>, vector<8x128xf32>,
      %140 = vector.shape_cast %0 : vector<8x128x128xf32> to vector<1024x128xf32>
      %c0_85 = arith.constant 0 : index
      %c0_86 = arith.constant 0 : index
      %141 = vector.load %arg5[%c0_85, %c0_86] : memref<128x128xf32, #tpu.memory_space<vmem>>, vector<128x128xf32>
      %cst_87 = arith.constant dense<0.000000e+00> : vector<1024x128xf32>
      %142 = tpu.matmul %140, %141, %cst_87 {dimension_numbers = #tpu.dot_dimension_numbers<[1], [0], [0], [1], [0, 0, 1, 1], [], []>} : vector<1024x128xf32>, vector<128x128xf32>, vector<1024x128xf32> -> vector<1024x128xf32>
      %c0_88 = arith.constant 0 : index
      %c0_89 = arith.constant 0 : index
      %143 = vector.load %arg6[%c0_88, %c0_89] : memref<1x128xf32, #tpu.memory_space<vmem>>, vector<1x128xf32>
      %144 = vector.broadcast %143 : vector<1x128xf32> to vector<1024x128xf32>
      %145 = arith.addf %142, %144 : vector<1024x128xf32>
      %146 = vector.shape_cast %145 : vector<1024x128xf32> to vector<8x128x128xf32>
      %c0_90 = arith.constant 0 : index
      %c0_91 = arith.constant 0 : index
      %c0_92 = arith.constant 0 : index
      %147 = vector.load %arg28[%c0_90, %c0_91, %c0_92] : memref<8x128x128xf32, #tpu.memory_space<vmem>>, vector<8x128x128xf32>
      tpu.vector_store %arg28[%c0_90, %c0_91, %c0_92], %146 {strides = array<i32>} : memref<8x128x128xf32, #tpu.memory_space<vmem>>, vector<8x128x128xf32>,
    } else {
    }
    %c0_3 = arith.constant 0 : index
    %c0_4 = arith.constant 0 : index
    %4 = vector.load %arg26[%c0_3, %c0_4] : memref<8x128xf32, #tpu.memory_space<vmem>>, vector<8x128xf32>
    %c0_5 = arith.constant 0 : index
    %c0_6 = arith.constant 0 : index
    %5 = vector.load %arg27[%c0_5, %c0_6] : memref<8x128xf32, #tpu.memory_space<vmem>>, vector<8x128xf32>
    %c0_7 = arith.constant 0 : index
    %c0_8 = arith.constant 0 : index
    %6 = vector.load %arg7[%c0_7, %c0_8] : memref<128x128xf32, #tpu.memory_space<vmem>>, vector<128x128xf32>
    %cst = arith.constant dense<0.000000e+00> : vector<8x128xf32>
    %7 = tpu.matmul %4, %6, %cst {dimension_numbers = #tpu.dot_dimension_numbers<[1], [0], [0], [1], [0, 0, 1, 1], [], []>} : vector<8x128xf32>, vector<128x128xf32>, vector<8x128xf32> -> vector<8x128xf32>
    %c0_9 = arith.constant 0 : index
    %c0_10 = arith.constant 0 : index
    %8 = vector.load %arg8[%c0_9, %c0_10] : memref<1x128xf32, #tpu.memory_space<vmem>>, vector<1x128xf32>
    %9 = vector.broadcast %8 : vector<1x128xf32> to vector<8x128xf32>
    %10 = arith.addf %7, %9 : vector<8x128xf32>
    %c0_11 = arith.constant 0 : index
    %c0_12 = arith.constant 0 : index
    %c0_13 = arith.constant 0 : index
    %11 = vector.load %arg28[%c0_11, %c0_12, %c0_13] : memref<8x128x128xf32, #tpu.memory_space<vmem>>, vector<8x128x128xf32>
    %12 = vector.shape_cast %10 : vector<8x128xf32> to vector<8x1x128xf32>
    %13 = vector.broadcast %12 : vector<8x1x128xf32> to vector<8x128x128xf32>
    %14 = arith.addf %11, %13 : vector<8x128x128xf32>
    %cst_14 = arith.constant 0.000000e+00 : f32
    %15 = vector.broadcast %cst_14 : f32 to vector<8x128x128xf32>
    %16 = arith.maximumf %14, %15 : vector<8x128x128xf32>
    %c0_15 = arith.constant 0 : index
    %c0_16 = arith.constant 0 : index
    %17 = vector.load %arg9[%c0_15, %c0_16] : memref<1x128xf32, #tpu.memory_space<vmem>>, vector<1x128xf32>
    %18 = vector.shape_cast %17 : vector<1x128xf32> to vector<1x1x128xf32>
    %19 = vector.broadcast %18 : vector<1x1x128xf32> to vector<8x128x128xf32>
    %20 = arith.mulf %16, %19 : vector<8x128x128xf32>
    %cst_17 = arith.constant dense<0.000000e+00> : vector<8x128xf32>
    %21 = vector.multi_reduction <add>, %20, %cst_17 [2] : vector<8x128x128xf32> to vector<8x128xf32>
    %c0_18 = arith.constant 0 : index
    %c0_19 = arith.constant 0 : index
    %22 = vector.load %arg10[%c0_18, %c0_19] : memref<1x1xf32, #tpu.memory_space<vmem>>, vector<1x1xf32>
    %23 = vector.broadcast %22 : vector<1x1xf32> to vector<8x128xf32>
    %24 = arith.addf %21, %23 : vector<8x128xf32>
    %25 = tpu.iota {dimensions = array<i32: 1>} : vector<1x128xi32>
    %c16_i32 = arith.constant 16 : i32
    %26 = vector.broadcast %c16_i32 : i32 to vector<1x128xi32>
    %27 = arith.cmpi slt, %25, %26 : vector<1x128xi32>
    %cst_20 = arith.constant -1.000000e+30 : f32
    %28 = vector.shape_cast %27 : vector<1x128xi1> to vector<1x128xi1>
    %29 = vector.broadcast %28 : vector<1x128xi1> to vector<8x128xi1>
    %30 = vector.broadcast %cst_20 : f32 to vector<8x128xf32>
    %31 = arith.select %29, %24, %30 : vector<8x128xi1>, vector<8x128xf32>
    %cst_21 = arith.constant dense<0xFF800000> : vector<8xf32>
    %32 = vector.multi_reduction <maximumf>, %31, %cst_21 [1] : vector<8x128xf32> to vector<8xf32>
    %33 = vector.shape_cast %32 : vector<8xf32> to vector<8x1xf32>
    %34 = vector.broadcast %33 : vector<8x1xf32> to vector<8x128xf32>
    %35 = arith.subf %31, %34 : vector<8x128xf32>
    %36 = math.exp %35 : vector<8x128xf32>
    %cst_22 = arith.constant 0.000000e+00 : f32
    %37 = vector.shape_cast %27 : vector<1x128xi1> to vector<1x128xi1>
    %38 = vector.broadcast %37 : vector<1x128xi1> to vector<8x128xi1>
    %39 = vector.broadcast %cst_22 : f32 to vector<8x128xf32>
    %40 = arith.select %38, %36, %39 : vector<8x128xi1>, vector<8x128xf32>
    %cst_23 = arith.constant dense<0.000000e+00> : vector<8xf32>
    %41 = vector.multi_reduction <add>, %40, %cst_23 [1] : vector<8x128xf32> to vector<8xf32>
    %42 = vector.shape_cast %41 : vector<8xf32> to vector<8x1xf32>
    %43 = tpu.reciprocal %42 {approx = true} : vector<8x1xf32> -> vector<8x1xf32>
    %44 = vector.broadcast %43 : vector<8x1xf32> to vector<8x128xf32>
    %45 = arith.mulf %40, %44 : vector<8x128xf32>
    %46 = vector.shape_cast %45 : vector<8x128xf32> to vector<8x1x128xf32>
    "tpu.trace_start"() <{level = 10 : i32, message = "bqp,bpe->bqe"}> : () -> ()
    %cst_24 = arith.constant dense<0.000000e+00> : vector<8x1x128xf32>
    %47 = tpu.matmul %46, %0, %cst_24 {dimension_numbers = #tpu.dot_dimension_numbers<[2], [1], [1], [2], [0, 0, 0, 1, 1, 2], [0], [0]>} : vector<8x1x128xf32>, vector<8x128x128xf32>, vector<8x1x128xf32> -> vector<8x1x128xf32>
    "tpu.trace_stop"() : () -> ()
    %48 = vector.shape_cast %47 : vector<8x1x128xf32> to vector<8x128xf32>
    %c0_25 = arith.constant 0 : index
    %c0_26 = arith.constant 0 : index
    %49 = vector.load %arg15[%c0_25, %c0_26] : memref<128x128xf32, #tpu.memory_space<vmem>>, vector<128x128xf32>
    %cst_27 = arith.constant dense<0.000000e+00> : vector<8x128xf32>
    %50 = tpu.matmul %4, %49, %cst_27 {dimension_numbers = #tpu.dot_dimension_numbers<[1], [0], [0], [1], [0, 0, 1, 1], [], []>} : vector<8x128xf32>, vector<128x128xf32>, vector<8x128xf32> -> vector<8x128xf32>
    %c0_28 = arith.constant 0 : index
    %c0_29 = arith.constant 0 : index
    %51 = vector.load %arg16[%c0_28, %c0_29] : memref<1x128xf32, #tpu.memory_space<vmem>>, vector<1x128xf32>
    %52 = vector.broadcast %51 : vector<1x128xf32> to vector<8x128xf32>
    %53 = arith.addf %50, %52 : vector<8x128xf32>
    %54 = arith.negf %53 : vector<8x128xf32>
    %55 = math.exp %54 : vector<8x128xf32>
    %cst_30 = arith.constant 1.000000e+00 : f32
    %56 = vector.broadcast %cst_30 : f32 to vector<8x128xf32>
    %57 = arith.addf %56, %55 : vector<8x128xf32>
    %58 = arith.divf %56, %57 : vector<8x128xf32>
    %59 = arith.mulf %58, %48 : vector<8x128xf32>
    %c0_31 = arith.constant 0 : index
    %c0_32 = arith.constant 0 : index
    %c0_33 = arith.constant 0 : index
    %60 = vector.load %arg4[%c0_31, %c0_32, %c0_33] : memref<1x8x128xf32, #tpu.memory_space<vmem>>, vector<1x8x128xf32>
    %61 = vector.shape_cast %60 : vector<1x8x128xf32> to vector<8x128xf32>
    %c0_34 = arith.constant 0 : index
    %c0_35 = arith.constant 0 : index
    %62 = vector.load %arg17[%c0_34, %c0_35] : memref<128x512xf32, #tpu.memory_space<vmem>>, vector<128x512xf32>
    %cst_36 = arith.constant dense<0.000000e+00> : vector<8x512xf32>
    %63 = tpu.matmul %61, %62, %cst_36 {dimension_numbers = #tpu.dot_dimension_numbers<[1], [0], [0], [1], [0, 0, 1, 1], [], []>} : vector<8x128xf32>, vector<128x512xf32>, vector<8x512xf32> -> vector<8x512xf32>
    %c0_37 = arith.constant 0 : index
    %c0_38 = arith.constant 0 : index
    %64 = vector.load %arg18[%c0_37, %c0_38] : memref<128x512xf32, #tpu.memory_space<vmem>>, vector<128x512xf32>
    %cst_39 = arith.constant dense<0.000000e+00> : vector<8x512xf32>
    %65 = tpu.matmul %59, %64, %cst_39 {dimension_numbers = #tpu.dot_dimension_numbers<[1], [0], [0], [1], [0, 0, 1, 1], [], []>} : vector<8x128xf32>, vector<128x512xf32>, vector<8x512xf32> -> vector<8x512xf32>
    %66 = arith.addf %63, %65 : vector<8x512xf32>
    %c0_40 = arith.constant 0 : index
    %c0_41 = arith.constant 0 : index
    %67 = vector.load %arg19[%c0_40, %c0_41] : memref<1x512xf32, #tpu.memory_space<vmem>>, vector<1x512xf32>
    %68 = vector.broadcast %67 : vector<1x512xf32> to vector<8x512xf32>
    %69 = arith.addf %66, %68 : vector<8x512xf32>
    %c0_42 = arith.constant 0 : index
    %c0_43 = arith.constant 0 : index
    %70 = vector.load %arg20[%c0_42, %c0_43] : memref<128x512xf32, #tpu.memory_space<vmem>>, vector<128x512xf32>
    %cst_44 = arith.constant dense<0.000000e+00> : vector<8x512xf32>
    %71 = tpu.matmul %4, %70, %cst_44 {dimension_numbers = #tpu.dot_dimension_numbers<[1], [0], [0], [1], [0, 0, 1, 1], [], []>} : vector<8x128xf32>, vector<128x512xf32>, vector<8x512xf32> -> vector<8x512xf32>
    %72 = arith.addf %69, %71 : vector<8x512xf32>
    %c0_45 = arith.constant 0 : index
    %c0_46 = arith.constant 0 : index
    %73 = vector.load %arg21[%c0_45, %c0_46] : memref<1x512xf32, #tpu.memory_space<vmem>>, vector<1x512xf32>
    %74 = vector.broadcast %73 : vector<1x512xf32> to vector<8x512xf32>
    %75 = arith.addf %72, %74 : vector<8x512xf32>
    %76 = vector.extract_strided_slice %75 {offsets = [0, 0], sizes = [8, 128], strides = [1, 1]} : vector<8x512xf32> to vector<8x128xf32>
    %77 = arith.negf %76 : vector<8x128xf32>
    %78 = math.exp %77 : vector<8x128xf32>
    %cst_47 = arith.constant 1.000000e+00 : f32
    %79 = vector.broadcast %cst_47 : f32 to vector<8x128xf32>
    %80 = arith.addf %79, %78 : vector<8x128xf32>
    %81 = arith.divf %79, %80 : vector<8x128xf32>
    %82 = vector.extract_strided_slice %75 {offsets = [0, 128], sizes = [8, 128], strides = [1, 1]} : vector<8x512xf32> to vector<8x128xf32>
    %83 = arith.negf %82 : vector<8x128xf32>
    %84 = math.exp %83 : vector<8x128xf32>
    %cst_48 = arith.constant 1.000000e+00 : f32
    %85 = vector.broadcast %cst_48 : f32 to vector<8x128xf32>
    %86 = arith.addf %85, %84 : vector<8x128xf32>
    %87 = arith.divf %85, %86 : vector<8x128xf32>
    %88 = vector.extract_strided_slice %75 {offsets = [0, 256], sizes = [8, 128], strides = [1, 1]} : vector<8x512xf32> to vector<8x128xf32>
    %89 = math.tanh %88 : vector<8x128xf32>
    %90 = vector.extract_strided_slice %75 {offsets = [0, 384], sizes = [8, 128], strides = [1, 1]} : vector<8x512xf32> to vector<8x128xf32>
    %91 = arith.negf %90 : vector<8x128xf32>
    %92 = math.exp %91 : vector<8x128xf32>
    %cst_49 = arith.constant 1.000000e+00 : f32
    %93 = vector.broadcast %cst_49 : f32 to vector<8x128xf32>
    %94 = arith.addf %93, %92 : vector<8x128xf32>
    %95 = arith.divf %93, %94 : vector<8x128xf32>
    %96 = arith.mulf %87, %5 : vector<8x128xf32>
    %97 = arith.mulf %81, %89 : vector<8x128xf32>
    %98 = arith.addf %96, %97 : vector<8x128xf32>
    %99 = math.tanh %98 : vector<8x128xf32>
    %100 = arith.mulf %95, %99 : vector<8x128xf32>
    %c0_50 = arith.constant 0 : index
    %c0_51 = arith.constant 0 : index
    %101 = vector.load %arg26[%c0_50, %c0_51] : memref<8x128xf32, #tpu.memory_space<vmem>>, vector<8x128xf32>
    tpu.vector_store %arg26[%c0_50, %c0_51], %100 {strides = array<i32>} : memref<8x128xf32, #tpu.memory_space<vmem>>, vector<8x128xf32>,
    %c0_52 = arith.constant 0 : index
    %c0_53 = arith.constant 0 : index
    %102 = vector.load %arg27[%c0_52, %c0_53] : memref<8x128xf32, #tpu.memory_space<vmem>>, vector<8x128xf32>
    tpu.vector_store %arg27[%c0_52, %c0_53], %98 {strides = array<i32>} : memref<8x128xf32, #tpu.memory_space<vmem>>, vector<8x128xf32>,
    %c0_54 = arith.constant 0 : index
    %c0_55 = arith.constant 0 : index
    %103 = vector.load %arg22[%c0_54, %c0_55] : memref<128x128xf32, #tpu.memory_space<vmem>>, vector<128x128xf32>
    %cst_56 = arith.constant dense<0.000000e+00> : vector<8x128xf32>
    %104 = tpu.matmul %100, %103, %cst_56 {dimension_numbers = #tpu.dot_dimension_numbers<[1], [0], [0], [1], [0, 0, 1, 1], [], []>} : vector<8x128xf32>, vector<128x128xf32>, vector<8x128xf32> -> vector<8x128xf32>
    %c0_57 = arith.constant 0 : index
    %c0_58 = arith.constant 0 : index
    %105 = vector.load %arg23[%c0_57, %c0_58] : memref<1x128xf32, #tpu.memory_space<vmem>>, vector<1x128xf32>
    %106 = vector.broadcast %105 : vector<1x128xf32> to vector<8x128xf32>
    %107 = arith.addf %104, %106 : vector<8x128xf32>
    %c0_59 = arith.constant 0 : index
    %c0_60 = arith.constant 0 : index
    %108 = vector.load %arg2[%c0_59, %c0_60] : memref<8x1xi32, #tpu.memory_space<vmem>>, vector<8x1xi32>
    %109 = vector.broadcast %arg1 : i32 to vector<8x1xi32>
    %110 = arith.cmpi sgt, %108, %109 : vector<8x1xi32>
    %cst_61 = arith.constant 0.000000e+00 : f32
    %111 = vector.shape_cast %110 : vector<8x1xi1> to vector<8x1xi1>
    %112 = vector.broadcast %111 : vector<8x1xi1> to vector<8x128xi1>
    %113 = vector.broadcast %cst_61 : f32 to vector<8x128xf32>
    %114 = arith.select %112, %107, %113 : vector<8x128xi1>, vector<8x128xf32>
    %c0_62 = arith.constant 0 : index
    %c0_63 = arith.constant 0 : index
    %c0_64 = arith.constant 0 : index
    %115 = vector.load %arg24[%c0_62, %c0_63, %c0_64] : memref<1x8x128xf32, #tpu.memory_space<vmem>>, vector<1x8x128xf32>
    %116 = vector.shape_cast %115 : vector<1x8x128xf32> to vector<8x128xf32>
    %117 = vector.shape_cast %114 : vector<8x128xf32> to vector<1x8x128xf32>
    tpu.vector_store %arg24[%c0_62, %c0_63, %c0_64], %117 {strides = array<i32>} : memref<1x8x128xf32, #tpu.memory_space<vmem>>, vector<1x8x128xf32>,
    %cst_65 = arith.constant 0.000000e+00 : f32
    %118 = vector.shape_cast %110 : vector<8x1xi1> to vector<8x1xi1>
    %119 = vector.broadcast %118 : vector<8x1xi1> to vector<8x128xi1>
    %120 = vector.broadcast %cst_65 : f32 to vector<8x128xf32>
    %121 = arith.select %119, %45, %120 : vector<8x128xi1>, vector<8x128xf32>
    %c0_66 = arith.constant 0 : index
    %c0_67 = arith.constant 0 : index
    %c0_68 = arith.constant 0 : index
    %122 = vector.load %arg25[%c0_66, %c0_67, %c0_68] : memref<1x8x128xf32, #tpu.memory_space<vmem>>, vector<1x8x128xf32>
    %123 = vector.shape_cast %122 : vector<1x8x128xf32> to vector<8x128xf32>
    %124 = vector.shape_cast %121 : vector<8x128xf32> to vector<1x8x128xf32>
    tpu.vector_store %arg25[%c0_66, %c0_67, %c0_68], %124 {strides = array<i32>} : memref<1x8x128xf32, #tpu.memory_space<vmem>>, vector<1x8x128xf32>,
    return
  }
  func.func @transform_0(%arg0: i32, %arg1: i32) -> (i32, i32) {
    %c0_i32 = arith.constant 0 : i32
    %c0_i32_0 = arith.constant 0 : i32
    return %arg0, %c0_i32 : i32, i32
  }
  func.func @transform_1(%arg0: i32, %arg1: i32) -> (i32, i32, i32) {
    %c0_i32 = arith.constant 0 : i32
    %c0_i32_0 = arith.constant 0 : i32
    %c0_i32_1 = arith.constant 0 : i32
    return %arg0, %c0_i32, %c0_i32_0 : i32, i32, i32
  }
  func.func @transform_2(%arg0: i32, %arg1: i32) -> (i32, i32, i32) {
    %c0_i32 = arith.constant 0 : i32
    %c0_i32_0 = arith.constant 0 : i32
    return %arg1, %arg0, %c0_i32 : i32, i32, i32
  }
  func.func @transform_3(%arg0: i32, %arg1: i32) -> (i32, i32) {
    %c0_i32 = arith.constant 0 : i32
    %c0_i32_0 = arith.constant 0 : i32
    %c0_i32_1 = arith.constant 0 : i32
    return %c0_i32, %c0_i32_0 : i32, i32
  }
  func.func @transform_4(%arg0: i32, %arg1: i32) -> (i32, i32) {
    %c0_i32 = arith.constant 0 : i32
    %c0_i32_0 = arith.constant 0 : i32
    %c0_i32_1 = arith.constant 0 : i32
    return %c0_i32, %c0_i32_0 : i32, i32
  }
  func.func @transform_5(%arg0: i32, %arg1: i32) -> (i32, i32) {
    %c0_i32 = arith.constant 0 : i32
    %c0_i32_0 = arith.constant 0 : i32
    %c0_i32_1 = arith.constant 0 : i32
    return %c0_i32, %c0_i32_0 : i32, i32
  }
  func.func @transform_6(%arg0: i32, %arg1: i32) -> (i32, i32) {
    %c0_i32 = arith.constant 0 : i32
    %c0_i32_0 = arith.constant 0 : i32
    %c0_i32_1 = arith.constant 0 : i32
    return %c0_i32, %c0_i32_0 : i32, i32
  }
  func.func @transform_7(%arg0: i32, %arg1: i32) -> (i32, i32) {
    %c0_i32 = arith.constant 0 : i32
    %c0_i32_0 = arith.constant 0 : i32
    %c0_i32_1 = arith.constant 0 : i32
    return %c0_i32, %c0_i32_0 : i32, i32
  }
  func.func @transform_8(%arg0: i32, %arg1: i32) -> (i32, i32) {
    %c0_i32 = arith.constant 0 : i32
    %c0_i32_0 = arith.constant 0 : i32
    %c0_i32_1 = arith.constant 0 : i32
    return %c0_i32, %c0_i32_0 : i32, i32
  }
  func.func @transform_9(%arg0: i32, %arg1: i32) -> (i32, i32) {
    %c0_i32 = arith.constant 0 : i32
    %c0_i32_0 = arith.constant 0 : i32
    %c0_i32_1 = arith.constant 0 : i32
    return %c0_i32, %c0_i32_0 : i32, i32
  }
  func.func @transform_10(%arg0: i32, %arg1: i32) -> (i32, i32) {
    %c0_i32 = arith.constant 0 : i32
    %c0_i32_0 = arith.constant 0 : i32
    %c0_i32_1 = arith.constant 0 : i32
    return %c0_i32, %c0_i32_0 : i32, i32
  }
  func.func @transform_11(%arg0: i32, %arg1: i32) -> (i32, i32) {
    %c0_i32 = arith.constant 0 : i32
    %c0_i32_0 = arith.constant 0 : i32
    %c0_i32_1 = arith.constant 0 : i32
    return %c0_i32, %c0_i32_0 : i32, i32
  }
  func.func @transform_12(%arg0: i32, %arg1: i32) -> (i32, i32) {
    %c0_i32 = arith.constant 0 : i32
    %c0_i32_0 = arith.constant 0 : i32
    %c0_i32_1 = arith.constant 0 : i32
    return %c0_i32, %c0_i32_0 : i32, i32
  }
  func.func @transform_13(%arg0: i32, %arg1: i32) -> (i32, i32) {
    %c0_i32 = arith.constant 0 : i32
    %c0_i32_0 = arith.constant 0 : i32
    %c0_i32_1 = arith.constant 0 : i32
    return %c0_i32, %c0_i32_0 : i32, i32
  }
  func.func @transform_14(%arg0: i32, %arg1: i32) -> (i32, i32) {
    %c0_i32 = arith.constant 0 : i32
    %c0_i32_0 = arith.constant 0 : i32
    %c0_i32_1 = arith.constant 0 : i32
    return %c0_i32, %c0_i32_0 : i32, i32
  }
  func.func @transform_15(%arg0: i32, %arg1: i32) -> (i32, i32) {
    %c0_i32 = arith.constant 0 : i32
    %c0_i32_0 = arith.constant 0 : i32
    %c0_i32_1 = arith.constant 0 : i32
    return %c0_i32, %c0_i32_0 : i32, i32
  }
  func.func @transform_16(%arg0: i32, %arg1: i32) -> (i32, i32) {
    %c0_i32 = arith.constant 0 : i32
    %c0_i32_0 = arith.constant 0 : i32
    %c0_i32_1 = arith.constant 0 : i32
    return %c0_i32, %c0_i32_0 : i32, i32
  }
  func.func @transform_17(%arg0: i32, %arg1: i32) -> (i32, i32) {
    %c0_i32 = arith.constant 0 : i32
    %c0_i32_0 = arith.constant 0 : i32
    %c0_i32_1 = arith.constant 0 : i32
    return %c0_i32, %c0_i32_0 : i32, i32
  }
  func.func @transform_18(%arg0: i32, %arg1: i32) -> (i32, i32) {
    %c0_i32 = arith.constant 0 : i32
    %c0_i32_0 = arith.constant 0 : i32
    %c0_i32_1 = arith.constant 0 : i32
    return %c0_i32, %c0_i32_0 : i32, i32
  }
  func.func @transform_19(%arg0: i32, %arg1: i32) -> (i32, i32) {
    %c0_i32 = arith.constant 0 : i32
    %c0_i32_0 = arith.constant 0 : i32
    %c0_i32_1 = arith.constant 0 : i32
    return %c0_i32, %c0_i32_0 : i32, i32
  }
  func.func @transform_20(%arg0: i32, %arg1: i32) -> (i32, i32) {
    %c0_i32 = arith.constant 0 : i32
    %c0_i32_0 = arith.constant 0 : i32
    %c0_i32_1 = arith.constant 0 : i32
    return %c0_i32, %c0_i32_0 : i32, i32
  }
  func.func @transform_21(%arg0: i32, %arg1: i32) -> (i32, i32) {
    %c0_i32 = arith.constant 0 : i32
    %c0_i32_0 = arith.constant 0 : i32
    %c0_i32_1 = arith.constant 0 : i32
    return %c0_i32, %c0_i32_0 : i32, i32
  }
  func.func @transform_22(%arg0: i32, %arg1: i32) -> (i32, i32, i32) {
    %c0_i32 = arith.constant 0 : i32
    %c0_i32_0 = arith.constant 0 : i32
    return %arg1, %arg0, %c0_i32 : i32, i32, i32
  }
  func.func @transform_23(%arg0: i32, %arg1: i32) -> (i32, i32, i32) {
    %c0_i32 = arith.constant 0 : i32
    %c0_i32_0 = arith.constant 0 : i32
    return %arg1, %arg0, %c0_i32 : i32, i32, i32
  }
}

</mosaic_0001>

<bundles_post_ra>
// kernel: tpu_custom_call.1
= control target key start
LH: loop header
LB: loop body
LE: loop exit
PB: predicated region body
PF: predicated region fallthrough
CT: control target
= control target key end

     0   :  { %s10907_s0 = inlined_call_operand.vmem [shape: s32[8,1], index: 0, kind: input, shape index: {}]   ;;  %s10908_s1 = inlined_call_operand.hbm [shape: f32[8,128,128], index: 1, kind: input, shape index: {}]   ;;  %s10909_s2 = inlined_call_operand.hbm [shape: f32[7,8,128], index: 2, kind: input, shape index: {}]   ;;  %s10910_s3 = inlined_call_operand.hbm [shape: f32[128,128], index: 3, kind: input, shape index: {}]   ;;  %s10911_s4 = inlined_call_operand.vmem [shape: f32[1,128], index: 4, kind: input, shape index: {}]   ;;  %s10912_s5 = inlined_call_operand.hbm [shape: f32[128,128], index: 5, kind: input, shape index: {}]   ;;  %s10913_s6 = inlined_call_operand.vmem [shape: f32[1,128], index: 6, kind: input, shape index: {}]   ;;  %s10914_s7 = inlined_call_operand.vmem [shape: f32[1,128], index: 7, kind: input, shape index: {}]   ;;  %s10915_s8 = inlined_call_operand.<no memory space> [shape: f32[1,1], index: 8, kind: input, shape index: {}]   ;;  %s10916_s9 = inlined_call_operand.hbm [shape: f32[128,128], index: 9, kind: input, shape index: {}]   ;;  %s10917_s10 = inlined_call_operand.vmem [shape: f32[1,128], index: 10, kind: input, shape index: {}]   ;;  %s10918_s11 = inlined_call_operand.hbm [shape: f32[128,128], index: 11, kind: input, shape index: {}]   ;;  %s10919_s12 = inlined_call_operand.vmem [shape: f32[1,128], index: 12, kind: input, shape index: {}]   ;;  %s10920_s13 = inlined_call_operand.hbm [shape: f32[128,128], index: 13, kind: input, shape index: {}]   ;;  %s10921_s14 = inlined_call_operand.vmem [shape: f32[1,128], index: 14, kind: input, shape index: {}]   ;;  %s10922_s15 = inlined_call_operand.hbm [shape: f32[128,512], index: 15, kind: input, shape index: {}]   ;;  %s10923_s16 = inlined_call_operand.hbm [shape: f32[128,512], index: 16, kind: input, shape index: {}]   ;;  %s10924_s17 = inlined_call_operand.vmem [shape: f32[1,512], index: 17, kind: input, shape index: {}]   ;;  %s10925_s18 = inlined_call_operand.hbm [shape: f32[128,512], index: 18, kind: input, shape index: {}]   ;;  %s10926_s19 = inlined_call_operand.vmem [shape: f32[1,512], index: 19, kind: input, shape index: {}]   ;;  %s10927_s20 = inlined_call_operand.hbm [shape: f32[128,128], index: 20, kind: input, shape index: {}]   ;;  %s10928_s21 = inlined_call_operand.vmem [shape: f32[1,128], index: 21, kind: input, shape index: {}]   ;;  %s10929_s22 = inlined_call_operand.hbm [shape: f32[7,8,128], index: 22, kind: output, shape index: {0}]   ;;  %s10930_s23 = inlined_call_operand.hbm [shape: f32[7,8,128], index: 23, kind: output, shape index: {1}]  }
   0x1   :  { %11090 = sst [smem:[#allocation160_spill]] %s10907_s0  ;;  %v29_v0 = vstv %s10915_s8 }
   0x2   :  { %11091 = sst [smem:[#allocation161_spill]] %s10908_s1  ;;  %30 = vst [vmem:[#allocation5] sm:$0x1] %v29_v0 }
   0x3   :  { %11092 = sst [smem:[#allocation162_spill]] %s10909_s2 }
   0x4   :  { %11093 = sst [smem:[#allocation163_spill]] %s10910_s3 }
   0x5   :  { %11094 = sst [smem:[#allocation164_spill]] %s10911_s4 }
   0x6   :  { %11095 = sst [smem:[#allocation165_spill]] %s10912_s5 }
   0x7   :  { %11096 = sst [smem:[#allocation166_spill]] %s10913_s6 }
   0x8   :  { %11097 = sst [smem:[#allocation167_spill]] %s10914_s7 }
   0x9   :  { %11098 = sst [smem:[#allocation168_spill]] %s10916_s9 }
   0xa   :  { %11099 = sst [smem:[#allocation169_spill]] %s10917_s10 }
   0xb   :  { %11100 = sst [smem:[#allocation170_spill]] %s10918_s11 }
   0xc   :  { %11101 = sst [smem:[#allocation171_spill]] %s10919_s12 }
   0xd   :  { %11102 = sst [smem:[#allocation172_spill]] %s10920_s13 }
   0xe   :  { %11103 = sst [smem:[#allocation173_spill]] %s10921_s14 }
   0xf   :  { %11104 = sst [smem:[#allocation174_spill]] %s10924_s17 }
  0x10   :  { %11105 = sst [smem:[#allocation175_spill]] %s10926_s19 }
  0x11   :  { %11106 = sst [smem:[#allocation176_spill]] %s10928_s21 }
  0x12   :  { %11107 = sst [smem:[#allocation177_spill]] %s10929_s22 }
  0x13   :  { %11108 = sst [smem:[#allocation178_spill]] %s10930_s23 }
  0x14   :  { %31 = vsyncpa [#allocation7], 0 }
  0x15   :  { %32 = vsyncpa [#allocation10], 0 }
  0x16   :  { %34 = vsyncpa [#allocation10 + $0x1], 0 }
  0x17   :  { %35 = vsyncpa [#allocation13], 0 }
  0x18   :  { %36 = vsyncpa [#allocation16], 0 }
  0x19   :  { %37 = vsyncpa [#allocation19], 0 }
  0x1a   :  { %38 = vsyncpa [#allocation22], 0 }
  0x1b   :  { %39 = vsyncpa [#allocation8], 0 }
  0x1c   :  { %41 = vsyncpa [#allocation8 + $0x1], 0 }
  0x1d   :  { %42 = vsyncpa [#allocation26], 0 }
  0x1e   :  { %44 = vsyncpa [#allocation26 + $0x1], 0  ;;  %s8496_s24 = smov 0   ;;  %s8498_s25 = smov 0  }
  0x1f   :  { %s8500_s5 = smov 0   ;;  %s8502_s1 = smov 0  }
  0x20   :  { %s8504_s8 = smov 0   ;;  %s8506_s26 = smov 0  }
  0x21 LB: > { %11109 = sst [smem:[#allocation36_spill]] %s8338_s1  ;;  %s8527_s2 = sadd.s32 4294967295, %s8346_s26   ;;  %s8346_s26 = sphi %s8506_s26, %s50_s26   ;;  %s8342_s8 = sphi %s8504_s8, %s11603_s8   ;;  %s8338_s1 = sphi %s8502_s1, %s11602_s1   ;;  %s8334_s5 = sphi %s8500_s5, %s11601_s5   ;;  %s8330_s25 = sphi %s8498_s25, %s11600_s25   ;;  %s8326_s24 = sphi %s8496_s24, %s11599_s24  }
  0x22   : > { %p6034_p0 = scmp.ge.s32.totalorder %s8346_s26, 1  ;;  %p10940_p1 = scmp.eq.s32.totalorder %s8527_s2, 0 }
  0x23   : > { %p602_p2 = scmp.lt.s32.totalorder %s8346_s26, 8  ;;  %s8348_s27 = smov [#allocation11]  }
  0x24   : > { %s638_s7 = sshll.u32 %s8348_s27, 4  ;;  %s8349_s28 = smov [#allocation12]   ;;  %s8536_s7 = int_to_ptr.vmem [resolvable:$true] %s638_s7 }
  0x25   : > { %p8532_p3 = pnand %p6034_p0, %p602_p2  ;;  %s654_s29 = sshll.u32 %s8349_s28, 4  ;;  %s8546_s29 = int_to_ptr.vmem [resolvable:$true] %s654_s29 }
  0x26   : > { %s8350_s0 = smov [#allocation15]   ;;  %s11113_s22 = sld [smem:[#allocation163_spill]] }
  0x27   : > { %s11110_s6 = scalar_select %p8532_p3, 1, 0 }
  0x28   : > { %p7736_p4 = pneg %p8532_p3  ;;  %s692_s4 = sshll.u32 %s8350_s0, 4  ;;  %s8548_s4 = int_to_ptr.vmem [resolvable:$true] %s692_s4 }
  0x29   : > { %11111 = sst [smem:[#allocation37_spill]] %s11110_s6 }
  0x2a   : > { %p8542_p5 = pnand %p7736_p4, %p10940_p1 }
  0x2c   : > { %s7898_s21 = scalar_lea.hbm %s11113_s22, 2048  ;;  %p8558_p7 = pneg %p8542_p5 }
  0x2d   : > { %p7899_p6 = scmp.ne.s32.totalorder %s11113_s22, %s7898_s21  ;;  %p7905_p10 = scmp.lt.u32.totalorder %s7898_s21, %s11113_s22 }
  0x2f   : > { %p7901_p8 = pnand %p8558_p7, %p7899_p6 }
  0x31   : > { %p7902_p9 = pneg %p7901_p8 }
  0x33   : > { %p7907_p11 = pnand %p7905_p10, %p7902_p9 }
  0x35   : > { %7910 = shalt.err (!%p7907_p11)
}
  0x36   : > { %s7911_s19 = scalar_lea.vmem %s8536_s7, 2048  ;;  %p7919_p2 = scmp.lt.s32.totalorder %s8536_s7, %s8536_s7 }
  0x37   : > { %p7912_p12 = scmp.ne.s32.totalorder %s8536_s7, %s7911_s19  ;;  %p7920_p4 = scmp.lt.s32.totalorder %s7911_s19, %s7911_s19 }
  0x39   : > { %p7914_p13 = pnand %p7912_p12, %p8558_p7  ;;  %p7921_p6 = por %p7920_p4, %p7919_p2 }
  0x3b   : > { %p7915_p0 = pneg %p7914_p13 }
  0x3d   : > { %p7922_p8 = pnand %p7921_p6, %p7915_p0 }
  0x3f   : > { %7925 = shalt.err (!%p7922_p8)
}
  0x40   : > { %s10942_s23 = smov 128   ;;  %s10944_s17 = smov 8  }
  0x41   : > { %7742 = dma.hbm_to_vmem [thread:$0]  (!%p8542_p5), %s11113_s22, 2048, %s8536_s7, [#allocation10], %s10942_s23, %s10942_s23, %s10944_s17  }
  0x42   : > { %s11115_s14 = sld [smem:[#allocation165_spill]] }
  0x48   : > { %s7926_s19 = scalar_lea.hbm %s11115_s14, 2048 }
  0x49   : > { %p7927_p9 = scmp.ne.s32.totalorder %s11115_s14, %s7926_s19  ;;  %p7933_p12 = scmp.lt.u32.totalorder %s7926_s19, %s11115_s14 }
  0x4b   : > { %p7929_p10 = pnand %p7927_p9, %p8558_p7 }
  0x4d   : > { %p7930_p11 = pneg %p7929_p10 }
  0x4f   : > { %p7935_p13 = pnand %p7933_p12, %p7930_p11 }
  0x51   : > { %7938 = shalt.err (!%p7935_p13)
}
  0x52   : > { %s7939_s7 = scalar_lea.vmem %s8546_s29, 2048  ;;  %p7947_p6 = scmp.lt.s32.totalorder %s8546_s29, %s8546_s29 }
  0x53   : > { %p7940_p0 = scmp.ne.s32.totalorder %s8546_s29, %s7939_s7  ;;  %p7948_p8 = scmp.lt.s32.totalorder %s7939_s7, %s7939_s7 }
  0x55   : > { %p7942_p2 = pnand %p7940_p0, %p8558_p7  ;;  %p7949_p9 = por %p7948_p8, %p7947_p6 }
  0x57   : > { %p7943_p4 = pneg %p7942_p2 }
  0x59   : > { %p7950_p10 = pnand %p7949_p9, %p7943_p4 }
  0x5b   : > { %7953 = shalt.err (!%p7950_p10)
}
  0x5c   : > { %7745 = dma.hbm_to_vmem [thread:$0]  (!%p8542_p5), %s11115_s14, 2048, %s8546_s29, [#allocation13], %s10942_s23, %s10942_s23, %s10944_s17  }
  0x5d   : > { %s11116_s11 = sld [smem:[#allocation170_spill]] }
  0x63   : > { %s7954_s21 = scalar_lea.hbm %s11116_s11, 2048 }
  0x64   : > { %p7955_p11 = scmp.ne.s32.totalorder %s11116_s11, %s7954_s21  ;;  %p7961_p0 = scmp.lt.u32.totalorder %s7954_s21, %s11116_s11 }
  0x66   : > { %p7957_p12 = pnand %p7955_p11, %p8558_p7 }
  0x68   : > { %p7958_p13 = pneg %p7957_p12 }
  0x6a   : > { %p7963_p2 = pnand %p7961_p0, %p7958_p13 }
  0x6c   : > { %7966 = shalt.err (!%p7963_p2)
}
  0x6d   : > { %s7967_s29 = scalar_lea.vmem %s8548_s4, 2048  ;;  %p7975_p9 = scmp.lt.s32.totalorder %s8548_s4, %s8548_s4 }
  0x6e   : > { %p7968_p4 = scmp.ne.s32.totalorder %s8548_s4, %s7967_s29  ;;  %p7976_p10 = scmp.lt.s32.totalorder %s7967_s29, %s7967_s29 }
  0x70   : > { %p7970_p6 = pnand %p7968_p4, %p8558_p7  ;;  %p7977_p11 = por %p7976_p10, %p7975_p9 }
  0x72   : > { %p7971_p8 = pneg %p7970_p6 }
  0x74   : > { %p7978_p12 = pnand %p7977_p11, %p7971_p8 }
  0x76   : > { %7981 = shalt.err (!%p7978_p12)
}
  0x77   : > { %7751 = dma.hbm_to_vmem [thread:$0]  (!%p8542_p5), %s11116_s11, 2048, %s8548_s4, [#allocation16], %s10942_s23, %s10942_s23, %s10944_s17  }
  0x78   : > { %s8353_s12 = smov [#allocation18]   ;;  %s7982_s30 = scalar_lea.hbm %s10922_s15, 8192 }
  0x79   : > { %s724_s1 = sshll.u32 %s8353_s12, 4  ;;  %p7983_p13 = scmp.ne.s32.totalorder %s10922_s15, %s7982_s30  ;;  %s725_s1 = int_to_ptr.vmem [resolvable:$true] %s724_s1 }
  0x7a   : > { %p7989_p4 = scmp.lt.u32.totalorder %s7982_s30, %s10922_s15 }
  0x7b   : > { %p7985_p0 = pnand %p7983_p13, %p8558_p7 }
  0x7d   : > { %p7986_p2 = pneg %p7985_p0 }
  0x7f   : > { %p7991_p6 = pnand %p7989_p4, %p7986_p2 }
  0x81   : > { %7994 = shalt.err (!%p7991_p6)
}
  0x82   : > { %s7995_s4 = scalar_lea.vmem %s725_s1, 8192  ;;  %p8003_p11 = scmp.lt.s32.totalorder %s725_s1, %s725_s1 }
  0x83   : > { %p7996_p8 = scmp.ne.s32.totalorder %s725_s1, %s7995_s4  ;;  %p8004_p12 = scmp.lt.s32.totalorder %s7995_s4, %s7995_s4 }
  0x85   : > { %p7998_p9 = pnand %p7996_p8, %p8558_p7  ;;  %p8005_p1 = por %p8004_p12, %p8003_p11 }
  0x87   : > { %p7999_p10 = pneg %p7998_p9 }
  0x89   : > { %p8006_p3 = pnand %p8005_p1, %p7999_p10 }
  0x8b   : > { %8009 = shalt.err (!%p8006_p3)
}
  0x8c   : > { %s10947_s7 = smov 512   ;;  %s10948_s10 = smov 32  }
  0x8d   : > { %7757 = dma.hbm_to_vmem [thread:$0]  (!%p8542_p5), %s10922_s15, 8192, %s725_s1, [#allocation19], %s10947_s7, %s10947_s7, %s10948_s10  }
  0x8e   : > { %s8356_s21 = smov [#allocation21]   ;;  %s8010_s19 = scalar_lea.hbm %s10925_s18, 8192 }
  0x8f   : > { %s753_s30 = sshll.u32 %s8356_s21, 4  ;;  %p8011_p1 = scmp.ne.s32.totalorder %s10925_s18, %s8010_s19  ;;  %s754_s30 = int_to_ptr.vmem [resolvable:$true] %s753_s30 }
  0x90   : > { %p8017_p0 = scmp.lt.u32.totalorder %s8010_s19, %s10925_s18 }
  0x91   : > { %p8013_p3 = pnand %p8011_p1, %p8558_p7 }
  0x93   : > { %p8014_p13 = pneg %p8013_p3 }
  0x95   : > { %p8019_p2 = pnand %p8017_p0, %p8014_p13 }
  0x97   : > { %8022 = shalt.err (!%p8019_p2)
}
  0x98   : > { %s8023_s1 = scalar_lea.vmem %s754_s30, 8192  ;;  %p8031_p9 = scmp.lt.s32.totalorder %s754_s30, %s754_s30 }
  0x99   : > { %p8024_p4 = scmp.ne.s32.totalorder %s754_s30, %s8023_s1  ;;  %p8032_p10 = scmp.lt.s32.totalorder %s8023_s1, %s8023_s1 }
  0x9b   : > { %p8026_p6 = pnand %p8024_p4, %p8558_p7  ;;  %p8033_p11 = por %p8032_p10, %p8031_p9 }
  0x9d   : > { %p8027_p8 = pneg %p8026_p6 }
  0x9f   : > { %p8034_p12 = pnand %p8033_p11, %p8027_p8 }
  0xa1   : > { %8037 = shalt.err (!%p8034_p12)
}
  0xa2   : > { %7763 = dma.hbm_to_vmem [thread:$0]  (!%p8542_p5), %s10925_s18, 8192, %s754_s30, [#allocation22], %s10947_s7, %s10947_s7, %s10948_s10  }
  0xa3   : > { %s8357_s12 = smov [#allocation6]   ;;  %s8358_s21 = smov [#allocation14]  }
  0xa4   : > { %s625_s6 = sshll.u32 %s8357_s12, 4  ;;  %s676_s27 = sshll.u32 %s8358_s21, 4  ;;  %s626_s6 = int_to_ptr.vmem [resolvable:$true] %s625_s6  ;;  %s677_s27 = int_to_ptr.vmem [resolvable:$true] %s676_s27 }
  0xa5   : > { %s11117_s29 = sld [smem:[#allocation161_spill]] }
  0xab   : > { %s8038_s4 = scalar_lea.hbm %s11117_s29, 16384 }
  0xac   : > { %p8039_p1 = scmp.ne.s32.totalorder %s11117_s29, %s8038_s4  ;;  %p8045_p0 = scmp.lt.u32.totalorder %s8038_s4, %s11117_s29 }
  0xae   : > { %p8041_p3 = pnand %p8039_p1, %p8558_p7 }
  0xb0   : > { %p8042_p13 = pneg %p8041_p3 }
  0xb2   : > { %p8047_p2 = pnand %p8045_p0, %p8042_p13 }
  0xb4   : > { %8050 = shalt.err (!%p8047_p2)
}
  0xb5   : > { %s8051_s30 = scalar_lea.vmem %s626_s6, 16384  ;;  %p8059_p9 = scmp.lt.s32.totalorder %s626_s6, %s626_s6 }
  0xb6   : > { %p8052_p4 = scmp.ne.s32.totalorder %s626_s6, %s8051_s30  ;;  %p8060_p10 = scmp.lt.s32.totalorder %s8051_s30, %s8051_s30 }
  0xb8   : > { %p8054_p6 = pnand %p8052_p4, %p8558_p7  ;;  %p8061_p11 = por %p8060_p10, %p8059_p9 }
  0xba   : > { %p8055_p8 = pneg %p8054_p6 }
  0xbc   : > { %p8062_p12 = pnand %p8061_p11, %p8055_p8 }
  0xbe   : > { %8065 = shalt.err (!%p8062_p12)
}
  0xbf   : > { %s11118_s11 = smov 8   ;;  %s11119_s17 = smov 128  }
  0xc0   : > { %7739 = dma.hbm_to_vmem [thread:$0]  (!%p8542_p5), %s11117_s29, 16384, %s626_s6, [#allocation7], %s11119_s17, %s11119_s17, %s11118_s11  }
  0xc1   : > { %s11120_s9 = sld [smem:[#allocation168_spill]] }
  0xc7   : > { %s8066_s19 = scalar_lea.hbm %s11120_s9, 2048 }
  0xc8   : > { %p8067_p1 = scmp.ne.s32.totalorder %s11120_s9, %s8066_s19  ;;  %p8073_p0 = scmp.lt.u32.totalorder %s8066_s19, %s11120_s9 }
  0xca   : > { %p8069_p3 = pnand %p8067_p1, %p8558_p7 }
  0xcc   : > { %p8070_p13 = pneg %p8069_p3 }
  0xce   : > { %p8075_p2 = pnand %p8073_p0, %p8070_p13 }
  0xd0   : > { %8078 = shalt.err (!%p8075_p2)
}
  0xd1   : > { %s8079_s14 = scalar_lea.vmem %s677_s27, 2048  ;;  %p8087_p9 = scmp.lt.s32.totalorder %s677_s27, %s677_s27 }
  0xd2   : > { %p8080_p4 = scmp.ne.s32.totalorder %s677_s27, %s8079_s14  ;;  %p8088_p10 = scmp.lt.s32.totalorder %s8079_s14, %s8079_s14 }
  0xd4   : > { %p8082_p6 = pnand %p8080_p4, %p8558_p7  ;;  %p8089_p11 = por %p8088_p10, %p8087_p9 }
  0xd6   : > { %p8083_p8 = pneg %p8082_p6 }
  0xd8   : > { %p8090_p12 = pnand %p8089_p11, %p8083_p8 }
  0xda   : > { %8093 = shalt.err (!%p8090_p12)
}
  0xdb   : > { %7748 = dma.hbm_to_vmem [thread:$0]  (!%p8542_p5), %s11120_s9, 2048, %s677_s27, [#allocation13], %s11119_s17, %s11119_s17, %s11118_s11  }
  0xdc   : > { %s8359_s21 = smov [#allocation17]   ;;  %s8360_s19 = smov [#allocation20]  }
  0xdd   : > { %s708_s0 = sshll.u32 %s8359_s21, 4  ;;  %s737_s4 = sshll.u32 %s8360_s19, 4  ;;  %s709_s0 = int_to_ptr.vmem [resolvable:$true] %s708_s0  ;;  %s738_s4 = int_to_ptr.vmem [resolvable:$true] %s737_s4 }
  0xde   : > { %s11121_s13 = sld [smem:[#allocation172_spill]] }
  0xe4   : > { %s8094_s30 = scalar_lea.hbm %s11121_s13, 2048 }
  0xe5   : > { %p8095_p1 = scmp.ne.s32.totalorder %s11121_s13, %s8094_s30  ;;  %p8101_p0 = scmp.lt.u32.totalorder %s8094_s30, %s11121_s13 }
  0xe7   : > { %p8097_p3 = pnand %p8095_p1, %p8558_p7 }
  0xe9   : > { %p8098_p13 = pneg %p8097_p3 }
  0xeb   : > { %p8103_p2 = pnand %p8101_p0, %p8098_p13 }
  0xed   : > { %8106 = shalt.err (!%p8103_p2)
}
  0xee   : > { %s8107_s27 = scalar_lea.vmem %s709_s0, 2048  ;;  %p8115_p9 = scmp.lt.s32.totalorder %s709_s0, %s709_s0 }
  0xef   : > { %p8108_p4 = scmp.ne.s32.totalorder %s709_s0, %s8107_s27  ;;  %p8116_p10 = scmp.lt.s32.totalorder %s8107_s27, %s8107_s27 }
  0xf1   : > { %p8110_p6 = pnand %p8108_p4, %p8558_p7  ;;  %p8117_p11 = por %p8116_p10, %p8115_p9 }
  0xf3   : > { %p8111_p8 = pneg %p8110_p6 }
  0xf5   : > { %p8118_p12 = pnand %p8117_p11, %p8111_p8 }
  0xf7   : > { %8121 = shalt.err (!%p8118_p12)
}
  0xf8   : > { %7754 = dma.hbm_to_vmem [thread:$0]  (!%p8542_p5), %s11121_s13, 2048, %s709_s0, [#allocation16], %s11119_s17, %s11119_s17, %s11118_s11  }
  0xf9   : > { %s8122_s19 = scalar_lea.hbm %s10923_s16, 8192 }
  0xfa   : > { %p8123_p1 = scmp.ne.s32.totalorder %s10923_s16, %s8122_s19  ;;  %p8129_p0 = scmp.lt.u32.totalorder %s8122_s19, %s10923_s16 }
  0xfc   : > { %p8125_p3 = pnand %p8123_p1, %p8558_p7 }
  0xfe   : > { %p8126_p13 = pneg %p8125_p3 }
 0x100   : > { %p8131_p2 = pnand %p8129_p0, %p8126_p13 }
 0x102   : > { %8134 = shalt.err (!%p8131_p2)
}
 0x103   : > { %s8135_s6 = scalar_lea.vmem %s738_s4, 8192  ;;  %p8143_p9 = scmp.lt.s32.totalorder %s738_s4, %s738_s4 }
 0x104   : > { %p8136_p4 = scmp.ne.s32.totalorder %s738_s4, %s8135_s6  ;;  %p8144_p10 = scmp.lt.s32.totalorder %s8135_s6, %s8135_s6 }
 0x106   : > { %p8138_p6 = pnand %p8136_p4, %p8558_p7  ;;  %p8145_p11 = por %p8144_p10, %p8143_p9 }
 0x108   : > { %p8139_p8 = pneg %p8138_p6 }
 0x10a   : > { %p8146_p12 = pnand %p8145_p11, %p8139_p8 }
 0x10c   : > { %8149 = shalt.err (!%p8146_p12)
}
 0x10d   : > { %s11122_s0 = smov 32   ;;  %s11123_s27 = smov 512  }
 0x10e   : > { %7760 = dma.hbm_to_vmem [thread:$0]  (!%p8542_p5), %s10923_s16, 8192, %s738_s4, [#allocation19], %s11123_s27, %s11123_s27, %s11122_s0  }
 0x10f   : > { %s8361_s12 = smov [#allocation23]   ;;  %s8150_s23 = scalar_lea.hbm %s10927_s20, 2048 }
 0x110   : > { %s769_s21 = sshll.u32 %s8361_s12, 4  ;;  %p8151_p1 = scmp.ne.s32.totalorder %s10927_s20, %s8150_s23  ;;  %s770_s21 = int_to_ptr.vmem [resolvable:$true] %s769_s21 }
 0x111   : > { %p8157_p0 = scmp.lt.u32.totalorder %s8150_s23, %s10927_s20 }
 0x112   : > { %p8153_p3 = pnand %p8151_p1, %p8558_p7 }
 0x114   : > { %p8154_p13 = pneg %p8153_p3 }
 0x116   : > { %p8159_p2 = pnand %p8157_p0, %p8154_p13 }
 0x118   : > { %8162 = shalt.err (!%p8159_p2)
}
 0x119   : > { %s8163_s4 = scalar_lea.vmem %s770_s21, 2048  ;;  %p8171_p9 = scmp.lt.s32.totalorder %s770_s21, %s770_s21 }
 0x11a   : > { %p8164_p4 = scmp.ne.s32.totalorder %s770_s21, %s8163_s4  ;;  %p8172_p10 = scmp.lt.s32.totalorder %s8163_s4, %s8163_s4 }
 0x11c   : > { %p8166_p6 = pnand %p8164_p4, %p8558_p7  ;;  %p8173_p11 = por %p8172_p10, %p8171_p9 }
 0x11e   : > { %p8167_p8 = pneg %p8166_p6 }
 0x120   : > { %p8174_p12 = pnand %p8173_p11, %p8167_p8 }
 0x122   : > { %8177 = shalt.err (!%p8174_p12)
}
 0x123   : > { %7766 = dma.hbm_to_vmem [thread:$0]  (!%p8542_p5), %s10927_s20, 2048, %s770_s21, [#allocation22], %s11119_s17, %s11119_s17, %s11118_s11  }
 0x124   : > { %s6033_s3 = sadd.s32 4294967294, %s8346_s26   ;;  %s59_s28 = sadd.s32 1, %s8342_s8 }
 0x125   : > { %p60_p7 = scmp.ge.s32.totalorder %s59_s28, 7  ;;  %s123_s27 = sadd.s32 1, %s8334_s5 }
 0x126   : > { %p130_p1 = scmp.ne.s32.totalorder %s8334_s5, %s8330_s25  ;;  %p131_p3 = scmp.eq.s32.totalorder %s8346_s26, 0 }
 0x127   : > { %s11605_s28 = smov (%p60_p7, %s59_s28), 0  ;;  %p136_p0 = scmp.ne.s32.totalorder %s8330_s25, %s8326_s24 }
 0x128   : > { %p8789_p13 = por %p131_p3, %p130_p1  ;;  %s118_s11 = ssub.s32 %s8342_s8, %s11605_s28 }
 0x129   : > { %p561_p5 = scmp.eq.s32.totalorder %s8527_s2, 6  ;;  %p121_p2 = scmp.eq.s32.totalorder %s118_s11, 0 }
 0x12a   : > { %p11125_p4 = scmp.eq.s32.totalorder %s8527_s2, 0  ;;  %p567_p9 = scmp.eq.s32.totalorder %s6033_s3, 6 }
 0x12b   : > { %p8804_p8 = por %p561_p5, %p130_p1  ;;  %p7788_p11 = scmp.lt.s32.totalorder %s8346_s26, 7 }
 0x12c   : > { %p8800_p6 = por %p11125_p4, %p136_p0  ;;  %p8811_p10 = por %p567_p9, %p136_p0 }
 0x12d   : > { %s11127_s10 = scalar_select %p8804_p8, 1, 0 }
 0x12e   : > { %s8809_s12 = scalar_select %p121_p2, %s8334_s5, %s123_s27  }
 0x12f   : > { %s11128_s21 = scalar_select %p8811_p10, 1, 0 }
 0x130   : > { %s786_s19 = sand.u32 1, %s8346_s26   ;;  %s788_s1 = sand.u32 1, %s8334_s5  }
 0x131   : > { %s6047_s23 = sshll.u32 %s788_s1, 3  ;;  %s6048_s30 = sshll.u32 %s8342_s8, 7 }
 0x132   : > { %s11129_s4 = sld [smem:[#allocation162_spill]]  ;;  %s790_s0 = scalar_lea.vmem [#allocation9], %s6047_s23 }
 0x133   : > { %s798_s3 = sshll.u32 %s790_s0, 4  ;;  %p8828_p12 = pnand %p7788_p11, %p8789_p13  ;;  %s8824_s3 = int_to_ptr.vmem [resolvable:$true] %s798_s3 }
 0x134   : > { %s787_s11 = scalar_lea.sflag [#allocation10], %s786_s19 }
 0x135   : > { %p8180_p1 = pneg %p8828_p12 }
 0x138   : > { %s8822_s9 = scalar_lea.hbm %s11129_s4, %s6048_s30  ;;  %s8183_s14 = scalar_lea.hbm %s11129_s4, 896 }
 0x139   : > { %s8178_s1 = scalar_lea.hbm %s8822_s9, 128  ;;  %p8184_p13 = scmp.lt.u32.totalorder %s8822_s9, %s11129_s4 }
 0x13a   : > { %p8179_p7 = scmp.ne.s32.totalorder %s8822_s9, %s8178_s1  ;;  %p8185_p5 = scmp.lt.u32.totalorder %s8183_s14, %s8178_s1 }
 0x13b   : > { %p8187_p4 = scmp.lt.u32.totalorder %s8178_s1, %s8822_s9 }
 0x13c   : > { %p8181_p3 = pnand %p8180_p1, %p8179_p7  ;;  %p8186_p2 = por %p8185_p5, %p8184_p13 }
 0x13e   : > { %p8182_p0 = pneg %p8181_p3  ;;  %p8188_p9 = por %p8187_p4, %p8186_p2 }
 0x140   : > { %p8189_p11 = pnand %p8188_p9, %p8182_p0 }
 0x142   : > { %8192 = shalt.err (!%p8189_p11)
}
 0x143   : > { %s8193_s19 = scalar_lea.vmem %s8824_s3, 128  ;;  %s8362_s0 = smov [#allocation9]  }
 0x144   : > { %p8194_p7 = scmp.ne.s32.totalorder %s8824_s3, %s8193_s19  ;;  %s8198_s23 = sshll.u32 %s8362_s0, 4  ;;  %s8199_s23 = int_to_ptr.vmem [resolvable:$false] %s8198_s23 }
 0x145   : > { %s8200_s30 = scalar_lea.vmem %s8199_s23, 256  ;;  %p8201_p8 = scmp.lt.s32.totalorder %s8824_s3, %s8199_s23 }
 0x146   : > { %p8196_p3 = pnand %p8194_p7, %p8180_p1  ;;  %p8202_p13 = scmp.lt.s32.totalorder %s8200_s30, %s8193_s19 }
 0x148   : > { %p8197_p10 = pneg %p8196_p3  ;;  %p8203_p5 = por %p8202_p13, %p8201_p8 }
 0x14a   : > { %p8204_p2 = pnand %p8203_p5, %p8197_p10 }
 0x14c   : > { %8207 = shalt.err (!%p8204_p2)
}
 0x14d   : > { %7770 = dma.hbm_to_vmem [thread:$0]  (!%p8828_p12), %s8822_s9, 128, %s8824_s3, %s787_s11  }
 0x14e   : > { %s11131_s1 = sld [smem:[#allocation37_spill]] }
 0x154   : > { %p11132_p0 = scmp.ne.s32.totalorder %s11131_s1, 0 }
 0x156   : > { %807 = sbr.rel (%p11132_p0) target bundleno = 2800 (0xaf0), region = 108 }
 0x15d   : > { %p11133_p1 = scmp.eq.s32.totalorder %s8527_s2, 0 }
 0x15f   : > { %8289 = dma.done.wait (%p11133_p1), [#allocation7], 16384   ;;  %p11134_p4 = pmov %p11133_p1 }
 0x160   : > { %s813_s14 = sand.u32 1, %s8527_s2   ;;  %s8865_s7 = sand.u32 1, %s8330_s25  }
 0x161   : > { %8291 = vsyncadd (%p11134_p4), [#allocation7], 4294950912  ;;  %s8868_s27 = sshll.u32 %s8865_s7, 3  ;;  %s814_s9 = scalar_lea.sflag [#allocation10], %s813_s14 }
 0x162   : > { %s817_s3 = scalar_lea.vmem [#allocation9], %s8868_s27 }
 0x163   : > { %8293 = dma.done.wait (%p8800_p6), %s814_s9, 128  }
 0x164   : > { %8295 = vsyncadd (%p8800_p6), %s814_s9, 4294967168  ;;  %p11135_p8 = pmov %p11133_p1 }
 0x165   : > { %p11136_p10 = pmov %p11133_p1 }
 0x166   : > { %8297 = dma.done.wait (%p11135_p8), [#allocation10], 2048  }
 0x167   : > { %8299 = vsyncadd (%p11136_p10), [#allocation10], 4294965248  ;;  %p11137_p12 = pmov %p11133_p1 }
 0x168   : > { %p11138_p9 = pmov %p11133_p1 }
 0x169   : > { %8301 = dma.done.wait (%p11137_p12), [#allocation13], 4096  }
 0x16a   : > { %8303 = vsyncadd (%p11138_p9), [#allocation13], 4294963200  ;;  %p11139_p11 = pmov %p11133_p1 }
 0x16b   : > { %p11140_p7 = pmov %p11133_p1 }
 0x16c   : > { %8305 = dma.done.wait (%p11139_p11), [#allocation16], 4096  }
 0x16d   : > { %8307 = vsyncadd (%p11140_p7), [#allocation16], 4294963200  ;;  %p11141_p6 = pmov %p11133_p1 }
 0x16e   : > { %p11142_p3 = pmov %p11133_p1 }
 0x16f   : > { %8309 = dma.done.wait (%p11141_p6), [#allocation19], 16384  }
 0x170   : > { %8311 = vsyncadd (%p11142_p3), [#allocation19], 4294950912  ;;  %p11143_p13 = pmov %p11133_p1 }
 0x171   : > { %p11144_p5 = pmov %p11133_p1 }
 0x172   : > { %8313 = dma.done.wait (%p11143_p13), [#allocation22], 10240  }
 0x173   : > { %8315 = vsyncadd (%p11144_p5), [#allocation22], 4294957056  ;;  %v8895_v1 = vld [vmem:[#allocation6] sm:$0xff]  ;;  %v8897_v2 = vld [vmem:[#allocation6 + $0x8] sm:$0xff]  ;;  %s924_s17 = scalar_lea.vmem [#allocation25], %s8868_s27  ;;  %s11265_s11 = sld [smem:[#allocation36_spill]] }
 0x174   : > { %11145 = vst [vmem:[#allocation38_spill] sm:$0xff] %v8895_v1  ;;  %11146 = vst [vmem:[#allocation39_spill] sm:$0xff] %v8897_v2  ;;  %v8899_v3 = vld [vmem:[#allocation6 + $0x10] sm:$0xff]  ;;  %v8901_v4 = vld [vmem:[#allocation6 + $0x18] sm:$0xff] }
 0x175   : > { %11147 = vst [vmem:[#allocation40_spill] sm:$0xff] %v8899_v3  ;;  %11148 = vst [vmem:[#allocation41_spill] sm:$0xff] %v8901_v4  ;;  %v8903_v5 = vld [vmem:[#allocation6 + $0x20] sm:$0xff]  ;;  %v8905_v6 = vld [vmem:[#allocation6 + $0x28] sm:$0xff] }
 0x176   : > { %11149 = vst [vmem:[#allocation42_spill] sm:$0xff] %v8903_v5  ;;  %11150 = vst [vmem:[#allocation43_spill] sm:$0xff] %v8905_v6  ;;  %v8907_v7 = vld [vmem:[#allocation6 + $0x30] sm:$0xff]  ;;  %v8909_v8 = vld [vmem:[#allocation6 + $0x38] sm:$0xff] }
 0x177   : > { %v8911_v9 = vld [vmem:[#allocation6 + $0x40] sm:$0xff]  ;;  %v8913_v10 = vld [vmem:[#allocation6 + $0x48] sm:$0xff]  ;;  %v8915_v11 = vld [vmem:[#allocation6 + $0x50] sm:$0xff] }
 0x178   : > { %11151 = vst [vmem:[#allocation44_spill] sm:$0xff] %v8915_v11  ;;  %v8917_v12 = vld [vmem:[#allocation6 + $0x58] sm:$0xff]  ;;  %v8919_v13 = vld [vmem:[#allocation6 + $0x60] sm:$0xff]  ;;  %v8921_v14 = vld [vmem:[#allocation6 + $0x68] sm:$0xff] }
 0x179   : > { %11152 = vst [vmem:[#allocation45_spill] sm:$0xff] %v8917_v12  ;;  %11153 = vst [vmem:[#allocation46_spill] sm:$0xff] %v8919_v13  ;;  %v8923_v15 = vld [vmem:[#allocation6 + $0x70] sm:$0xff]  ;;  %v8925_v16 = vld [vmem:[#allocation6 + $0x78] sm:$0xff]  ;;  %p6063_p2 = scmp.ne.s32.totalorder %s11265_s11, 0 }
 0x17a   : > { %11154 = vst [vmem:[#allocation47_spill] sm:$0xff] %v8921_v14  ;;  %11155 = vst [vmem:[#allocation48_spill] sm:$0xff] %v8923_v15  ;;  %v8927_v17 = vld [vmem:[#allocation6 + $0x80] sm:$0xff]  ;;  %v8929_v18 = vld [vmem:[#allocation6 + $0x88] sm:$0xff]  ;;  %vm8364_vm0 = vmmov (!%p6063_p2), 0   ;;  %vm1269_vm1 = vcmask (!%p6063_p2), 1041409  }
 0x17b   : > { %11156 = vst [vmem:[#allocation49_spill] sm:$0xff] %v8925_v16  ;;  %11157 = vst [vmem:[#allocation50_spill] sm:$0xff] %v8927_v17  ;;  %v8931_v19 = vld [vmem:[#allocation6 + $0x90] sm:$0xff]  ;;  %v8933_v20 = vld [vmem:[#allocation6 + $0x98] sm:$0xff]  ;;  %vm1271_vm2 = vcmask (!%p6063_p2), 1042434   ;;  %vm1273_vm3 = vcmask (!%p6063_p2), 1043459  }
 0x17c   : > { %11158 = vst [vmem:[#allocation51_spill] sm:$0xff] %v8929_v18  ;;  %11159 = vst [vmem:[#allocation52_spill] sm:$0xff] %v8931_v19  ;;  %v8935_v21 = vld [vmem:[#allocation6 + $0xa0] sm:$0xff]  ;;  %v8937_v22 = vld [vmem:[#allocation6 + $0xa8] sm:$0xff]  ;;  %vm1275_vm4 = vcmask (!%p6063_p2), 1044484   ;;  %vm1277_vm5 = vcmask (!%p6063_p2), 1045509  }
 0x17d   : > { %11160 = vst [vmem:[#allocation53_spill] sm:$0xff] %v8933_v20  ;;  %11161 = vst [vmem:[#allocation54_spill] sm:$0xff] %v8935_v21  ;;  %v8939_v23 = vld [vmem:[#allocation6 + $0xb0] sm:$0xff]  ;;  %v8941_v24 = vld [vmem:[#allocation6 + $0xb8] sm:$0xff]  ;;  %vm1279_vm6 = vcmask (!%p6063_p2), 1046534   ;;  %vm1281_vm7 = vcmask (!%p6063_p2), 1047559  }
 0x17e   : > { %11162 = vst [vmem:[#allocation55_spill] sm:$0xff] %v8937_v22  ;;  %11163 = vst [vmem:[#allocation56_spill] sm:$0xff] %v8939_v23  ;;  %v8943_v25 = vld [vmem:[#allocation6 + $0xc0] sm:$0xff]  ;;  %v8945_v26 = vld [vmem:[#allocation6 + $0xc8] sm:$0xff]  ;;  %s11449_s0 = sld [smem:[#allocation169_spill]] (!%p6063_p2)  ;;  %s11450_s1 = sld [smem:[#allocation171_spill]] (!%p6063_p2) }
 0x17f   : > { %11164 = vst [vmem:[#allocation57_spill] sm:$0xff] %v8941_v24  ;;  %11165 = vst [vmem:[#allocation58_spill] sm:$0xff] %v8943_v25  ;;  %v8947_v27 = vld [vmem:[#allocation6 + $0xd0] sm:$0xff]  ;;  %v8949_v28 = vld [vmem:[#allocation6 + $0xd8] sm:$0xff]  ;;  %s11451_s11 = sld [smem:[#allocation164_spill]] (!%p6063_p2) }
 0x180   : > { %11166 = vst [vmem:[#allocation59_spill] sm:$0xff] %v8945_v26  ;;  %11167 = vst [vmem:[#allocation60_spill] sm:$0xff] %v8947_v27  ;;  %v8951_v29 = vld [vmem:[#allocation6 + $0xe0] sm:$0xff]  ;;  %v8953_v30 = vld [vmem:[#allocation6 + $0xe8] sm:$0xff] }
 0x181   : > { %11168 = vst [vmem:[#allocation61_spill] sm:$0xff] %v8949_v28  ;;  %11169 = vst [vmem:[#allocation62_spill] sm:$0xff] %v8951_v29  ;;  %v8955_v31 = vld [vmem:[#allocation6 + $0xf0] sm:$0xff]  ;;  %v8957_v32 = vld [vmem:[#allocation6 + $0xf8] sm:$0xff] }
 0x182   : > { %11170 = vst [vmem:[#allocation63_spill] sm:$0xff] %v8953_v30  ;;  %11171 = vst [vmem:[#allocation64_spill] sm:$0xff] %v8955_v31  ;;  %v8959_v33 = vld [vmem:[#allocation6 + $0x100] sm:$0xff]  ;;  %v8961_v34 = vld [vmem:[#allocation6 + $0x108] sm:$0xff] }
 0x183   : > { %11172 = vst [vmem:[#allocation65_spill] sm:$0xff] %v8957_v32  ;;  %11173 = vst [vmem:[#allocation66_spill] sm:$0xff] %v8959_v33  ;;  %v8963_v35 = vld [vmem:[#allocation6 + $0x110] sm:$0xff]  ;;  %v8965_v36 = vld [vmem:[#allocation6 + $0x118] sm:$0xff] }
 0x184   : > { %11174 = vst [vmem:[#allocation67_spill] sm:$0xff] %v8961_v34  ;;  %11175 = vst [vmem:[#allocation68_spill] sm:$0xff] %v8963_v35  ;;  %v8967_v37 = vld [vmem:[#allocation6 + $0x120] sm:$0xff]  ;;  %v8969_v38 = vld [vmem:[#allocation6 + $0x128] sm:$0xff] }
 0x185   : > { %11176 = vst [vmem:[#allocation69_spill] sm:$0xff] %v8965_v36  ;;  %11177 = vst [vmem:[#allocation70_spill] sm:$0xff] %v8967_v37  ;;  %v8971_v39 = vld [vmem:[#allocation6 + $0x130] sm:$0xff]  ;;  %v8973_v40 = vld [vmem:[#allocation6 + $0x138] sm:$0xff] }
 0x186   : > { %11178 = vst [vmem:[#allocation71_spill] sm:$0xff] %v8969_v38  ;;  %11179 = vst [vmem:[#allocation72_spill] sm:$0xff] %v8971_v39  ;;  %v8975_v41 = vld [vmem:[#allocation6 + $0x140] sm:$0xff]  ;;  %v8977_v42 = vld [vmem:[#allocation6 + $0x148] sm:$0xff] }
 0x187   : > { %11180 = vst [vmem:[#allocation73_spill] sm:$0xff] %v8973_v40  ;;  %11181 = vst [vmem:[#allocation74_spill] sm:$0xff] %v8975_v41  ;;  %v8979_v43 = vld [vmem:[#allocation6 + $0x150] sm:$0xff]  ;;  %v8981_v44 = vld [vmem:[#allocation6 + $0x158] sm:$0xff] }
 0x188   : > { %11182 = vst [vmem:[#allocation75_spill] sm:$0xff] %v8977_v42  ;;  %11183 = vst [vmem:[#allocation76_spill] sm:$0xff] %v8979_v43  ;;  %v8983_v45 = vld [vmem:[#allocation6 + $0x160] sm:$0xff]  ;;  %v8985_v46 = vld [vmem:[#allocation6 + $0x168] sm:$0xff] }
 0x189   : > { %11184 = vst [vmem:[#allocation77_spill] sm:$0xff] %v8981_v44  ;;  %11185 = vst [vmem:[#allocation78_spill] sm:$0xff] %v8983_v45  ;;  %v8987_v47 = vld [vmem:[#allocation6 + $0x170] sm:$0xff]  ;;  %v8989_v48 = vld [vmem:[#allocation6 + $0x178] sm:$0xff] }
 0x18a   : > { %11186 = vst [vmem:[#allocation79_spill] sm:$0xff] %v8985_v46  ;;  %11187 = vst [vmem:[#allocation80_spill] sm:$0xff] %v8987_v47  ;;  %v8991_v49 = vld [vmem:[#allocation6 + $0x180] sm:$0xff]  ;;  %v8993_v50 = vld [vmem:[#allocation6 + $0x188] sm:$0xff] }
 0x18b   : > { %11188 = vst [vmem:[#allocation81_spill] sm:$0xff] %v8989_v48  ;;  %11189 = vst [vmem:[#allocation82_spill] sm:$0xff] %v8991_v49  ;;  %v8995_v51 = vld [vmem:[#allocation6 + $0x190] sm:$0xff]  ;;  %v8997_v52 = vld [vmem:[#allocation6 + $0x198] sm:$0xff] }
 0x18c   : > { %11190 = vst [vmem:[#allocation83_spill] sm:$0xff] %v8993_v50  ;;  %11191 = vst [vmem:[#allocation84_spill] sm:$0xff] %v8995_v51  ;;  %v8999_v53 = vld [vmem:[#allocation6 + $0x1a0] sm:$0xff]  ;;  %v9001_v54 = vld [vmem:[#allocation6 + $0x1a8] sm:$0xff] }
 0x18d   : > { %11192 = vst [vmem:[#allocation85_spill] sm:$0xff] %v8997_v52  ;;  %11193 = vst [vmem:[#allocation86_spill] sm:$0xff] %v8999_v53  ;;  %v9003_v55 = vld [vmem:[#allocation6 + $0x1b0] sm:$0xff]  ;;  %v9005_v56 = vld [vmem:[#allocation6 + $0x1b8] sm:$0xff] }
 0x18e   : > { %11194 = vst [vmem:[#allocation87_spill] sm:$0xff] %v9001_v54  ;;  %11195 = vst [vmem:[#allocation88_spill] sm:$0xff] %v9003_v55  ;;  %v9007_v57 = vld [vmem:[#allocation6 + $0x1c0] sm:$0xff]  ;;  %v9009_v58 = vld [vmem:[#allocation6 + $0x1c8] sm:$0xff] }
 0x18f   : > { %11196 = vst [vmem:[#allocation89_spill] sm:$0xff] %v9005_v56  ;;  %11197 = vst [vmem:[#allocation90_spill] sm:$0xff] %v9007_v57  ;;  %v9011_v59 = vld [vmem:[#allocation6 + $0x1d0] sm:$0xff]  ;;  %v9013_v60 = vld [vmem:[#allocation6 + $0x1d8] sm:$0xff] }
 0x190   : > { %11198 = vst [vmem:[#allocation91_spill] sm:$0xff] %v9009_v58  ;;  %11199 = vst [vmem:[#allocation92_spill] sm:$0xff] %v9011_v59  ;;  %v9015_v61 = vld [vmem:[#allocation6 + $0x1e0] sm:$0xff]  ;;  %v9017_v62 = vld [vmem:[#allocation6 + $0x1e8] sm:$0xff] }
 0x191   : > { %11200 = vst [vmem:[#allocation93_spill] sm:$0xff] %v9013_v60  ;;  %11201 = vst [vmem:[#allocation94_spill] sm:$0xff] %v9015_v61  ;;  %v9019_v63 = vld [vmem:[#allocation6 + $0x1f0] sm:$0xff]  ;;  %v9021_v0 = vld [vmem:[#allocation6 + $0x1f8] sm:$0xff] }
 0x192   : > { %11202 = vst [vmem:[#allocation95_spill] sm:$0xff] %v9017_v62  ;;  %11203 = vst [vmem:[#allocation96_spill] sm:$0xff] %v9019_v63  ;;  %v9023_v48 = vld [vmem:[#allocation6 + $0x200] sm:$0xff]  ;;  %v9025_v32 = vld [vmem:[#allocation6 + $0x208] sm:$0xff] }
 0x193   : > { %11204 = vst [vmem:[#allocation97_spill] sm:$0xff] %v9021_v0  ;;  %v9027_v16 = vld [vmem:[#allocation6 + $0x210] sm:$0xff]  ;;  %v9029_v47 = vld [vmem:[#allocation6 + $0x218] sm:$0xff]  ;;  %v9031_v31 = vld [vmem:[#allocation6 + $0x220] sm:$0xff] }
 0x194   : > { %11205 = vst [vmem:[#allocation98_spill] sm:$0xff] %v9027_v16  ;;  %11206 = vst [vmem:[#allocation99_spill] sm:$0xff] %v9029_v47  ;;  %v9033_v15 = vld [vmem:[#allocation6 + $0x228] sm:$0xff]  ;;  %v9035_v46 = vld [vmem:[#allocation6 + $0x230] sm:$0xff] }
 0x195   : > { %11207 = vst [vmem:[#allocation100_spill] sm:$0xff] %v9031_v31  ;;  %11208 = vst [vmem:[#allocation101_spill] sm:$0xff] %v9033_v15  ;;  %v9037_v61 = vld [vmem:[#allocation6 + $0x238] sm:$0xff]  ;;  %v9039_v62 = vld [vmem:[#allocation6 + $0x240] sm:$0xff] }
 0x196   : > { %11209 = vst [vmem:[#allocation102_spill] sm:$0xff] %v9035_v46  ;;  %11210 = vst [vmem:[#allocation103_spill] sm:$0xff] %v9037_v61  ;;  %v9041_v63 = vld [vmem:[#allocation6 + $0x248] sm:$0xff]  ;;  %v9043_v0 = vld [vmem:[#allocation6 + $0x250] sm:$0xff] }
 0x197   : > { %11211 = vst [vmem:[#allocation104_spill] sm:$0xff] %v9039_v62  ;;  %11212 = vst [vmem:[#allocation105_spill] sm:$0xff] %v9041_v63  ;;  %v9045_v30 = vld [vmem:[#allocation6 + $0x258] sm:$0xff]  ;;  %v9047_v14 = vld [vmem:[#allocation6 + $0x260] sm:$0xff] }
 0x198   : > { %11213 = vst [vmem:[#allocation106_spill] sm:$0xff] %v9043_v0  ;;  %11214 = vst [vmem:[#allocation107_spill] sm:$0xff] %v9045_v30  ;;  %v9049_v60 = vld [vmem:[#allocation6 + $0x268] sm:$0xff]  ;;  %v9051_v45 = vld [vmem:[#allocation6 + $0x270] sm:$0xff] }
 0x199   : > { %11215 = vst [vmem:[#allocation108_spill] sm:$0xff] %v9047_v14  ;;  %11216 = vst [vmem:[#allocation109_spill] sm:$0xff] %v9049_v60  ;;  %v9053_v29 = vld [vmem:[#allocation6 + $0x278] sm:$0xff]  ;;  %v9055_v13 = vld [vmem:[#allocation6 + $0x280] sm:$0xff] }
 0x19a   : > { %11217 = vst [vmem:[#allocation110_spill] sm:$0xff] %v9051_v45  ;;  %11218 = vst [vmem:[#allocation111_spill] sm:$0xff] %v9053_v29  ;;  %v9057_v59 = vld [vmem:[#allocation6 + $0x288] sm:$0xff]  ;;  %v9059_v44 = vld [vmem:[#allocation6 + $0x290] sm:$0xff] }
 0x19b   : > { %11219 = vst [vmem:[#allocation112_spill] sm:$0xff] %v9059_v44  ;;  %v9061_v62 = vld [vmem:[#allocation6 + $0x298] sm:$0xff]  ;;  %v9063_v63 = vld [vmem:[#allocation6 + $0x2a0] sm:$0xff]  ;;  %v9065_v0 = vld [vmem:[#allocation6 + $0x2a8] sm:$0xff] }
 0x19c   : > { %11220 = vst [vmem:[#allocation113_spill] sm:$0xff] %v9061_v62  ;;  %11221 = vst [vmem:[#allocation114_spill] sm:$0xff] %v9063_v63  ;;  %v9067_v30 = vld [vmem:[#allocation6 + $0x2b0] sm:$0xff]  ;;  %v9069_v14 = vld [vmem:[#allocation6 + $0x2b8] sm:$0xff] }
 0x19d   : > { %11222 = vst [vmem:[#allocation115_spill] sm:$0xff] %v9065_v0  ;;  %11223 = vst [vmem:[#allocation116_spill] sm:$0xff] %v9067_v30  ;;  %v9071_v60 = vld [vmem:[#allocation6 + $0x2c0] sm:$0xff]  ;;  %v9073_v45 = vld [vmem:[#allocation6 + $0x2c8] sm:$0xff] }
 0x19e   : > { %11224 = vst [vmem:[#allocation117_spill] sm:$0xff] %v9069_v14  ;;  %11225 = vst [vmem:[#allocation118_spill] sm:$0xff] %v9071_v60  ;;  %v9075_v29 = vld [vmem:[#allocation6 + $0x2d0] sm:$0xff]  ;;  %v9077_v28 = vld [vmem:[#allocation6 + $0x2d8] sm:$0xff] }
 0x19f   : > { %11226 = vst [vmem:[#allocation119_spill] sm:$0xff] %v9073_v45  ;;  %11227 = vst [vmem:[#allocation120_spill] sm:$0xff] %v9075_v29  ;;  %v9079_v61 = vld [vmem:[#allocation6 + $0x2e0] sm:$0xff]  ;;  %v9081_v12 = vld [vmem:[#allocation6 + $0x2e8] sm:$0xff] }
 0x1a0   : > { %11228 = vst [vmem:[#allocation121_spill] sm:$0xff] %v9077_v28  ;;  %11229 = vst [vmem:[#allocation122_spill] sm:$0xff] %v9079_v61  ;;  %v9083_v58 = vld [vmem:[#allocation6 + $0x2f0] sm:$0xff]  ;;  %v9085_v63 = vld [vmem:[#allocation6 + $0x2f8] sm:$0xff] }
 0x1a1   : > { %11230 = vst [vmem:[#allocation123_spill] sm:$0xff] %v9081_v12  ;;  %11231 = vst [vmem:[#allocation124_spill] sm:$0xff] %v9083_v58  ;;  %v9087_v0 = vld [vmem:[#allocation6 + $0x300] sm:$0xff]  ;;  %v9089_v30 = vld [vmem:[#allocation6 + $0x308] sm:$0xff] }
 0x1a2   : > { %11232 = vst [vmem:[#allocation125_spill] sm:$0xff] %v9085_v63  ;;  %11233 = vst [vmem:[#allocation126_spill] sm:$0xff] %v9087_v0  ;;  %v9091_v14 = vld [vmem:[#allocation6 + $0x310] sm:$0xff]  ;;  %v9093_v60 = vld [vmem:[#allocation6 + $0x318] sm:$0xff] }
 0x1a3   : > { %11234 = vst [vmem:[#allocation127_spill] sm:$0xff] %v9089_v30  ;;  %11235 = vst [vmem:[#allocation128_spill] sm:$0xff] %v9091_v14  ;;  %v9095_v45 = vld [vmem:[#allocation6 + $0x320] sm:$0xff]  ;;  %v9097_v29 = vld [vmem:[#allocation6 + $0x328] sm:$0xff] }
 0x1a4   : > { %11236 = vst [vmem:[#allocation129_spill] sm:$0xff] %v9093_v60  ;;  %11237 = vst [vmem:[#allocation130_spill] sm:$0xff] %v9095_v45  ;;  %v9099_v28 = vld [vmem:[#allocation6 + $0x330] sm:$0xff]  ;;  %v9101_v61 = vld [vmem:[#allocation6 + $0x338] sm:$0xff] }
 0x1a5   : > { %11238 = vst [vmem:[#allocation131_spill] sm:$0xff] %v9097_v29  ;;  %11239 = vst [vmem:[#allocation132_spill] sm:$0xff] %v9099_v28  ;;  %v9103_v12 = vld [vmem:[#allocation6 + $0x340] sm:$0xff]  ;;  %v9105_v58 = vld [vmem:[#allocation6 + $0x348] sm:$0xff] }
 0x1a6   : > { %11240 = vst [vmem:[#allocation133_spill] sm:$0xff] %v9101_v61  ;;  %11241 = vst [vmem:[#allocation134_spill] sm:$0xff] %v9103_v12  ;;  %v9107_v63 = vld [vmem:[#allocation6 + $0x350] sm:$0xff]  ;;  %v9109_v43 = vld [vmem:[#allocation6 + $0x358] sm:$0xff] }
 0x1a7   : > { %11242 = vst [vmem:[#allocation135_spill] sm:$0xff] %v9105_v58  ;;  %11243 = vst [vmem:[#allocation136_spill] sm:$0xff] %v9107_v63  ;;  %v9111_v27 = vld [vmem:[#allocation6 + $0x360] sm:$0xff]  ;;  %v9113_v46 = vld [vmem:[#allocation6 + $0x368] sm:$0xff] }
 0x1a8   : > { %11244 = vst [vmem:[#allocation137_spill] sm:$0xff] %v9109_v43  ;;  %11245 = vst [vmem:[#allocation138_spill] sm:$0xff] %v9111_v27  ;;  %v9115_v60 = vld [vmem:[#allocation6 + $0x370] sm:$0xff]  ;;  %v9117_v45 = vld [vmem:[#allocation6 + $0x378] sm:$0xff] }
 0x1a9   : > { %11246 = vst [vmem:[#allocation139_spill] sm:$0xff] %v9113_v46  ;;  %11247 = vst [vmem:[#allocation140_spill] sm:$0xff] %v9115_v60  ;;  %v9119_v29 = vld [vmem:[#allocation6 + $0x380] sm:$0xff]  ;;  %v9121_v61 = vld [vmem:[#allocation6 + $0x388] sm:$0xff] }
 0x1aa   : > { %11248 = vst [vmem:[#allocation141_spill] sm:$0xff] %v9117_v45  ;;  %11249 = vst [vmem:[#allocation142_spill] sm:$0xff] %v9119_v29  ;;  %v9123_v12 = vld [vmem:[#allocation6 + $0x390] sm:$0xff]  ;;  %v9125_v58 = vld [vmem:[#allocation6 + $0x398] sm:$0xff] }
 0x1ab   : > { %11250 = vst [vmem:[#allocation143_spill] sm:$0xff] %v9121_v61  ;;  %11251 = vst [vmem:[#allocation144_spill] sm:$0xff] %v9123_v12  ;;  %v9127_v63 = vld [vmem:[#allocation6 + $0x3a0] sm:$0xff]  ;;  %v9129_v43 = vld [vmem:[#allocation6 + $0x3a8] sm:$0xff] }
 0x1ac   : > { %11252 = vst [vmem:[#allocation145_spill] sm:$0xff] %v9125_v58  ;;  %11253 = vst [vmem:[#allocation146_spill] sm:$0xff] %v9127_v63  ;;  %v9131_v27 = vld [vmem:[#allocation6 + $0x3b0] sm:$0xff]  ;;  %v9133_v46 = vld [vmem:[#allocation6 + $0x3b8] sm:$0xff]  ;;  %1061 = sbr.rel (%p6063_p2) target bundleno = 874 (0x36a), region = 156 }
 0x1ad   : > { %11254 = vst [vmem:[#allocation147_spill] sm:$0xff] %v9129_v43  ;;  %11255 = vst [vmem:[#allocation148_spill] sm:$0xff] %v9131_v27  ;;  %v9135_v60 = vld [vmem:[#allocation6 + $0x3c0] sm:$0xff]  ;;  %v9137_v45 = vld [vmem:[#allocation6 + $0x3c8] sm:$0xff]  ;;  %v1083_v27 = vadd.f32 (!%p6063_p2), %v8929_v18, %v8927_v17  ;;  %v1104_v43 = vadd.f32 (!%p6063_p2), %v8961_v34, %v8959_v33 }
 0x1ae   : > { %11256 = vst [vmem:[#allocation149_spill] sm:$0xff] %v9133_v46  ;;  %11257 = vst [vmem:[#allocation150_spill] sm:$0xff] %v9135_v60  ;;  %v9139_v28 = vld [vmem:[#allocation6 + $0x3d0] sm:$0xff]  ;;  %v9141_v11 = vld [vmem:[#allocation6 + $0x3d8] sm:$0xff] }
 0x1af   : > { %11258 = vst [vmem:[#allocation151_spill] sm:$0xff] %v9137_v45  ;;  %11259 = vst [vmem:[#allocation152_spill] sm:$0xff] %v9139_v28  ;;  %v9143_v62 = vld [vmem:[#allocation6 + $0x3e0] sm:$0xff]  ;;  %v9145_v12 = vld [vmem:[#allocation6 + $0x3e8] sm:$0xff]  ;;  %v1062_v28 = vadd.f32 (!%p6063_p2), %v8897_v2, %v8895_v1  ;;  %v8365_v1 = vmov (!%p6063_p2), 0.0  }
 0x1b0   : > { %11260 = vst [vmem:[#allocation153_spill] sm:$0xff] %v9141_v11  ;;  %11261 = vst [vmem:[#allocation154_spill] sm:$0xff] %v9143_v62  ;;  %v9147_v58 = vld [vmem:[#allocation6 + $0x3f0] sm:$0xff]  ;;  %v9149_v63 = vld [vmem:[#allocation6 + $0x3f8] sm:$0xff]  ;;  %v11031_v11 = vmov (!%p6063_p2), 0.0|0.0   ;;  %6479 = vmatprep.mubr.msk.f32.mxu0 (!%p6063_p2), %vm8364_vm0, %v8365_v1  ;;  %6514 = vmatprep.mubr.msk.f32.mxu1 (!%p6063_p2), %vm8364_vm0, %v8365_v1 }
 0x1b1   : > { %11262 = vst [vmem:[#allocation155_spill] sm:$0xff] %v9145_v12  ;;  %11263 = vst [vmem:[#allocation156_spill] sm:$0xff] %v9147_v58  ;;  %v1238_v60 = vld [vmem:[#allocation14] sm:$0xff] (!%p6063_p2)  ;;  %v1239_v46 = vld [vmem:[#allocation14 + $0x8] sm:$0xff] (!%p6063_p2)  ;;  %7126 = vmatprep.subr.bf16.mxu0 (!%p6063_p2), %v11031_v11  ;;  %7150 = vmatprep.subr.bf16.mxu1 (!%p6063_p2), %v11031_v11 }
 0x1b2   : > { %11264 = vst [vmem:[#allocation157_spill] sm:$0xff] %v9149_v63  ;;  %v1355_v45 = vld [vmem:[#allocation15] sm:$0xff] (!%p6063_p2)  ;;  %v7127_v12 = vpack.c.bf16 (!%p6063_p2), %v1239_v46, %v1238_v60  ;;  %v1356_v58 = vld [vmem:[#allocation15 + $0x8] sm:$0xff] (!%p6063_p2)  ;;  %v1240_v62 = vld [vmem:[#allocation14 + $0x10] sm:$0xff] (!%p6063_p2)  ;;  %v1063_v46 = vadd.f32 (!%p6063_p2), %v1062_v28, %v8899_v3 }
 0x1b3   : > { %v1241_v63 = vld [vmem:[#allocation14 + $0x18] sm:$0xff]  ;;  %v7151_v57 = vpack.c.bf16 %v1356_v58, %v1355_v45  ;;  %v1357_v26 = vld [vmem:[#allocation15 + $0x10] sm:$0xff]  ;;  %v9162_v2 = vld [vmem:[#allocation14 + $0x20] sm:$0xff]  ;;  %v1084_v45 = vadd.f32 %v1083_v27, %v8931_v19  ;;  %v1105_v58 = vadd.f32 %v1104_v43, %v8963_v35 }
 0x1b4   : > { %v7130_v42 = vpack.c.bf16 %v1241_v63, %v1240_v62  ;;  %v1358_v14 = vld [vmem:[#allocation15 + $0x18] sm:$0xff]  ;;  %7128 = vmatpush3.bf16.msra.mxu0 %v7127_v12  ;;  %v1243_v11 = vld [vmem:[#allocation14 + $0x28] sm:$0xff]  ;;  %v9165_v15 = vld [vmem:[#allocation15 + $0x20] sm:$0xff]  ;;  %v1125_v62 = vadd.f32 %v8993_v50, %v8991_v49  ;;  %v11266_v63 = vmov 0.0|0.0   ;;  %v1064_v27 = vadd.f32 %v1063_v46, %v8901_v4 }
 0x1b5   : > { %v7154_v60 = vpack.c.bf16 %v1358_v14, %v1357_v26  ;;  %v9167_v18 = vld [vmem:[#allocation15 + $0x28] sm:$0xff]  ;;  %7152 = vmatpush3.bf16.msra.mxu1 %v7151_v57  ;;  %7129 = vmatprep.subr.bf16.mxu0 %v11266_v63  ;;  %v7133_v1 = vpack.c.bf16 %v1243_v11, %v9162_v2  ;;  %v9177_v14 = vld [vmem:[#allocation14 + $0x30] sm:$0xff]  ;;  %v9179_v26 = vld [vmem:[#allocation14 + $0x38] sm:$0xff]  ;;  %v1085_v11 = vadd.f32 %v1084_v45, %v8933_v20 }
 0x1b6   : > { %v7157_v12 = vpack.c.bf16 %v9167_v18, %v9165_v15  ;;  %v9181_v28 = vld [vmem:[#allocation15 + $0x30] sm:$0xff]  ;;  %7153 = vmatprep.subr.bf16.mxu1 %v11266_v63  ;;  %v9187_v57 = vld [vmem:[#allocation15 + $0x38] sm:$0xff]  ;;  %v9189_v50 = vld [vmem:[#allocation14 + $0x40] sm:$0xff]  ;;  %v1106_v15 = vadd.f32 %v1105_v58, %v8965_v36  ;;  %v1126_v18 = vadd.f32 %v1125_v62, %v8995_v51  ;;  %v1065_v33 = vadd.f32 %v1064_v27, %v8903_v5 }
 0x1b7   : > { %v9191_v2 = vld [vmem:[#allocation14 + $0x48] sm:$0xff]  ;;  %v9200_v35 = vld [vmem:[#allocation15 + $0x40] sm:$0xff]  ;;  %v9204_v34 = vld [vmem:[#allocation14 + $0x50] sm:$0xff]  ;;  %v1146_v45 = vadd.f32 %v9025_v32, %v9023_v48  ;;  %v1086_v51 = vadd.f32 %v1085_v11, %v8935_v21 }
 0x1b8   : > { %v9202_v43 = vld [vmem:[#allocation15 + $0x48] sm:$0xff]  ;;  %7131 = vmatpush3.bf16.msra.mxu0 %v7130_v42  ;;  %v9211_v62 = vld [vmem:[#allocation14 + $0x58] sm:$0xff]  ;;  %v9213_v46 = vld [vmem:[#allocation15 + $0x50] sm:$0xff]  ;;  %v1107_v36 = vadd.f32 %v1106_v15, %v8967_v37  ;;  %v1127_v20 = vadd.f32 %v1126_v18, %v8997_v52  ;;  %v1066_v11 = vadd.f32 %v1065_v33, %v8905_v6 }
 0x1b9   : > { %v9215_v49 = vld [vmem:[#allocation15 + $0x58] sm:$0xff]  ;;  %7155 = vmatpush3.bf16.msra.mxu1 %v7154_v60  ;;  %7132 = vmatprep.subr.bf16.mxu0 %v11266_v63  ;;  %v9225_v58 = vld [vmem:[#allocation14 + $0x60] sm:$0xff]  ;;  %v9227_v19 = vld [vmem:[#allocation14 + $0x68] sm:$0xff]  ;;  %v1087_v27 = vadd.f32 %v1086_v51, %v8937_v22  ;;  %v1147_v3 = vadd.f32 %v1146_v45, %v9027_v16 }
 0x1ba   : > { %v9229_v17 = vld [vmem:[#allocation15 + $0x60] sm:$0xff]  ;;  %7156 = vmatprep.subr.bf16.mxu1 %v11266_v63  ;;  %v9235_v15 = vld [vmem:[#allocation15 + $0x68] sm:$0xff]  ;;  %v9237_v18 = vld [vmem:[#allocation14 + $0x70] sm:$0xff]  ;;  %v1108_v52 = vadd.f32 %v1107_v36, %v8969_v38  ;;  %v1128_v37 = vadd.f32 %v1127_v20, %v8999_v53  ;;  %v1067_v4 = vadd.f32 %v1066_v11, %v8907_v7 }
 0x1bb   : > { %v9239_v42 = vld [vmem:[#allocation14 + $0x78] sm:$0xff]  ;;  %v9248_v6 = vld [vmem:[#allocation15 + $0x70] sm:$0xff]  ;;  %v1449_v5 = vld [vmem:[#allocation11] sm:$0xff]  ;;  %v1088_v51 = vadd.f32 %v1087_v27, %v8939_v23  ;;  %v1148_v45 = vadd.f32 %v1147_v3, %v9029_v47  ;;  %v1209_v3 = vadd.f32 %v9121_v61, %v9119_v29 }
 0x1bc   : > { %v9250_v60 = vld [vmem:[#allocation15 + $0x78] sm:$0xff]  ;;  %7134 = vmatpush3.bf16.msra.mxu0 %v7133_v1  ;;  %v1450_v20 = vld [vmem:[#allocation11 + $0x8] sm:$0xff]  ;;  %v1109_v33 = vadd.f32 %v1108_v52, %v8971_v39  ;;  %v1129_v21 = vadd.f32 %v1128_v37, %v9001_v54  ;;  %v1068_v11 = vadd.f32 %v1067_v4, %v8909_v8  ;;  %v1167_v37 = vadd.f32 %v9057_v59, %v9055_v13  ;;  %v11278_v39 = vld [vmem:[#allocation144_spill] sm:$0xff] }
 0x1bd   : > { %7158 = vmatpush3.bf16.msra.mxu1 %v7157_v12  ;;  %7135 = vmatprep.subr.bf16.mxu0 %v11266_v63  ;;  %v9260_v53 = vpack.c.bf16 %v1450_v20, %v1449_v5  ;;  %v1089_v1 = vadd.f32 %v1088_v51, %v8941_v24  ;;  %v1149_v5 = vadd.f32 %v1148_v45, %v9031_v31  ;;  %v11274_v61 = vld [vmem:[#allocation113_spill] sm:$0xff]  ;;  %v11280_v38 = vld [vmem:[#allocation60_spill] sm:$0xff] }
 0x1be   : > { %7159 = vmatprep.subr.bf16.mxu1 %v11266_v63  ;;  %v1110_v36 = vadd.f32 %v1109_v33, %v8973_v40  ;;  %v1130_v27 = vadd.f32 %v1129_v21, %v9003_v55  ;;  %v1069_v52 = vadd.f32 %v1068_v11, %v8911_v9  ;;  %v1188_v4 = vadd.f32 %v9089_v30, %v9087_v0  ;;  %v11269_v55 = vld [vmem:[#allocation101_spill] sm:$0xff]  ;;  %v11294_v0 = vld [vmem:[#allocation131_spill] sm:$0xff] }
 0x1bf   : > { %v11267_v12 = vpack.c.bf16 %v9179_v26, %v9177_v14  ;;  %v1090_v33 = vadd.f32 %v1089_v1, %v8943_v25  ;;  %v1168_v51 = vadd.f32 %v1167_v37, %v9059_v44  ;;  %v11268_v11 = vpack.c.bf16 %v9187_v57, %v9181_v28  ;;  %v11270_v14 = vld [vmem:[#allocation128_spill] sm:$0xff]  ;;  %v11271_v1 = vld [vmem:[#allocation59_spill] sm:$0xff]  ;;  %v11277_v40 = vld [vmem:[#allocation129_spill] sm:$0xff] }
 0x1c0   : > { %v1111_v21 = vadd.f32 %v1110_v36, %v8975_v41  ;;  %v1131_v20 = vadd.f32 %v1130_v27, %v9005_v56  ;;  %v1070_v45 = vadd.f32 %v1069_v52, %v8913_v10  ;;  %v1150_v54 = vadd.f32 %v1149_v5, %v11269_v55  ;;  %v11273_v56 = vld [vmem:[#allocation90_spill] sm:$0xff]  ;;  %v11275_v28 = vld [vmem:[#allocation44_spill] sm:$0xff] }
 0x1c1   : > { %7137 = vmatpush3.bf16.msra.mxu0 %v11267_v12  ;;  %7161 = vmatpush3.bf16.msra.mxu1 %v11268_v11  ;;  %v1189_v26 = vadd.f32 %v1188_v4, %v11270_v14  ;;  %v1091_v36 = vadd.f32 %v1090_v33, %v11271_v1  ;;  %v11272_v12 = vld [vmem:[#allocation75_spill] sm:$0xff]  ;;  %v1169_v29 = vadd.f32 %v1168_v51, %v11274_v61  ;;  %v11276_v11 = vld [vmem:[#allocation102_spill] sm:$0xff]  ;;  %v11281_v14 = vld [vmem:[#allocation76_spill] sm:$0xff] }
 0x1c2   : > { %7138 = vmatprep.subr.bf16.mxu0 %v11266_v63  ;;  %7162 = vmatprep.subr.bf16.mxu1 %v11266_v63  ;;  %v1112_v27 = vadd.f32 %v1111_v21, %v11272_v12  ;;  %v1132_v37 = vadd.f32 %v1131_v20, %v11273_v56  ;;  %v1071_v57 = vadd.f32 %v1070_v45, %v11275_v28  ;;  %v11282_v12 = vld [vmem:[#allocation91_spill] sm:$0xff]  ;;  %v11283_v56 = vld [vmem:[#allocation114_spill] sm:$0xff]  ;;  %v11311_v1 = vld [vmem:[#allocation133_spill] sm:$0xff] }
 0x1c3   : > { %v1151_v41 = vadd.f32 %v1150_v54, %v11276_v11  ;;  %v1190_v52 = vadd.f32 %v1189_v26, %v11277_v40  ;;  %v1210_v5 = vadd.f32 %v1209_v3, %v11278_v39  ;;  %v11279_v4 = vpack.c.bf16 %v9191_v2, %v9189_v50  ;;  %v11285_v54 = vld [vmem:[#allocation45_spill] sm:$0xff]  ;;  %v11286_v26 = vld [vmem:[#allocation103_spill] sm:$0xff]  ;;  %v11287_v50 = vld [vmem:[#allocation130_spill] sm:$0xff] }
 0x1c4   : > { %v1092_v33 = vadd.f32 %v1091_v36, %v11280_v38  ;;  %v1113_v21 = vadd.f32 %v1112_v27, %v11281_v14  ;;  %v1133_v20 = vadd.f32 %v1132_v37, %v11282_v12  ;;  %v1170_v51 = vadd.f32 %v1169_v29, %v11283_v56  ;;  %v11288_v36 = vld [vmem:[#allocation61_spill] sm:$0xff]  ;;  %v11290_v12 = vld [vmem:[#allocation92_spill] sm:$0xff]  ;;  %v11291_v14 = vld [vmem:[#allocation115_spill] sm:$0xff] }
 0x1c5   : > { %7140 = vmatpush3.bf16.msra.mxu0 %v11279_v4  ;;  %v11284_v45 = vpack.c.bf16 %v9202_v43, %v9200_v35  ;;  %v1072_v3 = vadd.f32 %v1071_v57, %v11285_v54  ;;  %v1152_v39 = vadd.f32 %v1151_v41, %v11286_v26  ;;  %v1191_v2 = vadd.f32 %v1190_v52, %v11287_v50  ;;  %v11289_v4 = vld [vmem:[#allocation77_spill] sm:$0xff]  ;;  %v11292_v35 = vld [vmem:[#allocation46_spill] sm:$0xff] }
 0x1c6   : > { %7141 = vmatprep.subr.bf16.mxu0 %v11266_v63  ;;  %v1093_v27 = vadd.f32 %v1092_v33, %v11288_v36  ;;  %v1114_v37 = vadd.f32 %v1113_v21, %v11289_v4  ;;  %v1134_v29 = vadd.f32 %v1133_v20, %v11290_v12  ;;  %v1171_v40 = vadd.f32 %v1170_v51, %v11291_v14  ;;  %v11295_v38 = vld [vmem:[#allocation145_spill] sm:$0xff]  ;;  %v11297_v50 = vld [vmem:[#allocation62_spill] sm:$0xff]  ;;  %v11300_v12 = vld [vmem:[#allocation116_spill] sm:$0xff] }
 0x1c7   : > { %7164 = vmatpush3.bf16.msra.mxu1 %v11284_v45  ;;  %v1073_v43 = vadd.f32 %v1072_v3, %v11292_v35  ;;  %v11293_v45 = vld [vmem:[#allocation104_spill] sm:$0xff]  ;;  %v1192_v57 = vadd.f32 %v1191_v2, %v11294_v0  ;;  %v1211_v41 = vadd.f32 %v1210_v5, %v11295_v38  ;;  %v11296_v52 = vpack.c.bf16 %v9211_v62, %v9204_v34  ;;  %v11298_v36 = vld [vmem:[#allocation78_spill] sm:$0xff]  ;;  %v11299_v4 = vld [vmem:[#allocation93_spill] sm:$0xff] }
 0x1c8   : > { %7165 = vmatprep.subr.bf16.mxu1 %v11266_v63  ;;  %v1153_v30 = vadd.f32 %v1152_v39, %v11293_v45  ;;  %v1094_v33 = vadd.f32 %v1093_v27, %v11297_v50  ;;  %v1115_v21 = vadd.f32 %v1114_v37, %v11298_v36  ;;  %v1135_v20 = vadd.f32 %v1134_v29, %v11299_v4  ;;  %v11302_v39 = vld [vmem:[#allocation47_spill] sm:$0xff]  ;;  %v11303_v2 = vld [vmem:[#allocation105_spill] sm:$0xff]  ;;  %v11304_v34 = vld [vmem:[#allocation132_spill] sm:$0xff] }
 0x1c9   : > { %7143 = vmatpush3.bf16.msra.mxu0 %v11296_v52  ;;  %v1172_v51 = vadd.f32 %v1171_v40, %v11300_v12  ;;  %v11301_v3 = vpack.c.bf16 %v9215_v49, %v9213_v46  ;;  %v1074_v5 = vadd.f32 %v1073_v43, %v11302_v39  ;;  %v1193_v62 = vadd.f32 %v1192_v57, %v11304_v34  ;;  %v11305_v27 = vld [vmem:[#allocation63_spill] sm:$0xff]  ;;  %v11307_v4 = vld [vmem:[#allocation94_spill] sm:$0xff]  ;;  %v11308_v36 = vld [vmem:[#allocation117_spill] sm:$0xff] }
 0x1ca   : > { %7144 = vmatprep.subr.bf16.mxu0 %v11266_v63  ;;  %v1154_v38 = vadd.f32 %v1153_v30, %v11303_v2  ;;  %v1095_v37 = vadd.f32 %v1094_v33, %v11305_v27  ;;  %v11306_v52 = vld [vmem:[#allocation79_spill] sm:$0xff]  ;;  %v1136_v40 = vadd.f32 %v1135_v20, %v11307_v4  ;;  %v11309_v49 = vld [vmem:[#allocation48_spill] sm:$0xff]  ;;  %v11312_v25 = vld [vmem:[#allocation146_spill] sm:$0xff]  ;;  %v11313_v57 = vpack.c.bf16 %v9227_v19, %v9225_v58 }
 0x1cb   : > { %7167 = vmatpush3.bf16.msra.mxu1 %v11301_v3  ;;  %v1116_v29 = vadd.f32 %v1115_v21, %v11306_v52  ;;  %v1173_v0 = vadd.f32 %v1172_v51, %v11308_v36  ;;  %v1075_v46 = vadd.f32 %v1074_v5, %v11309_v49  ;;  %v11310_v3 = vld [vmem:[#allocation106_spill] sm:$0xff]  ;;  %v1194_v43 = vadd.f32 %v1193_v62, %v11311_v1  ;;  %v11314_v34 = vld [vmem:[#allocation64_spill] sm:$0xff]  ;;  %v11316_v52 = vld [vmem:[#allocation95_spill] sm:$0xff] }
 0x1cc   : > { %7168 = vmatprep.subr.bf16.mxu1 %v11266_v63  ;;  %v1155_v50 = vadd.f32 %v1154_v38, %v11310_v3  ;;  %v1212_v30 = vadd.f32 %v1211_v41, %v11312_v25  ;;  %v1096_v33 = vadd.f32 %v1095_v37, %v11314_v34  ;;  %v11315_v27 = vld [vmem:[#allocation80_spill] sm:$0xff]  ;;  %v1137_v20 = vadd.f32 %v1136_v40, %v11316_v52  ;;  %v11317_v4 = vld [vmem:[#allocation118_spill] sm:$0xff]  ;;  %v11319_v38 = vld [vmem:[#allocation49_spill] sm:$0xff] }
 0x1cd   : > { %7146 = vmatpush3.bf16.msra.mxu0 %v11313_v57  ;;  %v1117_v21 = vadd.f32 %v1116_v29, %v11315_v27  ;;  %v1174_v51 = vadd.f32 %v1173_v0, %v11317_v4  ;;  %v11318_v5 = vpack.c.bf16 %v9235_v15, %v9229_v17  ;;  %v1076_v41 = vadd.f32 %v1075_v46, %v11319_v38  ;;  %v11320_v62 = vld [vmem:[#allocation107_spill] sm:$0xff]  ;;  %v11321_v19 = vld [vmem:[#allocation134_spill] sm:$0xff]  ;;  %v11322_v37 = vld [vmem:[#allocation65_spill] sm:$0xff] }
 0x1ce   : > { %7147 = vmatprep.subr.bf16.mxu0 %v11266_v63  ;;  %v1156_v25 = vadd.f32 %v1155_v50, %v11320_v62  ;;  %v1195_v58 = vadd.f32 %v1194_v43, %v11321_v19  ;;  %v1097_v29 = vadd.f32 %v1096_v33, %v11322_v37  ;;  %v11323_v57 = vld [vmem:[#allocation81_spill] sm:$0xff]  ;;  %v11324_v52 = vld [vmem:[#allocation96_spill] sm:$0xff]  ;;  %v11325_v27 = vld [vmem:[#allocation119_spill] sm:$0xff]  ;;  %v11329_v50 = vpack.c.bf16 %v9239_v42, %v9237_v18 }
 0x1cf   : > { %7170 = vmatpush3.bf16.msra.mxu1 %v11318_v5  ;;  %v1118_v40 = vadd.f32 %v1117_v21, %v11323_v57  ;;  %v1138_v0 = vadd.f32 %v1137_v20, %v11324_v52  ;;  %v1175_v1 = vadd.f32 %v1174_v51, %v11325_v27  ;;  %v1077_v17 = vrot.slane %v1076_v41, 4  ;;  %v11326_v15 = vld [vmem:[#allocation108_spill] sm:$0xff]  ;;  %v11327_v34 = vld [vmem:[#allocation135_spill] sm:$0xff]  ;;  %v11330_v33 = vld [vmem:[#allocation97_spill] sm:$0xff] }
 0x1d0   : > { %7171 = vmatprep.subr.bf16.mxu1 %v11266_v63  ;;  %v1157_v5 = vadd.f32 %v1156_v25, %v11326_v15  ;;  %v1196_v4 = vadd.f32 %v1195_v58, %v11327_v34  ;;  %v11328_v46 = vld [vmem:[#allocation147_spill] sm:$0xff]  ;;  %v1098_v63 = vrot.slane %v1097_v29, 4  ;;  %v11331_v21 = vld [vmem:[#allocation120_spill] sm:$0xff]  ;;  %v11332_v20 = vpack.c.bf16 %v9250_v60, %v9248_v6  ;;  %v11333_v51 = vld [vmem:[#allocation109_spill] sm:$0xff] }
 0x1d1   : > { %v1213_v36 = vadd.f32 %v1212_v30, %v11328_v46  ;;  %7149 = vmatpush3.bf16.msra.mxu0 %v11329_v50  ;;  %v1119_v43 = vrot.slane %v1118_v40, 4  ;;  %v1139_v19 = vadd.f32 %v1138_v0, %v11330_v33  ;;  %v1176_v57 = vadd.f32 %v1175_v1, %v11331_v21  ;;  %v11334_v30 = vld [vmem:[#allocation136_spill] sm:$0xff]  ;;  %v11335_v46 = vld [vmem:[#allocation121_spill] sm:$0xff]  ;;  %v11336_v1 = vld [vmem:[#allocation110_spill] sm:$0xff] }
 0x1d2   : > { %7175 = vmatprep.subr.bf16.mxu0 %v9260_v53  ;;  %v1078_v25 = vadd.f32 %v1077_v17, %v1076_v41  ;;  %v1158_v58 = vadd.f32 %v1157_v5, %v11333_v51  ;;  %v1197_v52 = vadd.f32 %v1196_v4, %v11334_v30  ;;  %v1099_v42 = vadd.f32 %v1098_v63, %v1097_v29  ;;  %v11337_v37 = vld [vmem:[#allocation137_spill] sm:$0xff]  ;;  %v11338_v60 = vld [vmem:[#allocation148_spill] sm:$0xff]  ;;  %v11339_v5 = vld [vmem:[#allocation122_spill] sm:$0xff] }
 0x1d3   : > { %7173 = vmatpush3.bf16.msra.mxu1 %v11332_v20  ;;  %v1120_v18 = vadd.f32 %v1119_v43, %v1118_v40  ;;  %v1140_v50 = vrot.slane %v1139_v19, 4  ;;  %v1177_v0 = vadd.f32 %v1176_v57, %v11335_v46  ;;  %v1214_v20 = vadd.f32 %v1213_v36, %v11338_v60  ;;  %v11340_v30 = vld [vmem:[#allocation111_spill] sm:$0xff]  ;;  %v11341_v29 = vld [vmem:[#allocation138_spill] sm:$0xff]  ;;  %v11342_v63 = vld [vmem:[#allocation149_spill] sm:$0xff] }
 0x1d4   : > { %7662 = vmatprep.subr.bf16.mxu1 %v9260_v53  ;;  %v1079_v33 = vrot.slane %v1078_v25, 2  ;;  %v1159_v34 = vadd.f32 %v1158_v58, %v11336_v1  ;;  %v1198_v6 = vadd.f32 %v1197_v52, %v11337_v37  ;;  %v1100_v21 = vrot.slane %v1099_v42, 2  ;;  %v11343_v58 = vld [vmem:[#allocation123_spill] sm:$0xff]  ;;  %v11345_v14 = vld [vmem:[#allocation150_spill] sm:$0xff] }
 0x1d5   : > { %v1121_v41 = vrot.slane %v1120_v18, 2  ;;  %v1141_v17 = vadd.f32 %v1140_v50, %v1139_v19  ;;  %v1178_v27 = vadd.f32 %v1177_v0, %v11339_v5  ;;  %v1215_v43 = vadd.f32 %v1214_v20, %v11342_v63  ;;  %v11344_v36 = vld [vmem:[#allocation139_spill] sm:$0xff]  ;;  %v11346_v0 = vld [vmem:[#allocation124_spill] sm:$0xff] }
 0x1d6   : > { %v1080_v4 = vadd.f32 %v1079_v33, %v1078_v25  ;;  %v1160_v24 = vadd.f32 %v1159_v34, %v11340_v30  ;;  %v1199_v40 = vadd.f32 %v1198_v6, %v11341_v29  ;;  %v1101_v57 = vadd.f32 %v1100_v21, %v1099_v42  ;;  %v11347_v5 = vld [vmem:[#allocation140_spill] sm:$0xff]  ;;  %v11348_v29 = vld [vmem:[#allocation151_spill] sm:$0xff] }
 0x1d7   : > { %v1122_v46 = vadd.f32 %v1121_v41, %v1120_v18  ;;  %v1142_v12 = vrot.slane %v1141_v17, 2  ;;  %v1179_v23 = vadd.f32 %v1178_v27, %v11343_v58  ;;  %v1216_v19 = vadd.f32 %v1215_v43, %v11345_v14  ;;  %v11349_v18 = vld [vmem:[#allocation125_spill] sm:$0xff] }
 0x1d8   : > { %v1081_v52 = vrot.slane %v1080_v4, 1  ;;  %v1161_v37 = vrot.slane %v1160_v24, 4  ;;  %v1200_v60 = vadd.f32 %v1199_v40, %v11344_v36  ;;  %v1102_v50 = vrot.slane %v1101_v57, 1  ;;  %v11350_v58 = vld [vmem:[#allocation141_spill] sm:$0xff]  ;;  %v11351_v40 = vld [vmem:[#allocation152_spill] sm:$0xff] }
 0x1d9   : > { %v1180_v33 = vadd.f32 %v1179_v23, %v11346_v0  ;;  %v1143_v25 = vadd.f32 %v1142_v12, %v1141_v17  ;;  %v1217_v20 = vadd.f32 %v1216_v19, %v11348_v29  ;;  %v1123_v42 = vrot.slane %v1122_v46, 1  ;;  %v11352_v12 = vld [vmem:[#allocation153_spill] sm:$0xff]  ;;  %v11353_v19 = vld [vmem:[#allocation154_spill] sm:$0xff] }
 0x1da   : > { %v1162_v34 = vadd.f32 %v1161_v37, %v1160_v24  ;;  %v1201_v6 = vadd.f32 %v1200_v60, %v11347_v5  ;;  %v1082_v21 = vadd.f32 %v1081_v52, %v1080_v4  ;;  %v1103_v27 = vadd.f32 %v1102_v50, %v1101_v57 }
 0x1db   : > { %v1181_v41 = vadd.f32 %v1180_v33, %v11349_v18  ;;  %v1218_v36 = vadd.f32 %v1217_v20, %v11351_v40  ;;  %v1144_v14 = vrot.slane %v1143_v25, 1  ;;  %v1124_v37 = vadd.f32 %v1123_v42, %v1122_v46  ;;  %v11356_v42 = vld [vmem:[#allocation157_spill] sm:$0xff] }
 0x1dc   : > { %v1163_v63 = vrot.slane %v1162_v34, 2  ;;  %v1202_v22 = vadd.f32 %v1201_v6, %v11350_v58  ;;  %v1230_v52 = vmul.f32 0.0625, %v1082_v21  ;;  %v1231_v29 = vmul.f32 0.0625, %v1103_v27  ;;  %v11354_v58 = vld [vmem:[#allocation155_spill] sm:$0xff] }
 0x1dd   : > { %v1182_v43 = vrot.slane %v1181_v41, 4  ;;  %v1219_v24 = vadd.f32 %v1218_v36, %v11352_v12  ;;  %v1145_v50 = vadd.f32 %v1144_v14, %v1143_v25  ;;  %v1232_v5 = vmul.f32 0.0625, %v1124_v37 }
 0x1de   : > { %v1164_v56 = vadd.f32 %v1163_v63, %v1162_v34  ;;  %v1203_v23 = vrot.slane %v1202_v22, 4  ;;  %v11355_v34 = vld [vmem:[#allocation156_spill] sm:$0xff]  ;;  %v1270_v36 = vsel %vm1269_vm1, %v1231_v29, %v1230_v52 }
 0x1df   : > { %v1183_v60 = vadd.f32 %v1182_v43, %v1181_v41  ;;  %v1220_v4 = vadd.f32 %v1219_v24, %v11353_v19  ;;  %v1233_v21 = vmul.f32 0.0625, %v1145_v50  ;;  %v1272_v43 = vsel %vm1271_vm2, %v1232_v5, %v1270_v36  ;;  %v1451_v50 = vld [vmem:[#allocation11 + $0x10] sm:$0xff]  ;;  %v1452_v5 = vld [vmem:[#allocation11 + $0x18] sm:$0xff] }
 0x1e0   : > { %v1204_v17 = vadd.f32 %v1203_v23, %v1202_v22  ;;  %v1165_v33 = vrot.slane %v1164_v56, 1 }
 0x1e1   : > { %v1184_v57 = vrot.slane %v1183_v60, 2  ;;  %v1221_v20 = vadd.f32 %v1220_v4, %v11354_v58  ;;  %v1274_v4 = vsel %vm1273_vm3, %v1233_v21, %v1272_v43  ;;  %v1456_v21 = vld [vmem:[#allocation11 + $0x38] sm:$0xff] }
 0x1e2   : > { %v1205_v6 = vrot.slane %v1204_v17, 2  ;;  %v1166_v46 = vadd.f32 %v1165_v33, %v1164_v56 }
 0x1e3   : > { %v1185_v40 = vadd.f32 %v1184_v57, %v1183_v60  ;;  %v1222_v18 = vadd.f32 %v1221_v20, %v11355_v34  ;;  %v7178_v20 = vpack.c.bf16 %v1452_v5, %v1451_v50  ;;  %v11361_v50 = vld [vmem:[#allocation42_spill] sm:$0xff]  ;;  %v11362_v5 = vld [vmem:[#allocation43_spill] sm:$0xff] }
 0x1e4   : > { %v1206_v63 = vadd.f32 %v1205_v6, %v1204_v17  ;;  %v1234_v25 = vmul.f32 0.0625, %v1166_v46  ;;  %v1453_v46 = vld [vmem:[#allocation11 + $0x20] sm:$0xff] }
 0x1e5   : > { %v1186_v22 = vrot.slane %v1185_v40, 1  ;;  %v1223_v41 = vadd.f32 %v1222_v18, %v11356_v42 }
 0x1e6   : > { %v1207_v27 = vrot.slane %v1206_v63, 1  ;;  %v1276_v57 = vsel %vm1275_vm4, %v1234_v25, %v1274_v4  ;;  %v1459_v25 = vld [vmem:[#allocation11 + $0x50] sm:$0xff] }
 0x1e7   : > { %v1187_v23 = vadd.f32 %v1186_v22, %v1185_v40  ;;  %v1224_v14 = vrot.slane %v1223_v41, 4  ;;  %v1454_v22 = vld [vmem:[#allocation11 + $0x28] sm:$0xff] }
 0x1e8   : > { %v1208_v37 = vadd.f32 %v1207_v27, %v1206_v63  ;;  %v7182_v63 = vpack.c.bf16 %v1454_v22, %v1453_v46  ;;  %v11357_v27 = vld [vmem:[#allocation38_spill] sm:$0xff]  ;;  %v11385_v46 = vld [vmem:[#allocation63_spill] sm:$0xff] }
 0x1e9   : > { %v1225_v24 = vadd.f32 %v1224_v14, %v1223_v41  ;;  %v1235_v17 = vmul.f32 0.0625, %v1187_v23  ;;  %v1455_v41 = vld [vmem:[#allocation11 + $0x30] sm:$0xff]  ;;  %v1457_v23 = vld [vmem:[#allocation11 + $0x40] sm:$0xff]  ;;  %v1458_v14 = vld [vmem:[#allocation11 + $0x48] sm:$0xff] }
 0x1ea   : > { %v1236_v56 = vmul.f32 0.0625, %v1208_v37  ;;  %v7186_v43 = vpack.c.bf16 %v1456_v21, %v1455_v41  ;;  %v1461_v37 = vld [vmem:[#allocation11 + $0x60] sm:$0xff]  ;;  %v11386_v22 = vld [vmem:[#allocation123_spill] sm:$0xff]  ;;  %v11388_v41 = vld [vmem:[#allocation65_spill] sm:$0xff] }
 0x1eb   : > { %v1226_v60 = vrot.slane %v1225_v24, 2  ;;  %v1278_v33 = vsel %vm1277_vm5, %v1235_v17, %v1276_v57  ;;  %v1463_v57 = vld [vmem:[#allocation11 + $0x70] sm:$0xff]  ;;  %v11389_v21 = vld [vmem:[#allocation125_spill] sm:$0xff] }
 0x1ec   : > { %v1280_v6 = vsel %vm1279_vm6, %v1236_v56, %v1278_v33  ;;  %v11359_v33 = vld [vmem:[#allocation40_spill] sm:$0xff] }
 0x1ed   : > { %v1227_v29 = vadd.f32 %v1226_v60, %v1225_v24  ;;  %v1460_v24 = vld [vmem:[#allocation11 + $0x58] sm:$0xff]  ;;  %v1462_v60 = vld [vmem:[#allocation11 + $0x68] sm:$0xff] }
 0x1ee   : > { %v7194_v4 = vpack.c.bf16 %v1460_v24, %v1459_v25  ;;  %v7198_v17 = vpack.c.bf16 %v1462_v60, %v1461_v37  ;;  %v11395_v25 = vld [vmem:[#allocation128_spill] sm:$0xff]  ;;  %v11396_v24 = vld [vmem:[#allocation69_spill] sm:$0xff]  ;;  %v11399_v37 = vld [vmem:[#allocation130_spill] sm:$0xff] }
 0x1ef   : > { %v1228_v52 = vrot.slane %v1227_v29, 1  ;;  %v11400_v60 = vld [vmem:[#allocation71_spill] sm:$0xff] }
 0x1f1   : > { %v1229_v18 = vadd.f32 %v1228_v52, %v1227_v29  ;;  %v1464_v29 = vld [vmem:[#allocation11 + $0x78] sm:$0xff]  ;;  %v11358_v52 = vld [vmem:[#allocation39_spill] sm:$0xff] }
 0x1f2   : > { %v7202_v56 = vpack.c.bf16 %v1464_v29, %v1463_v57  ;;  %v11402_v57 = vld [vmem:[#allocation72_spill] sm:$0xff] }
 0x1f3   : > { %v1237_v40 = vmul.f32 0.0625, %v1229_v18  ;;  %v11360_v18 = vld [vmem:[#allocation41_spill] sm:$0xff]  ;;  %v11403_v29 = vld [vmem:[#allocation132_spill] sm:$0xff] }
 0x1f5   : > { %v1282_v36 = vsel %vm1281_vm7, %v1237_v40, %v1280_v6  ;;  %v11381_v6 = vld [vmem:[#allocation61_spill] sm:$0xff] }
 0x1f6   : > { %6480 = vmatmul.mubr.f32.vlgmr.msra.gmra.mrb[0].mxu0 %v1282_v36  ;;  %6515 = vmatmul.mubr.f32.vlgmr.msra.gmra.mrb[0].mxu1 %v1282_v36  ;;  %v11382_v40 = vld [vmem:[#allocation121_spill] sm:$0xff]  ;;  %v11384_v36 = vld [vmem:[#allocation122_spill] sm:$0xff] }
 0x1f7   : > { %7177 = vmatpush3.bf16.msra.mxu0 %v9260_v53  ;;  %7670 = vmatpush3.bf16.msra.mxu1 %v9260_v53  ;;  %v7190_v53 = vpack.c.bf16 %v1458_v14, %v1457_v23  ;;  %v11392_v23 = vld [vmem:[#allocation67_spill] sm:$0xff] }
 0x1f8   : > { %7179 = vmatprep.subr.bf16.mxu0 %v7178_v20  ;;  %7663 = vmatprep.subr.bf16.mxu1 %v7178_v20  ;;  %v11393_v14 = vld [vmem:[#allocation127_spill] sm:$0xff] }
 0x1f9   : > { %6549 = vmatprep.mubr.f32.mxu0 %v11357_v27  ;;  %6645 = vmatprep.mubr.f32.mxu1 %v9023_v48  ;;  %v11390_v27 = vld [vmem:[#allocation66_spill] sm:$0xff] }
 0x1fb   : > { %7181 = vmatpush3.bf16.msra.mxu0 %v7178_v20  ;;  %7671 = vmatpush3.bf16.msra.mxu1 %v7178_v20  ;;  %v11383_v20 = vld [vmem:[#allocation62_spill] sm:$0xff] }
 0x1fc   : > { %7183 = vmatprep.subr.bf16.mxu0 %v7182_v63  ;;  %7664 = vmatprep.subr.bf16.mxu1 %v7182_v63 }
 0x1ff   : > { %7185 = vmatpush3.bf16.msra.mxu0 %v7182_v63  ;;  %7672 = vmatpush3.bf16.msra.mxu1 %v7182_v63  ;;  %v11387_v63 = vld [vmem:[#allocation64_spill] sm:$0xff] }
 0x200   : > { %7187 = vmatprep.subr.bf16.mxu0 %v7186_v43  ;;  %7665 = vmatprep.subr.bf16.mxu1 %v7186_v43 }
 0x203   : > { %7189 = vmatpush3.bf16.msra.mxu0 %v7186_v43  ;;  %7673 = vmatpush3.bf16.msra.mxu1 %v7186_v43  ;;  %v11391_v43 = vld [vmem:[#allocation126_spill] sm:$0xff] }
 0x204   : > { %7191 = vmatprep.subr.bf16.mxu0 %v7190_v53  ;;  %7666 = vmatprep.subr.bf16.mxu1 %v7190_v53 }
 0x207   : > { %7193 = vmatpush3.bf16.msra.mxu0 %v7190_v53  ;;  %7674 = vmatpush3.bf16.msra.mxu1 %v7190_v53  ;;  %v11394_v53 = vld [vmem:[#allocation68_spill] sm:$0xff] }
 0x208   : > { %7195 = vmatprep.subr.bf16.mxu0 %v7194_v4  ;;  %7667 = vmatprep.subr.bf16.mxu1 %v7194_v4 }
 0x20b   : > { %7197 = vmatpush3.bf16.msra.mxu0 %v7194_v4  ;;  %7675 = vmatpush3.bf16.msra.mxu1 %v7194_v4  ;;  %v11397_v4 = vld [vmem:[#allocation129_spill] sm:$0xff] }
 0x20c   : > { %7199 = vmatprep.subr.bf16.mxu0 %v7198_v17  ;;  %7668 = vmatprep.subr.bf16.mxu1 %v7198_v17 }
 0x20f   : > { %7201 = vmatpush3.bf16.msra.mxu0 %v7198_v17  ;;  %7676 = vmatpush3.bf16.msra.mxu1 %v7198_v17  ;;  %v11401_v17 = vld [vmem:[#allocation131_spill] sm:$0xff] }
 0x210   : > { %7203 = vmatprep.subr.bf16.mxu0 %v7202_v56  ;;  %7669 = vmatprep.subr.bf16.mxu1 %v7202_v56 }
 0x213   : > { %7205 = vmatpush3.bf16.msra.mxu0 %v7202_v56  ;;  %7677 = vmatpush3.bf16.msra.mxu1 %v7202_v56  ;;  %v11404_v56 = vld [vmem:[#allocation73_spill] sm:$0xff] }
 0x216   : > { %6550 = vmatmul.mubr.f32.vlgmr.msra.gmra.mrb[2].mxu0 %v11358_v52  ;;  %6646 = vmatmul.mubr.f32.vlgmr.msra.gmra.mrb[2].mxu1 %v9025_v32  ;;  %v11405_v52 = vld [vmem:[#allocation133_spill] sm:$0xff] }
 0x217   : > { %6552 = vmatprep.mubr.f32.mxu0 %v11359_v33  ;;  %6648 = vmatprep.mubr.f32.mxu1 %v9027_v16  ;;  %v11406_v33 = vld [vmem:[#allocation74_spill] sm:$0xff] }
 0x21a   : > { %6553 = vmatmul.mubr.f32.gmra.mrb[4].mxu0 %v11360_v18  ;;  %6649 = vmatmul.mubr.f32.gmra.mrb[4].mxu1 %v9029_v47  ;;  %v11407_v18 = vld [vmem:[#allocation134_spill] sm:$0xff] }
 0x21b   : > { %6555 = vmatprep.mubr.f32.mxu0 %v11361_v50  ;;  %6651 = vmatprep.mubr.f32.mxu1 %v9031_v31  ;;  %v11408_v50 = vld [vmem:[#allocation75_spill] sm:$0xff] }
 0x21e   : > { %6556 = vmatmul.mubr.f32.gmra.mrb[6].mxu0 %v11362_v5  ;;  %6652 = vmatmul.mubr.f32.gmra.mrb[6].mxu1 %v11269_v55  ;;  %v11363_v55 = vld [vmem:[#allocation50_spill] sm:$0xff]  ;;  %v11409_v5 = vld [vmem:[#allocation135_spill] sm:$0xff] }
 0x21f   : > { %6558 = vmatprep.mubr.f32.mxu0 %v8907_v7  ;;  %6654 = vmatprep.mubr.f32.mxu1 %v11276_v11  ;;  %v11365_v11 = vld [vmem:[#allocation52_spill] sm:$0xff] }
 0x222   : > { %6559 = vmatmul.mubr.f32.gmra.mrb[8].mxu0 %v8909_v8  ;;  %6655 = vmatmul.mubr.f32.gmra.mrb[8].mxu1 %v11286_v26  ;;  %v11367_v26 = vld [vmem:[#allocation54_spill] sm:$0xff] }
 0x223   : > { %6561 = vmatprep.mubr.f32.mxu0 %v8911_v9  ;;  %6657 = vmatprep.mubr.f32.mxu1 %v11293_v45  ;;  %v11369_v45 = vld [vmem:[#allocation55_spill] sm:$0xff] }
 0x226   : > { %6562 = vmatmul.mubr.f32.gmra.mrb[10].mxu0 %v8913_v10  ;;  %6658 = vmatmul.mubr.f32.gmra.mrb[10].mxu1 %v11303_v2  ;;  %v11371_v2 = vld [vmem:[#allocation56_spill] sm:$0xff] }
 0x227   : > { %6564 = vmatprep.mubr.f32.mxu0 %v11275_v28  ;;  %6660 = vmatprep.mubr.f32.mxu1 %v11310_v3  ;;  %v11364_v28 = vld [vmem:[#allocation51_spill] sm:$0xff]  ;;  %v11373_v3 = vld [vmem:[#allocation57_spill] sm:$0xff] }
 0x22a   : > { %6565 = vmatmul.mubr.f32.gmra.mrb[12].mxu0 %v11285_v54  ;;  %6661 = vmatmul.mubr.f32.gmra.mrb[12].mxu1 %v11320_v62  ;;  %v11366_v54 = vld [vmem:[#allocation53_spill] sm:$0xff]  ;;  %v11375_v62 = vld [vmem:[#allocation58_spill] sm:$0xff] }
 0x22b   : > { %6567 = vmatprep.mubr.f32.mxu0 %v11292_v35  ;;  %6663 = vmatprep.mubr.f32.mxu1 %v11326_v15  ;;  %v11368_v35 = vld [vmem:[#allocation114_spill] sm:$0xff] }
 0x22c   : > { %v11376_v15 = vld [vmem:[#allocation118_spill] sm:$0xff] }
 0x22e   : > { %6568 = vmatmul.mubr.f32.gmra.mrb[14].mxu0 %v11302_v39  ;;  %6664 = vmatmul.mubr.f32.gmra.mrb[14].mxu1 %v11333_v51  ;;  %v11370_v39 = vld [vmem:[#allocation115_spill] sm:$0xff] }
 0x22f   : > { %6570 = vmatprep.mubr.f32.mxu0 %v11309_v49  ;;  %6666 = vmatprep.mubr.f32.mxu1 %v11336_v1  ;;  %v11372_v49 = vld [vmem:[#allocation116_spill] sm:$0xff]  ;;  %v11378_v51 = vld [vmem:[#allocation119_spill] sm:$0xff] }
 0x230   : > { %v11380_v1 = vld [vmem:[#allocation120_spill] sm:$0xff] }
 0x232   : > { %6571 = vmatmul.mubr.f32.gmra.mrb[16].mxu0 %v11319_v38  ;;  %6667 = vmatmul.mubr.f32.gmra.mrb[16].mxu1 %v11340_v30  ;;  %v11374_v38 = vld [vmem:[#allocation117_spill] sm:$0xff]  ;;  %v11379_v30 = vld [vmem:[#allocation60_spill] sm:$0xff] }
 0x233   : > { %6573 = vmatprep.mubr.f32.mxu0 %v11363_v55  ;;  %6669 = vmatprep.mubr.f32.mxu1 %v9055_v13  ;;  %v11410_v55 = vld [vmem:[#allocation76_spill] sm:$0xff] }
 0x236   : > { %6574 = vmatmul.mubr.f32.gmra.mrb[18].mxu0 %v11364_v28  ;;  %6670 = vmatmul.mubr.f32.gmra.mrb[18].mxu1 %v9057_v59  ;;  %v11411_v28 = vld [vmem:[#allocation136_spill] sm:$0xff] }
 0x237   : > { %6576 = vmatprep.mubr.f32.mxu0 %v11365_v11  ;;  %6672 = vmatprep.mubr.f32.mxu1 %v9059_v44  ;;  %v11412_v11 = vld [vmem:[#allocation77_spill] sm:$0xff] }
 0x23a   : > { %6577 = vmatmul.mubr.f32.gmra.mrb[20].mxu0 %v11366_v54  ;;  %6673 = vmatmul.mubr.f32.gmra.mrb[20].mxu1 %v11274_v61  ;;  %v11377_v61 = vld [vmem:[#allocation59_spill] sm:$0xff]  ;;  %v11413_v54 = vld [vmem:[#allocation137_spill] sm:$0xff] }
 0x23b   : > { %6579 = vmatprep.mubr.f32.mxu0 %v11367_v26  ;;  %6675 = vmatprep.mubr.f32.mxu1 %v11368_v35  ;;  %v11414_v26 = vld [vmem:[#allocation78_spill] sm:$0xff] }
 0x23c   : > { %v11415_v35 = vld [vmem:[#allocation138_spill] sm:$0xff] }
 0x23e   : > { %6580 = vmatmul.mubr.f32.gmra.mrb[22].mxu0 %v11369_v45  ;;  %6676 = vmatmul.mubr.f32.gmra.mrb[22].mxu1 %v11370_v39  ;;  %v11416_v45 = vld [vmem:[#allocation79_spill] sm:$0xff] }
 0x23f   : > { %6582 = vmatprep.mubr.f32.mxu0 %v11371_v2  ;;  %6678 = vmatprep.mubr.f32.mxu1 %v11372_v49  ;;  %v11417_v39 = vld [vmem:[#allocation139_spill] sm:$0xff]  ;;  %v11418_v2 = vld [vmem:[#allocation80_spill] sm:$0xff] }
 0x240   : > { %v11419_v49 = vld [vmem:[#allocation140_spill] sm:$0xff] }
 0x242   : > { %6583 = vmatmul.mubr.f32.gmra.mrb[24].mxu0 %v11373_v3  ;;  %6679 = vmatmul.mubr.f32.gmra.mrb[24].mxu1 %v11374_v38  ;;  %v11420_v3 = vld [vmem:[#allocation81_spill] sm:$0xff] }
 0x243   : > { %6585 = vmatprep.mubr.f32.mxu0 %v11375_v62  ;;  %6681 = vmatprep.mubr.f32.mxu1 %v11376_v15  ;;  %v11421_v38 = vld [vmem:[#allocation141_spill] sm:$0xff]  ;;  %v11422_v62 = vld [vmem:[#allocation82_spill] sm:$0xff] }
 0x244   : > { %v11423_v15 = vld [vmem:[#allocation142_spill] sm:$0xff] }
 0x246   : > { %6586 = vmatmul.mubr.f32.gmra.mrb[26].mxu0 %v11377_v61  ;;  %6682 = vmatmul.mubr.f32.gmra.mrb[26].mxu1 %v11378_v51  ;;  %v11424_v61 = vld [vmem:[#allocation83_spill] sm:$0xff] }
 0x247   : > { %6588 = vmatprep.mubr.f32.mxu0 %v11379_v30  ;;  %6684 = vmatprep.mubr.f32.mxu1 %v11380_v1  ;;  %v11425_v51 = vld [vmem:[#allocation143_spill] sm:$0xff]  ;;  %v11426_v30 = vld [vmem:[#allocation84_spill] sm:$0xff] }
 0x248   : > { %v11427_v1 = vld [vmem:[#allocation144_spill] sm:$0xff] }
 0x24a   : > { %6589 = vmatmul.mubr.f32.gmra.mrb[28].mxu0 %v11381_v6  ;;  %6685 = vmatmul.mubr.f32.gmra.mrb[28].mxu1 %v11382_v40  ;;  %v11428_v6 = vld [vmem:[#allocation85_spill] sm:$0xff] }
 0x24b   : > { %6591 = vmatprep.mubr.f32.mxu0 %v11383_v20  ;;  %6687 = vmatprep.mubr.f32.mxu1 %v11384_v36  ;;  %v11429_v40 = vld [vmem:[#allocation145_spill] sm:$0xff]  ;;  %v11430_v20 = vld [vmem:[#allocation86_spill] sm:$0xff] }
 0x24c   : > { %v11431_v36 = vld [vmem:[#allocation146_spill] sm:$0xff] }
 0x24e   : > { %6592 = vmatmul.mubr.f32.gmra.mrb[30].mxu0 %v11385_v46  ;;  %6688 = vmatmul.mubr.f32.gmra.mrb[30].mxu1 %v11386_v22  ;;  %v11432_v46 = vld [vmem:[#allocation87_spill] sm:$0xff] }
 0x24f   : > { %6594 = vmatprep.mubr.f32.mxu0 %v11387_v63  ;;  %6690 = vmatprep.mubr.f32.mxu1 %v11346_v0  ;;  %v11398_v0 = vld [vmem:[#allocation70_spill] sm:$0xff]  ;;  %v11433_v22 = vld [vmem:[#allocation147_spill] sm:$0xff]  ;;  %v11434_v63 = vld [vmem:[#allocation88_spill] sm:$0xff] }
 0x252   : > { %6595 = vmatmul.mubr.f32.gmra.mrb[32].mxu0 %v11388_v41  ;;  %6691 = vmatmul.mubr.f32.gmra.mrb[32].mxu1 %v11389_v21  ;;  %v11435_v41 = vld [vmem:[#allocation148_spill] sm:$0xff]  ;;  %v11436_v21 = vld [vmem:[#allocation89_spill] sm:$0xff] }
 0x253   : > { %6597 = vmatprep.mubr.f32.mxu0 %v11390_v27  ;;  %6693 = vmatprep.mubr.f32.mxu1 %v11391_v43  ;;  %v11437_v27 = vld [vmem:[#allocation149_spill] sm:$0xff]  ;;  %v11438_v43 = vld [vmem:[#allocation90_spill] sm:$0xff] }
 0x256   : > { %6598 = vmatmul.mubr.f32.gmra.mrb[34].mxu0 %v11392_v23  ;;  %6694 = vmatmul.mubr.f32.gmra.mrb[34].mxu1 %v11393_v14  ;;  %v11439_v23 = vld [vmem:[#allocation150_spill] sm:$0xff]  ;;  %v11440_v14 = vld [vmem:[#allocation91_spill] sm:$0xff] }
 0x257   : > { %6600 = vmatprep.mubr.f32.mxu0 %v11394_v53  ;;  %6696 = vmatprep.mubr.f32.mxu1 %v11395_v25  ;;  %v11441_v53 = vld [vmem:[#allocation151_spill] sm:$0xff]  ;;  %v11442_v25 = vld [vmem:[#allocation92_spill] sm:$0xff] }
 0x25a   : > { %6601 = vmatmul.mubr.f32.gmra.mrb[36].mxu0 %v11396_v24  ;;  %6697 = vmatmul.mubr.f32.gmra.mrb[36].mxu1 %v11397_v4  ;;  %v11443_v24 = vld [vmem:[#allocation152_spill] sm:$0xff]  ;;  %v11444_v4 = vld [vmem:[#allocation93_spill] sm:$0xff] }
 0x25b   : > { %6603 = vmatprep.mubr.f32.mxu0 %v11398_v0  ;;  %6699 = vmatprep.mubr.f32.mxu1 %v11399_v37  ;;  %v11445_v0 = vld [vmem:[#allocation94_spill] sm:$0xff]  ;;  %v11446_v37 = vld [vmem:[#allocation95_spill] sm:$0xff] }
 0x25e   : > { %6604 = vmatmul.mubr.f32.gmra.mrb[38].mxu0 %v11400_v60  ;;  %6700 = vmatmul.mubr.f32.gmra.mrb[38].mxu1 %v11401_v17  ;;  %v11447_v60 = vld [vmem:[#allocation96_spill] sm:$0xff]  ;;  %v11448_v17 = vld [vmem:[#allocation97_spill] sm:$0xff] }
 0x25f   : > { %6606 = vmatprep.mubr.f32.mxu0 %v11402_v57  ;;  %6702 = vmatprep.mubr.f32.mxu1 %v11403_v29 }
 0x262   : > { %6607 = vmatmul.mubr.f32.gmra.mrb[40].mxu0 %v11404_v56  ;;  %6703 = vmatmul.mubr.f32.gmra.mrb[40].mxu1 %v11405_v52 }
 0x263   : > { %6609 = vmatprep.mubr.f32.mxu0 %v11406_v33  ;;  %6705 = vmatprep.mubr.f32.mxu1 %v11407_v18 }
 0x266   : > { %6610 = vmatmul.mubr.f32.gmra.mrb[42].mxu0 %v11408_v50  ;;  %6706 = vmatmul.mubr.f32.gmra.mrb[42].mxu1 %v11409_v5 }
 0x267   : > { %6612 = vmatprep.mubr.f32.mxu0 %v11410_v55  ;;  %6708 = vmatprep.mubr.f32.mxu1 %v11411_v28 }
 0x26a   : > { %6613 = vmatmul.mubr.f32.gmra.mrb[44].mxu0 %v11412_v11  ;;  %6709 = vmatmul.mubr.f32.gmra.mrb[44].mxu1 %v11413_v54 }
 0x26b   : > { %6615 = vmatprep.mubr.f32.mxu0 %v11414_v26  ;;  %6711 = vmatprep.mubr.f32.mxu1 %v11415_v35 }
 0x26e   : > { %6616 = vmatmul.mubr.f32.gmra.mrb[46].mxu0 %v11416_v45  ;;  %6712 = vmatmul.mubr.f32.gmra.mrb[46].mxu1 %v11417_v39 }
 0x26f   : > { %6618 = vmatprep.mubr.f32.mxu0 %v11418_v2  ;;  %6714 = vmatprep.mubr.f32.mxu1 %v11419_v49 }
 0x272   : > { %6619 = vmatmul.mubr.f32.gmra.mrb[48].mxu0 %v11420_v3  ;;  %6715 = vmatmul.mubr.f32.gmra.mrb[48].mxu1 %v11421_v38 }
 0x273   : > { %6621 = vmatprep.mubr.f32.mxu0 %v11422_v62  ;;  %6717 = vmatprep.mubr.f32.mxu1 %v11423_v15 }
 0x276   : > { %6622 = vmatmul.mubr.f32.gmra.mrb[50].mxu0 %v11424_v61  ;;  %6718 = vmatmul.mubr.f32.gmra.mrb[50].mxu1 %v11425_v51 }
 0x277   : > { %6624 = vmatprep.mubr.f32.mxu0 %v11426_v30  ;;  %6720 = vmatprep.mubr.f32.mxu1 %v11427_v1 }
 0x27a   : > { %6625 = vmatmul.mubr.f32.gmra.mrb[52].mxu0 %v11428_v6  ;;  %6721 = vmatmul.mubr.f32.gmra.mrb[52].mxu1 %v11429_v40 }
 0x27b   : > { %6627 = vmatprep.mubr.f32.mxu0 %v11430_v20  ;;  %6723 = vmatprep.mubr.f32.mxu1 %v11431_v36 }
 0x27e   : > { %6628 = vmatmul.mubr.f32.gmra.mrb[54].mxu0 %v11432_v46  ;;  %6724 = vmatmul.mubr.f32.gmra.mrb[54].mxu1 %v11433_v22 }
 0x27f   : > { %6630 = vmatprep.mubr.f32.mxu0 %v11434_v63  ;;  %6726 = vmatprep.mubr.f32.mxu1 %v11435_v41 }
 0x282   : > { %6631 = vmatmul.mubr.f32.gmra.mrb[56].mxu0 %v11436_v21  ;;  %6727 = vmatmul.mubr.f32.gmra.mrb[56].mxu1 %v11437_v27 }
 0x283   : > { %6633 = vmatprep.mubr.f32.mxu0 %v11438_v43  ;;  %6729 = vmatprep.mubr.f32.mxu1 %v11439_v23 }
 0x286   : > { %6634 = vmatmul.mubr.f32.gmra.mrb[58].mxu0 %v11440_v14  ;;  %6730 = vmatmul.mubr.f32.gmra.mrb[58].mxu1 %v11441_v53 }
 0x287   : > { %6636 = vmatprep.mubr.f32.mxu0 %v11442_v25  ;;  %6732 = vmatprep.mubr.f32.mxu1 %v11443_v24 }
 0x28a   : > { %6637 = vmatmul.mubr.f32.gmra.mrb[60].mxu0 %v11444_v4  ;;  %6733 = vmatmul.mubr.f32.gmra.mrb[60].mxu1 %v11352_v12  ;;  %v6064_v12 = vld [vmem:[%s11449_s0] ss:$0 sm:$0xff] }
 0x28b   : > { %6639 = vmatprep.mubr.f32.mxu0 %v11445_v0  ;;  %6735 = vmatprep.mubr.f32.mxu1 %v11353_v19  ;;  %v6065_v19 = vld [vmem:[%s11450_s1] ss:$0 sm:$0xff] }
 0x28e   : > { %6640 = vmatmul.mubr.f32.gmra.mrb[62].mxu0 %v11446_v37  ;;  %6736 = vmatmul.mubr.f32.gmra.mrb[62].mxu1 %v11354_v58 }
 0x28f   : > { %6642 = vmatprep.mubr.f32.mxu0 %v11447_v60  ;;  %6738 = vmatprep.mubr.f32.mxu1 %v11355_v34  ;;  %v9540_v34 = vld [vmem:[%s11451_s11] ss:$0 sm:$0xff] }
 0x292   : > { %6643 = vmatmul.mubr.f32.gmra.mrb[64].mxu0 %v11448_v17  ;;  %6739 = vmatmul.mubr.f32.gmra.mrb[64].mxu1 %v11356_v42 }
 0x2c9   : > { %v1350_v57 = vpop.f32.mrb[0].mxu0  ;;  %v1444_v29 = vpop.f32.mrb[0].mxu1 }
 0x2ca   : > { %v1351_v56 = vadd.f32 %v6064_v12, %v1350_v57  ;;  %v1445_v58 = vadd.f32 %v6065_v19, %v1444_v29  ;;  %v6481_v52 = vpop.f32.mrb[1].mxu0  ;;  %v6516_v33 = vpop.f32.mrb[1].mxu1 }
 0x2cc   : > { %1354 = vst [vmem:[#allocation2] sm:$0xff] %v1351_v56  ;;  %1448 = vst [vmem:[#allocation3] sm:$0xff] %v1445_v58 }
 0x2e9   : > { %v6551_v42 = vpop.f32.mrb[2].mxu0  ;;  %v6647_v18 = vpop.f32.mrb[2].mxu1 }
 0x2ea   : > { %v1544_v50 = vadd.f32 %v6551_v42, %v9540_v34  ;;  %v1864_v5 = vadd.f32 %v6647_v18, %v9540_v34  ;;  %v1538_v55 = vpop.f32.mrb[3].mxu0  ;;  %v1858_v28 = vpop.f32.mrb[3].mxu1 }
 0x2eb   : > { %v1539_v11 = vadd.f32 %v9540_v34, %v1538_v55  ;;  %v1859_v54 = vadd.f32 %v9540_v34, %v1858_v28 }
 0x2ec   : > { %2178 = vst [vmem:[#allocation4 + $0x8] sm:$0xff] %v1544_v50  ;;  %2242 = vst [vmem:[#allocation4 + $0x208] sm:$0xff] %v1864_v5 }
 0x2ed   : > { %2177 = vst [vmem:[#allocation4] sm:$0xff] %v1539_v11  ;;  %2241 = vst [vmem:[#allocation4 + $0x200] sm:$0xff] %v1859_v54  ;;  %v6554_v26 = vpop.f32.mrb[4].mxu0  ;;  %v6650_v35 = vpop.f32.mrb[4].mxu1 }
 0x2ee   : > { %v1554_v45 = vadd.f32 %v6554_v26, %v9540_v34  ;;  %v1874_v39 = vadd.f32 %v6650_v35, %v9540_v34  ;;  %v1548_v2 = vpop.f32.mrb[5].mxu0  ;;  %v1868_v49 = vpop.f32.mrb[5].mxu1 }
 0x2ef   : > { %v1549_v3 = vadd.f32 %v9540_v34, %v1548_v2  ;;  %v1869_v38 = vadd.f32 %v9540_v34, %v1868_v49 }
 0x2f0   : > { %2180 = vst [vmem:[#allocation4 + $0x18] sm:$0xff] %v1554_v45  ;;  %2244 = vst [vmem:[#allocation4 + $0x218] sm:$0xff] %v1874_v39 }
 0x2f1   : > { %2179 = vst [vmem:[#allocation4 + $0x10] sm:$0xff] %v1549_v3  ;;  %2243 = vst [vmem:[#allocation4 + $0x210] sm:$0xff] %v1869_v38  ;;  %v6557_v62 = vpop.f32.mrb[6].mxu0  ;;  %v6653_v15 = vpop.f32.mrb[6].mxu1 }
 0x2f2   : > { %v1564_v61 = vadd.f32 %v6557_v62, %v9540_v34  ;;  %v1884_v51 = vadd.f32 %v6653_v15, %v9540_v34  ;;  %v1558_v30 = vpop.f32.mrb[7].mxu0  ;;  %v1878_v1 = vpop.f32.mrb[7].mxu1 }
 0x2f3   : > { %v1559_v6 = vadd.f32 %v9540_v34, %v1558_v30  ;;  %v1879_v40 = vadd.f32 %v9540_v34, %v1878_v1 }
 0x2f4   : > { %2182 = vst [vmem:[#allocation4 + $0x28] sm:$0xff] %v1564_v61  ;;  %2246 = vst [vmem:[#allocation4 + $0x228] sm:$0xff] %v1884_v51 }
 0x2f5   : > { %2181 = vst [vmem:[#allocation4 + $0x20] sm:$0xff] %v1559_v6  ;;  %2245 = vst [vmem:[#allocation4 + $0x220] sm:$0xff] %v1879_v40  ;;  %v6560_v20 = vpop.f32.mrb[8].mxu0  ;;  %v6656_v36 = vpop.f32.mrb[8].mxu1 }
 0x2f6   : > { %v1574_v46 = vadd.f32 %v6560_v20, %v9540_v34  ;;  %v1894_v22 = vadd.f32 %v6656_v36, %v9540_v34  ;;  %v1568_v63 = vpop.f32.mrb[9].mxu0  ;;  %v1888_v41 = vpop.f32.mrb[9].mxu1 }
 0x2f7   : > { %v1569_v21 = vadd.f32 %v9540_v34, %v1568_v63  ;;  %v1889_v27 = vadd.f32 %v9540_v34, %v1888_v41 }
 0x2f8   : > { %2184 = vst [vmem:[#allocation4 + $0x38] sm:$0xff] %v1574_v46  ;;  %2248 = vst [vmem:[#allocation4 + $0x238] sm:$0xff] %v1894_v22 }
 0x2f9   : > { %2183 = vst [vmem:[#allocation4 + $0x30] sm:$0xff] %v1569_v21  ;;  %2247 = vst [vmem:[#allocation4 + $0x230] sm:$0xff] %v1889_v27  ;;  %v6563_v43 = vpop.f32.mrb[10].mxu0  ;;  %v6659_v23 = vpop.f32.mrb[10].mxu1 }
 0x2fa   : > { %v1584_v14 = vadd.f32 %v6563_v43, %v9540_v34  ;;  %v1904_v53 = vadd.f32 %v6659_v23, %v9540_v34  ;;  %v1578_v25 = vpop.f32.mrb[11].mxu0  ;;  %v1898_v24 = vpop.f32.mrb[11].mxu1 }
 0x2fb   : > { %v1579_v4 = vadd.f32 %v9540_v34, %v1578_v25  ;;  %v1899_v0 = vadd.f32 %v9540_v34, %v1898_v24 }
 0x2fc   : > { %2186 = vst [vmem:[#allocation4 + $0x48] sm:$0xff] %v1584_v14  ;;  %2250 = vst [vmem:[#allocation4 + $0x248] sm:$0xff] %v1904_v53 }
 0x2fd   : > { %2185 = vst [vmem:[#allocation4 + $0x40] sm:$0xff] %v1579_v4  ;;  %2249 = vst [vmem:[#allocation4 + $0x240] sm:$0xff] %v1899_v0  ;;  %v6566_v37 = vpop.f32.mrb[12].mxu0  ;;  %v6662_v60 = vpop.f32.mrb[12].mxu1 }
 0x2fe   : > { %v1594_v17 = vadd.f32 %v6566_v37, %v9540_v34  ;;  %v1914_v12 = vadd.f32 %v6662_v60, %v9540_v34  ;;  %v1588_v19 = vpop.f32.mrb[13].mxu0  ;;  %v1908_v57 = vpop.f32.mrb[13].mxu1 }
 0x2ff   : > { %v1589_v29 = vadd.f32 %v9540_v34, %v1588_v19  ;;  %v1909_v56 = vadd.f32 %v9540_v34, %v1908_v57 }
 0x300   : > { %2188 = vst [vmem:[#allocation4 + $0x58] sm:$0xff] %v1594_v17  ;;  %2252 = vst [vmem:[#allocation4 + $0x258] sm:$0xff] %v1914_v12 }
 0x301   : > { %2187 = vst [vmem:[#allocation4 + $0x50] sm:$0xff] %v1589_v29  ;;  %2251 = vst [vmem:[#allocation4 + $0x250] sm:$0xff] %v1909_v56  ;;  %v6569_v58 = vpop.f32.mrb[14].mxu0  ;;  %v6665_v52 = vpop.f32.mrb[14].mxu1 }
 0x302   : > { %v1604_v33 = vadd.f32 %v6569_v58, %v9540_v34  ;;  %v1924_v42 = vadd.f32 %v6665_v52, %v9540_v34  ;;  %v1598_v18 = vpop.f32.mrb[15].mxu0  ;;  %v1918_v50 = vpop.f32.mrb[15].mxu1 }
 0x303   : > { %v1599_v5 = vadd.f32 %v9540_v34, %v1598_v18  ;;  %v1919_v55 = vadd.f32 %v9540_v34, %v1918_v50 }
 0x304   : > { %2190 = vst [vmem:[#allocation4 + $0x68] sm:$0xff] %v1604_v33  ;;  %2254 = vst [vmem:[#allocation4 + $0x268] sm:$0xff] %v1924_v42 }
 0x305   : > { %2189 = vst [vmem:[#allocation4 + $0x60] sm:$0xff] %v1599_v5  ;;  %2253 = vst [vmem:[#allocation4 + $0x260] sm:$0xff] %v1919_v55  ;;  %v6572_v28 = vpop.f32.mrb[16].mxu0  ;;  %v6668_v11 = vpop.f32.mrb[16].mxu1 }
 0x306   : > { %v1614_v54 = vadd.f32 %v6572_v28, %v9540_v34  ;;  %v1934_v26 = vadd.f32 %v6668_v11, %v9540_v34  ;;  %v1608_v35 = vpop.f32.mrb[17].mxu0  ;;  %v1928_v45 = vpop.f32.mrb[17].mxu1 }
 0x307   : > { %v1609_v39 = vadd.f32 %v9540_v34, %v1608_v35  ;;  %v1929_v2 = vadd.f32 %v9540_v34, %v1928_v45 }
 0x308   : > { %2192 = vst [vmem:[#allocation4 + $0x78] sm:$0xff] %v1614_v54  ;;  %2256 = vst [vmem:[#allocation4 + $0x278] sm:$0xff] %v1934_v26 }
 0x309   : > { %2191 = vst [vmem:[#allocation4 + $0x70] sm:$0xff] %v1609_v39  ;;  %2255 = vst [vmem:[#allocation4 + $0x270] sm:$0xff] %v1929_v2  ;;  %v6575_v49 = vpop.f32.mrb[18].mxu0  ;;  %v6671_v3 = vpop.f32.mrb[18].mxu1 }
 0x30a   : > { %v1624_v38 = vadd.f32 %v6575_v49, %v9540_v34  ;;  %v1944_v62 = vadd.f32 %v6671_v3, %v9540_v34  ;;  %v1618_v15 = vpop.f32.mrb[19].mxu0  ;;  %v1938_v61 = vpop.f32.mrb[19].mxu1 }
 0x30b   : > { %v1619_v51 = vadd.f32 %v9540_v34, %v1618_v15  ;;  %v1939_v30 = vadd.f32 %v9540_v34, %v1938_v61 }
 0x30c   : > { %2194 = vst [vmem:[#allocation4 + $0x88] sm:$0xff] %v1624_v38  ;;  %2258 = vst [vmem:[#allocation4 + $0x288] sm:$0xff] %v1944_v62 }
 0x30d   : > { %2193 = vst [vmem:[#allocation4 + $0x80] sm:$0xff] %v1619_v51  ;;  %2257 = vst [vmem:[#allocation4 + $0x280] sm:$0xff] %v1939_v30  ;;  %v6578_v1 = vpop.f32.mrb[20].mxu0  ;;  %v6674_v6 = vpop.f32.mrb[20].mxu1 }
 0x30e   : > { %v1634_v40 = vadd.f32 %v6578_v1, %v9540_v34  ;;  %v1954_v20 = vadd.f32 %v6674_v6, %v9540_v34  ;;  %v1628_v36 = vpop.f32.mrb[21].mxu0  ;;  %v1948_v46 = vpop.f32.mrb[21].mxu1 }
 0x30f   : > { %v1629_v22 = vadd.f32 %v9540_v34, %v1628_v36  ;;  %v1949_v63 = vadd.f32 %v9540_v34, %v1948_v46 }
 0x310   : > { %2196 = vst [vmem:[#allocation4 + $0x98] sm:$0xff] %v1634_v40  ;;  %2260 = vst [vmem:[#allocation4 + $0x298] sm:$0xff] %v1954_v20 }
 0x311   : > { %2195 = vst [vmem:[#allocation4 + $0x90] sm:$0xff] %v1629_v22  ;;  %2259 = vst [vmem:[#allocation4 + $0x290] sm:$0xff] %v1949_v63  ;;  %v6581_v41 = vpop.f32.mrb[22].mxu0  ;;  %v6677_v21 = vpop.f32.mrb[22].mxu1 }
 0x312   : > { %v1644_v27 = vadd.f32 %v6581_v41, %v9540_v34  ;;  %v1964_v43 = vadd.f32 %v6677_v21, %v9540_v34  ;;  %v1638_v23 = vpop.f32.mrb[23].mxu0  ;;  %v1958_v14 = vpop.f32.mrb[23].mxu1 }
 0x313   : > { %v1639_v53 = vadd.f32 %v9540_v34, %v1638_v23  ;;  %v1959_v25 = vadd.f32 %v9540_v34, %v1958_v14 }
 0x314   : > { %2198 = vst [vmem:[#allocation4 + $0xa8] sm:$0xff] %v1644_v27  ;;  %2262 = vst [vmem:[#allocation4 + $0x2a8] sm:$0xff] %v1964_v43 }
 0x315   : > { %2197 = vst [vmem:[#allocation4 + $0xa0] sm:$0xff] %v1639_v53  ;;  %2261 = vst [vmem:[#allocation4 + $0x2a0] sm:$0xff] %v1959_v25  ;;  %v6584_v24 = vpop.f32.mrb[24].mxu0  ;;  %v6680_v4 = vpop.f32.mrb[24].mxu1 }
 0x316   : > { %v1654_v0 = vadd.f32 %v6584_v24, %v9540_v34  ;;  %v1974_v37 = vadd.f32 %v6680_v4, %v9540_v34  ;;  %v1648_v60 = vpop.f32.mrb[25].mxu0  ;;  %v1968_v17 = vpop.f32.mrb[25].mxu1 }
 0x317   : > { %v1649_v12 = vadd.f32 %v9540_v34, %v1648_v60  ;;  %v1969_v19 = vadd.f32 %v9540_v34, %v1968_v17 }
 0x318   : > { %2200 = vst [vmem:[#allocation4 + $0xb8] sm:$0xff] %v1654_v0  ;;  %2264 = vst [vmem:[#allocation4 + $0x2b8] sm:$0xff] %v1974_v37 }
 0x319   : > { %2199 = vst [vmem:[#allocation4 + $0xb0] sm:$0xff] %v1649_v12  ;;  %2263 = vst [vmem:[#allocation4 + $0x2b0] sm:$0xff] %v1969_v19  ;;  %v6587_v57 = vpop.f32.mrb[26].mxu0  ;;  %v6683_v29 = vpop.f32.mrb[26].mxu1 }
 0x31a   : > { %v1664_v56 = vadd.f32 %v6587_v57, %v9540_v34  ;;  %v1984_v58 = vadd.f32 %v6683_v29, %v9540_v34  ;;  %v1658_v52 = vpop.f32.mrb[27].mxu0  ;;  %v1978_v33 = vpop.f32.mrb[27].mxu1 }
 0x31b   : > { %v1659_v42 = vadd.f32 %v9540_v34, %v1658_v52  ;;  %v1979_v18 = vadd.f32 %v9540_v34, %v1978_v33 }
 0x31c   : > { %2202 = vst [vmem:[#allocation4 + $0xc8] sm:$0xff] %v1664_v56  ;;  %2266 = vst [vmem:[#allocation4 + $0x2c8] sm:$0xff] %v1984_v58 }
 0x31d   : > { %2201 = vst [vmem:[#allocation4 + $0xc0] sm:$0xff] %v1659_v42  ;;  %2265 = vst [vmem:[#allocation4 + $0x2c0] sm:$0xff] %v1979_v18  ;;  %v6590_v50 = vpop.f32.mrb[28].mxu0  ;;  %v6686_v5 = vpop.f32.mrb[28].mxu1 }
 0x31e   : > { %v1674_v55 = vadd.f32 %v6590_v50, %v9540_v34  ;;  %v1994_v28 = vadd.f32 %v6686_v5, %v9540_v34  ;;  %v1668_v11 = vpop.f32.mrb[29].mxu0  ;;  %v1988_v54 = vpop.f32.mrb[29].mxu1 }
 0x31f   : > { %v1669_v26 = vadd.f32 %v9540_v34, %v1668_v11  ;;  %v1989_v35 = vadd.f32 %v9540_v34, %v1988_v54 }
 0x320   : > { %2204 = vst [vmem:[#allocation4 + $0xd8] sm:$0xff] %v1674_v55  ;;  %2268 = vst [vmem:[#allocation4 + $0x2d8] sm:$0xff] %v1994_v28 }
 0x321   : > { %2203 = vst [vmem:[#allocation4 + $0xd0] sm:$0xff] %v1669_v26  ;;  %2267 = vst [vmem:[#allocation4 + $0x2d0] sm:$0xff] %v1989_v35  ;;  %v6593_v45 = vpop.f32.mrb[30].mxu0  ;;  %v6689_v39 = vpop.f32.mrb[30].mxu1 }
 0x322   : > { %v1684_v2 = vadd.f32 %v6593_v45, %v9540_v34  ;;  %v2004_v49 = vadd.f32 %v6689_v39, %v9540_v34  ;;  %v1678_v3 = vpop.f32.mrb[31].mxu0  ;;  %v1998_v38 = vpop.f32.mrb[31].mxu1 }
 0x323   : > { %v1679_v62 = vadd.f32 %v9540_v34, %v1678_v3  ;;  %v1999_v15 = vadd.f32 %v9540_v34, %v1998_v38 }
 0x324   : > { %2206 = vst [vmem:[#allocation4 + $0xe8] sm:$0xff] %v1684_v2  ;;  %2270 = vst [vmem:[#allocation4 + $0x2e8] sm:$0xff] %v2004_v49 }
 0x325   : > { %2205 = vst [vmem:[#allocation4 + $0xe0] sm:$0xff] %v1679_v62  ;;  %2269 = vst [vmem:[#allocation4 + $0x2e0] sm:$0xff] %v1999_v15  ;;  %v6596_v61 = vpop.f32.mrb[32].mxu0  ;;  %v6692_v51 = vpop.f32.mrb[32].mxu1 }
 0x326   : > { %v1694_v30 = vadd.f32 %v6596_v61, %v9540_v34  ;;  %v2014_v1 = vadd.f32 %v6692_v51, %v9540_v34  ;;  %v1688_v6 = vpop.f32.mrb[33].mxu0  ;;  %v2008_v40 = vpop.f32.mrb[33].mxu1 }
 0x327   : > { %v1689_v20 = vadd.f32 %v9540_v34, %v1688_v6  ;;  %v2009_v36 = vadd.f32 %v9540_v34, %v2008_v40 }
 0x328   : > { %2208 = vst [vmem:[#allocation4 + $0xf8] sm:$0xff] %v1694_v30  ;;  %2272 = vst [vmem:[#allocation4 + $0x2f8] sm:$0xff] %v2014_v1 }
 0x329   : > { %2207 = vst [vmem:[#allocation4 + $0xf0] sm:$0xff] %v1689_v20  ;;  %2271 = vst [vmem:[#allocation4 + $0x2f0] sm:$0xff] %v2009_v36  ;;  %v6599_v46 = vpop.f32.mrb[34].mxu0  ;;  %v6695_v22 = vpop.f32.mrb[34].mxu1 }
 0x32a   : > { %v1704_v63 = vadd.f32 %v6599_v46, %v9540_v34  ;;  %v2024_v41 = vadd.f32 %v6695_v22, %v9540_v34  ;;  %v1698_v21 = vpop.f32.mrb[35].mxu0  ;;  %v2018_v27 = vpop.f32.mrb[35].mxu1 }
 0x32b   : > { %v1699_v43 = vadd.f32 %v9540_v34, %v1698_v21  ;;  %v2019_v23 = vadd.f32 %v9540_v34, %v2018_v27 }
 0x32c   : > { %2210 = vst [vmem:[#allocation4 + $0x108] sm:$0xff] %v1704_v63  ;;  %2274 = vst [vmem:[#allocation4 + $0x308] sm:$0xff] %v2024_v41 }
 0x32d   : > { %2209 = vst [vmem:[#allocation4 + $0x100] sm:$0xff] %v1699_v43  ;;  %2273 = vst [vmem:[#allocation4 + $0x300] sm:$0xff] %v2019_v23  ;;  %v6602_v14 = vpop.f32.mrb[36].mxu0  ;;  %v6698_v53 = vpop.f32.mrb[36].mxu1 }
 0x32e   : > { %v1714_v25 = vadd.f32 %v6602_v14, %v9540_v34  ;;  %v2034_v24 = vadd.f32 %v6698_v53, %v9540_v34  ;;  %v1708_v4 = vpop.f32.mrb[37].mxu0  ;;  %v2028_v0 = vpop.f32.mrb[37].mxu1 }
 0x32f   : > { %v1709_v37 = vadd.f32 %v9540_v34, %v1708_v4  ;;  %v2029_v60 = vadd.f32 %v9540_v34, %v2028_v0 }
 0x330   : > { %2212 = vst [vmem:[#allocation4 + $0x118] sm:$0xff] %v1714_v25  ;;  %2276 = vst [vmem:[#allocation4 + $0x318] sm:$0xff] %v2034_v24 }
 0x331   : > { %2211 = vst [vmem:[#allocation4 + $0x110] sm:$0xff] %v1709_v37  ;;  %2275 = vst [vmem:[#allocation4 + $0x310] sm:$0xff] %v2029_v60  ;;  %v6605_v17 = vpop.f32.mrb[38].mxu0  ;;  %v6701_v12 = vpop.f32.mrb[38].mxu1 }
 0x332   : > { %v1724_v19 = vadd.f32 %v6605_v17, %v9540_v34  ;;  %v2044_v57 = vadd.f32 %v6701_v12, %v9540_v34  ;;  %v1718_v29 = vpop.f32.mrb[39].mxu0  ;;  %v2038_v56 = vpop.f32.mrb[39].mxu1 }
 0x333   : > { %v1719_v58 = vadd.f32 %v9540_v34, %v1718_v29  ;;  %v2039_v52 = vadd.f32 %v9540_v34, %v2038_v56 }
 0x334   : > { %2214 = vst [vmem:[#allocation4 + $0x128] sm:$0xff] %v1724_v19  ;;  %2278 = vst [vmem:[#allocation4 + $0x328] sm:$0xff] %v2044_v57 }
 0x335   : > { %2213 = vst [vmem:[#allocation4 + $0x120] sm:$0xff] %v1719_v58  ;;  %2277 = vst [vmem:[#allocation4 + $0x320] sm:$0xff] %v2039_v52  ;;  %v6608_v33 = vpop.f32.mrb[40].mxu0  ;;  %v6704_v42 = vpop.f32.mrb[40].mxu1 }
 0x336   : > { %v1734_v18 = vadd.f32 %v6608_v33, %v9540_v34  ;;  %v2054_v50 = vadd.f32 %v6704_v42, %v9540_v34  ;;  %v1728_v5 = vpop.f32.mrb[41].mxu0  ;;  %v2048_v55 = vpop.f32.mrb[41].mxu1 }
 0x337   : > { %v1729_v28 = vadd.f32 %v9540_v34, %v1728_v5  ;;  %v2049_v11 = vadd.f32 %v9540_v34, %v2048_v55 }
 0x338   : > { %2216 = vst [vmem:[#allocation4 + $0x138] sm:$0xff] %v1734_v18  ;;  %2280 = vst [vmem:[#allocation4 + $0x338] sm:$0xff] %v2054_v50 }
 0x339   : > { %2215 = vst [vmem:[#allocation4 + $0x130] sm:$0xff] %v1729_v28  ;;  %2279 = vst [vmem:[#allocation4 + $0x330] sm:$0xff] %v2049_v11  ;;  %v6611_v54 = vpop.f32.mrb[42].mxu0  ;;  %v6707_v26 = vpop.f32.mrb[42].mxu1 }
 0x33a   : > { %v1744_v35 = vadd.f32 %v6611_v54, %v9540_v34  ;;  %v2064_v45 = vadd.f32 %v6707_v26, %v9540_v34  ;;  %v1738_v39 = vpop.f32.mrb[43].mxu0  ;;  %v2058_v2 = vpop.f32.mrb[43].mxu1 }
 0x33b   : > { %v1739_v49 = vadd.f32 %v9540_v34, %v1738_v39  ;;  %v2059_v3 = vadd.f32 %v9540_v34, %v2058_v2 }
 0x33c   : > { %2218 = vst [vmem:[#allocation4 + $0x148] sm:$0xff] %v1744_v35  ;;  %2282 = vst [vmem:[#allocation4 + $0x348] sm:$0xff] %v2064_v45 }
 0x33d   : > { %2217 = vst [vmem:[#allocation4 + $0x140] sm:$0xff] %v1739_v49  ;;  %2281 = vst [vmem:[#allocation4 + $0x340] sm:$0xff] %v2059_v3  ;;  %v6614_v38 = vpop.f32.mrb[44].mxu0  ;;  %v6710_v62 = vpop.f32.mrb[44].mxu1 }
 0x33e   : > { %v1754_v15 = vadd.f32 %v6614_v38, %v9540_v34  ;;  %v2074_v61 = vadd.f32 %v6710_v62, %v9540_v34  ;;  %v1748_v51 = vpop.f32.mrb[45].mxu0  ;;  %v2068_v30 = vpop.f32.mrb[45].mxu1 }
 0x33f   : > { %v1749_v1 = vadd.f32 %v9540_v34, %v1748_v51  ;;  %v2069_v6 = vadd.f32 %v9540_v34, %v2068_v30 }
 0x340   : > { %2220 = vst [vmem:[#allocation4 + $0x158] sm:$0xff] %v1754_v15  ;;  %2284 = vst [vmem:[#allocation4 + $0x358] sm:$0xff] %v2074_v61 }
 0x341   : > { %2219 = vst [vmem:[#allocation4 + $0x150] sm:$0xff] %v1749_v1  ;;  %2283 = vst [vmem:[#allocation4 + $0x350] sm:$0xff] %v2069_v6  ;;  %v6617_v40 = vpop.f32.mrb[46].mxu0  ;;  %v6713_v20 = vpop.f32.mrb[46].mxu1 }
 0x342   : > { %v1764_v36 = vadd.f32 %v6617_v40, %v9540_v34  ;;  %v2084_v46 = vadd.f32 %v6713_v20, %v9540_v34  ;;  %v1758_v22 = vpop.f32.mrb[47].mxu0  ;;  %v2078_v63 = vpop.f32.mrb[47].mxu1 }
 0x343   : > { %v1759_v41 = vadd.f32 %v9540_v34, %v1758_v22  ;;  %v2079_v21 = vadd.f32 %v9540_v34, %v2078_v63 }
 0x344   : > { %2222 = vst [vmem:[#allocation4 + $0x168] sm:$0xff] %v1764_v36  ;;  %2286 = vst [vmem:[#allocation4 + $0x368] sm:$0xff] %v2084_v46 }
 0x345   : > { %2221 = vst [vmem:[#allocation4 + $0x160] sm:$0xff] %v1759_v41  ;;  %2285 = vst [vmem:[#allocation4 + $0x360] sm:$0xff] %v2079_v21  ;;  %v6620_v27 = vpop.f32.mrb[48].mxu0  ;;  %v6716_v43 = vpop.f32.mrb[48].mxu1 }
 0x346   : > { %v1774_v23 = vadd.f32 %v6620_v27, %v9540_v34  ;;  %v2094_v14 = vadd.f32 %v6716_v43, %v9540_v34  ;;  %v1768_v53 = vpop.f32.mrb[49].mxu0  ;;  %v2088_v25 = vpop.f32.mrb[49].mxu1 }
 0x347   : > { %v1769_v24 = vadd.f32 %v9540_v34, %v1768_v53  ;;  %v2089_v4 = vadd.f32 %v9540_v34, %v2088_v25 }
 0x348   : > { %2224 = vst [vmem:[#allocation4 + $0x178] sm:$0xff] %v1774_v23  ;;  %2288 = vst [vmem:[#allocation4 + $0x378] sm:$0xff] %v2094_v14 }
 0x349   : > { %2223 = vst [vmem:[#allocation4 + $0x170] sm:$0xff] %v1769_v24  ;;  %2287 = vst [vmem:[#allocation4 + $0x370] sm:$0xff] %v2089_v4  ;;  %v6623_v0 = vpop.f32.mrb[50].mxu0  ;;  %v6719_v37 = vpop.f32.mrb[50].mxu1 }
 0x34a   : > { %v1784_v60 = vadd.f32 %v6623_v0, %v9540_v34  ;;  %v2104_v17 = vadd.f32 %v6719_v37, %v9540_v34  ;;  %v1778_v12 = vpop.f32.mrb[51].mxu0  ;;  %v2098_v19 = vpop.f32.mrb[51].mxu1 }
 0x34b   : > { %v1779_v57 = vadd.f32 %v9540_v34, %v1778_v12  ;;  %v2099_v29 = vadd.f32 %v9540_v34, %v2098_v19 }
 0x34c   : > { %2226 = vst [vmem:[#allocation4 + $0x188] sm:$0xff] %v1784_v60  ;;  %2290 = vst [vmem:[#allocation4 + $0x388] sm:$0xff] %v2104_v17 }
 0x34d   : > { %2225 = vst [vmem:[#allocation4 + $0x180] sm:$0xff] %v1779_v57  ;;  %2289 = vst [vmem:[#allocation4 + $0x380] sm:$0xff] %v2099_v29  ;;  %v6626_v56 = vpop.f32.mrb[52].mxu0  ;;  %v6722_v58 = vpop.f32.mrb[52].mxu1 }
 0x34e   : > { %v1794_v52 = vadd.f32 %v6626_v56, %v9540_v34  ;;  %v2114_v33 = vadd.f32 %v6722_v58, %v9540_v34  ;;  %v1788_v42 = vpop.f32.mrb[53].mxu0  ;;  %v2108_v18 = vpop.f32.mrb[53].mxu1 }
 0x34f   : > { %v1789_v50 = vadd.f32 %v9540_v34, %v1788_v42  ;;  %v2109_v5 = vadd.f32 %v9540_v34, %v2108_v18 }
 0x350   : > { %2228 = vst [vmem:[#allocation4 + $0x198] sm:$0xff] %v1794_v52  ;;  %2292 = vst [vmem:[#allocation4 + $0x398] sm:$0xff] %v2114_v33 }
 0x351   : > { %2227 = vst [vmem:[#allocation4 + $0x190] sm:$0xff] %v1789_v50  ;;  %2291 = vst [vmem:[#allocation4 + $0x390] sm:$0xff] %v2109_v5  ;;  %v6629_v55 = vpop.f32.mrb[54].mxu0  ;;  %v6725_v28 = vpop.f32.mrb[54].mxu1 }
 0x352   : > { %v1804_v11 = vadd.f32 %v6629_v55, %v9540_v34  ;;  %v2124_v54 = vadd.f32 %v6725_v28, %v9540_v34  ;;  %v1798_v26 = vpop.f32.mrb[55].mxu0  ;;  %v2118_v35 = vpop.f32.mrb[55].mxu1 }
 0x353   : > { %v1799_v45 = vadd.f32 %v9540_v34, %v1798_v26  ;;  %v2119_v39 = vadd.f32 %v9540_v34, %v2118_v35 }
 0x354   : > { %2230 = vst [vmem:[#allocation4 + $0x1a8] sm:$0xff] %v1804_v11  ;;  %2294 = vst [vmem:[#allocation4 + $0x3a8] sm:$0xff] %v2124_v54 }
 0x355   : > { %2229 = vst [vmem:[#allocation4 + $0x1a0] sm:$0xff] %v1799_v45  ;;  %2293 = vst [vmem:[#allocation4 + $0x3a0] sm:$0xff] %v2119_v39  ;;  %v6632_v2 = vpop.f32.mrb[56].mxu0  ;;  %v6728_v49 = vpop.f32.mrb[56].mxu1 }
 0x356   : > { %v1814_v3 = vadd.f32 %v6632_v2, %v9540_v34  ;;  %v2134_v38 = vadd.f32 %v6728_v49, %v9540_v34  ;;  %v1808_v62 = vpop.f32.mrb[57].mxu0  ;;  %v2128_v15 = vpop.f32.mrb[57].mxu1 }
 0x357   : > { %v1809_v61 = vadd.f32 %v9540_v34, %v1808_v62  ;;  %v2129_v51 = vadd.f32 %v9540_v34, %v2128_v15 }
 0x358   : > { %2232 = vst [vmem:[#allocation4 + $0x1b8] sm:$0xff] %v1814_v3  ;;  %2296 = vst [vmem:[#allocation4 + $0x3b8] sm:$0xff] %v2134_v38 }
 0x359   : > { %2231 = vst [vmem:[#allocation4 + $0x1b0] sm:$0xff] %v1809_v61  ;;  %2295 = vst [vmem:[#allocation4 + $0x3b0] sm:$0xff] %v2129_v51  ;;  %v6635_v30 = vpop.f32.mrb[58].mxu0  ;;  %v6731_v1 = vpop.f32.mrb[58].mxu1 }
 0x35a   : > { %v1824_v6 = vadd.f32 %v6635_v30, %v9540_v34  ;;  %v2144_v40 = vadd.f32 %v6731_v1, %v9540_v34  ;;  %v1818_v20 = vpop.f32.mrb[59].mxu0  ;;  %v2138_v36 = vpop.f32.mrb[59].mxu1 }
 0x35b   : > { %v1819_v46 = vadd.f32 %v9540_v34, %v1818_v20  ;;  %v2139_v22 = vadd.f32 %v9540_v34, %v2138_v36 }
 0x35c   : > { %2234 = vst [vmem:[#allocation4 + $0x1c8] sm:$0xff] %v1824_v6  ;;  %2298 = vst [vmem:[#allocation4 + $0x3c8] sm:$0xff] %v2144_v40 }
 0x35d   : > { %2233 = vst [vmem:[#allocation4 + $0x1c0] sm:$0xff] %v1819_v46  ;;  %2297 = vst [vmem:[#allocation4 + $0x3c0] sm:$0xff] %v2139_v22  ;;  %v6638_v63 = vpop.f32.mrb[60].mxu0  ;;  %v6734_v41 = vpop.f32.mrb[60].mxu1 }
 0x35e   : > { %v1834_v21 = vadd.f32 %v6638_v63, %v9540_v34  ;;  %v2154_v27 = vadd.f32 %v6734_v41, %v9540_v34  ;;  %v1828_v43 = vpop.f32.mrb[61].mxu0  ;;  %v2148_v23 = vpop.f32.mrb[61].mxu1 }
 0x35f   : > { %v1829_v14 = vadd.f32 %v9540_v34, %v1828_v43  ;;  %v2149_v53 = vadd.f32 %v9540_v34, %v2148_v23 }
 0x360   : > { %2236 = vst [vmem:[#allocation4 + $0x1d8] sm:$0xff] %v1834_v21  ;;  %2300 = vst [vmem:[#allocation4 + $0x3d8] sm:$0xff] %v2154_v27 }
 0x361   : > { %2235 = vst [vmem:[#allocation4 + $0x1d0] sm:$0xff] %v1829_v14  ;;  %2299 = vst [vmem:[#allocation4 + $0x3d0] sm:$0xff] %v2149_v53  ;;  %v6641_v25 = vpop.f32.mrb[62].mxu0  ;;  %v6737_v24 = vpop.f32.mrb[62].mxu1 }
 0x362   : > { %v1844_v4 = vadd.f32 %v6641_v25, %v9540_v34  ;;  %v2164_v0 = vadd.f32 %v6737_v24, %v9540_v34  ;;  %v1838_v37 = vpop.f32.mrb[63].mxu0  ;;  %v2158_v60 = vpop.f32.mrb[63].mxu1 }
 0x363   : > { %v1839_v17 = vadd.f32 %v9540_v34, %v1838_v37  ;;  %v2159_v12 = vadd.f32 %v9540_v34, %v2158_v60 }
 0x364   : > { %2238 = vst [vmem:[#allocation4 + $0x1e8] sm:$0xff] %v1844_v4  ;;  %2302 = vst [vmem:[#allocation4 + $0x3e8] sm:$0xff] %v2164_v0 }
 0x365   : > { %2237 = vst [vmem:[#allocation4 + $0x1e0] sm:$0xff] %v1839_v17  ;;  %2301 = vst [vmem:[#allocation4 + $0x3e0] sm:$0xff] %v2159_v12  ;;  %v6644_v19 = vpop.f32.mrb[64].mxu0  ;;  %v6740_v57 = vpop.f32.mrb[64].mxu1 }
 0x366   : > { %v1854_v29 = vadd.f32 %v6644_v19, %v9540_v34  ;;  %v2174_v56 = vadd.f32 %v6740_v57, %v9540_v34  ;;  %v1848_v58 = vpop.f32.mrb[65].mxu0  ;;  %v2168_v52 = vpop.f32.mrb[65].mxu1 }
 0x367   : > { %v1849_v33 = vadd.f32 %v9540_v34, %v1848_v58  ;;  %v2169_v42 = vadd.f32 %v9540_v34, %v2168_v52 }
 0x368   : > { %2240 = vst [vmem:[#allocation4 + $0x1f8] sm:$0xff] %v1854_v29  ;;  %2304 = vst [vmem:[#allocation4 + $0x3f8] sm:$0xff] %v2174_v56 }
 0x369   : > { %2239 = vst [vmem:[#allocation4 + $0x1f0] sm:$0xff] %v1849_v33  ;;  %2303 = vst [vmem:[#allocation4 + $0x3f0] sm:$0xff] %v2169_v42 }
 0x36a PF: > { %v2307_v18 = vld [vmem:[#allocation12] sm:$0xff]  ;;  %v2308_v50 = vld [vmem:[#allocation12 + $0x8] sm:$0xff]  ;;  %v2309_v5 = vld [vmem:[#allocation12 + $0x10] sm:$0xff]  ;;  %v11070_v55 = vmov 0.0|0.0   ;;  %vm11077_vm8 = vmmov 0   ;;  %v11068_v54 = vmov 0.0   ;;  %v2533_v27 = vlaneseq }
 0x36b   : > { %7206 = vmatprep.subr.bf16.mxu0 %v11070_v55  ;;  %v7207_v28 = vpack.c.bf16 %v2308_v50, %v2307_v18  ;;  %v2310_v11 = vld [vmem:[#allocation12 + $0x18] sm:$0xff]  ;;  %6773 = vmatprep.mubr.msk.f32.mxu0 %vm11077_vm8, %v11068_v54  ;;  %v11072_v26 = vmov 0   ;;  %v2311_v35 = vld [vmem:[#allocation12 + $0x20] sm:$0xff]  ;;  %v2312_v45 = vld [vmem:[#allocation12 + $0x28] sm:$0xff]  ;;  %v8370_v41 = vmov 1966171168  }
 0x36c   : > { %7870 = vset.pattern.permute.xlu1 %v11072_v26  ;;  %7871 = vset.pattern.permute.xlu0 %v11072_v26  ;;  %v7210_v34 = vpack.c.bf16 %v2310_v11, %v2309_v5  ;;  %v6069_v39 = vld [vmem:[#allocation5] ss:$0 sm:$0xff]  ;;  %v7213_v2 = vpack.c.bf16 %v2312_v45, %v2311_v35  ;;  %v2313_v49 = vld [vmem:[#allocation12 + $0x30] sm:$0xff]  ;;  %v2314_v3 = vld [vmem:[#allocation12 + $0x38] sm:$0xff]  ;;  %v2531_v21 = vunpack.c.l.s4 %v8370_v41  ;;  %v9689_v23 = vshrl.u32 %v2533_v27, 7  ;;  %s11453_s0 = sld [smem:[#allocation166_spill]] }
 0x36d   : > { %7208 = vmatpush3.bf16.msra.mxu0 %v7207_v28  ;;  %7230 = vmatprep.subr.bf16.mxu1 %v11070_v55  ;;  %v7216_v38 = vpack.c.bf16 %v2314_v3, %v2313_v49  ;;  %v2315_v62 = vld [vmem:[#allocation12 + $0x40] sm:$0xff]  ;;  %v2316_v15 = vld [vmem:[#allocation12 + $0x48] sm:$0xff]  ;;  %v2317_v51 = vld [vmem:[#allocation12 + $0x50] sm:$0xff]  ;;  %s11455_s1 = sld [smem:[#allocation167_spill]]  ;;  %vm3545_vm9 = vcmask 130112   ;;  %vm3552_vm10 = vcmask 195712  }
 0x36e   : > { %7209 = vmatprep.subr.bf16.mxu0 %v11070_v55  ;;  %6808 = vmatprep.mubr.msk.f32.mxu1 %vm11077_vm8, %v11068_v54  ;;  %v7219_v61 = vpack.c.bf16 %v2316_v15, %v2315_v62  ;;  %v2318_v30 = vld [vmem:[#allocation12 + $0x58] sm:$0xff]  ;;  %v2319_v6 = vld [vmem:[#allocation12 + $0x60] sm:$0xff]  ;;  %v2320_v40 = vld [vmem:[#allocation12 + $0x68] sm:$0xff]  ;;  %v2532_v43 = vunpack.c.0.s8 %v2531_v21  ;;  %11452 = vst [vmem:[#allocation158_spill] sm:$0xff] %v9689_v23  ;;  %v9702_v37 = vsub.s32 0, %v9689_v23  ;;  %vm3559_vm11 = vcmask 261312  }
 0x36f   : > { %3272 = vperm.xlu1 %7870, %v6069_v39   ;;  %v7222_v1 = vpack.c.bf16 %v2318_v30, %v2317_v51  ;;  %v7225_v20 = vpack.c.bf16 %v2320_v40, %v2319_v6  ;;  %v2321_v36 = vld [vmem:[#allocation12 + $0x70] sm:$0xff]  ;;  %v2322_v46 = vld [vmem:[#allocation12 + $0x78] sm:$0xff]  ;;  %v2411_v49 = vld [vmem:[#allocation4 + $0x58] sm:$0xff]  ;;  %vm11081_vm12 = vcmask 326912   ;;  %vm3573_vm13 = vcmask 392512   ;;  %s11458_s6 = sld [smem:[#allocation36_spill]] }
 0x370   : > { %v7228_v22 = vpack.c.bf16 %v2322_v46, %v2321_v36  ;;  %v2305_v63 = vld [vmem:[#allocation2] sm:$0xff]  ;;  %v9695_v53 = vsub.s32 %v2532_v43, %v9689_v23  ;;  %11454 = vst [vmem:[#allocation159_spill] sm:$0xff] %v9702_v37  ;;  %v2404_v17 = vld [vmem:[#allocation4 + $0x20] sm:$0xff]  ;;  %v2405_v57 = vld [vmem:[#allocation4 + $0x28] sm:$0xff]  ;;  %vm3580_vm14 = vcmask 458112   ;;  %vm3587_vm15 = vcmask 523712  }
 0x371   : > { %7211 = vmatpush3.bf16.msra.mxu0 %v7210_v34  ;;  %v2400_v12 = vld [vmem:[#allocation4] sm:$0xff]  ;;  %v2401_v29 = vld [vmem:[#allocation4 + $0x8] sm:$0xff]  ;;  %v2402_v33 = vld [vmem:[#allocation4 + $0x10] sm:$0xff]  ;;  %vm3594_vm0 = vcmask 589312   ;;  %vm3601_vm1 = vcmask 654912   ;;  %vm3608_vm2 = vcmask 720512  }
 0x372   : > { %7212 = vmatprep.subr.bf16.mxu0 %v11070_v55  ;;  %v6067_v14 = vld [vmem:[%s11453_s0] ss:$0 sm:$0xff]  ;;  %v2408_v52 = vld [vmem:[#allocation4 + $0x40] sm:$0xff]  ;;  %v2403_v3 = vld [vmem:[#allocation4 + $0x18] sm:$0xff]  ;;  %vm3615_vm3 = vcmask 786112   ;;  %vm3622_vm4 = vcmask 851712  }
 0x373   : > { %s11456_s14 = smov %s11455_s1  ;;  %v9716_v42 = vld [vmem:[%s11455_s1] ss:$0 sm:$0xff]  ;;  %v2413_v41 = vld [vmem:[#allocation4 + $0x68] sm:$0xff]  ;;  %v2407_v21 = vld [vmem:[#allocation4 + $0x38] sm:$0xff]  ;;  %vm3629_vm5 = vcmask 917312   ;;  %vm3636_vm6 = vcmask 982912  }
 0x374   : > { %v2406_v6 = vld [vmem:[#allocation4 + $0x30] sm:$0xff]  ;;  %vm3643_vm7 = vcmask 1048512   ;;  %s11459_s23 = sld [smem:[#allocation160_spill]]  ;;  %s11586_s9 = sld [smem:[#allocation173_spill]] }
 0x375   : > { %7214 = vmatpush3.bf16.msra.mxu0 %v7213_v2  ;;  %s11587_s19 = sld [smem:[#allocation174_spill]]  ;;  %s11589_s30 = sld [smem:[#allocation175_spill]] }
 0x376   : > { %7215 = vmatprep.subr.bf16.mxu0 %v11070_v55  ;;  %s11087_s1 = sshll.u32 %s11458_s6, 7  ;;  %s11591_s11 = sld [smem:[#allocation178_spill]] }
 0x377   : > { %s5805_s0 = sshll.u32 %s924_s17, 4  ;;  %p11592_p1 = scmp.ne.s32.totalorder %s11127_s10, 0  ;;  %s5806_s0 = int_to_ptr.vmem [resolvable:$true] %s5805_s0 }
 0x378   : > { %s8371_s2 = smov [#allocation25]  }
 0x379   : > { %7217 = vmatpush3.bf16.msra.mxu0 %v7216_v38  ;;  %s8212_s4 = sshll.u32 %s8371_s2, 4  ;;  %s8213_s4 = int_to_ptr.vmem [resolvable:$false] %s8212_s4 }
 0x37a   : > { %7218 = vmatprep.subr.bf16.mxu0 %v11070_v55  ;;  %s8214_s13 = scalar_lea.vmem %s8213_s4, 256  ;;  %p8215_p10 = scmp.lt.s32.totalorder %s5806_s0, %s8213_s4 }
 0x37d   : > { %7220 = vmatpush3.bf16.msra.mxu0 %v7219_v61 }
 0x37e   : > { %7221 = vmatprep.subr.bf16.mxu0 %v11070_v55 }
 0x381   : > { %7223 = vmatpush3.bf16.msra.mxu0 %v7222_v1  ;;  %v2412_v1 = vld [vmem:[#allocation4 + $0x60] sm:$0xff] }
 0x382   : > { %7224 = vmatprep.subr.bf16.mxu0 %v11070_v55 }
 0x385   : > { %7226 = vmatpush3.bf16.msra.mxu0 %v7225_v20 }
 0x386   : > { %7227 = vmatprep.subr.bf16.mxu0 %v11070_v55 }
 0x389   : > { %7229 = vmatpush3.bf16.msra.mxu0 %v7228_v22 }
 0x38a   : > { %7254 = vmatprep.subr.bf16.mxu0 %v11070_v55 }
 0x38c   : > { %6774 = vmatmul.mubr.f32.vlgmr.msra.gmra.mrb[0].mxu0 %v2305_v63 }
 0x38d   : > { %6843 = vmatprep.mubr.msk.f32.mxu0 %vm11077_vm8, %v11068_v54  ;;  %vm11079_vm8 = vcmask 1041409  }
 0x45f   : > { %v2396_v25 = vpop.f32.mrb[0].mxu0 }
 0x460   : > { %v9697_v24 = vadd.f32 %v6067_v14, %v2396_v25  ;;  %v6775_v4 = vpop.f32.mrb[1].mxu0 }
 0x462   : > { %v2536_v0 = vrot.slane %v9697_v24, %v9695_v53 }
 0x464   : > { %v9705_v60 = vrot.slane %v2536_v0, %v9695_v53  ;;  %v2544_v43 = vcombine.high %v2536_v0, %v2536_v0 }
 0x466   : > { %v9709_v19 = vrot.slane %v9705_v60, %v9702_v37  ;;  %v2574_v0 = vcombine.high %v9705_v60, %v9705_v60 }
 0x468   : > { %v2622_v56 = vadd.f32 %v9709_v19, %v2404_v17  ;;  %v2618_v58 = vadd.f32 %v9709_v19, %v2400_v12  ;;  %v2623_v5 = vadd.f32 %v9709_v19, %v2405_v57  ;;  %v2619_v28 = vadd.f32 %v9709_v19, %v2401_v29  ;;  %v2414_v29 = vld [vmem:[#allocation4 + $0x70] sm:$0xff] }
 0x469   : > { %v2626_v11 = vadd.f32 %v9709_v19, %v2408_v52  ;;  %v2620_v34 = vadd.f32 %v9709_v19, %v2402_v33  ;;  %v2629_v62 = vadd.f32 %v9709_v19, %v2411_v49  ;;  %v2621_v30 = vadd.f32 %v9709_v19, %v2403_v3 }
 0x46a   : > { %v2750_v18 = vmax.f32 %v2622_v56, 0.0  ;;  %v2746_v50 = vmax.f32 %v2618_v58, 0.0  ;;  %v2751_v39 = vmax.f32 %v2623_v5, 0.0  ;;  %v2747_v2 = vmax.f32 %v2619_v28, 0.0  ;;  %v2409_v56 = vld [vmem:[#allocation4 + $0x48] sm:$0xff] }
 0x46b   : > { %v2754_v38 = vmax.f32 %v2626_v11, 0.0  ;;  %v2748_v51 = vmax.f32 %v2620_v34, 0.0  ;;  %v2757_v40 = vmax.f32 %v2629_v62, 0.0  ;;  %v2630_v20 = vadd.f32 %v9709_v19, %v2412_v1  ;;  %v2415_v11 = vld [vmem:[#allocation4 + $0x78] sm:$0xff]  ;;  %v2410_v34 = vld [vmem:[#allocation4 + $0x50] sm:$0xff] }
 0x46c   : > { %v2885_v35 = vmul.f32 %v9716_v42, %v2750_v18  ;;  %v2881_v45 = vmul.f32 %v9716_v42, %v2746_v50  ;;  %v2886_v15 = vmul.f32 %v9716_v42, %v2751_v39  ;;  %v2882_v61 = vmul.f32 %v9716_v42, %v2747_v2 }
 0x46d   : > { %v2889_v36 = vmul.f32 %v9716_v42, %v2754_v38  ;;  %v2883_v46 = vmul.f32 %v9716_v42, %v2748_v51  ;;  %v2749_v22 = vmax.f32 %v2621_v30, 0.0  ;;  %v2624_v63 = vadd.f32 %v9709_v19, %v2406_v6 }
 0x46e   : > { %3017 = vadd.xlane.f32.xlu1 %v2885_v35  ;;  %3009 = vadd.xlane.f32.xlu0 %v2881_v45  ;;  %v2892_v14 = vmul.f32 %v9716_v42, %v2757_v40  ;;  %v2758_v25 = vmax.f32 %v2630_v20, 0.0  ;;  %v2631_v12 = vadd.f32 %v9709_v19, %v2413_v41  ;;  %v2625_v57 = vadd.f32 %v9709_v19, %v2407_v21 }
 0x46f   : > { %v2884_v4 = vmul.f32 %v9716_v42, %v2749_v22  ;;  %v2752_v17 = vmax.f32 %v2624_v63, 0.0  ;;  %v9737_v58 = vrot.slane %v2544_v43, %v9695_v53  ;;  %v2632_v52 = vadd.f32 %v9709_v19, %v2414_v29 }
 0x470   : > { %v2627_v33 = vadd.f32 %v9709_v19, %v2409_v56  ;;  %v2893_v18 = vmul.f32 %v9716_v42, %v2758_v25  ;;  %v2759_v5 = vmax.f32 %v2631_v12, 0.0  ;;  %v2753_v28 = vmax.f32 %v2625_v57, 0.0  ;;  %v2420_v25 = vld [vmem:[#allocation4 + $0xa0] sm:$0xff] }
 0x471   : > { %v2887_v50 = vmul.f32 %v9716_v42, %v2752_v17  ;;  %v2529_v35 = vcombine.high %v9697_v24, %v9697_v24  ;;  %v9749_v60 = vrot.slane %v9737_v58, %v9702_v37  ;;  %v9752_v45 = vrot.slane %v2574_v0, %v9702_v37  ;;  %v2432_v24 = vld [vmem:[#allocation4 + $0x100] sm:$0xff] }
 0x472   : > { %3019 = vadd.xlane.f32.xlu1 %v2886_v15  ;;  %3011 = vadd.xlane.f32.xlu0 %v2882_v61  ;;  %v2760_v39 = vmax.f32 %v2632_v52, 0.0  ;;  %v2633_v2 = vadd.f32 %v9709_v19, %v2415_v11  ;;  %v2894_v49 = vmul.f32 %v9716_v42, %v2759_v5  ;;  %v2888_v3 = vmul.f32 %v9716_v42, %v2753_v28  ;;  %v2416_v15 = vld [vmem:[#allocation4 + $0x80] sm:$0xff] }
 0x473   : > { %v2755_v38 = vmax.f32 %v2627_v33, 0.0  ;;  %v2628_v62 = vadd.f32 %v9709_v19, %v2410_v34  ;;  %v9759_v61 = vrot.slane %v2529_v35, %v9695_v53  ;;  %v2650_v30 = vadd.f32 %v9752_v45, %v2432_v24  ;;  %v2433_v33 = vld [vmem:[#allocation4 + $0x108] sm:$0xff] }
 0x474   : > { %v2761_v51 = vmax.f32 %v2633_v2, 0.0  ;;  %v2895_v1 = vmul.f32 %v9716_v42, %v2760_v39  ;;  %v2634_v20 = vadd.f32 %v9749_v60, %v2416_v15  ;;  %v2638_v12 = vadd.f32 %v9749_v60, %v2420_v25  ;;  %v2419_v39 = vld [vmem:[#allocation4 + $0x98] sm:$0xff]  ;;  %v2421_v2 = vld [vmem:[#allocation4 + $0xa8] sm:$0xff] }
 0x475   : > { %v2890_v6 = vmul.f32 %v9716_v42, %v2755_v38  ;;  %v2756_v40 = vmax.f32 %v2628_v62, 0.0  ;;  %v9767_v19 = vrot.slane %v9759_v61, %v9695_v53  ;;  %v2778_v63 = vmax.f32 %v2650_v30, 0.0  ;;  %v2437_v30 = vld [vmem:[#allocation4 + $0x128] sm:$0xff] }
 0x476   : > { %3025 = vadd.xlane.f32.xlu1 %v2889_v36  ;;  %3013 = vadd.xlane.f32.xlu0 %v2883_v46  ;;  %v2434_v36 = vld [vmem:[#allocation4 + $0x110] sm:$0xff]  ;;  %v2417_v46 = vld [vmem:[#allocation4 + $0x88] sm:$0xff]  ;;  %v2896_v22 = vmul.f32 %v9716_v42, %v2761_v51  ;;  %v2762_v21 = vmax.f32 %v2634_v20, 0.0  ;;  %v2651_v5 = vadd.f32 %v9752_v45, %v2433_v33  ;;  %v2637_v24 = vadd.f32 %v9749_v60, %v2419_v39  ;;  %v2435_v51 = vld [vmem:[#allocation4 + $0x118] sm:$0xff] }
 0x477   : > { %v2891_v41 = vmul.f32 %v9716_v42, %v2756_v40  ;;  %v2652_v43 = vadd.f32 %v9752_v45, %v2434_v36  ;;  %v9775_v17 = vrot.slane %v9767_v19, %v9702_v37  ;;  %v2913_v29 = vmul.f32 %v9716_v42, %v2778_v63  ;;  %v2464_v63 = vld [vmem:[#allocation4 + $0x200] sm:$0xff] }
 0x478   : > { %v2897_v56 = vmul.f32 %v9716_v42, %v2762_v21  ;;  %v2639_v15 = vadd.f32 %v9749_v60, %v2421_v2  ;;  %v2765_v20 = vmax.f32 %v2637_v24, 0.0 }
 0x479   : > { %v2780_v0 = vmax.f32 %v2652_v43, 0.0  ;;  %v2682_v21 = vadd.f32 %v9775_v17, %v2464_v63 }
 0x47a   : > { %3031 = vadd.xlane.f32.xlu1 %v2892_v14  ;;  %3015 = vadd.xlane.f32.xlu0 %v2884_v4  ;;  %v2635_v14 = vadd.f32 %v9749_v60, %v2417_v46  ;;  %v2418_v4 = vld [vmem:[#allocation4 + $0x90] sm:$0xff]  ;;  %v2767_v36 = vmax.f32 %v2639_v15, 0.0  ;;  %v2655_v46 = vadd.f32 %v9752_v45, %v2437_v30  ;;  %v2900_v43 = vmul.f32 %v9716_v42, %v2765_v20 }
 0x47b   : > { %v2636_v57 = vadd.f32 %v9749_v60, %v2418_v4  ;;  %v2915_v28 = vmul.f32 %v9716_v42, %v2780_v0  ;;  %v2810_v33 = vmax.f32 %v2682_v21, 0.0  ;;  %v2439_v21 = vld [vmem:[#allocation4 + $0x138] sm:$0xff] }
 0x47c   : > { %v2763_v52 = vmax.f32 %v2635_v14, 0.0  ;;  %v2902_v14 = vmul.f32 %v9716_v42, %v2767_v36  ;;  %v2783_v4 = vmax.f32 %v2655_v46, 0.0 }
 0x47d   : > { %v2764_v34 = vmax.f32 %v2636_v57, 0.0  ;;  %v2436_v57 = vld [vmem:[#allocation4 + $0x120] sm:$0xff] }
 0x47e   : > { %3033 = vadd.xlane.f32.xlu1 %v2893_v18  ;;  %3021 = vadd.xlane.f32.xlu0 %v2887_v50  ;;  %v2465_v18 = vld [vmem:[#allocation4 + $0x208] sm:$0xff]  ;;  %v2766_v50 = vmax.f32 %v2638_v12, 0.0  ;;  %v2898_v11 = vmul.f32 %v9716_v42, %v2763_v52  ;;  %v2438_v12 = vld [vmem:[#allocation4 + $0x130] sm:$0xff]  ;;  %v2918_v52 = vmul.f32 %v9716_v42, %v2783_v4 }
 0x47f   : > { %v2683_v35 = vadd.f32 %v9775_v17, %v2465_v18  ;;  %v2899_v38 = vmul.f32 %v9716_v42, %v2764_v34  ;;  %v2654_v18 = vadd.f32 %v9752_v45, %v2436_v57  ;;  %v2945_v34 = vmul.f32 %v9716_v42, %v2810_v33 }
 0x480   : > { %v2657_v57 = vadd.f32 %v9752_v45, %v2439_v21 }
 0x481   : > { %v2811_v62 = vmax.f32 %v2683_v35, 0.0  ;;  %v2782_v35 = vmax.f32 %v2654_v18, 0.0 }
 0x482   : > { %3035 = vadd.xlane.f32.xlu1 %v2894_v49  ;;  %3023 = vadd.xlane.f32.xlu0 %v2888_v3  ;;  %v2901_v49 = vmul.f32 %v9716_v42, %v2766_v50  ;;  %v2779_v3 = vmax.f32 %v2651_v5, 0.0  ;;  %v2468_v50 = vld [vmem:[#allocation4 + $0x220] sm:$0xff]  ;;  %v2466_v5 = vld [vmem:[#allocation4 + $0x210] sm:$0xff]  ;;  %v2785_v18 = vmax.f32 %v2657_v57, 0.0 }
 0x483   : > { %v2946_v40 = vmul.f32 %v9716_v42, %v2811_v62  ;;  %v2686_v39 = vadd.f32 %v9775_v17, %v2468_v50  ;;  %v2684_v2 = vadd.f32 %v9775_v17, %v2466_v5  ;;  %v2917_v24 = vmul.f32 %v9716_v42, %v2782_v35 }
 0x485   : > { %v2814_v15 = vmax.f32 %v2686_v39, 0.0  ;;  %v2920_v39 = vmul.f32 %v9716_v42, %v2785_v18 }
 0x486   : > { %3037 = vadd.xlane.f32.xlu1 %v2895_v1  ;;  %3027 = vadd.xlane.f32.xlu0 %v2890_v6  ;;  %v2914_v1 = vmul.f32 %v9716_v42, %v2779_v3  ;;  %v2653_v6 = vadd.f32 %v9752_v45, %v2435_v51  ;;  %v2422_v3 = vld [vmem:[#allocation4 + $0xb0] sm:$0xff]  ;;  %v2812_v51 = vmax.f32 %v2684_v2, 0.0 }
 0x487   : > { %v2640_v30 = vadd.f32 %v9749_v60, %v2422_v3  ;;  %v2949_v36 = vmul.f32 %v9716_v42, %v2814_v15 }
 0x488   : > { %v2781_v25 = vmax.f32 %v2653_v6, 0.0  ;;  %v2423_v6 = vld [vmem:[#allocation4 + $0xb8] sm:$0xff]  ;;  %v2947_v46 = vmul.f32 %v9716_v42, %v2812_v51 }
 0x489   : > { %v2641_v20 = vadd.f32 %v9749_v60, %v2423_v6  ;;  %v2768_v63 = vmax.f32 %v2640_v30, 0.0 }
 0x48a   : > { %3039 = vadd.xlane.f32.xlu1 %v2896_v22  ;;  %3029 = vadd.xlane.f32.xlu0 %v2891_v41  ;;  %v2467_v22 = vld [vmem:[#allocation4 + $0x218] sm:$0xff]  ;;  %v2916_v0 = vmul.f32 %v9716_v42, %v2781_v25 }
 0x48b   : > { %v2685_v41 = vadd.f32 %v9775_v17, %v2467_v22  ;;  %v2903_v4 = vmul.f32 %v9716_v42, %v2768_v63 }
 0x48e   : > { %3073 = vadd.xlane.f32.xlu0 %v2913_v29  ;;  %3041 = vadd.xlane.f32.xlu1 %v2897_v56  ;;  %v2813_v29 = vmax.f32 %v2685_v41, 0.0  ;;  %v2656_v56 = vadd.f32 %v9752_v45, %v2438_v12  ;;  %v2440_v41 = vld [vmem:[#allocation4 + $0x140] sm:$0xff]  ;;  %v2769_v12 = vmax.f32 %v2641_v20, 0.0 }
 0x48f   : > { %v2472_v20 = vld [vmem:[#allocation4 + $0x240] sm:$0xff] }
 0x490   : > { %v2904_v33 = vmul.f32 %v9716_v42, %v2769_v12 }
 0x492   : > { %3077 = vadd.xlane.f32.xlu0 %v2915_v28  ;;  %3043 = vadd.xlane.f32.xlu1 %v2898_v11  ;;  %v2948_v28 = vmul.f32 %v9716_v42, %v2813_v29  ;;  %v2784_v11 = vmax.f32 %v2656_v56, 0.0  ;;  %v2426_v29 = vld [vmem:[#allocation4 + $0xd0] sm:$0xff]  ;;  %v2469_v56 = vld [vmem:[#allocation4 + $0x228] sm:$0xff] }
 0x493   : > { %v2644_v50 = vadd.f32 %v9749_v60, %v2426_v29  ;;  %v2687_v5 = vadd.f32 %v9775_v17, %v2469_v56 }
 0x495   : > { %v2772_v2 = vmax.f32 %v2644_v50, 0.0 }
 0x496   : > { %3049 = vadd.xlane.f32.xlu0 %v2901_v49  ;;  %3045 = vadd.xlane.f32.xlu1 %v2899_v38  ;;  %v2424_v49 = vld [vmem:[#allocation4 + $0xc0] sm:$0xff]  ;;  %v2919_v38 = vmul.f32 %v9716_v42, %v2784_v11  ;;  %v2470_v11 = vld [vmem:[#allocation4 + $0x230] sm:$0xff] }
 0x497   : > { %v2642_v62 = vadd.f32 %v9749_v60, %v2424_v49  ;;  %v2815_v49 = vmax.f32 %v2687_v5, 0.0  ;;  %v2688_v3 = vadd.f32 %v9775_v17, %v2470_v11  ;;  %v2907_v51 = vmul.f32 %v9716_v42, %v2772_v2 }
 0x499   : > { %v2770_v22 = vmax.f32 %v2642_v62, 0.0  ;;  %v2442_v62 = vld [vmem:[#allocation4 + $0x150] sm:$0xff]  ;;  %v2950_v30 = vmul.f32 %v9716_v42, %v2815_v49  ;;  %v2816_v6 = vmax.f32 %v2688_v3, 0.0 }
 0x49a   : > { %3075 = vadd.xlane.f32.xlu1 %v2914_v1  ;;  %3139 = vadd.xlane.f32.xlu0 %v2946_v40  ;;  %v2425_v1 = vld [vmem:[#allocation4 + $0xc8] sm:$0xff]  ;;  %v2660_v15 = vadd.f32 %v9752_v45, %v2442_v62 }
 0x49b   : > { %v2643_v40 = vadd.f32 %v9749_v60, %v2425_v1  ;;  %v2905_v25 = vmul.f32 %v9716_v42, %v2770_v22  ;;  %v2951_v63 = vmul.f32 %v9716_v42, %v2816_v6 }
 0x49c   : > { %v2788_v21 = vmax.f32 %v2660_v15, 0.0  ;;  %v2474_v15 = vld [vmem:[#allocation4 + $0x250] sm:$0xff] }
 0x49e   : > { %3047 = vadd.xlane.f32.xlu1 %v2900_v43  ;;  %3051 = vadd.xlane.f32.xlu0 %v2902_v14  ;;  %v2771_v43 = vmax.f32 %v2643_v40, 0.0  ;;  %v2658_v14 = vadd.f32 %v9752_v45, %v2440_v41  ;;  %v2427_v40 = vld [vmem:[#allocation4 + $0xd8] sm:$0xff]  ;;  %v2923_v57 = vmul.f32 %v9716_v42, %v2788_v21 }
 0x4a2   : > { %3079 = vadd.xlane.f32.xlu1 %v2916_v0  ;;  %3083 = vadd.xlane.f32.xlu0 %v2918_v52  ;;  %v2906_v0 = vmul.f32 %v9716_v42, %v2771_v43  ;;  %v2786_v52 = vmax.f32 %v2658_v14, 0.0  ;;  %v2428_v43 = vld [vmem:[#allocation4 + $0xe0] sm:$0xff]  ;;  %v2443_v14 = vld [vmem:[#allocation4 + $0x158] sm:$0xff] }
 0x4a3   : > { %v2646_v29 = vadd.f32 %v9749_v60, %v2428_v43  ;;  %v2661_v56 = vadd.f32 %v9752_v45, %v2443_v14 }
 0x4a5   : > { %v2774_v50 = vmax.f32 %v2646_v29, 0.0  ;;  %v2789_v5 = vmax.f32 %v2661_v56, 0.0 }
 0x4a6   : > { %3143 = vadd.xlane.f32.xlu0 %v2948_v28  ;;  %3137 = vadd.xlane.f32.xlu1 %v2945_v34  ;;  %v2441_v28 = vld [vmem:[#allocation4 + $0x148] sm:$0xff]  ;;  %v2921_v34 = vmul.f32 %v9716_v42, %v2786_v52 }
 0x4a7   : > { %v2659_v35 = vadd.f32 %v9752_v45, %v2441_v28  ;;  %v2473_v52 = vld [vmem:[#allocation4 + $0x248] sm:$0xff]  ;;  %v2909_v49 = vmul.f32 %v9716_v42, %v2774_v50  ;;  %v2924_v3 = vmul.f32 %v9716_v42, %v2789_v5  ;;  %v2545_v50 = vcombine.high %v9759_v61, %v9759_v61 }
 0x4a8   : > { %v2691_v11 = vadd.f32 %v9775_v17, %v2473_v52 }
 0x4a9   : > { %v2787_v1 = vmax.f32 %v2659_v35, 0.0  ;;  %v2444_v35 = vld [vmem:[#allocation4 + $0x160] sm:$0xff] }
 0x4aa   : > { %3085 = vadd.xlane.f32.xlu0 %v2919_v38  ;;  %3081 = vadd.xlane.f32.xlu1 %v2917_v24  ;;  %v2471_v38 = vld [vmem:[#allocation4 + $0x238] sm:$0xff]  ;;  %v2662_v2 = vadd.f32 %v9752_v45, %v2444_v35  ;;  %v2819_v62 = vmax.f32 %v2691_v11, 0.0 }
 0x4ab   : > { %v2689_v24 = vadd.f32 %v9775_v17, %v2471_v38  ;;  %v2922_v22 = vmul.f32 %v9716_v42, %v2787_v1 }
 0x4ac   : > { %v2954_v6 = vmul.f32 %v9716_v42, %v2819_v62 }
 0x4ad   : > { %v2817_v41 = vmax.f32 %v2689_v24, 0.0  ;;  %v2431_v24 = vld [vmem:[#allocation4 + $0xf8] sm:$0xff] }
 0x4ae   : > { %3145 = vadd.xlane.f32.xlu0 %v2949_v36  ;;  %3141 = vadd.xlane.f32.xlu1 %v2947_v46  ;;  %v2645_v36 = vadd.f32 %v9749_v60, %v2427_v40  ;;  %v2690_v46 = vadd.f32 %v9775_v17, %v2472_v20  ;;  %v2790_v20 = vmax.f32 %v2662_v2, 0.0  ;;  %v2450_v2 = vld [vmem:[#allocation4 + $0x190] sm:$0xff] }
 0x4af   : > { %v2952_v12 = vmul.f32 %v9716_v42, %v2817_v41 }
 0x4b2   : > { %3057 = vadd.xlane.f32.xlu0 %v2905_v25  ;;  %3053 = vadd.xlane.f32.xlu1 %v2903_v4  ;;  %v2773_v25 = vmax.f32 %v2645_v36, 0.0  ;;  %v2818_v4 = vmax.f32 %v2690_v46, 0.0  ;;  %v2478_v36 = vld [vmem:[#allocation4 + $0x270] sm:$0xff]  ;;  %v2445_v46 = vld [vmem:[#allocation4 + $0x168] sm:$0xff] }
 0x4b3   : > { %v2696_v43 = vadd.f32 %v9775_v17, %v2478_v36  ;;  %v2663_v14 = vadd.f32 %v9752_v45, %v2445_v46 }
 0x4b4   : > { %v2953_v18 = vmul.f32 %v9716_v42, %v2818_v4  ;;  %v2475_v4 = vld [vmem:[#allocation4 + $0x258] sm:$0xff] }
 0x4b5   : > { %v2824_v29 = vmax.f32 %v2696_v43, 0.0  ;;  %v2791_v56 = vmax.f32 %v2663_v14, 0.0  ;;  %v2693_v52 = vadd.f32 %v9775_v17, %v2475_v4 }
 0x4b6   : > { %3059 = vadd.xlane.f32.xlu0 %v2906_v0  ;;  %3055 = vadd.xlane.f32.xlu1 %v2904_v33  ;;  %v2429_v0 = vld [vmem:[#allocation4 + $0xe8] sm:$0xff]  ;;  %v2908_v33 = vmul.f32 %v9716_v42, %v2773_v25  ;;  %v2479_v25 = vld [vmem:[#allocation4 + $0x278] sm:$0xff] }
 0x4b7   : > { %v2647_v28 = vadd.f32 %v9749_v60, %v2429_v0  ;;  %v2697_v0 = vadd.f32 %v9775_v17, %v2479_v25  ;;  %v2959_v11 = vmul.f32 %v9716_v42, %v2824_v29  ;;  %v2448_v29 = vld [vmem:[#allocation4 + $0x180] sm:$0xff] }
 0x4b9   : > { %v2775_v38 = vmax.f32 %v2647_v28, 0.0  ;;  %v2825_v35 = vmax.f32 %v2697_v0, 0.0 }
 0x4ba   : > { %3089 = vadd.xlane.f32.xlu0 %v2921_v34  ;;  %3087 = vadd.xlane.f32.xlu1 %v2920_v39  ;;  %v2430_v34 = vld [vmem:[#allocation4 + $0xf0] sm:$0xff] }
 0x4bb   : > { %v2648_v39 = vadd.f32 %v9749_v60, %v2430_v34  ;;  %v2910_v1 = vmul.f32 %v9716_v42, %v2775_v38  ;;  %v2926_v34 = vmul.f32 %v9716_v42, %v2791_v56  ;;  %v2960_v62 = vmul.f32 %v9716_v42, %v2825_v35  ;;  %v2496_v56 = vld [vmem:[#allocation4 + $0x300] sm:$0xff] }
 0x4bd   : > { %v2776_v40 = vmax.f32 %v2648_v39, 0.0  ;;  %v2821_v39 = vmax.f32 %v2693_v52, 0.0 }
 0x4be   : > { %3061 = vadd.xlane.f32.xlu0 %v2907_v51  ;;  %3147 = vadd.xlane.f32.xlu1 %v2950_v30  ;;  %v2649_v51 = vadd.f32 %v9749_v60, %v2431_v24  ;;  %v2692_v30 = vadd.f32 %v9775_v17, %v2474_v15  ;;  %v2925_v60 = vmul.f32 %v9716_v42, %v2790_v20 }
 0x4bf   : > { %v2911_v21 = vmul.f32 %v9716_v42, %v2776_v40  ;;  %v2956_v24 = vmul.f32 %v9716_v42, %v2821_v39 }
 0x4c0   : > { %v2820_v41 = vmax.f32 %v2692_v30, 0.0  ;;  %v2451_v30 = vld [vmem:[#allocation4 + $0x198] sm:$0xff] }
 0x4c2   : > { %3091 = vadd.xlane.f32.xlu0 %v2922_v22  ;;  %3149 = vadd.xlane.f32.xlu1 %v2951_v63  ;;  %v2576_v22 = vcombine.high %v9737_v58, %v9737_v58  ;;  %v2777_v63 = vmax.f32 %v2649_v51, 0.0  ;;  %v2955_v58 = vmul.f32 %v9716_v42, %v2820_v41 }
 0x4c6   : > { %3151 = vadd.xlane.f32.xlu0 %v2952_v12  ;;  %3093 = vadd.xlane.f32.xlu1 %v2923_v57  ;;  %v9856_v12 = vrot.slane %v2576_v22, %v9702_v37  ;;  %v2912_v57 = vmul.f32 %v9716_v42, %v2777_v63 }
 0x4c8   : > { %v2668_v38 = vadd.f32 %v9856_v12, %v2450_v2  ;;  %v2669_v63 = vadd.f32 %v9856_v12, %v2451_v30 }
 0x4ca   : > { %3063 = vadd.xlane.f32.xlu0 %v2908_v33  ;;  %3153 = vadd.xlane.f32.xlu1 %v2953_v18  ;;  %v2449_v33 = vld [vmem:[#allocation4 + $0x188] sm:$0xff]  ;;  %v2446_v18 = vld [vmem:[#allocation4 + $0x170] sm:$0xff]  ;;  %v2796_v20 = vmax.f32 %v2668_v38, 0.0  ;;  %v2797_v25 = vmax.f32 %v2669_v63, 0.0 }
 0x4cb   : > { %v2667_v5 = vadd.f32 %v9856_v12, %v2449_v33  ;;  %v2664_v28 = vadd.f32 %v9752_v45, %v2446_v18  ;;  %v2454_v38 = vld [vmem:[#allocation4 + $0x1b0] sm:$0xff] }
 0x4cc   : > { %v2931_v43 = vmul.f32 %v9716_v42, %v2796_v20  ;;  %v2932_v52 = vmul.f32 %v9716_v42, %v2797_v25  ;;  %v9907_v20 = vpop.permute.xlu1 %3272  ;;  %v2455_v25 = vld [vmem:[#allocation4 + $0x1b8] sm:$0xff] }
 0x4cd   : > { %v2795_v15 = vmax.f32 %v2667_v5, 0.0  ;;  %v2792_v51 = vmax.f32 %v2664_v28, 0.0  ;;  %v2481_v5 = vld [vmem:[#allocation4 + $0x288] sm:$0xff]  ;;  %v2498_v28 = vld [vmem:[#allocation4 + $0x310] sm:$0xff] }
 0x4ce   : > { %3065 = vadd.xlane.f32.xlu0 %v2909_v49  ;;  %3095 = vadd.xlane.f32.xlu1 %v2924_v3  ;;  %v2476_v49 = vld [vmem:[#allocation4 + $0x260] sm:$0xff]  ;;  %v9869_v3 = vrot.slane %v2545_v50, %v9695_v53 }
 0x4cf   : > { %v2694_v61 = vadd.f32 %v9775_v17, %v2476_v49  ;;  %v2930_v46 = vmul.f32 %v9716_v42, %v2795_v15  ;;  %v2927_v22 = vmul.f32 %v9716_v42, %v2792_v51  ;;  %v2452_v49 = vld [vmem:[#allocation4 + $0x1a0] sm:$0xff] }
 0x4d0   : > { %v9879_v40 = vrot.slane %v9869_v3, %v9702_v37  ;;  %v2670_v30 = vadd.f32 %v9856_v12, %v2452_v49 }
 0x4d1   : > { %v2822_v36 = vmax.f32 %v2694_v61, 0.0 }
 0x4d2   : > { %3067 = vadd.xlane.f32.xlu0 %v2910_v1  ;;  %3155 = vadd.xlane.f32.xlu1 %v2954_v6  ;;  %v2447_v1 = vld [vmem:[#allocation4 + $0x178] sm:$0xff]  ;;  %v2575_v6 = vcombine.high %v9767_v19, %v9767_v19 }
 0x4d3   : > { %v2665_v41 = vadd.f32 %v9752_v45, %v2447_v1  ;;  %v2957_v14 = vmul.f32 %v9716_v42, %v2822_v36  ;;  %v2666_v45 = vadd.f32 %v9856_v12, %v2448_v29  ;;  %v2672_v1 = vadd.f32 %v9856_v12, %v2454_v38  ;;  %v2484_v36 = vld [vmem:[#allocation4 + $0x2a0] sm:$0xff] }
 0x4d4   : > { %v9886_v19 = vrot.slane %v2575_v6, %v9702_v37  ;;  %v2482_v6 = vld [vmem:[#allocation4 + $0x290] sm:$0xff] }
 0x4d5   : > { %v2793_v4 = vmax.f32 %v2665_v41, 0.0  ;;  %v2794_v39 = vmax.f32 %v2666_v45, 0.0  ;;  %v2798_v41 = vmax.f32 %v2670_v30, 0.0 }
 0x4d6   : > { %3069 = vadd.xlane.f32.xlu0 %v2911_v21  ;;  %3097 = vadd.xlane.f32.xlu1 %v2925_v60  ;;  %v2477_v21 = vld [vmem:[#allocation4 + $0x268] sm:$0xff]  ;;  %v2480_v60 = vld [vmem:[#allocation4 + $0x280] sm:$0xff]  ;;  %v2714_v0 = vadd.f32 %v9886_v19, %v2496_v56 }
 0x4d7   : > { %v2928_v33 = vmul.f32 %v9716_v42, %v2793_v4  ;;  %v2929_v15 = vmul.f32 %v9716_v42, %v2794_v39 }
 0x4d8   : > { %v2842_v2 = vmax.f32 %v2714_v0, 0.0  ;;  %v2453_v0 = vld [vmem:[#allocation4 + $0x1a8] sm:$0xff] }
 0x4da   : > { %3071 = vadd.xlane.f32.xlu0 %v2912_v57  ;;  %3157 = vadd.xlane.f32.xlu1 %v2955_v58  ;;  %v2695_v57 = vadd.f32 %v9775_v17, %v2477_v21  ;;  %v2698_v58 = vadd.f32 %v9879_v40, %v2480_v60  ;;  %v2699_v17 = vadd.f32 %v9879_v40, %v2481_v5  ;;  %v2800_v21 = vmax.f32 %v2672_v1, 0.0 }
 0x4db   : > { %v2977_v51 = vmul.f32 %v9716_v42, %v2842_v2  ;;  %v2702_v60 = vadd.f32 %v9879_v40, %v2484_v36  ;;  %v2671_v2 = vadd.f32 %v9856_v12, %v2453_v0  ;;  %v2500_v36 = vld [vmem:[#allocation4 + $0x320] sm:$0xff] }
 0x4dc   : > { %v2823_v18 = vmax.f32 %v2695_v57, 0.0  ;;  %v2826_v50 = vmax.f32 %v2698_v58, 0.0  ;;  %v2827_v61 = vmax.f32 %v2699_v17, 0.0 }
 0x4de   : > { %3165 = vadd.xlane.f32.xlu0 %v2959_v11  ;;  %3099 = vadd.xlane.f32.xlu1 %v2926_v34  ;;  %v2716_v11 = vadd.f32 %v9886_v19, %v2498_v28  ;;  %v2958_v34 = vmul.f32 %v9716_v42, %v2823_v18  ;;  %v2961_v35 = vmul.f32 %v9716_v42, %v2826_v50  ;;  %v2830_v18 = vmax.f32 %v2702_v60, 0.0 }
 0x4df   : > { %v2673_v50 = vadd.f32 %v9856_v12, %v2455_v25  ;;  %v2799_v60 = vmax.f32 %v2671_v2, 0.0 }
 0x4e0   : > { %v2965_v30 = vmul.f32 %v9716_v42, %v2830_v18  ;;  %v2456_v18 = vld [vmem:[#allocation4 + $0x1c0] sm:$0xff] }
 0x4e1   : > { %v2801_v1 = vmax.f32 %v2673_v50, 0.0  ;;  %v2934_v2 = vmul.f32 %v9716_v42, %v2799_v60 }
 0x4e2   : > { %3167 = vadd.xlane.f32.xlu0 %v2960_v62  ;;  %3159 = vadd.xlane.f32.xlu1 %v2956_v24  ;;  %v2844_v62 = vmax.f32 %v2716_v11, 0.0  ;;  %v9901_v24 = vand.u32 127, %v2533_v27  ;;  %v2700_v27 = vadd.f32 %v9879_v40, %v2482_v6 }
 0x4e3   : > { %v2936_v0 = vmul.f32 %v9716_v42, %v2801_v1  ;;  %v2674_v1 = vadd.f32 %v9856_v12, %v2456_v18 }
 0x4e4   : > { %v2979_v63 = vmul.f32 %v9716_v42, %v2844_v62  ;;  %v3540_v4 = vadd.s32 4294967288, %v9901_v24  ;;  %v2828_v56 = vmax.f32 %v2700_v27, 0.0  ;;  %v9927_v5 = vsub.s32 %v9901_v24, %v9689_v23 }
 0x4e5   : > { %v3589_v17 = vadd.s32 4294967232, %v9901_v24  ;;  %v3547_v11 = vadd.s32 4294967280, %v9901_v24  ;;  %v3610_v27 = vadd.s32 4294967208, %v9901_v24  ;;  %v3582_v60 = vadd.s32 4294967240, %v9901_v24 }
 0x4e6   : > { %3107 = vadd.xlane.f32.xlu0 %v2930_v46  ;;  %3101 = vadd.xlane.f32.xlu1 %v2927_v22  ;;  %v2962_v46 = vmul.f32 %v9716_v42, %v2827_v61  ;;  %v3561_v22 = vadd.s32 4294967264, %v9901_v24  ;;  %v9936_v39 = vsub.s32 %v3540_v4, %v9689_v23  ;;  %v2963_v61 = vmul.f32 %v9716_v42, %v2828_v56 }
 0x4e7   : > { %v9962_v50 = vsub.s32 %v3610_v27, %v9689_v23  ;;  %v2802_v18 = vmax.f32 %v2674_v1, 0.0 }
 0x4e8   : > { %v9917_v57 = vsub.s32 %v3561_v22, %v9689_v23  ;;  %v9947_v22 = vsub.s32 %v3547_v11, %v9689_v23  ;;  %v3617_v11 = vadd.s32 4294967200, %v9901_v24 }
 0x4ea   : > { %3109 = vadd.xlane.f32.xlu0 %v2931_v43  ;;  %3161 = vadd.xlane.f32.xlu1 %v2957_v14  ;;  %v2497_v43 = vld [vmem:[#allocation4 + $0x308] sm:$0xff]  ;;  %v3568_v14 = vadd.s32 4294967256, %v9901_v24 }
 0x4eb   : > { %v2715_v45 = vadd.f32 %v9886_v19, %v2497_v43 }
 0x4ec   : > { %v9930_v28 = vsub.s32 %v3568_v14, %v9689_v23 }
 0x4ed   : > { %v2843_v62 = vmax.f32 %v2715_v45, 0.0 }
 0x4ee   : > { %3111 = vadd.xlane.f32.xlu0 %v2932_v52  ;;  %3103 = vadd.xlane.f32.xlu1 %v2928_v33  ;;  %v2933_v52 = vmul.f32 %v9716_v42, %v2798_v41  ;;  %v2935_v33 = vmul.f32 %v9716_v42, %v2800_v21 }
 0x4ef   : > { %v2978_v4 = vmul.f32 %v9716_v42, %v2843_v62 }
 0x4f2   : > { %3163 = vadd.xlane.f32.xlu1 %v2958_v34  ;;  %3169 = vadd.xlane.f32.xlu0 %v2961_v35  ;;  %v2485_v34 = vld [vmem:[#allocation4 + $0x2a8] sm:$0xff] }
 0x4f3   : > { %v2703_v6 = vadd.f32 %v9879_v40, %v2485_v34  ;;  %v3575_v34 = vadd.s32 4294967248, %v9901_v24 }
 0x4f6   : > { %3105 = vadd.xlane.f32.xlu1 %v2929_v15  ;;  %3201 = vadd.xlane.f32.xlu0 %v2977_v51  ;;  %v2483_v15 = vld [vmem:[#allocation4 + $0x298] sm:$0xff] }
 0x4f7   : > { %v2701_v43 = vadd.f32 %v9879_v40, %v2483_v15 }
 0x4fa   : > { %3171 = vadd.xlane.f32.xlu1 %v2962_v46  ;;  %3205 = vadd.xlane.f32.xlu0 %v2979_v63  ;;  %v9944_v46 = vsub.s32 %v3589_v17, %v9689_v23  ;;  %v3554_v63 = vadd.s32 4294967272, %v9901_v24 }
 0x4fb   : > { %v9919_v58 = vpop.xlane.xlu1 %3017  ;;  %v3010_v29 = vpop.xlane.xlu0 %3009 }
 0x4fc   : > { %v3275_v35 = vadd.f32 %v9907_v20, %v3010_v29  ;;  %v2718_v29 = vadd.f32 %v9886_v19, %v2500_v36  ;;  %v9965_v17 = vsub.s32 %v3554_v63, %v9689_v23 }
 0x4fe   : > { %3113 = vadd.xlane.f32.xlu1 %v2933_v52  ;;  %3117 = vadd.xlane.f32.xlu0 %v2935_v33  ;;  %v3539_v41 = vrot.slane %v3275_v35, %v9927_v5  ;;  %v2831_v52 = vmax.f32 %v2703_v6, 0.0  ;;  %v2499_v33 = vld [vmem:[#allocation4 + $0x318] sm:$0xff]  ;;  %v2501_v6 = vld [vmem:[#allocation4 + $0x328] sm:$0xff] }
 0x4ff   : > { %v3020_v49 = vpop.xlane.xlu1 %3019  ;;  %v3012_v38 = vpop.xlane.xlu0 %3011 }
 0x500   : > { %v3276_v51 = vadd.f32 %v9907_v20, %v3012_v38  ;;  %v2829_v38 = vmax.f32 %v2701_v43, 0.0  ;;  %v3280_v36 = vadd.f32 %v9907_v20, %v3020_v49  ;;  %v2486_v43 = vld [vmem:[#allocation4 + $0x2b0] sm:$0xff] }
 0x502   : > { %v3544_v21 = vrot.slane %v3276_v51, %v9936_v39  ;;  %3173 = vadd.xlane.f32.xlu1 %v2963_v61  ;;  %3177 = vadd.xlane.f32.xlu0 %v2965_v30  ;;  %v3279_v61 = vadd.f32 %v9907_v20, %v9919_v58  ;;  %v2846_v51 = vmax.f32 %v2718_v29, 0.0  ;;  %v2717_v30 = vadd.f32 %v9886_v19, %v2499_v33 }
 0x503   : > { %v9954_v14 = vpop.xlane.xlu1 %3025  ;;  %v3014_v25 = vpop.xlane.xlu0 %3013  ;;  %v9985_v58 = vsub.s32 %v3575_v34, %v9689_v23  ;;  %v2964_v49 = vmul.f32 %v9716_v42, %v2829_v38  ;;  %v2719_v29 = vadd.f32 %v9886_v19, %v2501_v6  ;;  %v2502_v38 = vld [vmem:[#allocation4 + $0x330] sm:$0xff]  ;;  %v3631_v6 = vadd.s32 4294967184, %v9901_v24 }
 0x504   : > { %v3546_v56 = vsel %vm3545_vm9, %v3544_v21, %v3539_v41  ;;  %v3277_v45 = vadd.f32 %v9907_v20, %v3014_v25  ;;  %v2966_v41 = vmul.f32 %v9716_v42, %v2831_v52  ;;  %v9982_v21 = vsub.s32 %v3617_v11, %v9689_v23 }
 0x505   : > { %v2981_v52 = vmul.f32 %v9716_v42, %v2846_v51  ;;  %v2845_v33 = vmax.f32 %v2717_v30, 0.0  ;;  %v3572_v11 = vrot.slane %v3280_v36, %v9930_v28  ;;  %v2457_v51 = vld [vmem:[#allocation4 + $0x1c8] sm:$0xff]  ;;  %v3596_v36 = vadd.s32 4294967224, %v9901_v24 }
 0x506   : > { %v3551_v35 = vrot.slane %v3277_v45, %v9947_v22  ;;  %3203 = vadd.xlane.f32.xlu1 %v2978_v4  ;;  %3119 = vadd.xlane.f32.xlu0 %v2936_v0  ;;  %v3624_v4 = vadd.s32 4294967192, %v9901_v24 }
 0x507   : > { %v9973_v62 = vpop.xlane.xlu1 %3031  ;;  %v3016_v15 = vpop.xlane.xlu0 %3015 }
 0x508   : > { %v3553_v27 = vsel %vm3552_vm10, %v3551_v35, %v3546_v56  ;;  %v3278_v63 = vadd.f32 %v9907_v20, %v3016_v15  ;;  %v3565_v56 = vrot.slane %v3279_v61, %v9917_v57  ;;  %v10002_v61 = vsub.s32 %v3582_v60, %v9689_v23 }
 0x509   : > { %v2980_v60 = vmul.f32 %v9716_v42, %v2845_v33  ;;  %v3638_v33 = vadd.s32 4294967176, %v9901_v24 }
 0x50a   : > { %v3558_v25 = vrot.slane %v3278_v63, %v9965_v17  ;;  %3115 = vadd.xlane.f32.xlu1 %v2934_v2  ;;  %3179 = vadd.xlane.f32.xlu0 %v2966_v41  ;;  %v2704_v2 = vadd.f32 %v9879_v40, %v2486_v43  ;;  %v3283_v63 = vadd.f32 %v9907_v20, %v9954_v14 }
 0x50b   : > { %v9993_v45 = vpop.xlane.xlu1 %3033  ;;  %v3022_v0 = vpop.xlane.xlu0 %3021  ;;  %v10020_v14 = vsub.s32 %v3631_v6, %v9689_v23 }
 0x50c   : > { %v3560_v34 = vsel %vm3559_vm11, %v3558_v25, %v3553_v27  ;;  %v3281_v35 = vadd.f32 %v9907_v20, %v3022_v0  ;;  %v2847_v27 = vmax.f32 %v2719_v29, 0.0  ;;  %v2937_v25 = vmul.f32 %v9716_v42, %v2802_v18  ;;  %v2487_v29 = vld [vmem:[#allocation4 + $0x2b8] sm:$0xff] }
 0x50d   : > { %v3567_v15 = vsel %vm11081_vm12, %v3565_v56, %v3560_v34  ;;  %v2720_v56 = vadd.f32 %v9886_v19, %v2502_v38  ;;  %v2503_v34 = vld [vmem:[#allocation4 + $0x338] sm:$0xff]  ;;  %v3603_v42 = vadd.s32 4294967216, %v9901_v24 }
 0x50e   : > { %v3574_v30 = vsel %vm3573_vm13, %v3572_v11, %v3567_v15  ;;  %v3579_v1 = vrot.slane %v3281_v35, %v9985_v58  ;;  %3175 = vadd.xlane.f32.xlu1 %v2964_v49  ;;  %3209 = vadd.xlane.f32.xlu0 %v2981_v52  ;;  %v2832_v49 = vmax.f32 %v2704_v2, 0.0  ;;  %v2675_v52 = vadd.f32 %v9856_v12, %v2457_v51 }
 0x50f   : > { %v3036_v41 = vpop.xlane.xlu1 %3035  ;;  %v3024_v43 = vpop.xlane.xlu0 %3023  ;;  %v10017_v35 = vsub.s32 %v3624_v4, %v9689_v23  ;;  %v10026_v2 = vsub.s32 %v3596_v36, %v9689_v23  ;;  %v10031_v4 = vld [vmem:[%s11456_s14] ss:$0 sm:$0xff]  ;;  %v3593_v15 = vrot.slane %v3283_v63, %v9944_v46  ;;  %v10042_v63 = vsub.s32 %v3638_v33, %v9689_v23 }
 0x510   : > { %v3581_v0 = vsel %vm3580_vm14, %v3579_v1, %v3574_v30  ;;  %v3282_v11 = vadd.f32 %v9907_v20, %v3024_v43  ;;  %v2982_v38 = vmul.f32 %v10031_v4, %v2847_v27  ;;  %v2848_v30 = vmax.f32 %v2720_v56, 0.0 }
 0x511   : > { %v2721_v1 = vadd.f32 %v9886_v19, %v2503_v34  ;;  %v2705_v43 = vadd.f32 %v9879_v40, %v2487_v29  ;;  %v2967_v54 = vmul.f32 %v10031_v4, %v2832_v49  ;;  %v2803_v55 = vmax.f32 %v2675_v52, 0.0  ;;  %v2505_v49 = vld [vmem:[#allocation4 + $0x348] sm:$0xff] }
 0x512   : > { %v3586_v18 = vrot.slane %v3282_v11, %v10002_v61  ;;  %3207 = vadd.xlane.f32.xlu1 %v2980_v60  ;;  %3121 = vadd.xlane.f32.xlu0 %v2937_v25  ;;  %v2504_v60 = vld [vmem:[#allocation4 + $0x340] sm:$0xff]  ;;  %v2458_v25 = vld [vmem:[#allocation4 + $0x1d0] sm:$0xff]  ;;  %v10045_v56 = vsub.s32 %v3603_v42, %v9689_v23  ;;  %v3286_v52 = vadd.f32 %v9907_v20, %v9973_v62  ;;  %v2459_v23 = vld [vmem:[#allocation4 + $0x1d8] sm:$0xff] }
 0x513   : > { %v3038_v6 = vpop.xlane.xlu1 %3037  ;;  %v3028_v51 = vpop.xlane.xlu0 %3027  ;;  %v2676_v29 = vadd.f32 %v9856_v12, %v2458_v25  ;;  %v2983_v33 = vmul.f32 %v10031_v4, %v2848_v30  ;;  %v2833_v42 = vmax.f32 %v2705_v43, 0.0  ;;  %v2938_v25 = vmul.f32 %v10031_v4, %v2803_v55 }
 0x514   : > { %v3588_v36 = vsel %vm3587_vm15, %v3586_v18, %v3581_v0  ;;  %v3284_v11 = vadd.f32 %v9907_v20, %v3028_v51  ;;  %v2722_v0 = vadd.f32 %v9886_v19, %v2504_v60  ;;  %v2849_v51 = vmax.f32 %v2721_v1, 0.0 }
 0x515   : > { %v3595_v27 = vsel %vm3594_vm0, %v3593_v15, %v3588_v36  ;;  %v2488_v36 = vld [vmem:[#allocation4 + $0x2c0] sm:$0xff]  ;;  %v2723_v62 = vadd.f32 %v9886_v19, %v2505_v49  ;;  %v3289_v30 = vadd.f32 %v9907_v20, %v3038_v6  ;;  %v3614_v43 = vrot.slane %v3286_v52, %v9962_v50  ;;  %v2506_v52 = vld [vmem:[#allocation4 + $0x350] sm:$0xff] }
 0x516   : > { %v3600_v34 = vrot.slane %v3284_v11, %v10026_v2  ;;  %3211 = vadd.xlane.f32.xlu1 %v2982_v38  ;;  %3181 = vadd.xlane.f32.xlu0 %v2967_v54  ;;  %v3287_v38 = vadd.f32 %v9907_v20, %v9993_v45  ;;  %v3288_v11 = vadd.f32 %v9907_v20, %v3036_v41  ;;  %v2850_v41 = vmax.f32 %v2722_v0, 0.0 }
 0x517   : > { %v3040_v18 = vpop.xlane.xlu1 %3039  ;;  %v3030_v15 = vpop.xlane.xlu0 %3029  ;;  %v2706_v45 = vadd.f32 %v9879_v40, %v2488_v36  ;;  %v2984_v6 = vmul.f32 %v10031_v4, %v2849_v51 }
 0x518   : > { %v3602_v54 = vsel %vm3601_vm1, %v3600_v34, %v3595_v27  ;;  %v3285_v60 = vadd.f32 %v9907_v20, %v3030_v15  ;;  %v3290_v27 = vadd.f32 %v9907_v20, %v3040_v18  ;;  %v2804_v15 = vmax.f32 %v2676_v29, 0.0 }
 0x519   : > { %v3621_v26 = vrot.slane %v3287_v38, %v9982_v21  ;;  %v3635_v18 = vrot.slane %v3289_v30, %v10020_v14  ;;  %v2834_v29 = vmax.f32 %v2706_v45, 0.0  ;;  %v2724_v30 = vadd.f32 %v9886_v19, %v2506_v52 }
 0x51a   : > { %v3607_v1 = vrot.slane %v3285_v60, %v10045_v56  ;;  %3213 = vadd.xlane.f32.xlu1 %v2983_v33  ;;  %3123 = vadd.xlane.f32.xlu0 %v2938_v25  ;;  %v2968_v60 = vmul.f32 %v10031_v4, %v2833_v42  ;;  %v3628_v33 = vrot.slane %v3288_v11, %v10017_v35  ;;  %v2851_v25 = vmax.f32 %v2723_v62, 0.0 }
 0x51b   : > { %v3074_v55 = vpop.xlane.xlu0 %3073  ;;  %v3042_v34 = vpop.xlane.xlu1 %3041  ;;  %v3642_v51 = vrot.slane %v3290_v27, %v10042_v63  ;;  %v2985_v11 = vmul.f32 %v10031_v4, %v2850_v41  ;;  %v2939_v62 = vmul.f32 %v10031_v4, %v2804_v15  ;;  %v2463_v41 = vld [vmem:[#allocation4 + $0x1f8] sm:$0xff] }
 0x51c   : > { %v3609_v49 = vsel %vm3608_vm2, %v3607_v1, %v3602_v54  ;;  %v3291_v27 = vadd.f32 %v9907_v20, %v3042_v34  ;;  %v2969_v34 = vmul.f32 %v10031_v4, %v2834_v29 }
 0x51d   : > { %v3616_v36 = vsel %vm3615_vm3, %v3614_v43, %v3609_v49  ;;  %v2507_v43 = vld [vmem:[#allocation4 + $0x358] sm:$0xff]  ;;  %v2489_v49 = vld [vmem:[#allocation4 + $0x2c8] sm:$0xff] }
 0x51e   : > { %v3623_v0 = vsel %vm3622_vm4, %v3621_v26, %v3616_v36  ;;  %3215 = vadd.xlane.f32.xlu1 %v2984_v6  ;;  %3183 = vadd.xlane.f32.xlu0 %v2968_v60  ;;  %v2677_v26 = vadd.f32 %v9856_v12, %v2459_v23  ;;  %v2986_v36 = vmul.f32 %v10031_v4, %v2851_v25 }
 0x51f   : > { %v3630_v42 = vsel %vm3629_vm5, %v3628_v33, %v3623_v0  ;;  %v3078_v38 = vpop.xlane.xlu0 %3077  ;;  %v3044_v54 = vpop.xlane.xlu1 %3043  ;;  %v2725_v23 = vadd.f32 %v9886_v19, %v2507_v43  ;;  %v2707_v52 = vadd.f32 %v9879_v40, %v2489_v49  ;;  %v2460_v0 = vld [vmem:[#allocation4 + $0x1e0] sm:$0xff]  ;;  %v2493_v43 = vld [vmem:[#allocation4 + $0x2e8] sm:$0xff] }
 0x520   : > { %v3292_v1 = vadd.f32 %v9907_v20, %v3044_v54  ;;  %v3637_v45 = vsel %vm3636_vm6, %v3635_v18, %v3630_v42  ;;  %v2805_v42 = vmax.f32 %v2677_v26, 0.0  ;;  %v3648_v54 = vrot.slane %v3291_v27, %v9927_v5  ;;  %v2490_v27 = vld [vmem:[#allocation4 + $0x2d0] sm:$0xff] }
 0x521   : > { %v10083_v6 = vsel %vm3643_vm7, %v3642_v51, %v3637_v45  ;;  %v2852_v51 = vmax.f32 %v2724_v30, 0.0  ;;  %v2678_v25 = vadd.f32 %v9856_v12, %v2460_v0  ;;  %v3309_v49 = vadd.f32 %v9907_v20, %v3078_v38 }
 0x522   : > { %3217 = vadd.xlane.f32.xlu1 %v2985_v11  ;;  %3125 = vadd.xlane.f32.xlu0 %v2939_v62  ;;  %v3652_v15 = vrot.slane %v3292_v1, %v9936_v39  ;;  %v2681_v11 = vadd.f32 %v9856_v12, %v2463_v41  ;;  %v3307_v62 = vadd.f32 %v9907_v20, %v3074_v55  ;;  %v2853_v26 = vmax.f32 %v2725_v23, 0.0 }
 0x523   : > { %v3050_v60 = vpop.xlane.xlu0 %3049  ;;  %v3046_v33 = vpop.xlane.xlu1 %3045  ;;  %v2577_v0 = vcombine.high %v9869_v3, %v9869_v3  ;;  %v2711_v38 = vadd.f32 %v9879_v40, %v2493_v43  ;;  %v2806_v3 = vmax.f32 %v2678_v25, 0.0 }
 0x524   : > { %v3293_v18 = vadd.f32 %v9907_v20, %v3046_v33  ;;  %v3653_v45 = vsel %vm3545_vm9, %v3652_v15, %v3648_v54  ;;  %v2835_v33 = vmax.f32 %v2707_v52, 0.0  ;;  %v3727_v15 = vrot.slane %v3307_v62, %v9927_v5 }
 0x525   : > { %v2809_v23 = vmax.f32 %v2681_v11, 0.0  ;;  %v2708_v52 = vadd.f32 %v9879_v40, %v2490_v27  ;;  %v3736_v54 = vrot.slane %v3309_v49, %v9947_v22  ;;  %v2494_v11 = vld [vmem:[#allocation4 + $0x2f0] sm:$0xff]  ;;  %v10117_v49 = vrot.slane %v2577_v0, %v9702_v37  ;;  %v2509_v37 = vld [vmem:[#allocation4 + $0x368] sm:$0xff] }
 0x526   : > { %v3657_v1 = vrot.slane %v3293_v18, %v9947_v22  ;;  %3219 = vadd.xlane.f32.xlu1 %v2986_v36  ;;  %3185 = vadd.xlane.f32.xlu0 %v2969_v34  ;;  %v2987_v18 = vmul.f32 %v10031_v4, %v2852_v51  ;;  %v2940_v36 = vmul.f32 %v10031_v4, %v2805_v42  ;;  %v2839_v25 = vmax.f32 %v2711_v38, 0.0  ;;  %v2491_v38 = vld [vmem:[#allocation4 + $0x2d8] sm:$0xff] }
 0x527   : > { %v3076_v29 = vpop.xlane.xlu1 %3075  ;;  %v3140_v30 = vpop.xlane.xlu0 %3139  ;;  %v3295_v51 = vadd.f32 %v9907_v20, %v3050_v60 }
 0x528   : > { %v3658_v41 = vsel %vm3552_vm10, %v3657_v1, %v3653_v45  ;;  %v3308_v55 = vadd.f32 %v9907_v20, %v3076_v29  ;;  %v2988_v45 = vmul.f32 %v10031_v4, %v2853_v26  ;;  %v2836_v26 = vmax.f32 %v2708_v52, 0.0  ;;  %v2512_v52 = vld [vmem:[#allocation4 + $0x380] sm:$0xff] }
 0x52a   : > { %v3731_v34 = vrot.slane %v3308_v55, %v9936_v39  ;;  %3221 = vadd.xlane.f32.xlu1 %v2987_v18  ;;  %3127 = vadd.xlane.f32.xlu0 %v2940_v36  ;;  %v2970_v55 = vmul.f32 %v10031_v4, %v2835_v33  ;;  %v2461_v18 = vld [vmem:[#allocation4 + $0x1e8] sm:$0xff]  ;;  %v3667_v36 = vrot.slane %v3295_v51, %v9917_v57 }
 0x52b   : > { %v3048_v1 = vpop.xlane.xlu1 %3047  ;;  %v3052_v42 = vpop.xlane.xlu0 %3051  ;;  %v2941_v33 = vmul.f32 %v10031_v4, %v2806_v3 }
 0x52c   : > { %v3732_v43 = vsel %vm3545_vm9, %v3731_v34, %v3727_v15  ;;  %v3294_v62 = vadd.f32 %v9907_v20, %v3048_v1  ;;  %v3296_v29 = vadd.f32 %v9907_v20, %v3052_v42  ;;  %v2944_v1 = vmul.f32 %v10031_v4, %v2809_v23 }
 0x52d   : > { %v3737_v27 = vsel %vm3552_vm10, %v3736_v54, %v3732_v43  ;;  %v2712_v54 = vadd.f32 %v9879_v40, %v2494_v11  ;;  %v2974_v11 = vmul.f32 %v10031_v4, %v2839_v25 }
 0x52e   : > { %v3662_v60 = vrot.slane %v3294_v62, %v9965_v17  ;;  %3223 = vadd.xlane.f32.xlu1 %v2988_v45  ;;  %3187 = vadd.xlane.f32.xlu0 %v2970_v55  ;;  %v3672_v0 = vrot.slane %v3296_v29, %v9930_v28  ;;  %v2679_v45 = vadd.f32 %v9856_v12, %v2461_v18 }
 0x52f   : > { %v3080_v15 = vpop.xlane.xlu1 %3079  ;;  %v3084_v34 = vpop.xlane.xlu0 %3083  ;;  %v3340_v62 = vadd.f32 %v9907_v20, %v3140_v30  ;;  %v2709_v18 = vadd.f32 %v9879_v40, %v2491_v38 }
 0x530   : > { %v3663_v42 = vsel %vm3559_vm11, %v3662_v60, %v3658_v41  ;;  %v3310_v43 = vadd.f32 %v9907_v20, %v3080_v15  ;;  %v2462_v41 = vld [vmem:[#allocation4 + $0x1f0] sm:$0xff]  ;;  %v2840_v60 = vmax.f32 %v2712_v54, 0.0  ;;  %v2730_v15 = vadd.f32 %v10117_v49, %v2512_v52  ;;  %v2492_v54 = vld [vmem:[#allocation4 + $0x2e0] sm:$0xff] }
 0x531   : > { %v3668_v51 = vsel %vm11081_vm12, %v3667_v36, %v3663_v42  ;;  %v2523_v36 = vld [vmem:[#allocation4 + $0x3d8] sm:$0xff]  ;;  %v3312_v38 = vadd.f32 %v9907_v20, %v3084_v34 }
 0x532   : > { %v10131_v23 = vsel %vm3573_vm13, %v3672_v0, %v3668_v51  ;;  %v3741_v3 = vrot.slane %v3310_v43, %v9965_v17  ;;  %3135 = vadd.xlane.f32.xlu1 %v2944_v1  ;;  %3129 = vadd.xlane.f32.xlu0 %v2941_v33  ;;  %v2971_v0 = vmul.f32 %v10031_v4, %v2836_v26  ;;  %v2807_v43 = vmax.f32 %v2679_v45, 0.0  ;;  %v2524_v45 = vld [vmem:[#allocation4 + $0x3e0] sm:$0xff] }
 0x533   : > { %v3144_v55 = vpop.xlane.xlu0 %3143  ;;  %v3138_v29 = vpop.xlane.xlu1 %3137  ;;  %v2680_v1 = vadd.f32 %v9856_v12, %v2462_v41  ;;  %v3889_v33 = vrot.slane %v3340_v62, %v9936_v39  ;;  %v2741_v25 = vadd.f32 %v10117_v49, %v2523_v36  ;;  %v2858_v26 = vmax.f32 %v2730_v15, 0.0 }
 0x534   : > { %v3742_v30 = vsel %vm3559_vm11, %v3741_v3, %v3737_v27  ;;  %v3339_v42 = vadd.f32 %v9907_v20, %v3138_v29  ;;  %v2975_v3 = vmul.f32 %v10031_v4, %v2840_v60  ;;  %v2837_v29 = vmax.f32 %v2709_v18, 0.0 }
 0x535   : > { %v2710_v36 = vadd.f32 %v9879_v40, %v2492_v54  ;;  %v2808_v34 = vmax.f32 %v2680_v1, 0.0  ;;  %v2742_v60 = vadd.f32 %v10117_v49, %v2524_v45  ;;  %v3751_v18 = vrot.slane %v3312_v38, %v9930_v28  ;;  %v2510_v45 = vld [vmem:[#allocation4 + $0x370] sm:$0xff] }
 0x536   : > { %v3885_v51 = vrot.slane %v3339_v42, %v9927_v5  ;;  %3195 = vadd.xlane.f32.xlu1 %v2974_v11  ;;  %3189 = vadd.xlane.f32.xlu0 %v2971_v0  ;;  %v2942_v11 = vmul.f32 %v10031_v4, %v2807_v43  ;;  %v2869_v0 = vmax.f32 %v2741_v25, 0.0  ;;  %v3342_v15 = vadd.f32 %v9907_v20, %v3144_v55  ;;  %v2508_v25 = vld [vmem:[#allocation4 + $0x360] sm:$0xff] }
 0x537   : > { %v3086_v52 = vpop.xlane.xlu0 %3085  ;;  %v3082_v27 = vpop.xlane.xlu1 %3081  ;;  %v2993_v43 = vmul.f32 %v10031_v4, %v2858_v26 }
 0x538   : > { %v3890_v12 = vsel %vm3545_vm9, %v3889_v33, %v3885_v51  ;;  %v3313_v62 = vadd.f32 %v9907_v20, %v3086_v52  ;;  %v3311_v41 = vadd.f32 %v9907_v20, %v3082_v27  ;;  %v2972_v52 = vmul.f32 %v10031_v4, %v2837_v29 }
 0x539   : > { %v2870_v29 = vmax.f32 %v2742_v60, 0.0  ;;  %v3004_v60 = vmul.f32 %v10031_v4, %v2869_v0 }
 0x53a   : > { %v3746_v42 = vrot.slane %v3311_v41, %v9917_v57  ;;  %3197 = vadd.xlane.f32.xlu1 %v2975_v3  ;;  %3131 = vadd.xlane.f32.xlu0 %v2942_v11  ;;  %v3756_v54 = vrot.slane %v3313_v62, %v9985_v58  ;;  %v2838_v41 = vmax.f32 %v2710_v36, 0.0  ;;  %v3899_v62 = vrot.slane %v3342_v15, %v9965_v17 }
 0x53b   : > { %v3146_v33 = vpop.xlane.xlu0 %3145  ;;  %v3142_v51 = vpop.xlane.xlu1 %3141 }
 0x53c   : > { %v3747_v27 = vsel %vm11081_vm12, %v3746_v42, %v3742_v30  ;;  %v3343_v3 = vadd.f32 %v9907_v20, %v3146_v33  ;;  %v3341_v1 = vadd.f32 %v9907_v20, %v3142_v51  ;;  %v2943_v42 = vmul.f32 %v10031_v4, %v2808_v34 }
 0x53d   : > { %v3752_v38 = vsel %vm3573_vm13, %v3751_v18, %v3747_v27  ;;  %v2726_v33 = vadd.f32 %v9886_v19, %v2508_v25  ;;  %v2728_v51 = vadd.f32 %v9886_v19, %v2510_v45 }
 0x53e   : > { %v3894_v55 = vrot.slane %v3341_v1, %v9947_v22  ;;  %3191 = vadd.xlane.f32.xlu0 %v2972_v52  ;;  %3233 = vadd.xlane.f32.xlu1 %v2993_v43  ;;  %v3757_v26 = vsel %vm3580_vm14, %v3756_v54, %v3752_v38  ;;  %v3904_v36 = vrot.slane %v3343_v3, %v9917_v57  ;;  %v2511_v43 = vld [vmem:[#allocation4 + $0x378] sm:$0xff] }
 0x53f   : > { %v3058_v11 = vpop.xlane.xlu0 %3057  ;;  %v3054_v30 = vpop.xlane.xlu1 %3053  ;;  %v2973_v54 = vmul.f32 %v10031_v4, %v2838_v41  ;;  %v2727_v1 = vadd.f32 %v9886_v19, %v2509_v37  ;;  %v2854_v45 = vmax.f32 %v2726_v33, 0.0  ;;  %v2856_v38 = vmax.f32 %v2728_v51, 0.0 }
 0x540   : > { %v3895_v18 = vsel %vm3552_vm10, %v3894_v55, %v3890_v12  ;;  %v3297_v52 = vadd.f32 %v9907_v20, %v3054_v30  ;;  %v3299_v3 = vadd.f32 %v9907_v20, %v3058_v11  ;;  %v2729_v0 = vadd.f32 %v9886_v19, %v2511_v43  ;;  %v2513_v55 = vld [vmem:[#allocation4 + $0x388] sm:$0xff] }
 0x541   : > { %v3900_v15 = vsel %vm3559_vm11, %v3899_v62, %v3895_v18  ;;  %v2527_v62 = vld [vmem:[#allocation4 + $0x3f8] sm:$0xff]  ;;  %v2855_v11 = vmax.f32 %v2727_v1, 0.0  ;;  %v2731_v33 = vadd.f32 %v10117_v49, %v2513_v55  ;;  %v2514_v1 = vld [vmem:[#allocation4 + $0x390] sm:$0xff] }
 0x542   : > { %v3677_v34 = vrot.slane %v3297_v52, %v9985_v58  ;;  %3133 = vadd.xlane.f32.xlu0 %v2943_v42  ;;  %3255 = vadd.xlane.f32.xlu1 %v3004_v60  ;;  %v3905_v27 = vsel %vm11081_vm12, %v3904_v36, %v3900_v15  ;;  %v3005_v36 = vmul.f32 %v10031_v4, %v2870_v29  ;;  %v2857_v43 = vmax.f32 %v2729_v0, 0.0 }
 0x543   : > { %v3060_v12 = vpop.xlane.xlu0 %3059  ;;  %v3056_v25 = vpop.xlane.xlu1 %3055  ;;  %v2745_v19 = vadd.f32 %v10117_v49, %v2527_v62  ;;  %v3687_v51 = vrot.slane %v3299_v3, %v9944_v46  ;;  %v2991_v60 = vmul.f32 %v10031_v4, %v2856_v38  ;;  %v2990_v55 = vmul.f32 %v10031_v4, %v2855_v11 }
 0x544   : > { %v3678_v41 = vsel %vm3580_vm14, %v3677_v34, %v10131_v23  ;;  %v3300_v30 = vadd.f32 %v9907_v20, %v3060_v12  ;;  %v3298_v42 = vadd.f32 %v9907_v20, %v3056_v25  ;;  %v2989_v23 = vmul.f32 %v10031_v4, %v2854_v45 }
 0x545   : > { %v2859_v62 = vmax.f32 %v2731_v33, 0.0 }
 0x546   : > { %v3682_v37 = vrot.slane %v3298_v42, %v10002_v61  ;;  %3193 = vadd.xlane.f32.xlu0 %v2973_v54  ;;  %3257 = vadd.xlane.f32.xlu1 %v3005_v36  ;;  %v3692_v29 = vrot.slane %v3300_v30, %v10026_v2  ;;  %v2732_v30 = vadd.f32 %v10117_v49, %v2514_v1 }
 0x547   : > { %v3090_v18 = vpop.xlane.xlu0 %3089  ;;  %v3088_v52 = vpop.xlane.xlu1 %3087 }
 0x548   : > { %v3683_v15 = vsel %vm3587_vm15, %v3682_v37, %v3678_v41  ;;  %v3315_v54 = vadd.f32 %v9907_v20, %v3090_v18  ;;  %v3314_v34 = vadd.f32 %v9907_v20, %v3088_v52  ;;  %v2873_v41 = vmax.f32 %v2745_v19, 0.0  ;;  %v2515_v18 = vld [vmem:[#allocation4 + $0x398] sm:$0xff] }
 0x549   : > { %v3688_v12 = vsel %vm3594_vm0, %v3687_v51, %v3683_v15  ;;  %v2992_v51 = vmul.f32 %v10031_v4, %v2857_v43  ;;  %v2994_v19 = vmul.f32 %v10031_v4, %v2859_v62  ;;  %v2733_v15 = vadd.f32 %v10117_v49, %v2515_v18 }
 0x54a   : > { %v3766_v3 = vrot.slane %v3315_v54, %v9944_v46  ;;  %v3761_v25 = vrot.slane %v3314_v34, %v10002_v61  ;;  %3225 = vadd.xlane.f32.xlu0 %v2989_v23  ;;  %3229 = vadd.xlane.f32.xlu1 %v2991_v60  ;;  %v3693_v45 = vsel %vm3601_vm1, %v3692_v29, %v3688_v12  ;;  %v2860_v29 = vmax.f32 %v2732_v30, 0.0  ;;  %v2516_v12 = vld [vmem:[#allocation4 + $0x3a0] sm:$0xff] }
 0x54b   : > { %v3062_v38 = vpop.xlane.xlu0 %3061  ;;  %v3148_v0 = vpop.xlane.xlu1 %3147  ;;  %v2734_v62 = vadd.f32 %v10117_v49, %v2516_v12 }
 0x54c   : > { %v3762_v42 = vsel %vm3587_vm15, %v3761_v25, %v3757_v26  ;;  %v3301_v36 = vadd.f32 %v9907_v20, %v3062_v38  ;;  %v3344_v37 = vadd.f32 %v9907_v20, %v3148_v0  ;;  %v3008_v26 = vmul.f32 %v10031_v4, %v2873_v41 }
 0x54d   : > { %v3767_v52 = vsel %vm3594_vm0, %v3766_v3, %v3762_v42  ;;  %v2995_v30 = vmul.f32 %v10031_v4, %v2860_v29  ;;  %v2517_v42 = vld [vmem:[#allocation4 + $0x3a8] sm:$0xff] }
 0x54e   : > { %v3697_v23 = vrot.slane %v3301_v36, %v10045_v56  ;;  %v3909_v60 = vrot.slane %v3344_v37, %v9930_v28  ;;  %3227 = vadd.xlane.f32.xlu0 %v2990_v55  ;;  %3231 = vadd.xlane.f32.xlu1 %v2992_v51  ;;  %v2861_v55 = vmax.f32 %v2733_v15, 0.0  ;;  %v2518_v15 = vld [vmem:[#allocation4 + $0x3b0] sm:$0xff] }
 0x54f   : > { %v3092_v11 = vpop.xlane.xlu0 %3091  ;;  %v3150_v33 = vpop.xlane.xlu1 %3149 }
 0x550   : > { %v3698_v43 = vsel %vm3608_vm2, %v3697_v23, %v3693_v45  ;;  %v3910_v54 = vsel %vm3573_vm13, %v3909_v60, %v3905_v27  ;;  %v3316_v34 = vadd.f32 %v9907_v20, %v3092_v11  ;;  %v3345_v1 = vadd.f32 %v9907_v20, %v3150_v33 }
 0x551   : > { %v2862_v60 = vmax.f32 %v2734_v62, 0.0  ;;  %v2735_v11 = vadd.f32 %v10117_v49, %v2517_v42  ;;  %v2996_v29 = vmul.f32 %v10031_v4, %v2861_v55 }
 0x552   : > { %v3914_v3 = vrot.slane %v3345_v1, %v9985_v58  ;;  %3235 = vadd.xlane.f32.xlu0 %v2994_v19  ;;  %3263 = vadd.xlane.f32.xlu1 %v3008_v26  ;;  %v3771_v25 = vrot.slane %v3316_v34, %v10026_v2 }
 0x553   : > { %v3152_v38 = vpop.xlane.xlu0 %3151  ;;  %v3094_v0 = vpop.xlane.xlu1 %3093 }
 0x554   : > { %v3915_v45 = vsel %vm3580_vm14, %v3914_v3, %v3910_v54  ;;  %v3346_v27 = vadd.f32 %v9907_v20, %v3152_v38  ;;  %v3317_v41 = vadd.f32 %v9907_v20, %v3094_v0  ;;  %v3772_v37 = vsel %vm3601_vm1, %v3771_v25, %v3767_v52 }
 0x555   : > { %v2997_v3 = vmul.f32 %v10031_v4, %v2862_v60  ;;  %v2863_v25 = vmax.f32 %v2735_v11, 0.0  ;;  %v2736_v38 = vadd.f32 %v10117_v49, %v2518_v15 }
 0x556   : > { %v3776_v36 = vrot.slane %v3317_v41, %v10045_v56  ;;  %3237 = vadd.xlane.f32.xlu0 %v2995_v30  ;;  %v3919_v51 = vrot.slane %v3346_v27, %v10002_v61  ;;  %v2519_v41 = vld [vmem:[#allocation4 + $0x3b8] sm:$0xff] }
 0x557   : > { %v3064_v18 = vpop.xlane.xlu0 %3063  ;;  %v3154_v23 = vpop.xlane.xlu1 %3153 }
 0x558   : > { %v3777_v33 = vsel %vm3608_vm2, %v3776_v36, %v3772_v37  ;;  %v3302_v19 = vadd.f32 %v9907_v20, %v3064_v18  ;;  %v3347_v26 = vadd.f32 %v9907_v20, %v3154_v23  ;;  %v3920_v34 = vsel %vm3587_vm15, %v3919_v51, %v3915_v45 }
 0x559   : > { %v2998_v37 = vmul.f32 %v10031_v4, %v2863_v25  ;;  %v2864_v51 = vmax.f32 %v2736_v38, 0.0  ;;  %v2737_v18 = vadd.f32 %v10117_v49, %v2519_v41  ;;  %v2521_v38 = vld [vmem:[#allocation4 + $0x3c8] sm:$0xff] }
 0x55a   : > { %v3702_v54 = vrot.slane %v3302_v19, %v9962_v50  ;;  %v3924_v52 = vrot.slane %v3347_v26, %v9944_v46  ;;  %3239 = vadd.xlane.f32.xlu0 %v2996_v29  ;;  %v2520_v19 = vld [vmem:[#allocation4 + $0x3c0] sm:$0xff] }
 0x55b   : > { %v3066_v1 = vpop.xlane.xlu0 %3065  ;;  %v3096_v12 = vpop.xlane.xlu1 %3095 }
 0x55c   : > { %v3703_v0 = vsel %vm3615_vm3, %v3702_v54, %v3698_v43  ;;  %v3925_v62 = vsel %vm3594_vm0, %v3924_v52, %v3920_v34  ;;  %v3303_v55 = vadd.f32 %v9907_v20, %v3066_v1  ;;  %v3318_v27 = vadd.f32 %v9907_v20, %v3096_v12 }
 0x55d   : > { %v2999_v52 = vmul.f32 %v10031_v4, %v2864_v51  ;;  %v2865_v34 = vmax.f32 %v2737_v18, 0.0  ;;  %v2738_v1 = vadd.f32 %v10117_v49, %v2520_v19  ;;  %v2522_v18 = vld [vmem:[#allocation4 + $0x3d0] sm:$0xff] }
 0x55e   : > { %v3707_v30 = vrot.slane %v3303_v55, %v9982_v21  ;;  %v3781_v45 = vrot.slane %v3318_v27, %v9962_v50  ;;  %3241 = vadd.xlane.f32.xlu0 %v2997_v3 }
 0x55f   : > { %v3068_v42 = vpop.xlane.xlu0 %3067  ;;  %v3156_v36 = vpop.xlane.xlu1 %3155 }
 0x560   : > { %v3708_v43 = vsel %vm3622_vm4, %v3707_v30, %v3703_v0  ;;  %v3782_v23 = vsel %vm3615_vm3, %v3781_v45, %v3777_v33  ;;  %v3304_v60 = vadd.f32 %v9907_v20, %v3068_v42  ;;  %v3348_v11 = vadd.f32 %v9907_v20, %v3156_v36 }
 0x561   : > { %v3000_v30 = vmul.f32 %v10031_v4, %v2865_v34  ;;  %v2866_v45 = vmax.f32 %v2738_v1, 0.0  ;;  %v2739_v42 = vadd.f32 %v10117_v49, %v2521_v38  ;;  %v2495_v34 = vld [vmem:[#allocation4 + $0x2f8] sm:$0xff] }
 0x562   : > { %v3712_v26 = vrot.slane %v3304_v60, %v10017_v35  ;;  %v3929_v29 = vrot.slane %v3348_v11, %v10026_v2  ;;  %3243 = vadd.xlane.f32.xlu0 %v2998_v37  ;;  %v2713_v38 = vadd.f32 %v9879_v40, %v2495_v34 }
 0x563   : > { %v3070_v15 = vpop.xlane.xlu0 %3069  ;;  %v3098_v54 = vpop.xlane.xlu1 %3097 }
 0x564   : > { %v3713_v12 = vsel %vm3629_vm5, %v3712_v26, %v3708_v43  ;;  %v3930_v33 = vsel %vm3601_vm1, %v3929_v29, %v3925_v62  ;;  %v3305_v3 = vadd.f32 %v9907_v20, %v3070_v15  ;;  %v3319_v25 = vadd.f32 %v9907_v20, %v3098_v54 }
 0x565   : > { %v2867_v26 = vmax.f32 %v2739_v42, 0.0  ;;  %v2740_v29 = vadd.f32 %v10117_v49, %v2522_v18  ;;  %v2841_v42 = vmax.f32 %v2713_v38, 0.0 }
 0x566   : > { %v3717_v0 = vrot.slane %v3305_v3, %v10020_v14  ;;  %v3786_v55 = vrot.slane %v3319_v25, %v9982_v21  ;;  %3245 = vadd.xlane.f32.xlu0 %v2999_v52  ;;  %v3001_v52 = vmul.f32 %v10031_v4, %v2866_v45 }
 0x567   : > { %v3072_v27 = vpop.xlane.xlu0 %3071  ;;  %v3158_v41 = vpop.xlane.xlu1 %3157 }
 0x568   : > { %v3718_v36 = vsel %vm3636_vm6, %v3717_v0, %v3713_v12  ;;  %v3787_v62 = vsel %vm3622_vm4, %v3786_v55, %v3782_v23  ;;  %v3306_v37 = vadd.f32 %v9907_v20, %v3072_v27  ;;  %v3349_v51 = vadd.f32 %v9907_v20, %v3158_v41  ;;  %v2525_v41 = vld [vmem:[#allocation4 + $0x3e8] sm:$0xff] }
 0x569   : > { %v2868_v27 = vmax.f32 %v2740_v29, 0.0 }
 0x56a   : > { %v3722_v43 = vrot.slane %v3306_v37, %v10042_v63  ;;  %v3934_v60 = vrot.slane %v3349_v51, %v10045_v56  ;;  %3247 = vadd.xlane.f32.xlu0 %v3000_v30  ;;  %v2526_v51 = vld [vmem:[#allocation4 + $0x3f0] sm:$0xff] }
 0x56b   : > { %v3166_v11 = vpop.xlane.xlu0 %3165  ;;  %v3100_v19 = vpop.xlane.xlu1 %3099  ;;  %v3003_v40 = vmul.f32 %v10031_v4, %v2868_v27 }
 0x56c   : > { %v3723_v15 = vsel %vm3643_vm7, %v3722_v43, %v3718_v36  ;;  %v3935_v23 = vsel %vm3608_vm2, %v3934_v60, %v3930_v33  ;;  %v3320_v54 = vadd.f32 %v9907_v20, %v3100_v19  ;;  %v3002_v33 = vmul.f32 %v10031_v4, %v2867_v26 }
 0x56d   : > { %v4199_v1 = vsel %vm11079_vm8, %v3723_v15, %v10083_v6  ;;  %v2976_v19 = vmul.f32 %v10031_v4, %v2841_v42  ;;  %vm11080_vm8 = vcmask 1042434  }
 0x56e   : > { %v3791_v12 = vrot.slane %v3320_v54, %v10017_v35  ;;  %3249 = vadd.xlane.f32.xlu0 %v3001_v52 }
 0x56f   : > { %v3168_v3 = vpop.xlane.xlu0 %3167  ;;  %v3160_v25 = vpop.xlane.xlu1 %3159 }
 0x570   : > { %v3792_v0 = vsel %vm3629_vm5, %v3791_v12, %v3787_v62  ;;  %v3350_v55 = vadd.f32 %v9907_v20, %v3160_v25  ;;  %v2743_v62 = vadd.f32 %v10117_v49, %v2525_v41  ;;  %v3354_v41 = vadd.f32 %v9907_v20, %v3168_v3 }
 0x572   : > { %v3939_v30 = vrot.slane %v3350_v55, %v9962_v50  ;;  %3251 = vadd.xlane.f32.xlu0 %v3002_v33  ;;  %v2871_v15 = vmax.f32 %v2743_v62, 0.0  ;;  %v3353_v33 = vadd.f32 %v9907_v20, %v3166_v11 }
 0x573   : > { %v3108_v45 = vpop.xlane.xlu0 %3107  ;;  %v3102_v6 = vpop.xlane.xlu1 %3101 }
 0x574   : > { %v3940_v36 = vsel %vm3615_vm3, %v3939_v30, %v3935_v23  ;;  %v3321_v37 = vadd.f32 %v9907_v20, %v3102_v6  ;;  %v2744_v23 = vadd.f32 %v10117_v49, %v2526_v51  ;;  %v3006_v38 = vmul.f32 %v10031_v4, %v2871_v15 }
 0x575   : > { %v3954_v11 = vrot.slane %v3353_v33, %v10020_v14 }
 0x576   : > { %v3796_v18 = vrot.slane %v3321_v37, %v10020_v14  ;;  %3253 = vadd.xlane.f32.xlu0 %v3003_v40  ;;  %v2872_v55 = vmax.f32 %v2744_v23, 0.0  ;;  %v3324_v37 = vadd.f32 %v9907_v20, %v3108_v45 }
 0x577   : > { %v3110_v43 = vpop.xlane.xlu0 %3109  ;;  %v3162_v60 = vpop.xlane.xlu1 %3161 }
 0x578   : > { %v3797_v26 = vsel %vm3636_vm6, %v3796_v18, %v3792_v0  ;;  %v3351_v29 = vadd.f32 %v9907_v20, %v3162_v60  ;;  %v3007_v42 = vmul.f32 %v10031_v4, %v2872_v55  ;;  %v3325_v62 = vadd.f32 %v9907_v20, %v3110_v43 }
 0x579   : > { %v3959_v18 = vrot.slane %v3354_v41, %v10042_v63  ;;  %v3810_v45 = vrot.slane %v3324_v37, %v9936_v39 }
 0x57a   : > { %v3944_v54 = vrot.slane %v3351_v29, %v9982_v21  ;;  %3199 = vadd.xlane.f32.xlu0 %v2976_v19  ;;  %v3815_v15 = vrot.slane %v3325_v62, %v9947_v22 }
 0x57b   : > { %v3112_v52 = vpop.xlane.xlu0 %3111  ;;  %v3104_v34 = vpop.xlane.xlu1 %3103 }
 0x57c   : > { %v3945_v12 = vsel %vm3622_vm4, %v3944_v54, %v3940_v36  ;;  %v3322_v25 = vadd.f32 %v9907_v20, %v3104_v34  ;;  %v3326_v60 = vadd.f32 %v9907_v20, %v3112_v52 }
 0x57e   : > { %v3801_v0 = vrot.slane %v3322_v25, %v10042_v63  ;;  %3259 = vadd.xlane.f32.xlu0 %v3006_v38  ;;  %v3820_v52 = vrot.slane %v3326_v60, %v9965_v17 }
 0x57f   : > { %v3164_v27 = vpop.xlane.xlu1 %3163  ;;  %v3170_v49 = vpop.xlane.xlu0 %3169 }
 0x580   : > { %v3802_v30 = vsel %vm3643_vm7, %v3801_v0, %v3797_v26  ;;  %v3352_v6 = vadd.f32 %v9907_v20, %v3164_v27  ;;  %v3355_v29 = vadd.f32 %v9907_v20, %v3170_v49 }
 0x581   : > { %v10297_v36 = vsel %vm11080_vm8, %v3802_v30, %v4199_v1  ;;  %vm4202_vm8 = vcmask 1043459  }
 0x582   : > { %v3949_v40 = vrot.slane %v3352_v6, %v10017_v35  ;;  %3261 = vadd.xlane.f32.xlu0 %v3007_v42  ;;  %v3964_v38 = vrot.slane %v3355_v29, %v9927_v5 }
 0x583   : > { %v3106_v51 = vpop.xlane.xlu1 %3105  ;;  %v3202_v3 = vpop.xlane.xlu0 %3201 }
 0x584   : > { %v3950_v4 = vsel %vm3629_vm5, %v3949_v40, %v3945_v12  ;;  %v3323_v1 = vadd.f32 %v9907_v20, %v3106_v51 }
 0x585   : > { %v3955_v19 = vsel %vm3636_vm6, %v3954_v11, %v3950_v4  ;;  %v3371_v11 = vadd.f32 %v9907_v20, %v3202_v3 }
 0x586   : > { %v10310_v26 = vsel %vm3643_vm7, %v3959_v18, %v3955_v19  ;;  %v3806_v43 = vrot.slane %v3323_v1, %v9927_v5 }
 0x587   : > { %v3172_v23 = vpop.xlane.xlu1 %3171  ;;  %v3206_v54 = vpop.xlane.xlu0 %3205  ;;  %v4043_v19 = vrot.slane %v3371_v11, %v9927_v5 }
 0x588   : > { %v3811_v34 = vsel %vm3545_vm9, %v3810_v45, %v3806_v43  ;;  %v3356_v12 = vadd.f32 %v9907_v20, %v3172_v23  ;;  %v3373_v51 = vadd.f32 %v9907_v20, %v3206_v54 }
 0x589   : > { %v3816_v25 = vsel %vm3552_vm10, %v3815_v15, %v3811_v34 }
 0x58a   : > { %v3968_v55 = vrot.slane %v3356_v12, %v9936_v39  ;;  %v3821_v0 = vsel %vm3559_vm11, %v3820_v52, %v3816_v25  ;;  %v4052_v29 = vrot.slane %v3373_v51, %v9947_v22 }
 0x58b   : > { %v3114_v33 = vpop.xlane.xlu1 %3113  ;;  %v3118_v27 = vpop.xlane.xlu0 %3117 }
 0x58c   : > { %v3969_v49 = vsel %vm3545_vm9, %v3968_v55, %v3964_v38  ;;  %v3327_v41 = vadd.f32 %v9907_v20, %v3114_v33  ;;  %v3329_v43 = vadd.f32 %v9907_v20, %v3118_v27 }
 0x58e   : > { %v3825_v30 = vrot.slane %v3327_v41, %v9917_v57  ;;  %v3835_v25 = vrot.slane %v3329_v43, %v9985_v58 }
 0x58f   : > { %v3174_v6 = vpop.xlane.xlu1 %3173  ;;  %v3178_v42 = vpop.xlane.xlu0 %3177 }
 0x590   : > { %v3826_v37 = vsel %vm11081_vm12, %v3825_v30, %v3821_v0  ;;  %v3357_v40 = vadd.f32 %v9907_v20, %v3174_v6  ;;  %v3359_v38 = vadd.f32 %v9907_v20, %v3178_v42 }
 0x592   : > { %v3973_v62 = vrot.slane %v3357_v40, %v9947_v22  ;;  %v3983_v11 = vrot.slane %v3359_v38, %v9917_v57 }
 0x593   : > { %v3204_v18 = vpop.xlane.xlu1 %3203  ;;  %v3120_v60 = vpop.xlane.xlu0 %3119 }
 0x594   : > { %v3974_v4 = vsel %vm3552_vm10, %v3973_v62, %v3969_v49  ;;  %v3372_v1 = vadd.f32 %v9907_v20, %v3204_v18  ;;  %v3330_v54 = vadd.f32 %v9907_v20, %v3120_v60 }
 0x596   : > { %v4047_v45 = vrot.slane %v3372_v1, %v9936_v39  ;;  %v3840_v33 = vrot.slane %v3330_v54, %v10002_v61 }
 0x597   : > { %v3116_v15 = vpop.xlane.xlu1 %3115  ;;  %v3180_v3 = vpop.xlane.xlu0 %3179 }
 0x598   : > { %v4048_v23 = vsel %vm3545_vm9, %v4047_v45, %v4043_v19  ;;  %v3328_v52 = vadd.f32 %v9907_v20, %v3116_v15  ;;  %v3360_v49 = vadd.f32 %v9907_v20, %v3180_v3 }
 0x599   : > { %v4053_v34 = vsel %vm3552_vm10, %v4052_v29, %v4048_v23 }
 0x59a   : > { %v3830_v12 = vrot.slane %v3328_v52, %v9930_v28  ;;  %v3988_v18 = vrot.slane %v3360_v49, %v9930_v28 }
 0x59b   : > { %v3176_v55 = vpop.xlane.xlu1 %3175  ;;  %v3210_v0 = vpop.xlane.xlu0 %3209 }
 0x59c   : > { %v3831_v27 = vsel %vm3573_vm13, %v3830_v12, %v3826_v37  ;;  %v3358_v41 = vadd.f32 %v9907_v20, %v3176_v55  ;;  %v3375_v42 = vadd.f32 %v9907_v20, %v3210_v0 }
 0x59d   : > { %v3836_v30 = vsel %vm3580_vm14, %v3835_v25, %v3831_v27 }
 0x59e   : > { %v3978_v6 = vrot.slane %v3358_v41, %v9965_v17  ;;  %v3841_v40 = vsel %vm3587_vm15, %v3840_v33, %v3836_v30  ;;  %v4062_v15 = vrot.slane %v3375_v42, %v9917_v57 }
 0x59f   : > { %v3208_v62 = vpop.xlane.xlu1 %3207  ;;  %v3122_v51 = vpop.xlane.xlu0 %3121 }
 0x5a0   : > { %v3979_v37 = vsel %vm3559_vm11, %v3978_v6, %v3974_v4  ;;  %v3374_v60 = vadd.f32 %v9907_v20, %v3208_v62  ;;  %v3331_v1 = vadd.f32 %v9907_v20, %v3122_v51 }
 0x5a1   : > { %v3984_v19 = vsel %vm11081_vm12, %v3983_v11, %v3979_v37 }
 0x5a2   : > { %v4057_v45 = vrot.slane %v3374_v60, %v9965_v17  ;;  %v3845_v29 = vrot.slane %v3331_v1, %v9944_v46  ;;  %v3989_v43 = vsel %vm3573_vm13, %v3988_v18, %v3984_v19 }
 0x5a3   : > { %v10361_v3 = vpop.xlane.xlu1 %3211  ;;  %v3182_v23 = vpop.xlane.xlu0 %3181 }
 0x5a4   : > { %v4058_v54 = vsel %vm3559_vm11, %v4057_v45, %v4053_v34  ;;  %v3846_v4 = vsel %vm3594_vm0, %v3845_v29, %v3841_v40  ;;  %v3361_v52 = vadd.f32 %v9907_v20, %v3182_v23 }
 0x5a5   : > { %v10367_v12 = vsel %vm11081_vm12, %v4062_v15, %v4058_v54  ;;  %vm4204_vm12 = vcmask 1044484  }
 0x5a6   : > { %v3993_v25 = vrot.slane %v3361_v52, %v9985_v58 }
 0x5a7   : > { %v3124_v38 = vpop.xlane.xlu0 %3123  ;;  %v10371_v0 = vpop.xlane.xlu1 %3213 }
 0x5a8   : > { %v3994_v55 = vsel %vm3580_vm14, %v3993_v25, %v3989_v43  ;;  %v3332_v33 = vadd.f32 %v9907_v20, %v3124_v38 }
 0x5aa   : > { %v3850_v27 = vrot.slane %v3332_v33, %v10026_v2 }
 0x5ab   : > { %v3184_v49 = vpop.xlane.xlu0 %3183  ;;  %v10377_v30 = vpop.xlane.xlu1 %3215 }
 0x5ac   : > { %v3851_v34 = vsel %vm3601_vm1, %v3850_v27, %v3846_v4  ;;  %v3362_v41 = vadd.f32 %v9907_v20, %v3184_v49 }
 0x5ae   : > { %v3998_v6 = vrot.slane %v3362_v41, %v10002_v61 }
 0x5af   : > { %v3126_v40 = vpop.xlane.xlu0 %3125  ;;  %v3218_v18 = vpop.xlane.xlu1 %3217 }
 0x5b0   : > { %v3999_v11 = vsel %vm3587_vm15, %v3998_v6, %v3994_v55  ;;  %v3333_v42 = vadd.f32 %v9907_v20, %v3126_v40 }
 0x5b2   : > { %v3855_v62 = vrot.slane %v3333_v42, %v10045_v56 }
 0x5b3   : > { %v3186_v51 = vpop.xlane.xlu0 %3185  ;;  %v3220_v43 = vpop.xlane.xlu1 %3219 }
 0x5b4   : > { %v3856_v37 = vsel %vm3608_vm2, %v3855_v62, %v3851_v34  ;;  %v3363_v60 = vadd.f32 %v9907_v20, %v3186_v51 }
 0x5b6   : > { %v4003_v1 = vrot.slane %v3363_v60, %v9944_v46 }
 0x5b7   : > { %v3128_v19 = vpop.xlane.xlu0 %3127  ;;  %v3222_v38 = vpop.xlane.xlu1 %3221 }
 0x5b8   : > { %v4004_v45 = vsel %vm3594_vm0, %v4003_v1, %v3999_v11  ;;  %v3334_v29 = vadd.f32 %v9907_v20, %v3128_v19 }
 0x5ba   : > { %v3860_v15 = vrot.slane %v3334_v29, %v9962_v50 }
 0x5bb   : > { %v3188_v23 = vpop.xlane.xlu0 %3187  ;;  %v3224_v6 = vpop.xlane.xlu1 %3223 }
 0x5bc   : > { %v3861_v54 = vsel %vm3615_vm3, %v3860_v15, %v3856_v37  ;;  %v3364_v4 = vadd.f32 %v9907_v20, %v3188_v23 }
 0x5be   : > { %v4008_v52 = vrot.slane %v3364_v4, %v10026_v2 }
 0x5bf   : > { %v3130_v25 = vpop.xlane.xlu0 %3129  ;;  %v3136_v60 = vpop.xlane.xlu1 %3135 }
 0x5c0   : > { %v4009_v55 = vsel %vm3601_vm1, %v4008_v52, %v4004_v45  ;;  %v3335_v33 = vadd.f32 %v9907_v20, %v3130_v25  ;;  %v3338_v19 = vadd.f32 %v9907_v20, %v3136_v60 }
 0x5c2   : > { %v3865_v27 = vrot.slane %v3335_v33, %v9982_v21  ;;  %v3880_v23 = vrot.slane %v3338_v19, %v10042_v63 }
 0x5c3   : > { %v3190_v49 = vpop.xlane.xlu0 %3189 }
 0x5c4   : > { %v3866_v34 = vsel %vm3622_vm4, %v3865_v27, %v3861_v54  ;;  %v3365_v41 = vadd.f32 %v9907_v20, %v3190_v49 }
 0x5c6   : > { %v4013_v40 = vrot.slane %v3365_v41, %v10045_v56 }
 0x5c7   : > { %v3132_v11 = vpop.xlane.xlu0 %3131 }
 0x5c8   : > { %v10399_v42 = vsel %vm3608_vm2, %v4013_v40, %v4009_v55  ;;  %v3336_v62 = vadd.f32 %v9907_v20, %v3132_v11 }
 0x5ca   : > { %v3870_v51 = vrot.slane %v3336_v62, %v10017_v35 }
 0x5cb   : > { %v3192_v37 = vpop.xlane.xlu0 %3191 }
 0x5cc   : > { %v3871_v1 = vsel %vm3629_vm5, %v3870_v51, %v3866_v34  ;;  %v3196_v34 = vpop.xlane.xlu1 %3195  ;;  %v3366_v44 = vadd.f32 %v9907_v20, %v3192_v37 }
 0x5cd   : > { %v3368_v37 = vadd.f32 %v9907_v20, %v3196_v34 }
 0x5cf   : > { %v3134_v45 = vpop.xlane.xlu0 %3133 }
 0x5d0   : > { %v3337_v29 = vadd.f32 %v9907_v20, %v3134_v45  ;;  %v10416_v40 = vpop.xlane.xlu1 %3197  ;;  %v3378_v45 = vadd.f32 %v9907_v20, %v10377_v30 }
 0x5d2   : > { %v3875_v15 = vrot.slane %v3337_v29, %v10020_v14  ;;  %v3379_v29 = vadd.f32 %v9907_v20, %v3218_v18 }
 0x5d3   : > { %v3194_v54 = vpop.xlane.xlu0 %3193 }
 0x5d4   : > { %v3876_v4 = vsel %vm3636_vm6, %v3875_v15, %v3871_v1  ;;  %v3234_v51 = vpop.xlane.xlu1 %3233  ;;  %v3376_v1 = vadd.f32 %v9907_v20, %v10361_v3 }
 0x5d5   : > { %v3881_v52 = vsel %vm3643_vm7, %v3880_v23, %v3876_v4  ;;  %v3380_v23 = vadd.f32 %v9907_v20, %v3220_v43  ;;  %v3367_v43 = vadd.f32 %v9907_v20, %v3194_v54  ;;  %v3387_v54 = vadd.f32 %v9907_v20, %v3234_v51 }
 0x5d6   : > { %v4203_v25 = vsel %vm4202_vm8, %v3881_v52, %v10297_v36  ;;  %v3377_v36 = vadd.f32 %v9907_v20, %v10371_v0  ;;  %v4067_v15 = vrot.slane %v3376_v1, %v9930_v28  ;;  %v3381_v52 = vadd.f32 %v9907_v20, %v3222_v38 }
 0x5d7   : > { %v3226_v55 = vpop.xlane.xlu0 %3225  ;;  %v10414_v33 = vsel %vm4204_vm12, %v10310_v26, %v4203_v25  ;;  %v4077_v25 = vrot.slane %v3378_v45, %v10002_v61  ;;  %v4082_v0 = vrot.slane %v3379_v29, %v9944_v46  ;;  %v4087_v18 = vrot.slane %v3380_v23, %v10026_v2 }
 0x5d8   : > { %v10420_v19 = vpop.xlane.xlu1 %3255  ;;  %v4072_v4 = vrot.slane %v3377_v36, %v9985_v58  ;;  %v4068_v30 = vsel %vm3573_vm13, %v4067_v15, %v10367_v12  ;;  %v4092_v38 = vrot.slane %v3381_v52, %v10045_v56  ;;  %v3382_v29 = vadd.f32 %v9907_v20, %v3224_v6 }
 0x5d9   : > { %v4018_v15 = vrot.slane %v3366_v44, %v9962_v50  ;;  %v3383_v52 = vadd.f32 %v9907_v20, %v3226_v55 }
 0x5da   : > { %v4073_v1 = vsel %vm3580_vm14, %v4072_v4, %v4068_v30 }
 0x5db   : > { %v3228_v27 = vpop.xlane.xlu0 %3227  ;;  %v4078_v47 = vsel %vm3587_vm15, %v4077_v25, %v4073_v1 }
 0x5dc   : > { %v10432_v31 = vpop.xlane.xlu1 %3257  ;;  %v4083_v12 = vsel %vm3594_vm0, %v4082_v0, %v4078_v47  ;;  %v4028_v0 = vrot.slane %v3368_v37, %v10017_v35  ;;  %v3369_v37 = vadd.f32 %v9907_v20, %v10416_v40 }
 0x5dd   : > { %v4088_v4 = vsel %vm3601_vm1, %v4087_v18, %v4083_v12  ;;  %v4122_v18 = vrot.slane %v3387_v54, %v9927_v5 }
 0x5de   : > { %v4093_v34 = vsel %vm3608_vm2, %v4092_v38, %v4088_v4 }
 0x5df   : > { %v3236_v49 = vpop.xlane.xlu0 %3235 }
 0x5e0   : > { %v3388_v36 = vadd.f32 %v9907_v20, %v3236_v49  ;;  %v4023_v49 = vrot.slane %v3367_v43, %v9982_v21  ;;  %v3230_v25 = vpop.xlane.xlu1 %3229  ;;  %v4102_v43 = vrot.slane %v3383_v52, %v9982_v21 }
 0x5e2   : > { %v4126_v47 = vrot.slane %v3388_v36, %v9936_v39 }
 0x5e3   : > { %v3238_v41 = vpop.xlane.xlu0 %3237 }
 0x5e4   : > { %v3389_v16 = vadd.f32 %v9907_v20, %v3238_v41  ;;  %v3384_v41 = vadd.f32 %v9907_v20, %v3228_v27 }
 0x5e6   : > { %v4131_v30 = vrot.slane %v3389_v16, %v9947_v22  ;;  %v4107_v16 = vrot.slane %v3384_v41, %v10017_v35  ;;  %v4127_v22 = vsel %vm3545_vm9, %v4126_v47, %v4122_v18  ;;  %vm11457_vm9 = vcmask 326912  }
 0x5e7   : > { %v3240_v11 = vpop.xlane.xlu0 %3239  ;;  %v4033_v47 = vrot.slane %v3369_v37, %v10020_v14  ;;  %v11462_v37 = vld [vmem:[#allocation50_spill] sm:$0xff] }
 0x5e8   : > { %v3390_v23 = vadd.f32 %v9907_v20, %v3240_v11  ;;  %v4097_v11 = vrot.slane %v3382_v29, %v9962_v50  ;;  %v4132_v36 = vsel %vm3552_vm10, %v4131_v30, %v4127_v22  ;;  %vm4206_vm10 = vcmask 1045509  }
 0x5ea   : > { %v4136_v27 = vrot.slane %v3390_v23, %v9965_v17  ;;  %v3385_v17 = vadd.f32 %v9907_v20, %v3230_v25 }
 0x5eb   : > { %v3242_v62 = vpop.xlane.xlu0 %3241 }
 0x5ec   : > { %v3391_v6 = vadd.f32 %v9907_v20, %v3242_v62  ;;  %v4019_v62 = vsel %vm3615_vm3, %v4018_v15, %v10399_v42  ;;  %v4137_v12 = vsel %vm3559_vm11, %v4136_v27, %v4132_v36  ;;  %vm4208_vm11 = vcmask 1046534  }
 0x5ee   : > { %v4141_v1 = vrot.slane %v3391_v6, %v9917_v57  ;;  %v4112_v6 = vrot.slane %v3385_v17, %v10020_v14 }
 0x5ef   : > { %v3244_v60 = vpop.xlane.xlu0 %3243 }
 0x5f0   : > { %v3392_v44 = vadd.f32 %v9907_v20, %v3244_v60  ;;  %v4024_v60 = vsel %vm3622_vm4, %v4023_v49, %v4019_v62  ;;  %v4142_v23 = vsel %vm11457_vm9, %v4141_v1, %v4137_v12  ;;  %v11463_v12 = vld [vmem:[#allocation51_spill] sm:$0xff] }
 0x5f1   : > { %v4029_v15 = vsel %vm3629_vm5, %v4028_v0, %v4024_v60 }
 0x5f2   : > { %v4146_v42 = vrot.slane %v3392_v44, %v9930_v28  ;;  %v4034_v30 = vsel %vm3636_vm6, %v4033_v47, %v4029_v15  ;;  %v11464_v15 = vmov 0   ;;  %v11473_v47 = vld [vmem:[#allocation55_spill] sm:$0xff] }
 0x5f3   : > { %v3246_v26 = vpop.xlane.xlu0 %3245 }
 0x5f4   : > { %v3393_v55 = vadd.f32 %v9907_v20, %v3246_v26  ;;  %v4147_v52 = vsel %vm3573_vm13, %v4146_v42, %v4142_v23  ;;  %vm4210_vm13 = vcmask 1047559   ;;  %v11465_v23 = vld [vmem:[#allocation40_spill] sm:$0xff] }
 0x5f6   : > { %v4151_v29 = vrot.slane %v3393_v55, %v9985_v58 }
 0x5f7   : > { %v3248_v3 = vpop.xlane.xlu0 %3247 }
 0x5f8   : > { %v3394_v39 = vadd.f32 %v9907_v20, %v3248_v3  ;;  %v3232_v3 = vpop.xlane.xlu1 %3231 }
 0x5f9   : > { %v3386_v49 = vadd.f32 %v9907_v20, %v3232_v3 }
 0x5fa   : > { %v4156_v28 = vrot.slane %v3394_v39, %v10002_v61  ;;  %v4152_v61 = vsel %vm3580_vm14, %v4151_v29, %v4147_v52  ;;  %vm3405_vm14 = vcmp.lt.s32.totalorder %v9901_v24, 16  ;;  %v11468_v52 = vld [vmem:[#allocation53_spill] sm:$0xff]  ;;  %v11482_v24 = vld [vmem:[#allocation46_spill] sm:$0xff] }
 0x5fb   : > { %v3250_v45 = vpop.xlane.xlu0 %3249  ;;  %v4117_v0 = vrot.slane %v3386_v49, %v10042_v63  ;;  %v11467_v49 = vld [vmem:[#allocation52_spill] sm:$0xff] }
 0x5fc   : > { %v3395_v38 = vadd.f32 %v9907_v20, %v3250_v45  ;;  %v4098_v45 = vsel %vm3615_vm3, %v4097_v11, %v4093_v34  ;;  %v4157_v44 = vsel %vm3587_vm15, %v4156_v28, %v4152_v61  ;;  %v3264_v62 = vpop.xlane.xlu1 %3263  ;;  %v7255_v28 = vpack.c.bf16 %v11463_v12, %v11462_v37  ;;  %v11471_v61 = vld [vmem:[#allocation43_spill] sm:$0xff]  ;;  %v11492_v12 = vld [vmem:[#allocation82_spill] sm:$0xff] }
 0x5fd   : > { %v4103_v54 = vsel %vm3622_vm4, %v4102_v43, %v4098_v45 }
 0x5fe   : > { %v4161_v4 = vrot.slane %v3395_v38, %v9944_v46  ;;  %v4108_v58 = vsel %vm3629_vm5, %v4107_v16, %v4103_v54  ;;  %v3398_v46 = vadd.f32 %v9907_v20, %v10420_v19  ;;  %v3399_v19 = vadd.f32 %v9907_v20, %v10432_v31  ;;  %7256 = vmatpush3.bf16.msra.mxu0 %v7255_v28  ;;  %v11493_v28 = vld [vmem:[#allocation83_spill] sm:$0xff] }
 0x5ff   : > { %v3252_v51 = vpop.xlane.xlu0 %3251  ;;  %v3402_v16 = vadd.f32 %v9907_v20, %v3264_v62  ;;  %v11477_v62 = vld [vmem:[#allocation59_spill] sm:$0xff] }
 0x600   : > { %v3396_v5 = vadd.f32 %v9907_v20, %v3252_v51  ;;  %v4113_v51 = vsel %vm3636_vm6, %v4112_v6, %v4108_v58  ;;  %v4176_v60 = vrot.slane %v3398_v46, %v9962_v50  ;;  %v11470_v6 = vld [vmem:[#allocation42_spill] sm:$0xff] }
 0x601   : > { %v4118_v43 = vsel %vm3643_vm7, %v4117_v0, %v4113_v51  ;;  %v11474_v51 = vld [vmem:[#allocation56_spill] sm:$0xff] }
 0x602   : > { %v4166_v40 = vrot.slane %v3396_v5, %v10026_v2  ;;  %v4162_v2 = vsel %vm3594_vm0, %v4161_v4, %v4157_v44  ;;  %v4181_v5 = vrot.slane %v3399_v19, %v9982_v21  ;;  %v5759_v21 = vld [vmem:[%s11459_s23] sm:$0xff]  ;;  %v7240_v44 = vpack.c.bf16 %v8909_v8, %v8907_v7  ;;  %s5777_s23 = scalar_lea.sflag [#allocation26], %s8865_s7 }
 0x603   : > { %v3254_v26 = vpop.xlane.xlu0 %3253  ;;  %v11466_v4 = vld [vmem:[#allocation41_spill] sm:$0xff]  ;;  %v7243_v8 = vpack.c.bf16 %v8913_v10, %v8911_v9  ;;  %v11476_v19 = vld [vmem:[#allocation58_spill] sm:$0xff] }
 0x604   : > { %v3397_v57 = vadd.f32 %v9907_v20, %v3254_v26  ;;  %v7234_v58 = vpack.c.bf16 %v11466_v4, %v11465_v23  ;;  %v11484_v10 = vld [vmem:[#allocation62_spill] sm:$0xff]  ;;  %v11494_v23 = vld [vmem:[#allocation68_spill] sm:$0xff]  ;;  %v11495_v4 = vld [vmem:[#allocation69_spill] sm:$0xff] }
 0x606   : > { %v4171_v34 = vrot.slane %v3397_v57, %v10045_v56  ;;  %v4167_v56 = vsel %vm3601_vm1, %v4166_v40, %v4162_v2  ;;  %v11461_v57 = vld [vmem:[#allocation39_spill] sm:$0xff]  ;;  %v7258_v40 = vpack.c.bf16 %v11468_v52, %v11467_v49  ;;  %v11475_v2 = vld [vmem:[#allocation57_spill] sm:$0xff]  ;;  %v11496_v49 = vmov 0.0   ;;  %v11498_v52 = vld [vmem:[#allocation84_spill] sm:$0xff] }
 0x607   : > { %v3200_v25 = vpop.xlane.xlu0 %3199  ;;  %vm11497_vm1 = vmmov 0  }
 0x608   : > { %v3370_v41 = vadd.f32 %v9907_v20, %v3200_v25  ;;  %v4172_v18 = vsel %vm3608_vm2, %v4171_v34, %v4167_v56  ;;  %v11469_v25 = vmov 0.0|0.0   ;;  %v7237_v34 = vpack.c.bf16 %v11471_v61, %v11470_v6  ;;  %v11500_v61 = vld [vmem:[#allocation70_spill] sm:$0xff] }
 0x609   : > { %v4177_v31 = vsel %vm3615_vm3, %v4176_v60, %v4172_v18  ;;  %7257 = vmatprep.subr.bf16.mxu0 %v11469_v25  ;;  %v7267_v18 = vpack.c.bf16 %v11477_v62, %v11476_v19  ;;  %v11510_v19 = vld [vmem:[#allocation90_spill] sm:$0xff]  ;;  %v11511_v62 = vld [vmem:[#allocation91_spill] sm:$0xff]  ;;  %vm11584_vm2 = vcmask 1041409   ;;  %vm11585_vm3 = vcmask 1042434  }
 0x60a   : > { %v4038_v11 = vrot.slane %v3370_v41, %v10042_v63  ;;  %v4182_v50 = vsel %vm3622_vm4, %v4181_v5, %v4177_v31  ;;  %7259 = vmatpush3.bf16.msra.mxu0 %v7258_v40  ;;  %v11472_v41 = vld [vmem:[#allocation54_spill] sm:$0xff]  ;;  %v11485_v31 = vld [vmem:[#allocation63_spill] sm:$0xff]  ;;  %v11487_v5 = vld [vmem:[#allocation49_spill] sm:$0xff] }
 0x60b   : > { %v3260_v55 = vpop.xlane.xlu0 %3259  ;;  %v7261_v46 = vpack.c.bf16 %v11473_v47, %v11472_v41  ;;  %7260 = vmatprep.subr.bf16.mxu0 %v11469_v25  ;;  %v11499_v40 = vld [vmem:[#allocation85_spill] sm:$0xff]  ;;  %v11502_v47 = vld [vmem:[#allocation86_spill] sm:$0xff] }
 0x60c   : > { %v4039_v27 = vsel %vm3643_vm7, %v4038_v11, %v4034_v30  ;;  %v3400_v39 = vadd.f32 %v9907_v20, %v3260_v55  ;;  %v7264_v11 = vpack.c.bf16 %v11475_v2, %v11474_v51  ;;  %v7306_v6 = vpack.c.bf16 %v11499_v40, %v11498_v52  ;;  %v11504_v51 = vld [vmem:[#allocation72_spill] sm:$0xff]  ;;  %v11505_v2 = vld [vmem:[#allocation73_spill] sm:$0xff] }
 0x60d   : > { %v4207_v1 = vsel %vm4206_vm10, %v4039_v27, %v10414_v33  ;;  %v4196_v33 = vrot.slane %v3402_v16, %v10042_v63  ;;  %v11460_v63 = vld [vmem:[#allocation38_spill] sm:$0xff]  ;;  %v11478_v27 = vld [vmem:[#allocation44_spill] sm:$0xff]  ;;  %v11483_v16 = vld [vmem:[#allocation47_spill] sm:$0xff] }
 0x60e   : > { %v4209_v38 = vsel %vm4208_vm11, %v4118_v43, %v4207_v1  ;;  %v4186_v22 = vrot.slane %v3400_v39, %v10017_v35  ;;  %v7231_v45 = vpack.c.bf16 %v11461_v57, %v11460_v63  ;;  %7262 = vmatpush3.bf16.msra.mxu0 %v7261_v46  ;;  %v11479_v39 = vld [vmem:[#allocation45_spill] sm:$0xff]  ;;  %v11480_v43 = vld [vmem:[#allocation60_spill] sm:$0xff]  ;;  %v7249_v9 = vpack.c.bf16 %v11483_v16, %v11482_v24  ;;  %v11491_v63 = vld [vmem:[#allocation67_spill] sm:$0xff] }
 0x60f   : > { %v3262_v42 = vpop.xlane.xlu0 %3261  ;;  %7263 = vmatprep.subr.bf16.mxu0 %v11469_v25  ;;  %v7246_v60 = vpack.c.bf16 %v11479_v39, %v11478_v27  ;;  %v11481_v1 = vld [vmem:[#allocation61_spill] sm:$0xff]  ;;  %v11503_v46 = vld [vmem:[#allocation87_spill] sm:$0xff]  ;;  %v11512_v27 = vld [vmem:[#allocation76_spill] sm:$0xff] }
 0x610   : > { %v3401_v26 = vadd.f32 %v9907_v20, %v3262_v42  ;;  %v4187_v3 = vsel %vm3629_vm5, %v4186_v22, %v4182_v50  ;;  %7232 = vmatpush3.bf16.msra.mxu1 %v7231_v45  ;;  %v7273_v22 = vpack.c.bf16 %v11485_v31, %v11484_v10  ;;  %v11486_v42 = vld [vmem:[#allocation48_spill] sm:$0xff]  ;;  %v11513_v39 = vld [vmem:[#allocation77_spill] sm:$0xff]  ;;  %v11516_v24 = vld [vmem:[#allocation78_spill] sm:$0xff] }
 0x611   : > { %7233 = vmatprep.subr.bf16.mxu1 %v11469_v25  ;;  %v11488_v50 = vld [vmem:[#allocation64_spill] sm:$0xff]  ;;  %v11517_v16 = vld [vmem:[#allocation79_spill] sm:$0xff]  ;;  %v11518_v10 = vld [vmem:[#allocation94_spill] sm:$0xff] }
 0x612   : > { %v4191_v17 = vrot.slane %v3401_v26, %v10020_v14  ;;  %v5760_v14 = vstv %s11458_s6  ;;  %7265 = vmatpush3.bf16.msra.mxu0 %v7264_v11  ;;  %v7252_v26 = vpack.c.bf16 %v11487_v5, %v11486_v42  ;;  %v7288_v11 = vpack.c.bf16 %v11505_v2, %v11504_v51  ;;  %v11519_v31 = vld [vmem:[#allocation95_spill] sm:$0xff]  ;;  %v11520_v42 = vld [vmem:[#allocation80_spill] sm:$0xff]  ;;  %v11521_v5 = vld [vmem:[#allocation81_spill] sm:$0xff] }
 0x613   : > { %vm5761_vm15 = vcmp.gt.s32.totalorder %v5759_v21, %v5760_v14  ;;  %7266 = vmatprep.subr.bf16.mxu0 %v11469_v25  ;;  %v11490_v14 = vld [vmem:[#allocation66_spill] sm:$0xff]  ;;  %v11535_v52 = vld [vmem:[#allocation117_spill] sm:$0xff]  ;;  %v11541_v51 = vld [vmem:[#allocation107_spill] sm:$0xff] }
 0x614   : > { %v4192_v36 = vsel %vm3636_vm6, %v4191_v17, %v4187_v3  ;;  %v5762_v54 = vsel %vm5761_vm15, 1, %v11464_v15  ;;  %7235 = vmatpush3.bf16.msra.mxu1 %v7234_v58  ;;  %v11489_v17 = vld [vmem:[#allocation65_spill] sm:$0xff]  ;;  %v7279_v57 = vpack.c.bf16 %v11491_v63, %v11490_v14  ;;  %v7303_v15 = vpack.c.bf16 %v11493_v28, %v11492_v12  ;;  %v11524_v14 = vld [vmem:[#allocation98_spill] sm:$0xff]  ;;  %v11525_v63 = vld [vmem:[#allocation99_spill] sm:$0xff] }
 0x615   : > { %v4197_v35 = vsel %vm3643_vm7, %v4196_v33, %v4192_v36  ;;  %7236 = vmatprep.subr.bf16.mxu1 %v11469_v25  ;;  %v7276_v33 = vpack.c.bf16 %v11489_v17, %v11488_v50  ;;  %v7282_v58 = vpack.c.bf16 %v11495_v4, %v11494_v23  ;;  %v11522_v50 = vld [vmem:[#allocation96_spill] sm:$0xff]  ;;  %v11523_v17 = vld [vmem:[#allocation97_spill] sm:$0xff]  ;;  %v11530_v12 = vld [vmem:[#allocation114_spill] sm:$0xff] }
 0x616   : > { %v4211_v29 = vsel %vm4210_vm13, %v4197_v35, %v4209_v38  ;;  %7268 = vmatpush3.bf16.msra.mxu0 %v7267_v18  ;;  %v7270_v38 = vpack.c.bf16 %v11481_v1, %v11480_v43  ;;  %v7315_v18 = vpack.c.bf16 %v11511_v62, %v11510_v19  ;;  %v11514_v43 = vld [vmem:[#allocation92_spill] sm:$0xff]  ;;  %v11515_v1 = vld [vmem:[#allocation93_spill] sm:$0xff]  ;;  %v11531_v28 = vld [vmem:[#allocation115_spill] sm:$0xff] }
 0x617   : > { %v4213_v20 = vsel %vm3405_vm14, %v4211_v29, -1e+30  ;;  %7269 = vmatprep.subr.bf16.mxu0 %v11469_v25  ;;  %v11533_v23 = vld [vmem:[#allocation103_spill] sm:$0xff]  ;;  %v11546_v19 = vld [vmem:[#allocation122_spill] sm:$0xff] }
 0x618   : > { %4214 = vmax.xlane.f32.xlu0 %v4213_v20  ;;  %7238 = vmatpush3.bf16.msra.mxu1 %v7237_v34  ;;  %v11501_v34 = vld [vmem:[#allocation71_spill] sm:$0xff] }
 0x619   : > { %7239 = vmatprep.subr.bf16.mxu1 %v11469_v25  ;;  %v7285_v41 = vpack.c.bf16 %v11501_v34, %v11500_v61  ;;  %v11537_v61 = vld [vmem:[#allocation105_spill] sm:$0xff]  ;;  %v11547_v62 = vld [vmem:[#allocation123_spill] sm:$0xff] }
 0x61a   : > { %7271 = vmatpush3.bf16.msra.mxu0 %v7270_v38  ;;  %v7318_v38 = vpack.c.bf16 %v11515_v1, %v11514_v43  ;;  %v11550_v43 = vld [vmem:[#allocation124_spill] sm:$0xff]  ;;  %v11551_v1 = vld [vmem:[#allocation125_spill] sm:$0xff] }
 0x61b   : > { %7272 = vmatprep.subr.bf16.mxu0 %v11469_v25 }
 0x61c   : > { %7241 = vmatpush3.bf16.msra.mxu1 %v7240_v44  ;;  %v7309_v44 = vpack.c.bf16 %v11503_v46, %v11502_v47  ;;  %v11539_v47 = vld [vmem:[#allocation119_spill] sm:$0xff] }
 0x61d   : > { %7242 = vmatprep.subr.bf16.mxu1 %v11469_v25 }
 0x61e   : > { %7274 = vmatpush3.bf16.msra.mxu0 %v7273_v22  ;;  %v7321_v22 = vpack.c.bf16 %v11519_v31, %v11518_v10 }
 0x61f   : > { %7275 = vmatprep.subr.bf16.mxu0 %v11469_v25 }
 0x620   : > { %7244 = vmatpush3.bf16.msra.mxu1 %v7243_v8 }
 0x621   : > { %7245 = vmatprep.subr.bf16.mxu1 %v11469_v25 }
 0x622   : > { %7277 = vmatpush3.bf16.msra.mxu0 %v7276_v33  ;;  %v7324_v33 = vpack.c.bf16 %v11523_v17, %v11522_v50  ;;  %v11556_v50 = vld [vmem:[#allocation128_spill] sm:$0xff]  ;;  %v11557_v17 = vld [vmem:[#allocation129_spill] sm:$0xff] }
 0x623   : > { %7302 = vmatprep.subr.bf16.mxu0 %v11469_v25 }
 0x624   : > { %7247 = vmatpush3.bf16.msra.mxu1 %v7246_v60  ;;  %v7294_v60 = vpack.c.bf16 %v11513_v39, %v11512_v27  ;;  %v11548_v39 = vld [vmem:[#allocation110_spill] sm:$0xff] }
 0x625   : > { %7248 = vmatprep.subr.bf16.mxu1 %v11469_v25 }
 0x628   : > { %7250 = vmatpush3.bf16.msra.mxu1 %v7249_v9  ;;  %v7297_v9 = vpack.c.bf16 %v11517_v16, %v11516_v24  ;;  %v11552_v16 = vld [vmem:[#allocation126_spill] sm:$0xff] }
 0x629   : > { %7251 = vmatprep.subr.bf16.mxu1 %v11469_v25 }
 0x62c   : > { %7253 = vmatpush3.bf16.msra.mxu1 %v7252_v26  ;;  %v7300_v26 = vpack.c.bf16 %v11521_v5, %v11520_v42  ;;  %v11555_v42 = vld [vmem:[#allocation143_spill] sm:$0xff] }
 0x62d   : > { %7278 = vmatprep.subr.bf16.mxu1 %v11469_v25 }
 0x62e   : > { %5764 = vperm.xlu0 %7871, %v5762_v54  }
 0x6a5   : > { %v4215_v0 = vpop.xlane.xlu0 %4214 }
 0x6a6   : > { %v4216_v56 = vsub.f32 %v4213_v20, %v4215_v0  ;;  %v11506_v0 = vld [vmem:[#allocation88_spill] sm:$0xff] }
 0x6a8   : > { %v4217_v30 = vmul.f32 1.442695, %v4216_v56  ;;  %v11507_v56 = vld [vmem:[#allocation89_spill] sm:$0xff] }
 0x6aa   : > { %7872 = vpow2.f32 %v4217_v30  ;;  %v7312_v30 = vpack.c.bf16 %v11507_v56, %v11506_v0  ;;  %v11543_v0 = vld [vmem:[#allocation121_spill] sm:$0xff] }
 0x6ad   : > { %v10587_v36 = vpop.permute.xlu0 %5764 }
 0x6ae   : > { %vm5766_vm0 = vcmp.eq.s32.totalorder %v10587_v36, 1 }
 0x6b4   : > { %v7873_v55 = vpop.eup %7872 }
 0x6b5   : > { %v4219_v7 = vsel %vm3405_vm14, %v7873_v55, 0.0  ;;  %v11508_v55 = vld [vmem:[#allocation74_spill] sm:$0xff] }
 0x6b6   : > { %4220 = vadd.xlane.f32.xlu1 %v4219_v7 }
 0x743   : > { %v4221_v3 = vpop.xlane.xlu1 %4220 }
 0x744   : > { %7874 = vrcp.f32 %v4221_v3  ;;  %v7327_v3 = vpack.c.bf16 %v9025_v32, %v9023_v48  ;;  %v11526_v32 = vld [vmem:[#allocation112_spill] sm:$0xff]  ;;  %v11527_v48 = vld [vmem:[#allocation113_spill] sm:$0xff] }
 0x74e   : > { %v7875_v35 = vpop.eup %7874 }
 0x74f   : > { %v10590_v29 = vmul.f32 %v7875_v35, %v4219_v7  ;;  %v11509_v7 = vld [vmem:[#allocation75_spill] sm:$0xff] }
 0x750   : > { %v7291_v8 = vpack.c.bf16 %v11509_v7, %v11508_v55  ;;  %v11544_v55 = vld [vmem:[#allocation108_spill] sm:$0xff]  ;;  %v11545_v7 = vld [vmem:[#allocation109_spill] sm:$0xff] }
 0x751   : > { %v5769_v20 = vsel %vm5766_vm0, %v10590_v29, 0.0  ;;  %v4232_v21 = vrot.slane %v10590_v29, %v9695_v53 }
 0x752   : > { %5770 = vst [vmem:[%s924_s17] sm:$0xff] %v5769_v20  ;;  %v7351_v20 = vpack.c.bf16 %v9057_v59, %v9055_v13  ;;  %v11528_v13 = vld [vmem:[#allocation100_spill] sm:$0xff]  ;;  %v11529_v59 = vld [vmem:[#allocation101_spill] sm:$0xff] }
 0x753   : > { %v4240_v45 = vcombine.high %v4232_v21, %v4232_v21  ;;  %v4248_v37 = vrot.slane %v4232_v21, %v9695_v53 }
 0x755   : > { %6809 = vmatmul.mubr.f32.vlgmr.msra.gmra.mrb[0].mxu1 %v4248_v37  ;;  %v4262_v54 = vrot.slane %v4240_v45, %v9695_v53  ;;  %v4270_v35 = vcombine.high %v4248_v37, %v4248_v37  ;;  %v7354_v45 = vpack.c.bf16 %v11527_v48, %v11526_v32  ;;  %v7333_v37 = vpack.c.bf16 %v11529_v59, %v11528_v13  ;;  %v11564_v48 = vld [vmem:[#allocation132_spill] sm:$0xff] }
 0x756   : > { %7280 = vmatpush3.bf16.msra.mxu1 %v7279_v57  ;;  %6878 = vmatprep.mubr.msk.f32.mxu1 %vm11497_vm1, %v11496_v49  ;;  %v7330_v57 = vpack.c.bf16 %v11525_v63, %v11524_v14  ;;  %v11562_v63 = vld [vmem:[#allocation146_spill] sm:$0xff]  ;;  %v11566_v59 = vld [vmem:[#allocation148_spill] sm:$0xff] }
 0x757   : > { %6844 = vmatmul.mubr.f32.vlgmr.msra.gmra.mrb[2].mxu0 %v4262_v54  ;;  %7281 = vmatprep.subr.bf16.mxu1 %v11469_v25  ;;  %v4272_v21 = vcombine.high %v4262_v54, %v4262_v54  ;;  %v11532_v54 = vld [vmem:[#allocation102_spill] sm:$0xff] }
 0x758   : > { %7304 = vmatpush3.bf16.msra.mxu0 %v7303_v15  ;;  %6913 = vmatprep.mubr.msk.f32.mxu0 %vm11497_vm1, %v11496_v49  ;;  %v7357_v15 = vpack.c.bf16 %v11531_v28, %v11530_v12  ;;  %v7336_v4 = vpack.c.bf16 %v11533_v23, %v11532_v54  ;;  %v11568_v28 = vld [vmem:[#allocation134_spill] sm:$0xff] }
 0x759   : > { %7305 = vmatprep.subr.bf16.mxu0 %v11469_v25  ;;  %v11570_v23 = vld [vmem:[#allocation150_spill] sm:$0xff] }
 0x75a   : > { %7283 = vmatpush3.bf16.msra.mxu1 %v7282_v58  ;;  %v11534_v58 = vld [vmem:[#allocation116_spill] sm:$0xff] }
 0x75b   : > { %7284 = vmatprep.subr.bf16.mxu1 %v11469_v25  ;;  %v7360_v40 = vpack.c.bf16 %v11535_v52, %v11534_v58  ;;  %v11572_v52 = vld [vmem:[#allocation136_spill] sm:$0xff] }
 0x75c   : > { %7307 = vmatpush3.bf16.msra.mxu0 %v7306_v6  ;;  %v11536_v6 = vld [vmem:[#allocation104_spill] sm:$0xff] }
 0x75d   : > { %7308 = vmatprep.subr.bf16.mxu0 %v11469_v25  ;;  %v7339_v34 = vpack.c.bf16 %v11537_v61, %v11536_v6  ;;  %v11574_v61 = vld [vmem:[#allocation152_spill] sm:$0xff] }
 0x75e   : > { %7286 = vmatpush3.bf16.msra.mxu1 %v7285_v41  ;;  %v11538_v41 = vld [vmem:[#allocation118_spill] sm:$0xff] }
 0x75f   : > { %7287 = vmatprep.subr.bf16.mxu1 %v11469_v25  ;;  %v7363_v46 = vpack.c.bf16 %v11539_v47, %v11538_v41  ;;  %v11576_v47 = vld [vmem:[#allocation138_spill] sm:$0xff] }
 0x760   : > { %7310 = vmatpush3.bf16.msra.mxu0 %v7309_v44  ;;  %v11540_v44 = vld [vmem:[#allocation106_spill] sm:$0xff] }
 0x761   : > { %7311 = vmatprep.subr.bf16.mxu0 %v11469_v25  ;;  %v7342_v2 = vpack.c.bf16 %v11541_v51, %v11540_v44  ;;  %v11578_v51 = vld [vmem:[#allocation154_spill] sm:$0xff] }
 0x762   : > { %7289 = vmatpush3.bf16.msra.mxu1 %v7288_v11  ;;  %v11542_v11 = vld [vmem:[#allocation120_spill] sm:$0xff] }
 0x763   : > { %7290 = vmatprep.subr.bf16.mxu1 %v11469_v25  ;;  %v7366_v56 = vpack.c.bf16 %v11543_v0, %v11542_v11  ;;  %v11580_v0 = vld [vmem:[#allocation140_spill] sm:$0xff] }
 0x764   : > { %7313 = vmatpush3.bf16.msra.mxu0 %v7312_v30  ;;  %v4225_v30 = vcombine.high %v10590_v29, %v10590_v29 }
 0x765   : > { %7314 = vmatprep.subr.bf16.mxu0 %v11469_v25 }
 0x766   : > { %7292 = vmatpush3.bf16.msra.mxu1 %v7291_v8  ;;  %v7345_v8 = vpack.c.bf16 %v11545_v7, %v11544_v55  ;;  %v4239_v27 = vrot.slane %v4225_v30, %v9695_v53  ;;  %v4842_v55 = vld [vmem:[#allocation17] sm:$0xff]  ;;  %v4843_v7 = vld [vmem:[#allocation17 + $0x8] sm:$0xff] }
 0x767   : > { %7293 = vmatprep.subr.bf16.mxu1 %v11469_v25 }
 0x768   : > { %7316 = vmatpush3.bf16.msra.mxu0 %v7315_v18  ;;  %v7369_v18 = vpack.c.bf16 %v11547_v62, %v11546_v19  ;;  %v4241_v24 = vcombine.high %v4239_v27, %v4239_v27  ;;  %v4255_v31 = vrot.slane %v4239_v27, %v9695_v53  ;;  %v11583_v19 = vld [vmem:[#allocation157_spill] sm:$0xff] }
 0x769   : > { %7317 = vmatprep.subr.bf16.mxu0 %v11469_v25 }
 0x76a   : > { %7295 = vmatpush3.bf16.msra.mxu1 %v7294_v60  ;;  %v11549_v60 = vld [vmem:[#allocation111_spill] sm:$0xff]  ;;  %v4271_v27 = vcombine.high %v4255_v31, %v4255_v31 }
 0x76b   : > { %7296 = vmatprep.subr.bf16.mxu1 %v11469_v25  ;;  %v7348_v29 = vpack.c.bf16 %v11549_v60, %v11548_v39  ;;  %v4844_v39 = vld [vmem:[#allocation17 + $0x10] sm:$0xff]  ;;  %v4845_v60 = vld [vmem:[#allocation17 + $0x18] sm:$0xff] }
 0x76c   : > { %7319 = vmatpush3.bf16.msra.mxu0 %v7318_v38  ;;  %v7372_v38 = vpack.c.bf16 %v11551_v1, %v11550_v43  ;;  %v7426_v43 = vpack.c.bf16 %v4845_v60, %v4844_v39  ;;  %v4846_v1 = vld [vmem:[#allocation17 + $0x20] sm:$0xff]  ;;  %v5048_v39 = vld [vmem:[#allocation20 + $0x90] sm:$0xff] }
 0x76d   : > { %7320 = vmatprep.subr.bf16.mxu0 %v11469_v25 }
 0x76e   : > { %7298 = vmatpush3.bf16.msra.mxu1 %v7297_v9  ;;  %v11553_v9 = vld [vmem:[#allocation127_spill] sm:$0xff] }
 0x76f   : > { %7299 = vmatprep.subr.bf16.mxu1 %v11469_v25  ;;  %v7375_v10 = vpack.c.bf16 %v11553_v9, %v11552_v16  ;;  %v4848_v16 = vld [vmem:[#allocation17 + $0x30] sm:$0xff]  ;;  %v4849_v9 = vld [vmem:[#allocation17 + $0x38] sm:$0xff] }
 0x770   : > { %7322 = vmatpush3.bf16.msra.mxu0 %v7321_v22  ;;  %v11554_v22 = vld [vmem:[#allocation142_spill] sm:$0xff] }
 0x771   : > { %7323 = vmatprep.subr.bf16.mxu0 %v11469_v25  ;;  %v7399_v5 = vpack.c.bf16 %v11555_v42, %v11554_v22  ;;  %v4851_v22 = vld [vmem:[#allocation17 + $0x48] sm:$0xff] }
 0x772   : > { %7301 = vmatpush3.bf16.msra.mxu1 %v7300_v26  ;;  %v4269_v26 = vrot.slane %v4241_v24, %v9695_v53  ;;  %v11560_v53 = vld [vmem:[#allocation130_spill] sm:$0xff] }
 0x773   : > { %7326 = vmatprep.subr.bf16.mxu1 %v11469_v25 }
 0x774   : > { %7325 = vmatpush3.bf16.msra.mxu0 %v7324_v33  ;;  %v7378_v33 = vpack.c.bf16 %v11557_v17, %v11556_v50  ;;  %v4854_v17 = vld [vmem:[#allocation17 + $0x60] sm:$0xff] }
 0x775   : > { %6879 = vmatmul.mubr.f32.vlgmr.msra.gmra.mrb[2].mxu1 %v4270_v35  ;;  %7350 = vmatprep.subr.bf16.mxu0 %v11469_v25  ;;  %v11559_v35 = vld [vmem:[#allocation145_spill] sm:$0xff] }
 0x776   : > { %7328 = vmatpush3.bf16.msra.mxu1 %v7327_v3  ;;  %6948 = vmatprep.mubr.msk.f32.mxu1 %vm11497_vm1, %v11496_v49  ;;  %v11558_v3 = vld [vmem:[#allocation144_spill] sm:$0xff] }
 0x777   : > { %6914 = vmatmul.mubr.f32.vlgmr.msra.gmra.mrb[4].mxu0 %v4272_v21  ;;  %7329 = vmatprep.subr.bf16.mxu1 %v11469_v25  ;;  %v11561_v21 = vld [vmem:[#allocation131_spill] sm:$0xff] }
 0x778   : > { %7352 = vmatpush3.bf16.msra.mxu0 %v7351_v20  ;;  %6983 = vmatprep.mubr.msk.f32.mxu0 %vm11497_vm1, %v11496_v49  ;;  %v7402_v20 = vpack.c.bf16 %v11559_v35, %v11558_v3  ;;  %v7381_v14 = vpack.c.bf16 %v11561_v21, %v11560_v53  ;;  %v4856_v35 = vld [vmem:[#allocation17 + $0x70] sm:$0xff]  ;;  %v10771_v21 = vld [vmem:[#allocation2] sm:$0xff] }
 0x779   : > { %7353 = vmatprep.subr.bf16.mxu0 %v11469_v25 }
 0x77a   : > { %7331 = vmatpush3.bf16.msra.mxu1 %v7330_v57  ;;  %v11563_v57 = vld [vmem:[#allocation147_spill] sm:$0xff] }
 0x77b   : > { %7332 = vmatprep.subr.bf16.mxu1 %v11469_v25  ;;  %v7405_v32 = vpack.c.bf16 %v11563_v57, %v11562_v63  ;;  %v5035_v63 = vld [vmem:[#allocation20 + $0x28] sm:$0xff]  ;;  %v5033_v57 = vld [vmem:[#allocation20 + $0x18] sm:$0xff] }
 0x77c   : > { %7355 = vmatpush3.bf16.msra.mxu0 %v7354_v45  ;;  %v11565_v45 = vld [vmem:[#allocation133_spill] sm:$0xff] }
 0x77d   : > { %7356 = vmatprep.subr.bf16.mxu0 %v11469_v25  ;;  %v7384_v13 = vpack.c.bf16 %v11565_v45, %v11564_v48  ;;  %v5037_v48 = vld [vmem:[#allocation20 + $0x38] sm:$0xff]  ;;  %v5030_v45 = vld [vmem:[#allocation20] sm:$0xff] }
 0x77e   : > { %7334 = vmatpush3.bf16.msra.mxu1 %v7333_v37  ;;  %v11567_v37 = vld [vmem:[#allocation149_spill] sm:$0xff] }
 0x77f   : > { %7335 = vmatprep.subr.bf16.mxu1 %v11469_v25  ;;  %v7408_v12 = vpack.c.bf16 %v11567_v37, %v11566_v59  ;;  %v7478_v59 = vpack.c.bf16 %v5037_v48, %v5033_v57  ;;  %v5064_v57 = vld [vmem:[#allocation20 + $0x110] sm:$0xff]  ;;  %v5071_v48 = vld [vmem:[#allocation20 + $0x148] sm:$0xff] }
 0x780   : > { %7358 = vmatpush3.bf16.msra.mxu0 %v7357_v15  ;;  %v11569_v15 = vld [vmem:[#allocation135_spill] sm:$0xff] }
 0x781   : > { %7359 = vmatprep.subr.bf16.mxu0 %v11469_v25  ;;  %v7387_v54 = vpack.c.bf16 %v11569_v15, %v11568_v28  ;;  %v5036_v28 = vld [vmem:[#allocation20 + $0x30] sm:$0xff] }
 0x782   : > { %7337 = vmatpush3.bf16.msra.mxu1 %v7336_v4  ;;  %v11571_v4 = vld [vmem:[#allocation151_spill] sm:$0xff] }
 0x783   : > { %7338 = vmatprep.subr.bf16.mxu1 %v11469_v25  ;;  %v7411_v58 = vpack.c.bf16 %v11571_v4, %v11570_v23 }
 0x784   : > { %7361 = vmatpush3.bf16.msra.mxu0 %v7360_v40  ;;  %v11573_v40 = vld [vmem:[#allocation137_spill] sm:$0xff] }
 0x785   : > { %7362 = vmatprep.subr.bf16.mxu0 %v11469_v25  ;;  %v7390_v6 = vpack.c.bf16 %v11573_v40, %v11572_v52 }
 0x786   : > { %7340 = vmatpush3.bf16.msra.mxu1 %v7339_v34  ;;  %v11575_v34 = vld [vmem:[#allocation153_spill] sm:$0xff] }
 0x787   : > { %7341 = vmatprep.subr.bf16.mxu1 %v11469_v25  ;;  %v7414_v41 = vpack.c.bf16 %v11575_v34, %v11574_v61  ;;  %v5043_v61 = vld [vmem:[#allocation20 + $0x68] sm:$0xff]  ;;  %v5041_v34 = vld [vmem:[#allocation20 + $0x58] sm:$0xff] }
 0x788   : > { %7364 = vmatpush3.bf16.msra.mxu0 %v7363_v46  ;;  %v11577_v46 = vld [vmem:[#allocation139_spill] sm:$0xff] }
 0x789   : > { %7365 = vmatprep.subr.bf16.mxu0 %v11469_v25  ;;  %v7393_v44 = vpack.c.bf16 %v11577_v46, %v11576_v47  ;;  %v5045_v47 = vld [vmem:[#allocation20 + $0x78] sm:$0xff]  ;;  %v5038_v46 = vld [vmem:[#allocation20 + $0x40] sm:$0xff] }
 0x78a   : > { %7343 = vmatpush3.bf16.msra.mxu1 %v7342_v2  ;;  %v11579_v2 = vld [vmem:[#allocation155_spill] sm:$0xff] }
 0x78b   : > { %7344 = vmatprep.subr.bf16.mxu1 %v11469_v25  ;;  %v7417_v11 = vpack.c.bf16 %v11579_v2, %v11578_v51  ;;  %v7482_v51 = vpack.c.bf16 %v5045_v47, %v5041_v34  ;;  %v5081_v47 = vld [vmem:[#allocation20 + $0x198] sm:$0xff] }
 0x78c   : > { %7367 = vmatpush3.bf16.msra.mxu0 %v7366_v56  ;;  %v11581_v56 = vld [vmem:[#allocation141_spill] sm:$0xff] }
 0x78d   : > { %7368 = vmatprep.subr.bf16.mxu0 %v11469_v25  ;;  %v7396_v30 = vpack.c.bf16 %v11581_v56, %v11580_v0  ;;  %v5044_v0 = vld [vmem:[#allocation20 + $0x70] sm:$0xff]  ;;  %v5047_v56 = vld [vmem:[#allocation20 + $0x88] sm:$0xff] }
 0x78e   : > { %7346 = vmatpush3.bf16.msra.mxu1 %v7345_v8  ;;  %v11582_v8 = vld [vmem:[#allocation156_spill] sm:$0xff] }
 0x78f   : > { %7347 = vmatprep.subr.bf16.mxu1 %v11469_v25  ;;  %v7420_v62 = vpack.c.bf16 %v11583_v19, %v11582_v8  ;;  %v5053_v8 = vld [vmem:[#allocation20 + $0xb8] sm:$0xff] }
 0x790   : > { %7370 = vmatpush3.bf16.msra.mxu0 %v7369_v18  ;;  %v7423_v18 = vpack.c.bf16 %v4843_v7, %v4842_v55  ;;  %v5051_v55 = vld [vmem:[#allocation20 + $0xa8] sm:$0xff]  ;;  %v5049_v7 = vld [vmem:[#allocation20 + $0x98] sm:$0xff] }
 0x791   : > { %7371 = vmatprep.subr.bf16.mxu0 %v11469_v25  ;;  %v7454_v19 = vpack.c.bf16 %v5051_v55, %v5047_v56  ;;  %v5078_v55 = vld [vmem:[#allocation20 + $0x180] sm:$0xff] }
 0x792   : > { %7349 = vmatpush3.bf16.msra.mxu1 %v7348_v29  ;;  %v4273_v29 = vcombine.high %v4269_v26, %v4269_v26 }
 0x793   : > { %7374 = vmatprep.subr.bf16.mxu1 %v11469_v25 }
 0x794   : > { %7373 = vmatpush3.bf16.msra.mxu0 %v7372_v38  ;;  %v4847_v38 = vld [vmem:[#allocation17 + $0x28] sm:$0xff] }
 0x795   : > { %6949 = vmatmul.mubr.f32.vlgmr.msra.gmra.mrb[4].mxu1 %v4255_v31  ;;  %7398 = vmatprep.subr.bf16.mxu0 %v11469_v25  ;;  %v7429_v24 = vpack.c.bf16 %v4847_v38, %v4846_v1  ;;  %v4850_v31 = vld [vmem:[#allocation17 + $0x40] sm:$0xff]  ;;  %v5059_v1 = vld [vmem:[#allocation20 + $0xe8] sm:$0xff] }
 0x796   : > { %7376 = vmatpush3.bf16.msra.mxu1 %v7375_v10  ;;  %7018 = vmatprep.mubr.msk.f32.mxu1 %vm11497_vm1, %v11496_v49  ;;  %v7432_v10 = vpack.c.bf16 %v4849_v9, %v4848_v16  ;;  %v7435_v42 = vpack.c.bf16 %v4851_v22, %v4850_v31  ;;  %v5057_v16 = vld [vmem:[#allocation20 + $0xd8] sm:$0xff]  ;;  %v5058_v22 = vld [vmem:[#allocation20 + $0xe0] sm:$0xff] }
 0x797   : > { %6984 = vmatmul.mubr.f32.vlgmr.msra.gmra.mrb[6].mxu0 %v4269_v26  ;;  %7377 = vmatprep.subr.bf16.mxu1 %v11469_v25  ;;  %v4853_v26 = vld [vmem:[#allocation17 + $0x58] sm:$0xff] }
 0x798   : > { %7400 = vmatpush3.bf16.msra.mxu0 %v7399_v5  ;;  %7053 = vmatprep.mubr.msk.f32.mxu0 %vm11497_vm1, %v11496_v49  ;;  %v4852_v5 = vld [vmem:[#allocation17 + $0x50] sm:$0xff]  ;;  %v5061_v9 = vld [vmem:[#allocation20 + $0xf8] sm:$0xff] }
 0x799   : > { %7401 = vmatprep.subr.bf16.mxu0 %v11469_v25  ;;  %v7438_v50 = vpack.c.bf16 %v4853_v26, %v4852_v5  ;;  %v7490_v31 = vpack.c.bf16 %v5061_v9, %v5057_v16  ;;  %v5060_v5 = vld [vmem:[#allocation20 + $0xf0] sm:$0xff] }
 0x79a   : > { %7379 = vmatpush3.bf16.msra.mxu1 %v7378_v33  ;;  %v4855_v33 = vld [vmem:[#allocation17 + $0x68] sm:$0xff]  ;;  %v5088_v16 = vld [vmem:[#allocation20 + $0x1d0] sm:$0xff] }
 0x79b   : > { %7380 = vmatprep.subr.bf16.mxu1 %v11469_v25  ;;  %v7441_v3 = vpack.c.bf16 %v4855_v33, %v4854_v17  ;;  %v5067_v17 = vld [vmem:[#allocation20 + $0x128] sm:$0xff]  ;;  %v5065_v33 = vld [vmem:[#allocation20 + $0x118] sm:$0xff] }
 0x79c   : > { %7403 = vmatpush3.bf16.msra.mxu0 %v7402_v20  ;;  %v4857_v20 = vld [vmem:[#allocation17 + $0x78] sm:$0xff] }
 0x79d   : > { %7404 = vmatprep.subr.bf16.mxu0 %v11469_v25  ;;  %v7444_v53 = vpack.c.bf16 %v4857_v20, %v4856_v35  ;;  %v5069_v20 = vld [vmem:[#allocation20 + $0x138] sm:$0xff] }
 0x79e   : > { %7382 = vmatpush3.bf16.msra.mxu1 %v7381_v14  ;;  %v5031_v14 = vld [vmem:[#allocation20 + $0x8] sm:$0xff] }
 0x79f   : > { %7383 = vmatprep.subr.bf16.mxu1 %v11469_v25 }
 0x7a0   : > { %7406 = vmatpush3.bf16.msra.mxu0 %v7405_v32  ;;  %v7446_v32 = vpack.c.bf16 %v5035_v63, %v5031_v14  ;;  %v5066_v14 = vld [vmem:[#allocation20 + $0x120] sm:$0xff]  ;;  %v7494_v63 = vpack.c.bf16 %v5069_v20, %v5065_v33 }
 0x7a1   : > { %7407 = vmatprep.subr.bf16.mxu0 %v11469_v25 }
 0x7a2   : > { %7385 = vmatpush3.bf16.msra.mxu1 %v7384_v13  ;;  %v5034_v13 = vld [vmem:[#allocation20 + $0x20] sm:$0xff] }
 0x7a3   : > { %7386 = vmatprep.subr.bf16.mxu1 %v11469_v25  ;;  %v7448_v37 = vpack.c.bf16 %v5034_v13, %v5030_v45  ;;  %v5075_v45 = vld [vmem:[#allocation20 + $0x168] sm:$0xff]  ;;  %v5073_v13 = vld [vmem:[#allocation20 + $0x158] sm:$0xff] }
 0x7a4   : > { %7409 = vmatpush3.bf16.msra.mxu0 %v7408_v12  ;;  %v5032_v12 = vld [vmem:[#allocation20 + $0x10] sm:$0xff] }
 0x7a5   : > { %7410 = vmatprep.subr.bf16.mxu0 %v11469_v25  ;;  %v7480_v15 = vpack.c.bf16 %v5036_v28, %v5032_v12  ;;  %v7466_v28 = vpack.c.bf16 %v5075_v45, %v5071_v48 }
 0x7a6   : > { %7388 = vmatpush3.bf16.msra.mxu1 %v7387_v54 }
 0x7a7   : > { %7389 = vmatprep.subr.bf16.mxu1 %v11469_v25 }
 0x7a8   : > { %7412 = vmatpush3.bf16.msra.mxu0 %v7411_v58 }
 0x7a9   : > { %7413 = vmatprep.subr.bf16.mxu0 %v11469_v25 }
 0x7aa   : > { %7391 = vmatpush3.bf16.msra.mxu1 %v7390_v6  ;;  %v5039_v6 = vld [vmem:[#allocation20 + $0x48] sm:$0xff] }
 0x7ab   : > { %7392 = vmatprep.subr.bf16.mxu1 %v11469_v25 }
 0x7ac   : > { %7415 = vmatpush3.bf16.msra.mxu0 %v7414_v41  ;;  %v7450_v41 = vpack.c.bf16 %v5043_v61, %v5039_v6  ;;  %v5079_v6 = vld [vmem:[#allocation20 + $0x188] sm:$0xff] }
 0x7ad   : > { %7416 = vmatprep.subr.bf16.mxu0 %v11469_v25  ;;  %v5083_v61 = vld [vmem:[#allocation20 + $0x1a8] sm:$0xff] }
 0x7ae   : > { %7394 = vmatpush3.bf16.msra.mxu1 %v7393_v44  ;;  %v5042_v44 = vld [vmem:[#allocation20 + $0x60] sm:$0xff] }
 0x7af   : > { %7395 = vmatprep.subr.bf16.mxu1 %v11469_v25  ;;  %v7452_v2 = vpack.c.bf16 %v5042_v44, %v5038_v46  ;;  %v5085_v46 = vld [vmem:[#allocation20 + $0x1b8] sm:$0xff] }
 0x7b0   : > { %7418 = vmatpush3.bf16.msra.mxu0 %v7417_v11  ;;  %v5040_v11 = vld [vmem:[#allocation20 + $0x50] sm:$0xff] }
 0x7b1   : > { %7419 = vmatprep.subr.bf16.mxu0 %v11469_v25 }
 0x7b2   : > { %7397 = vmatpush3.bf16.msra.mxu1 %v7396_v30  ;;  %v7484_v30 = vpack.c.bf16 %v5044_v0, %v5040_v11 }
 0x7b3   : > { %7422 = vmatprep.subr.bf16.mxu1 %v11469_v25 }
 0x7b4   : > { %7421 = vmatpush3.bf16.msra.mxu0 %v7420_v62  ;;  %v7486_v62 = vpack.c.bf16 %v5053_v8, %v5049_v7  ;;  %v5082_v7 = vld [vmem:[#allocation20 + $0x1a0] sm:$0xff]  ;;  %v5080_v8 = vld [vmem:[#allocation20 + $0x190] sm:$0xff] }
 0x7b5   : > { %7019 = vmatmul.mubr.f32.vlgmr.msra.gmra.mrb[6].mxu1 %v4271_v27  ;;  %7447 = vmatprep.subr.bf16.mxu0 %v7446_v32  ;;  %v5050_v27 = vld [vmem:[#allocation20 + $0xa0] sm:$0xff]  ;;  %v5068_v32 = vld [vmem:[#allocation20 + $0x130] sm:$0xff] }
 0x7b6   : > { %7424 = vmatpush3.bf16.msra.mxu1 %v7423_v18  ;;  %7088 = vmatprep.mubr.msk.f32.mxu1 %vm11497_vm1, %v11496_v49  ;;  %v5046_v18 = vld [vmem:[#allocation20 + $0x80] sm:$0xff]  ;;  %v7496_v12 = vpack.c.bf16 %v5068_v32, %v5064_v57 }
 0x7b7   : > { %7054 = vmatmul.mubr.f32.vlgmr.msra.gmra.mrb[8].mxu0 %v4273_v29  ;;  %7425 = vmatprep.subr.bf16.mxu1 %v11469_v25  ;;  %v7456_v60 = vpack.c.bf16 %v5050_v27, %v5046_v18  ;;  %v5052_v29 = vld [vmem:[#allocation20 + $0xb0] sm:$0xff]  ;;  %v5087_v18 = vld [vmem:[#allocation20 + $0x1c8] sm:$0xff] }
 0x7b8   : > { %5158 = vmatprep.mubr.f32.mxu0 %v11496_v49  ;;  %7449 = vmatpush1.bf16.msra.mxu0 %v7448_v37  ;;  %v7488_v38 = vpack.c.bf16 %v5052_v29, %v5048_v39  ;;  %v5091_v27 = vld [vmem:[#allocation20 + $0x1e8] sm:$0xff]  ;;  %v5093_v29 = vld [vmem:[#allocation20 + $0x1f8] sm:$0xff] }
 0x7b9   : > { %7451 = vmatprep.subr.bf16.mxu0 %v7450_v41 }
 0x7ba   : > { %7427 = vmatpush3.bf16.msra.mxu1 %v7426_v43  ;;  %v5055_v43 = vld [vmem:[#allocation20 + $0xc8] sm:$0xff] }
 0x7bb   : > { %7428 = vmatprep.subr.bf16.mxu1 %v11469_v25 }
 0x7bc   : > { %7453 = vmatpush1.bf16.msra.mxu0 %v7452_v2 }
 0x7bd   : > { %7455 = vmatprep.subr.bf16.mxu0 %v7454_v19  ;;  %v7502_v19 = vpack.c.bf16 %v5085_v46, %v5081_v47  ;;  %v4968_v47 = vld [vmem:[#allocation18 + $0x10] sm:$0xff] }
 0x7be   : > { %7430 = vmatpush3.bf16.msra.mxu1 %v7429_v24  ;;  %v7458_v24 = vpack.c.bf16 %v5059_v1, %v5055_v43  ;;  %v7474_v1 = vpack.c.bf16 %v5091_v27, %v5087_v18  ;;  %v4972_v46 = vld [vmem:[#allocation18 + $0x30] sm:$0xff] }
 0x7bf   : > { %7431 = vmatprep.subr.bf16.mxu1 %v11469_v25  ;;  %v4976_v18 = vld [vmem:[#allocation18 + $0x50] sm:$0xff] }
 0x7c0   : > { %7457 = vmatpush1.bf16.msra.mxu0 %v7456_v60  ;;  %v5089_v60 = vld [vmem:[#allocation20 + $0x1d8] sm:$0xff]  ;;  %v4980_v27 = vld [vmem:[#allocation18 + $0x70] sm:$0xff] }
 0x7c1   : > { %7459 = vmatprep.subr.bf16.mxu0 %v7458_v24  ;;  %v5090_v24 = vld [vmem:[#allocation20 + $0x1e0] sm:$0xff]  ;;  %v7506_v9 = vpack.c.bf16 %v5093_v29, %v5089_v60  ;;  %v4987_v60 = vld [vmem:[#allocation18 + $0xa8] sm:$0xff]  ;;  %v4985_v29 = vld [vmem:[#allocation18 + $0x98] sm:$0xff] }
 0x7c2   : > { %7433 = vmatpush3.bf16.msra.mxu1 %v7432_v10  ;;  %v5054_v10 = vld [vmem:[#allocation20 + $0xc0] sm:$0xff] }
 0x7c3   : > { %7434 = vmatprep.subr.bf16.mxu1 %v11469_v25  ;;  %v7460_v26 = vpack.c.bf16 %v5058_v22, %v5054_v10  ;;  %v5092_v10 = vld [vmem:[#allocation20 + $0x1f0] sm:$0xff]  ;;  %v4971_v22 = vld [vmem:[#allocation18 + $0x28] sm:$0xff] }
 0x7c5   : > { %7461 = vmatpush1.bf16.msra.mxu0 %v7460_v26 }
 0x7c6   : > { %7436 = vmatpush3.bf16.msra.mxu1 %v7435_v42  ;;  %v5056_v42 = vld [vmem:[#allocation20 + $0xd0] sm:$0xff] }
 0x7c7   : > { %7437 = vmatprep.subr.bf16.mxu1 %v11469_v25 }
 0x7ca   : > { %7439 = vmatpush3.bf16.msra.mxu1 %v7438_v50  ;;  %v5063_v50 = vld [vmem:[#allocation20 + $0x108] sm:$0xff] }
 0x7cb   : > { %7440 = vmatprep.subr.bf16.mxu1 %v11469_v25  ;;  %v7462_v35 = vpack.c.bf16 %v5067_v17, %v5063_v50  ;;  %v7508_v50 = vpack.c.bf16 %v5092_v10, %v5088_v16  ;;  %v4984_v10 = vld [vmem:[#allocation18 + $0x90] sm:$0xff] }
 0x7cd   : > { %7463 = vmatprep.subr.bf16.mxu0 %v7462_v35 }
 0x7ce   : > { %7442 = vmatpush3.bf16.msra.mxu1 %v7441_v3  ;;  %v7492_v3 = vpack.c.bf16 %v5060_v5, %v5056_v42  ;;  %v4969_v42 = vld [vmem:[#allocation18 + $0x18] sm:$0xff] }
 0x7cf   : > { %7443 = vmatprep.subr.bf16.mxu1 %v11469_v25  ;;  %v4973_v5 = vld [vmem:[#allocation18 + $0x38] sm:$0xff] }
 0x7d0   : > { %v7542_v33 = vpack.c.bf16 %v4973_v5, %v4969_v42  ;;  %v4995_v42 = vld [vmem:[#allocation18 + $0xe8] sm:$0xff]  ;;  %v4993_v5 = vld [vmem:[#allocation18 + $0xd8] sm:$0xff] }
 0x7d2   : > { %7445 = vmatpush3.bf16.msra.mxu1 %v7444_v53  ;;  %v5062_v53 = vld [vmem:[#allocation20 + $0x100] sm:$0xff] }
 0x7d3   : > { %7479 = vmatprep.subr.bf16.mxu1 %v7478_v59  ;;  %v5077_v59 = vld [vmem:[#allocation20 + $0x178] sm:$0xff]  ;;  %v7464_v37 = vpack.c.bf16 %v5066_v14, %v5062_v53 }
 0x7d5   : > { %7089 = vmatmul.mubr.f32.vlgmr.msra.gmra.mrb[8].mxu1 %v10771_v21  ;;  %7465 = vmatpush1.bf16.msra.mxu0 %v7464_v37 }
 0x7d6   : > { %5229 = vmatprep.mubr.f32.mxu1 %v11496_v49  ;;  %7481 = vmatpush1.bf16.msra.mxu1 %v7480_v15  ;;  %v5070_v15 = vld [vmem:[#allocation20 + $0x140] sm:$0xff] }
 0x7d7   : > { %7483 = vmatprep.subr.bf16.mxu1 %v7482_v51  ;;  %7467 = vmatprep.subr.bf16.mxu0 %v7466_v28 }
 0x7da   : > { %7485 = vmatpush1.bf16.msra.mxu1 %v7484_v30  ;;  %v7470_v30 = vpack.c.bf16 %v5083_v61, %v5079_v6 }
 0x7db   : > { %7487 = vmatprep.subr.bf16.mxu1 %v7486_v62  ;;  %v5084_v62 = vld [vmem:[#allocation20 + $0x1b0] sm:$0xff] }
 0x7dc   : > { %v7504_v43 = vpack.c.bf16 %v5084_v62, %v5080_v8 }
 0x7de   : > { %7489 = vmatpush1.bf16.msra.mxu1 %v7488_v38  ;;  %v5086_v38 = vld [vmem:[#allocation20 + $0x1c0] sm:$0xff] }
 0x7df   : > { %7491 = vmatprep.subr.bf16.mxu1 %v7490_v31  ;;  %v4967_v31 = vld [vmem:[#allocation18 + $0x8] sm:$0xff]  ;;  %v7476_v26 = vpack.c.bf16 %v5090_v24, %v5086_v38  ;;  %v4982_v38 = vld [vmem:[#allocation18 + $0x80] sm:$0xff] }
 0x7e0   : > { %v7510_v17 = vpack.c.bf16 %v4971_v22, %v4967_v31  ;;  %v4986_v24 = vld [vmem:[#allocation18 + $0xa0] sm:$0xff]  ;;  %v4988_v31 = vld [vmem:[#allocation18 + $0xb0] sm:$0xff]  ;;  %v4991_v22 = vld [vmem:[#allocation18 + $0xc8] sm:$0xff] }
 0x7e2   : > { %7493 = vmatpush1.bf16.msra.mxu1 %v7492_v3 }
 0x7e3   : > { %7495 = vmatprep.subr.bf16.mxu1 %v7494_v63 }
 0x7e6   : > { %7497 = vmatpush1.bf16.msra.mxu1 %v7496_v12 }
 0x828   : > { %v4348_v54 = vpop.f32.mrb[0].mxu1 }
 0x829   : > { %v6810_v23 = vpop.f32.mrb[1].mxu1 }
 0x82a   : > { %v4418_v4 = vpop.f32.mrb[2].mxu0  ;;  %v5072_v23 = vld [vmem:[#allocation20 + $0x150] sm:$0xff] }
 0x82b   : > { %v4949_v58 = vrot.slane %v4418_v4, 7  ;;  %v6845_v52 = vpop.f32.mrb[3].mxu0 }
 0x82c   : > { %v5076_v52 = vld [vmem:[#allocation20 + $0x170] sm:$0xff] }
 0x82d   : > { %v10776_v40 = vsel %vm11584_vm2, %v4949_v58, %v4348_v54  ;;  %v5074_v54 = vld [vmem:[#allocation20 + $0x160] sm:$0xff]  ;;  %v7498_v58 = vpack.c.bf16 %v5077_v59, %v5073_v13  ;;  %v7500_v56 = vpack.c.bf16 %v5076_v52, %v5072_v23 }
 0x82e   : > { %v7468_v51 = vpack.c.bf16 %v5074_v54, %v5070_v15  ;;  %v6070_v54 = vld [vmem:[%s11586_s9] ss:$0 sm:$0xff] }
 0x82f   : > { %7499 = vmatprep.subr.bf16.mxu1 %v7498_v58 }
 0x830   : > { %7469 = vmatpush1.bf16.msra.mxu0 %v7468_v51  ;;  %7501 = vmatpush1.bf16.msra.mxu1 %v7500_v56  ;;  %v4979_v51 = vld [vmem:[#allocation18 + $0x68] sm:$0xff] }
 0x831   : > { %7471 = vmatprep.subr.bf16.mxu0 %v7470_v30  ;;  %7503 = vmatprep.subr.bf16.mxu1 %v7502_v19  ;;  %v7544_v30 = vpack.c.bf16 %v4972_v46, %v4968_v47 }
 0x834   : > { %7505 = vmatpush1.bf16.msra.mxu1 %v7504_v43 }
 0x835   : > { %7507 = vmatprep.subr.bf16.mxu1 %v7506_v9 }
 0x838   : > { %7509 = vmatpush1.bf16.msra.mxu1 %v7508_v50  ;;  %v7520_v50 = vpack.c.bf16 %v4986_v24, %v4982_v38  ;;  %v5022_v38 = vld [vmem:[#allocation18 + $0x1c0] sm:$0xff] }
 0x839   : > { %7543 = vmatprep.subr.bf16.mxu1 %v7542_v33  ;;  %v4990_v33 = vld [vmem:[#allocation18 + $0xc0] sm:$0xff] }
 0x83a   : > { %v5026_v24 = vld [vmem:[#allocation18 + $0x1e0] sm:$0xff] }
 0x848   : > { %v4488_v4 = vpop.f32.mrb[2].mxu1 }
 0x849   : > { %v4951_v34 = vrot.slane %v4488_v4, 6  ;;  %v6880_v41 = vpop.f32.mrb[3].mxu1 }
 0x84a   : > { %v4558_v44 = vpop.f32.mrb[4].mxu0  ;;  %v4970_v41 = vld [vmem:[#allocation18 + $0x20] sm:$0xff] }
 0x84b   : > { %v4952_v2 = vsel %vm11585_vm3, %v4951_v34, %v10776_v40  ;;  %v4953_v11 = vrot.slane %v4558_v44, 5  ;;  %v6915_v0 = vpop.f32.mrb[5].mxu0  ;;  %v7472_v40 = vpack.c.bf16 %v5082_v7, %v5078_v55  ;;  %v4966_v34 = vld [vmem:[#allocation18] sm:$0xff]  ;;  %v4975_v44 = vld [vmem:[#allocation18 + $0x48] sm:$0xff] }
 0x84c   : > { %v7512_v56 = vpack.c.bf16 %v4970_v41, %v4966_v34  ;;  %v4974_v55 = vld [vmem:[#allocation18 + $0x40] sm:$0xff]  ;;  %v7514_v19 = vpack.c.bf16 %v4979_v51, %v4975_v44  ;;  %v5008_v44 = vld [vmem:[#allocation18 + $0x150] sm:$0xff] }
 0x84d   : > { %v4954_v39 = vsel %vm4202_vm8, %v4953_v11, %v4952_v2  ;;  %7473 = vmatpush1.bf16.msra.mxu0 %v7472_v40  ;;  %v4977_v2 = vld [vmem:[#allocation18 + $0x58] sm:$0xff]  ;;  %v4978_v7 = vld [vmem:[#allocation18 + $0x60] sm:$0xff]  ;;  %v5012_v51 = vld [vmem:[#allocation18 + $0x170] sm:$0xff] }
 0x84e   : > { %7475 = vmatprep.subr.bf16.mxu0 %v7474_v1  ;;  %v4981_v11 = vld [vmem:[#allocation18 + $0x78] sm:$0xff]  ;;  %v7516_v43 = vpack.c.bf16 %v4978_v7, %v4974_v55  ;;  %v7548_v1 = vpack.c.bf16 %v4980_v27, %v4976_v18  ;;  %v5006_v34 = vld [vmem:[#allocation18 + $0x140] sm:$0xff]  ;;  %v7564_v55 = vpack.c.bf16 %v5012_v51, %v5008_v44  ;;  %v5016_v18 = vld [vmem:[#allocation18 + $0x190] sm:$0xff] }
 0x84f   : > { %v7546_v62 = vpack.c.bf16 %v4981_v11, %v4977_v2  ;;  %v4989_v40 = vld [vmem:[#allocation18 + $0xb8] sm:$0xff]  ;;  %v5010_v41 = vld [vmem:[#allocation18 + $0x160] sm:$0xff]  ;;  %v5015_v2 = vld [vmem:[#allocation18 + $0x188] sm:$0xff] }
 0x850   : > { %v7550_v9 = vpack.c.bf16 %v4989_v40, %v4985_v29  ;;  %v5019_v11 = vld [vmem:[#allocation18 + $0x1a8] sm:$0xff]  ;;  %v5014_v7 = vld [vmem:[#allocation18 + $0x180] sm:$0xff]  ;;  %v5020_v27 = vld [vmem:[#allocation18 + $0x1b0] sm:$0xff] }
 0x851   : > { %7477 = vmatpush1.bf16.msra.mxu0 %v7476_v26  ;;  %v4997_v26 = vld [vmem:[#allocation18 + $0xf8] sm:$0xff]  ;;  %v5422_v51 = vld [vmem:[#allocation21 + $0x90] sm:$0xff] }
 0x852   : > { %7511 = vmatprep.subr.bf16.mxu0 %v7510_v17  ;;  %v7552_v17 = vpack.c.bf16 %v4988_v31, %v4984_v10  ;;  %v5025_v29 = vld [vmem:[#allocation18 + $0x1d8] sm:$0xff]  ;;  %v5024_v10 = vld [vmem:[#allocation18 + $0x1d0] sm:$0xff] }
 0x853   : > { %v5029_v40 = vld [vmem:[#allocation18 + $0x1f8] sm:$0xff]  ;;  %v5028_v31 = vld [vmem:[#allocation18 + $0x1f0] sm:$0xff] }
 0x868   : > { %v4628_v3 = vpop.f32.mrb[4].mxu1 }
 0x869   : > { %v4955_v35 = vrot.slane %v4628_v3, 4  ;;  %v6950_v20 = vpop.f32.mrb[5].mxu1  ;;  %v4994_v3 = vld [vmem:[#allocation18 + $0xe0] sm:$0xff] }
 0x86a   : > { %v4698_v53 = vpop.f32.mrb[6].mxu0  ;;  %v7554_v20 = vpack.c.bf16 %v4997_v26, %v4993_v5  ;;  %v5407_v5 = vld [vmem:[#allocation21 + $0x18] sm:$0xff] }
 0x86b   : > { %v4956_v14 = vsel %vm4204_vm12, %v4955_v35, %v4954_v39  ;;  %v4957_v63 = vrot.slane %v4698_v53, 3  ;;  %v6985_v57 = vpop.f32.mrb[7].mxu0  ;;  %v4983_v39 = vld [vmem:[#allocation18 + $0x88] sm:$0xff]  ;;  %v7522_v35 = vpack.c.bf16 %v4995_v42, %v4991_v22  ;;  %v4992_v53 = vld [vmem:[#allocation18 + $0xd0] sm:$0xff]  ;;  %v5411_v26 = vld [vmem:[#allocation21 + $0x38] sm:$0xff] }
 0x86c   : > { %v7518_v16 = vpack.c.bf16 %v4987_v60, %v4983_v39  ;;  %v5003_v57 = vld [vmem:[#allocation18 + $0x128] sm:$0xff] }
 0x86d   : > { %v4958_v32 = vsel %vm4206_vm10, %v4957_v63, %v4956_v14  ;;  %v4996_v14 = vld [vmem:[#allocation18 + $0xf0] sm:$0xff]  ;;  %v4999_v63 = vld [vmem:[#allocation18 + $0x108] sm:$0xff] }
 0x86e   : > { %v5023_v39 = vld [vmem:[#allocation18 + $0x1c8] sm:$0xff] }
 0x86f   : > { %v5027_v60 = vld [vmem:[#allocation18 + $0x1e8] sm:$0xff] }
 0x870   : > { %v5405_v22 = vld [vmem:[#allocation21 + $0x8] sm:$0xff] }
 0x871   : > { %v5409_v42 = vld [vmem:[#allocation21 + $0x28] sm:$0xff] }
 0x888   : > { %v4768_v48 = vpop.f32.mrb[6].mxu1 }
 0x889   : > { %v4959_v45 = vrot.slane %v4768_v48, 2  ;;  %v7020_v13 = vpop.f32.mrb[7].mxu1  ;;  %v5005_v48 = vld [vmem:[#allocation18 + $0x138] sm:$0xff] }
 0x88a   : > { %v4838_v59 = vpop.f32.mrb[8].mxu0  ;;  %v7556_v13 = vpack.c.bf16 %v4996_v14, %v4992_v53  ;;  %v5406_v53 = vld [vmem:[#allocation21 + $0x10] sm:$0xff] }
 0x88b   : > { %v4960_v37 = vsel %vm4208_vm11, %v4959_v45, %v4958_v32  ;;  %v4961_v12 = vrot.slane %v4838_v59, 1  ;;  %v7055_v28 = vpop.f32.mrb[9].mxu0  ;;  %v5001_v32 = vld [vmem:[#allocation18 + $0x118] sm:$0xff]  ;;  %v7524_v45 = vpack.c.bf16 %v4994_v3, %v4990_v33  ;;  %v4998_v59 = vld [vmem:[#allocation18 + $0x100] sm:$0xff]  ;;  %v5410_v14 = vld [vmem:[#allocation21 + $0x30] sm:$0xff] }
 0x88c   : > { %v7558_v28 = vpack.c.bf16 %v5005_v48, %v5001_v32  ;;  %v5404_v33 = vld [vmem:[#allocation21] sm:$0xff]  ;;  %v5415_v32 = vld [vmem:[#allocation21 + $0x58] sm:$0xff] }
 0x88d   : > { %v4962_v15 = vsel %vm4210_vm13, %v4961_v12, %v4960_v37  ;;  %v5002_v37 = vld [vmem:[#allocation18 + $0x120] sm:$0xff]  ;;  %v7526_v12 = vpack.c.bf16 %v5003_v57, %v4999_v63  ;;  %v5413_v63 = vld [vmem:[#allocation21 + $0x48] sm:$0xff]  ;;  %v5419_v48 = vld [vmem:[#allocation21 + $0x78] sm:$0xff] }
 0x88e   : > { %v5408_v3 = vld [vmem:[#allocation21 + $0x20] sm:$0xff]  ;;  %v5417_v57 = vld [vmem:[#allocation21 + $0x68] sm:$0xff] }
 0x8a8   : > { %v4931_v23 = vpop.f32.mrb[8].mxu1 }
 0x8a9   : > { %v4932_v4 = vadd.f32 %v6070_v54, %v4931_v23  ;;  %v7090_v58 = vpop.f32.mrb[9].mxu1  ;;  %v5004_v54 = vld [vmem:[#allocation18 + $0x130] sm:$0xff]  ;;  %v5007_v23 = vld [vmem:[#allocation18 + $0x148] sm:$0xff] }
 0x8aa   : > { %v5009_v58 = vld [vmem:[#allocation18 + $0x158] sm:$0xff] }
 0x8ab   : > { %v6071_v52 = vmul.f32 -1.442695, %v4932_v4  ;;  %v5011_v4 = vld [vmem:[#allocation18 + $0x168] sm:$0xff] }
 0x8ac   : > { %v7530_v47 = vpack.c.bf16 %v5011_v4, %v5007_v23  ;;  %v5418_v23 = vld [vmem:[#allocation21 + $0x70] sm:$0xff]  ;;  %v5421_v4 = vld [vmem:[#allocation21 + $0x88] sm:$0xff] }
 0x8ad   : > { %7876 = vpow2.f32 %v6071_v52  ;;  %v5013_v52 = vld [vmem:[#allocation18 + $0x178] sm:$0xff] }
 0x8ae   : > { %v7562_v46 = vpack.c.bf16 %v5013_v52, %v5009_v58  ;;  %v5425_v58 = vld [vmem:[#allocation21 + $0xa8] sm:$0xff]  ;;  %v5423_v52 = vld [vmem:[#allocation21 + $0x98] sm:$0xff] }
 0x8b7   : > { %v7877_v6 = vpop.eup %7876 }
 0x8b8   : > { %v4938_v61 = vadd.f32 1.0, %v7877_v6  ;;  %v7528_v6 = vpack.c.bf16 %v5002_v37, %v4998_v59  ;;  %v7608_v59 = vpack.c.bf16 %v5410_v14, %v5406_v53  ;;  %v5412_v37 = vld [vmem:[#allocation21 + $0x40] sm:$0xff]  ;;  %v5446_v14 = vld [vmem:[#allocation21 + $0x150] sm:$0xff] }
 0x8ba   : > { %7878 = vrcp.f32 %v4938_v61 }
 0x8c4   : > { %v7879_v0 = vpop.eup %7878 }
 0x8c5   : > { %v4964_v8 = vmul.f32 %v7879_v0, %v4962_v15  ;;  %v5000_v15 = vld [vmem:[#allocation18 + $0x110] sm:$0xff]  ;;  %v5017_v0 = vld [vmem:[#allocation18 + $0x198] sm:$0xff] }
 0x8c6   : > { %v7560_v61 = vpack.c.bf16 %v5004_v54, %v5000_v15  ;;  %v7610_v15 = vpack.c.bf16 %v5419_v48, %v5415_v32  ;;  %v5414_v54 = vld [vmem:[#allocation21 + $0x50] sm:$0xff]  ;;  %v5457_v32 = vld [vmem:[#allocation21 + $0x1a8] sm:$0xff]  ;;  %v5455_v48 = vld [vmem:[#allocation21 + $0x198] sm:$0xff] }
 0x8c7   : > { %5159 = vmatmul.mubr.f32.vlgmr.msra.gmra.mrb[10].mxu0 %v4964_v8  ;;  %5230 = vmatmul.mubr.f32.vlgmr.msra.gmra.mrb[10].mxu1 %v4964_v8  ;;  %v5018_v8 = vld [vmem:[#allocation18 + $0x1a0] sm:$0xff] }
 0x8c8   : > { %7513 = vmatpush1.bf16.msra.mxu0 %v7512_v56  ;;  %7545 = vmatpush1.bf16.msra.mxu1 %v7544_v30  ;;  %v5021_v56 = vld [vmem:[#allocation18 + $0x1b8] sm:$0xff]  ;;  %v7532_v30 = vpack.c.bf16 %v5010_v41, %v5006_v34  ;;  %v7612_v34 = vpack.c.bf16 %v5418_v23, %v5414_v54  ;;  %v5420_v41 = vld [vmem:[#allocation21 + $0x80] sm:$0xff]  ;;  %v5454_v54 = vld [vmem:[#allocation21 + $0x190] sm:$0xff] }
 0x8c9   : > { %7515 = vmatprep.subr.bf16.mxu0 %v7514_v19  ;;  %7547 = vmatprep.subr.bf16.mxu1 %v7546_v62  ;;  %v7534_v19 = vpack.c.bf16 %v5019_v11, %v5015_v2  ;;  %v7566_v62 = vpack.c.bf16 %v5021_v56, %v5017_v0  ;;  %v5426_v2 = vld [vmem:[#allocation21 + $0xb0] sm:$0xff]  ;;  %v5429_v11 = vld [vmem:[#allocation21 + $0xc8] sm:$0xff]  ;;  %v5431_v56 = vld [vmem:[#allocation21 + $0xd8] sm:$0xff] }
 0x8ca   : > { %5300 = vmatprep.mubr.f32.mxu0 %v11496_v49  ;;  %5371 = vmatprep.mubr.f32.mxu1 %v11496_v49  ;;  %v5433_v0 = vld [vmem:[#allocation21 + $0xe8] sm:$0xff]  ;;  %v5458_v23 = vld [vmem:[#allocation21 + $0x1b0] sm:$0xff] }
 0x8cc   : > { %7517 = vmatpush1.bf16.msra.mxu0 %v7516_v43  ;;  %7549 = vmatpush1.bf16.msra.mxu1 %v7548_v1  ;;  %v7536_v43 = vpack.c.bf16 %v5018_v8, %v5014_v7  ;;  %v7568_v1 = vpack.c.bf16 %v5020_v27, %v5016_v18  ;;  %v7616_v7 = vpack.c.bf16 %v5426_v2, %v5422_v51  ;;  %v5428_v8 = vld [vmem:[#allocation21 + $0xc0] sm:$0xff]  ;;  %v5430_v27 = vld [vmem:[#allocation21 + $0xd0] sm:$0xff] }
 0x8cd   : > { %7519 = vmatprep.subr.bf16.mxu0 %v7518_v16  ;;  %7551 = vmatprep.subr.bf16.mxu1 %v7550_v9  ;;  %v7538_v16 = vpack.c.bf16 %v5027_v60, %v5023_v39  ;;  %v7570_v9 = vpack.c.bf16 %v5029_v40, %v5025_v29  ;;  %v5434_v39 = vld [vmem:[#allocation21 + $0xf0] sm:$0xff]  ;;  %v5437_v60 = vld [vmem:[#allocation21 + $0x108] sm:$0xff]  ;;  %v5439_v40 = vld [vmem:[#allocation21 + $0x118] sm:$0xff] }
 0x8ce   : > { %v5441_v29 = vld [vmem:[#allocation21 + $0x128] sm:$0xff]  ;;  %v5462_v51 = vld [vmem:[#allocation21 + $0x1d0] sm:$0xff] }
 0x8cf   : > { %v5466_v2 = vld [vmem:[#allocation21 + $0x1f0] sm:$0xff] }
 0x8d0   : > { %7521 = vmatpush1.bf16.msra.mxu0 %v7520_v50  ;;  %7553 = vmatpush1.bf16.msra.mxu1 %v7552_v17  ;;  %v7540_v50 = vpack.c.bf16 %v5026_v24, %v5022_v38  ;;  %v7572_v17 = vpack.c.bf16 %v5028_v31, %v5024_v10  ;;  %v7620_v38 = vpack.c.bf16 %v5434_v39, %v5430_v27  ;;  %v5436_v24 = vld [vmem:[#allocation21 + $0x100] sm:$0xff]  ;;  %v5438_v31 = vld [vmem:[#allocation21 + $0x110] sm:$0xff] }
 0x8d1   : > { %7523 = vmatprep.subr.bf16.mxu0 %v7522_v35  ;;  %7555 = vmatprep.subr.bf16.mxu1 %v7554_v20  ;;  %v7574_v35 = vpack.c.bf16 %v5409_v42, %v5405_v22  ;;  %v7606_v20 = vpack.c.bf16 %v5411_v26, %v5407_v5  ;;  %v5442_v22 = vld [vmem:[#allocation21 + $0x130] sm:$0xff]  ;;  %v5445_v42 = vld [vmem:[#allocation21 + $0x148] sm:$0xff]  ;;  %v5447_v26 = vld [vmem:[#allocation21 + $0x158] sm:$0xff] }
 0x8d2   : > { %v5449_v5 = vld [vmem:[#allocation21 + $0x168] sm:$0xff]  ;;  %v5672_v39 = vld [vmem:[#allocation23 + $0x30] sm:$0xff] }
 0x8d4   : > { %7525 = vmatpush1.bf16.msra.mxu0 %v7524_v45  ;;  %7557 = vmatpush1.bf16.msra.mxu1 %v7556_v13  ;;  %v4965_v45 = vld [vmem:[%s817_s3] sm:$0xff]  ;;  %v7576_v13 = vpack.c.bf16 %v5408_v3, %v5404_v33  ;;  %v7624_v33 = vpack.c.bf16 %v5442_v22, %v5438_v31  ;;  %v5444_v3 = vld [vmem:[#allocation21 + $0x140] sm:$0xff] }
 0x8d5   : > { %7527 = vmatprep.subr.bf16.mxu0 %v7526_v12  ;;  %7559 = vmatprep.subr.bf16.mxu1 %v7558_v28  ;;  %v5416_v12 = vld [vmem:[#allocation21 + $0x60] sm:$0xff]  ;;  %v7578_v28 = vpack.c.bf16 %v5417_v57, %v5413_v63  ;;  %v5450_v63 = vld [vmem:[#allocation21 + $0x170] sm:$0xff]  ;;  %v5453_v57 = vld [vmem:[#allocation21 + $0x188] sm:$0xff] }
 0x8d6   : > { %v5681_v31 = vld [vmem:[#allocation23 + $0x78] sm:$0xff] }
 0x8d8   : > { %7529 = vmatpush1.bf16.msra.mxu0 %v7528_v6  ;;  %7561 = vmatpush1.bf16.msra.mxu1 %v7560_v61  ;;  %v5427_v6 = vld [vmem:[#allocation21 + $0xb8] sm:$0xff]  ;;  %v7580_v61 = vpack.c.bf16 %v5416_v12, %v5412_v37  ;;  %v5452_v37 = vld [vmem:[#allocation21 + $0x180] sm:$0xff] }
 0x8d9   : > { %7531 = vmatprep.subr.bf16.mxu0 %v7530_v47  ;;  %7563 = vmatprep.subr.bf16.mxu1 %v7562_v46  ;;  %v5424_v47 = vld [vmem:[#allocation21 + $0xa0] sm:$0xff]  ;;  %v7582_v46 = vpack.c.bf16 %v5425_v58, %v5421_v4  ;;  %v7614_v44 = vpack.c.bf16 %v5427_v6, %v5423_v52  ;;  %v5461_v4 = vld [vmem:[#allocation21 + $0x1c8] sm:$0xff]  ;;  %v5463_v52 = vld [vmem:[#allocation21 + $0x1d8] sm:$0xff] }
 0x8da   : > { %v5456_v12 = vld [vmem:[#allocation21 + $0x1a0] sm:$0xff]  ;;  %v5465_v58 = vld [vmem:[#allocation21 + $0x1e8] sm:$0xff]  ;;  %v5467_v6 = vld [vmem:[#allocation21 + $0x1f8] sm:$0xff] }
 0x8dc   : > { %7533 = vmatpush1.bf16.msra.mxu0 %v7532_v30  ;;  %7565 = vmatpush1.bf16.msra.mxu1 %v7564_v55  ;;  %v5435_v30 = vld [vmem:[#allocation21 + $0xf8] sm:$0xff]  ;;  %v7584_v55 = vpack.c.bf16 %v5424_v47, %v5420_v41  ;;  %v5460_v41 = vld [vmem:[#allocation21 + $0x1c0] sm:$0xff]  ;;  %v7602_v47 = vpack.c.bf16 %v5465_v58, %v5461_v4 }
 0x8dd   : > { %7535 = vmatprep.subr.bf16.mxu0 %v7534_v19  ;;  %7567 = vmatprep.subr.bf16.mxu1 %v7566_v62  ;;  %v5432_v19 = vld [vmem:[#allocation21 + $0xe0] sm:$0xff]  ;;  %v7586_v62 = vpack.c.bf16 %v5433_v0, %v5429_v11  ;;  %v7618_v18 = vpack.c.bf16 %v5435_v30, %v5431_v56  ;;  %v7636_v0 = vpack.c.bf16 %v5466_v2, %v5462_v51  ;;  %v5667_v30 = vld [vmem:[#allocation23 + $0x8] sm:$0xff] }
 0x8de   : > { %v5666_v56 = vld [vmem:[#allocation23] sm:$0xff] }
 0x8df   : > { %v2306_v2 = vld [vmem:[#allocation3] sm:$0xff] }
 0x8e0   : > { %7537 = vmatpush1.bf16.msra.mxu0 %v7536_v43  ;;  %7569 = vmatpush1.bf16.msra.mxu1 %v7568_v1  ;;  %v5443_v43 = vld [vmem:[#allocation21 + $0x138] sm:$0xff]  ;;  %v7588_v1 = vpack.c.bf16 %v5432_v19, %v5428_v8 }
 0x8e1   : > { %7539 = vmatprep.subr.bf16.mxu0 %v7538_v16  ;;  %7571 = vmatprep.subr.bf16.mxu1 %v7570_v9  ;;  %v5440_v16 = vld [vmem:[#allocation21 + $0x120] sm:$0xff]  ;;  %v7590_v9 = vpack.c.bf16 %v5441_v29, %v5437_v60  ;;  %v7622_v10 = vpack.c.bf16 %v5443_v43, %v5439_v40  ;;  %v5669_v8 = vld [vmem:[#allocation23 + $0x18] sm:$0xff]  ;;  %v5675_v29 = vld [vmem:[#allocation23 + $0x48] sm:$0xff] }
 0x8e2   : > { %v5676_v43 = vld [vmem:[#allocation23 + $0x50] sm:$0xff] }
 0x8e4   : > { %7541 = vmatpush1.bf16.msra.mxu0 %v7540_v50  ;;  %7573 = vmatpush1.bf16.msra.mxu1 %v7572_v17  ;;  %v5451_v50 = vld [vmem:[#allocation21 + $0x178] sm:$0xff]  ;;  %v7592_v17 = vpack.c.bf16 %v5440_v16, %v5436_v24  ;;  %v5678_v24 = vld [vmem:[#allocation23 + $0x60] sm:$0xff]  ;;  %v5679_v16 = vld [vmem:[#allocation23 + $0x68] sm:$0xff] }
 0x8e5   : > { %7575 = vmatprep.subr.bf16.mxu0 %v7574_v35  ;;  %7607 = vmatprep.subr.bf16.mxu1 %v7606_v20  ;;  %v5448_v35 = vld [vmem:[#allocation21 + $0x160] sm:$0xff]  ;;  %v7594_v20 = vpack.c.bf16 %v5449_v5, %v5445_v42  ;;  %v7626_v53 = vpack.c.bf16 %v5451_v50, %v5447_v26 }
 0x8e6   : > { %v5378_v42 = vld [vmem:[%s11587_s19] sm:$0xf]  ;;  %s10823_s19 = scalar_lea.hbm %s11591_s11, %s11087_s1 }
 0x8e7   : > { %5301 = vmatmul.mubr.f32.vlgmr.msra.gmra.mrb[10].mxu0 %v4965_v45  ;;  %5372 = vmatmul.mubr.f32.vlgmr.msra.gmra.mrb[10].mxu1 %v4965_v45  ;;  %v5459_v45 = vld [vmem:[#allocation21 + $0x1b8] sm:$0xff]  ;;  %v11588_v5 = vld [vmem:[#allocation158_spill] sm:$0xff] }
 0x8e8   : > { %7577 = vmatpush1.bf16.msra.mxu0 %v7576_v13  ;;  %7609 = vmatpush1.bf16.msra.mxu1 %v7608_v59  ;;  %v7596_v13 = vpack.c.bf16 %v5448_v35, %v5444_v3  ;;  %v7628_v59 = vpack.c.bf16 %v5450_v63, %v5446_v14  ;;  %v5386_v26 = vsub.s32 1, %v11588_v5  ;;  %v5614_v50 = vld [vmem:[%s11589_s30] sm:$0xf]  ;;  %v5394_v35 = vsub.s32 3, %v11588_v5  ;;  %s8208_s30 = scalar_lea.vmem %s5806_s0, 128 }
 0x8e9   : > { %7579 = vmatprep.subr.bf16.mxu0 %v7578_v28  ;;  %7611 = vmatprep.subr.bf16.mxu1 %v7610_v15  ;;  %v7598_v28 = vpack.c.bf16 %v5457_v32, %v5453_v57  ;;  %v7630_v15 = vpack.c.bf16 %v5459_v45, %v5455_v48  ;;  %p8209_p0 = scmp.ne.s32.totalorder %s5806_s0, %s8208_s30  ;;  %p8216_p12 = scmp.lt.s32.totalorder %s8214_s13, %s8208_s30 }
 0x8ea   : > { %5532 = vmatprep.mubr.f32.mxu0 %v11496_v49  ;;  %5603 = vmatprep.mubr.f32.mxu1 %v11496_v49  ;;  %v5387_v3 = vrot.slane %v5378_v42, %v5386_v26  ;;  %v5623_v14 = vrot.slane %v5614_v50, %v5386_v26  ;;  %v5395_v45 = vrot.slane %v5378_v42, %v5394_v35 }
 0x8eb   : > { %p8210_p4 = pnand %p8209_p0, %p11592_p1  ;;  %p8217_p9 = por %p8216_p12, %p8215_p10 }
 0x8ec   : > { %7581 = vmatpush1.bf16.msra.mxu0 %v7580_v61  ;;  %7613 = vmatpush1.bf16.msra.mxu1 %v7612_v34  ;;  %v7600_v61 = vpack.c.bf16 %v5456_v12, %v5452_v37  ;;  %v7632_v34 = vpack.c.bf16 %v5458_v23, %v5454_v54  ;;  %v5631_v54 = vrot.slane %v5614_v50, %v5394_v35 }
 0x8ed   : > { %7583 = vmatprep.subr.bf16.mxu0 %v7582_v46  ;;  %7615 = vmatprep.subr.bf16.mxu1 %v7614_v44  ;;  %v7634_v46 = vpack.c.bf16 %v5467_v6, %v5463_v52  ;;  %v5464_v44 = vld [vmem:[#allocation21 + $0x1e0] sm:$0xff]  ;;  %p8211_p8 = pneg %p8210_p4 }
 0x8ee   : > { %v7604_v11 = vpack.c.bf16 %v5464_v44, %v5460_v41 }
 0x8ef   : > { %p8218_p11 = pnand %p8217_p9, %p8211_p8 }
 0x8f0   : > { %7585 = vmatpush1.bf16.msra.mxu0 %v7584_v55  ;;  %7617 = vmatpush1.bf16.msra.mxu1 %v7616_v7  ;;  %v5668_v55 = vld [vmem:[#allocation23 + $0x10] sm:$0xff]  ;;  %v7639_v7 = vpack.c.bf16 %v5667_v30, %v5666_v56 }
 0x8f1   : > { %7587 = vmatprep.subr.bf16.mxu0 %v7586_v62  ;;  %7619 = vmatprep.subr.bf16.mxu1 %v7618_v18  ;;  %v7642_v19 = vpack.c.bf16 %v5669_v8, %v5668_v55  ;;  %v5670_v62 = vld [vmem:[#allocation23 + $0x20] sm:$0xff]  ;;  %v5671_v18 = vld [vmem:[#allocation23 + $0x28] sm:$0xff] }
 0x8f2   : > { %v7645_v27 = vpack.c.bf16 %v5671_v18, %v5670_v62 }
 0x8f4   : > { %7589 = vmatpush1.bf16.msra.mxu0 %v7588_v1  ;;  %7621 = vmatpush1.bf16.msra.mxu1 %v7620_v38  ;;  %v5677_v1 = vld [vmem:[#allocation23 + $0x58] sm:$0xff] }
 0x8f5   : > { %7591 = vmatprep.subr.bf16.mxu0 %v7590_v9  ;;  %7623 = vmatprep.subr.bf16.mxu1 %v7622_v10  ;;  %v7654_v38 = vpack.c.bf16 %v5677_v1, %v5676_v43  ;;  %v7657_v9 = vpack.c.bf16 %v5679_v16, %v5678_v24  ;;  %v5680_v10 = vld [vmem:[#allocation23 + $0x70] sm:$0xff] }
 0x8f6   : > { %v7660_v22 = vpack.c.bf16 %v5681_v31, %v5680_v10 }
 0x8f8   : > { %7593 = vmatpush1.bf16.msra.mxu0 %v7592_v17  ;;  %7625 = vmatpush1.bf16.msra.mxu1 %v7624_v33  ;;  %v11590_v17 = vld [vmem:[#allocation159_spill] sm:$0xff] }
 0x8f9   : > { %7595 = vmatprep.subr.bf16.mxu0 %v7594_v20  ;;  %7627 = vmatprep.subr.bf16.mxu1 %v7626_v53  ;;  %v5383_v33 = vrot.slane %v5378_v42, %v11590_v17  ;;  %v5619_v20 = vrot.slane %v5614_v50, %v11590_v17 }
 0x8fc   : > { %7597 = vmatpush1.bf16.msra.mxu0 %v7596_v13  ;;  %7629 = vmatpush1.bf16.msra.mxu1 %v7628_v59  ;;  %v5390_v59 = vsub.s32 2, %v11588_v5 }
 0x8fd   : > { %7599 = vmatprep.subr.bf16.mxu0 %v7598_v28  ;;  %7631 = vmatprep.subr.bf16.mxu1 %v7630_v15 }
 0x8fe   : > { %v5391_v23 = vrot.slane %v5378_v42, %v5390_v59  ;;  %v5627_v52 = vrot.slane %v5614_v50, %v5390_v59 }
 0x900   : > { %7601 = vmatpush1.bf16.msra.mxu0 %v7600_v61  ;;  %7633 = vmatpush1.bf16.msra.mxu1 %v7632_v34 }
 0x901   : > { %7603 = vmatprep.subr.bf16.mxu0 %v7602_v47  ;;  %7635 = vmatprep.subr.bf16.mxu1 %v7634_v46 }
 0x904   : > { %7605 = vmatpush1.bf16.msra.mxu0 %v7604_v11  ;;  %7637 = vmatpush1.bf16.msra.mxu1 %v7636_v0 }
 0x905   : > { %7638 = vmatprep.subr.bf16.mxu0 %v11469_v25 }
 0x907   : > { %5533 = vmatmul.mubr.f32.vlgmr.msra.gmra.mrb[10].mxu0 %v10771_v21  ;;  %5604 = vmatmul.mubr.f32.vlgmr.msra.gmra.mrb[10].mxu1 %v10771_v21  ;;  %v5673_v21 = vld [vmem:[#allocation23 + $0x38] sm:$0xff] }
 0x908   : > { %7123 = vmatprep.mubr.msk.f32.mxu0 %vm11497_vm1, %v11496_v49  ;;  %7640 = vmatpush3.bf16.msra.mxu0 %v7639_v7  ;;  %v7648_v60 = vpack.c.bf16 %v5673_v21, %v5672_v39  ;;  %v5674_v49 = vld [vmem:[#allocation23 + $0x40] sm:$0xff] }
 0x909   : > { %7641 = vmatprep.subr.bf16.mxu0 %v11469_v25  ;;  %v7651_v40 = vpack.c.bf16 %v5675_v29, %v5674_v49 }
 0x90c   : > { %7643 = vmatpush3.bf16.msra.mxu0 %v7642_v19 }
 0x90d   : > { %7644 = vmatprep.subr.bf16.mxu0 %v11469_v25 }
 0x910   : > { %7646 = vmatpush3.bf16.msra.mxu0 %v7645_v27 }
 0x911   : > { %7647 = vmatprep.subr.bf16.mxu0 %v11469_v25 }
 0x914   : > { %7649 = vmatpush3.bf16.msra.mxu0 %v7648_v60 }
 0x915   : > { %7650 = vmatprep.subr.bf16.mxu0 %v11469_v25 }
 0x918   : > { %7652 = vmatpush3.bf16.msra.mxu0 %v7651_v40 }
 0x919   : > { %7653 = vmatprep.subr.bf16.mxu0 %v11469_v25 }
 0x91c   : > { %7655 = vmatpush3.bf16.msra.mxu0 %v7654_v38 }
 0x91d   : > { %7656 = vmatprep.subr.bf16.mxu0 %v11469_v25 }
 0x920   : > { %7658 = vmatpush3.bf16.msra.mxu0 %v7657_v9 }
 0x921   : > { %7659 = vmatprep.subr.bf16.mxu0 %v11469_v25 }
 0x924   : > { %7661 = vmatpush3.bf16.msra.mxu0 %v7660_v22 }
 0x9da   : > { %v5534_v53 = vpop.f32.mrb[10].mxu0  ;;  %v5605_v25 = vpop.f32.mrb[10].mxu1 }
 0x9db   : > { %v7678_v63 = vadd.f32 %v5534_v53, %v5383_v33  ;;  %v5536_v57 = vpop.f32.mrb[11].mxu0  ;;  %v5607_v32 = vpop.f32.mrb[11].mxu1  ;;  %v7680_v58 = vadd.f32 %v5605_v25, %v5391_v23 }
 0x9dc   : > { %v7679_v48 = vadd.f32 %v5536_v57, %v5387_v3  ;;  %v7681_v15 = vadd.f32 %v5607_v32, %v5395_v45 }
 0x9dd   : > { %v5636_v13 = vadd.f32 %v7678_v63, %v5619_v20  ;;  %v5638_v61 = vadd.f32 %v7680_v58, %v5627_v52 }
 0x9de   : > { %v5637_v37 = vadd.f32 %v7679_v48, %v5623_v14  ;;  %v5639_v4 = vadd.f32 %v7681_v15, %v5631_v54 }
 0x9df   : > { %v6072_v12 = vmul.f32 -1.442695, %v5636_v13 }
 0x9e0   : > { %v6073_v28 = vmul.f32 -1.442695, %v5637_v37  ;;  %v6074_v6 = vmul.f32 -1.442695, %v5639_v4 }
 0x9e1   : > { %7880 = vpow2.f32 %v6072_v12 }
 0x9e2   : > { %7882 = vpow2.f32 %v6073_v28 }
 0x9e3   : > { %7884 = vpow2.f32 %v6074_v6 }
 0x9e4   : > { %7886 = vtanh.f32 %v5638_v61 }
 0x9eb   : > { %v7881_v34 = vpop.eup %7880 }
 0x9ec   : > { %v7883_v41 = vpop.eup %7882  ;;  %v5643_v47 = vadd.f32 1.0, %v7881_v34 }
 0x9ed   : > { %v5649_v46 = vadd.f32 1.0, %v7883_v41  ;;  %v7885_v44 = vpop.eup %7884 }
 0x9ee   : > { %7888 = vrcp.f32 %v5643_v47  ;;  %v7887_v51 = vpop.eup %7886  ;;  %v5656_v30 = vadd.f32 1.0, %v7885_v44 }
 0x9ef   : > { %7890 = vrcp.f32 %v5649_v46 }
 0x9f0   : > { %7892 = vrcp.f32 %v5656_v30 }
 0x9f8   : > { %v7889_v11 = vpop.eup %7888 }
 0x9f9   : > { %v7891_v0 = vpop.eup %7890  ;;  %v5660_v56 = vmul.f32 %v7889_v11, %v7887_v51 }
 0x9fa   : > { %v5659_v55 = vmul.f32 %v7891_v0, %v2306_v2  ;;  %v7893_v8 = vpop.eup %7892 }
 0x9fc   : > { %v5661_v7 = vadd.f32 %v5660_v56, %v5659_v55 }
 0x9fe   : > { %5665 = vst [vmem:[#allocation3] sm:$0xff] %v5661_v7  ;;  %7894 = vtanh.f32 %v5661_v7 }
 0xa08   : > { %v7895_v19 = vpop.eup %7894 }
 0xa09   : > { %v5663_v62 = vmul.f32 %v7895_v19, %v7893_v8 }
 0xa0b   : > { %5664 = vst [vmem:[#allocation2] sm:$0xff] %v5663_v62  ;;  %7124 = vmatmul.mubr.f32.vlgmr.msra.gmra.mrb[12].mxu0 %v5663_v62 }
 0xa0c   : > { %8221 = shalt.err (!%p8218_p11)
}
 0xa0d   : > { %s8222_s17 = scalar_lea.hbm %s10823_s19, 128  ;;  %s8226_s2 = scalar_lea.hbm %s11591_s11, 896 }
 0xa0e   : > { %p8223_p7 = scmp.ne.s32.totalorder %s10823_s19, %s8222_s17  ;;  %p8227_p13 = scmp.lt.u32.totalorder %s10823_s19, %s11591_s11 }
 0xa0f   : > { %p8228_p5 = scmp.lt.u32.totalorder %s8226_s2, %s8222_s17  ;;  %p8230_p0 = scmp.lt.u32.totalorder %s8222_s17, %s10823_s19 }
 0xa10   : > { %p8224_p6 = pnand %p8223_p7, %p11592_p1 }
 0xa11   : > { %p8229_p2 = por %p8228_p5, %p8227_p13 }
 0xa12   : > { %p8225_p3 = pneg %p8224_p6 }
 0xa13   : > { %p8231_p4 = por %p8230_p0, %p8229_p2 }
 0xa15   : > { %p8232_p8 = pnand %p8231_p4, %p8225_p3 }
 0xa17   : > { %8235 = shalt.err (!%p8232_p8)
}
 0xa18   : > { %7733 = dma.vmem_to_hbm [thread:$0]  (%p11592_p1), %s5806_s0, 128, %s10823_s19, %s5777_s23  }
 0xa19   : > { %s11593_s9 = sld [smem:[#allocation176_spill]]  ;;  %s11594_s1 = scalar_lea.vmem [#allocation24], %s8868_s27 }
 0xa1a   : > { %s5791_s3 = sshll.u32 %s11594_s1, 4  ;;  %s11595_s17 = sshll.u32 %s11458_s6, 7  ;;  %s10857_s3 = int_to_ptr.vmem [resolvable:$true] %s5791_s3 }
 0xa1b   : > { %s11596_s11 = sld [smem:[#allocation177_spill]]  ;;  %s11597_s19 = smov %s11594_s1 }
 0xa1c   : > { %s5772_s0 = scalar_lea.sflag [#allocation8], %s8865_s7  ;;  %s8236_s23 = scalar_lea.vmem %s10857_s3, 128 }
 0xa1d   : > { %p8237_p10 = scmp.ne.s32.totalorder %s10857_s3, %s8236_s23  ;;  %s8372_s6 = smov [#allocation24]  }
 0xa1e   : > { %s8240_s13 = sshll.u32 %s8372_s6, 4  ;;  %s8241_s13 = int_to_ptr.vmem [resolvable:$false] %s8240_s13 }
 0xa1f   : > { %v6075_v18 = vld [vmem:[%s11593_s9] ss:$0 sm:$0xff]  ;;  %p8238_p12 = pnand %p8237_p10, %p11592_p1  ;;  %s8242_s30 = scalar_lea.vmem %s8241_s13, 256 }
 0xa20   : > { %p8243_p11 = scmp.lt.s32.totalorder %s10857_s3, %s8241_s13  ;;  %p8244_p7 = scmp.lt.s32.totalorder %s8242_s30, %s8236_s23 }
 0xa21   : > { %s10855_s14 = scalar_lea.hbm %s11596_s11, %s11595_s17  ;;  %p8239_p9 = pneg %p8238_p12 }
 0xa22   : > { %p8245_p6 = por %p8244_p7, %p8243_p11 }
 0xa24   : > { %p8246_p3 = pnand %p8245_p6, %p8239_p9 }
 0xade   : > { %v5755_v27 = vpop.f32.mrb[12].mxu0 }
 0xadf   : > { %v5756_v39 = vadd.f32 %v6075_v18, %v5755_v27  ;;  %v7125_v21 = vpop.f32.mrb[13].mxu0 }
 0xae1   : > { %v5767_v60 = vsel %vm5766_vm0, %v5756_v39, 0.0 }
 0xae2   : > { %5768 = vst [vmem:[%s11597_s19] sm:$0xff] %v5767_v60 }
 0xae3   : > { %8249 = shalt.err (!%p8246_p3)
}
 0xae4   : > { %s8250_s7 = scalar_lea.hbm %s10855_s14, 128  ;;  %s8254_s1 = scalar_lea.hbm %s11596_s11, 896 }
 0xae5   : > { %p8251_p13 = scmp.ne.s32.totalorder %s10855_s14, %s8250_s7  ;;  %p8255_p0 = scmp.lt.u32.totalorder %s10855_s14, %s11596_s11 }
 0xae6   : > { %p8256_p4 = scmp.lt.u32.totalorder %s8254_s1, %s8250_s7  ;;  %p8258_p10 = scmp.lt.u32.totalorder %s8250_s7, %s10855_s14 }
 0xae7   : > { %p8252_p5 = pnand %p8251_p13, %p11592_p1 }
 0xae8   : > { %p8257_p8 = por %p8256_p4, %p8255_p0 }
 0xae9   : > { %p8253_p2 = pneg %p8252_p5 }
 0xaea   : > { %p8259_p12 = por %p8258_p10, %p8257_p8 }
 0xaec   : > { %p8260_p9 = pnand %p8259_p12, %p8253_p2 }
 0xaee   : > { %8263 = shalt.err (!%p8260_p9)
}
 0xaef   : > { %7732 = dma.vmem_to_hbm [thread:$0]  (%p11592_p1), %s10857_s3, 128, %s10855_s14, %s5772_s0  }
 0xaf0 PF: > { %p7799_p11 = scmp.ge.s32.totalorder %s8346_s26, 2  ;;  %s5817_s4 = sand.u32 1, %s8326_s24  }
 0xaf1   : > { %p11598_p7 = scmp.ne.s32.totalorder %s11128_s21, 0  ;;  %s5818_s19 = scalar_lea.sflag [#allocation8], %s5817_s4 }
 0xaf3   : > { %p7772_p6 = pnand %p7799_p11, %p11598_p7 }
 0xaf5   : > { %8317 = dma.done.wait (!%p7772_p6), %s5818_s19, 128  }
 0xaf6   : > { %8319 = vsyncadd (!%p7772_p6), %s5818_s19, 4294967168  ;;  %s5827_s23 = scalar_lea.sflag [#allocation26], %s5817_s4 }
 0xaf7   : > { %8321 = dma.done.wait (!%p7772_p6), %s5827_s23, 128  }
 0xaf8   : > { %8323 = vsyncadd (!%p7772_p6), %s5827_s23, 4294967168  ;;  %s50_s26 = sadd.s32 1, %s8346_s26   ;;  %s11599_s24 = smov %s8330_s25 }
 0xaf9   : > { %p47_p3 = scmp.ge.s32.totalorder %s50_s26, 9   ;;  %s11600_s25 = smov %s8334_s5 }
 0xafa   : > { %s11601_s5 = smov %s8809_s12  ;;  %s11602_s1 = smov %s8342_s8 }
 0xafb   : > { %s11603_s8 = smov %s11605_s28  ;;  %49 = sbr.rel (!%p47_p3) target bundleno = 33 (0x21), region = 219 }
 0xb02   :  { %5832 = vsyncpa [#allocation7], 1 }
 0xb03   :  { %5834 = vsyncpa [#allocation7 + $0x1], 1 }
 0xb04   :  { %5835 = vsyncpa [#allocation10], 1 }
 0xb05   :  { %5837 = vsyncpa [#allocation10 + $0x1], 1 }
 0xb06   :  { %5838 = vsyncpa [#allocation13], 1 }
 0xb07   :  { %5839 = vsyncpa [#allocation16], 1 }
 0xb08   :  { %5840 = vsyncpa [#allocation19], 1 }
 0xb09   :  { %5841 = vsyncpa [#allocation22], 1 }
 0xb0a   :  { %5842 = vsyncpa [#allocation8], 1 }
 0xb0b   :  { %5844 = vsyncpa [#allocation8 + $0x1], 1 }
 0xb0c   :  { %5845 = vsyncpa [#allocation26], 1 }
 0xb0d   :  { %5847 = vsyncpa [#allocation26 + $0x1], 1 }

</bundles_post_ra>
